<compile_context>
chip_gen: v7x
topology: tpu7x:2x2x1
jax: 0.10.0
libtpu: 0.0.40
codegen_flags: <defaults>
</compile_context>

<pallas_src>
import functools

import jax
import jax.numpy as jnp
from jax.experimental import pallas as pl
from jax.experimental.pallas import tpu as pltpu


# ----------------------------------------------------------------------------
# Fused forward kernel (closure over static shapes).
# Row convention for all (T*B, ...) tensors: row = t * B + b  (time-major).
# ----------------------------------------------------------------------------
def _make_fused_kernel(T, B, H, num_layers):
    n_lstm = 4 * num_layers
    n_in = 1 + n_lstm + 10

    def kernel(*refs):
        emb_ref = refs[0]                                   # (T*B, Din) bf16
        lstm_refs = refs[1:1 + n_lstm]
        (wa1_ref, ba1_ref, wa2_ref, ba2_ref,
         wf1_ref, bf1_ref, lnw_ref, lnb_ref, wf2_ref, bf2_ref) = refs[1 + n_lstm:n_in]
        logits_ref, hn_ref, cn_ref = refs[n_in:n_in + 3]
        xp_ref, seq_ref, sc_ref = refs[n_in + 3:]

        # ------------------------- bidirectional LSTM stack -------------------------
        x_bf = emb_ref[...]                                 # (T*B, Din) bf16
        for l in range(num_layers):
            wih_ref = lstm_refs[4 * l]                      # (Din, 8H) bf16 [fwd | bwd]
            whhf_ref = lstm_refs[4 * l + 1]                 # (H, 4H)  bf16 fwd
            whhb_ref = lstm_refs[4 * l + 2]                 # (H, 4H)  bf16 bwd
            b_ref = lstm_refs[4 * l + 3]                    # (1, 8H)  f32

            # Hoisted input projection (+ bias) for both directions, all timesteps.
            xp_ref[...] = (jnp.dot(x_bf, wih_ref[...],
                                   preferred_element_type=jnp.float32)
                           + b_ref[...])                    # (T*B, 8H) f32

            h_f = jnp.zeros((B, H), jnp.float32)
            c_f = jnp.zeros((B, H), jnp.float32)
            h_b = jnp.zeros((B, H), jnp.float32)
            c_b = jnp.zeros((B, H), jnp.float32)

            for s in range(T):                              # unrolled: T static & small
                # ---- forward direction, input position s ----
                g = (xp_ref[s * B:(s + 1) * B, 0:4 * H]
                     + jnp.dot(h_f.astype(jnp.bfloat16), whhf_ref[...],
                               preferred_element_type=jnp.float32))    # (B, 4H)
                i_g = jax.nn.sigmoid(g[:, 0 * H:1 * H])
                f_g = jax.nn.sigmoid(g[:, 1 * H:2 * H])
                g_g = jnp.tanh(g[:, 2 * H:3 * H])
                o_g = jax.nn.sigmoid(g[:, 3 * H:4 * H])
                c_f = f_g * c_f + i_g * g_g
                h_f = o_g * jnp.tanh(c_f)
                seq_ref[s * B:(s + 1) * B, 0:H] = h_f                  # output pos s

                # ---- backward direction, input position T-1-s ----
                g = (xp_ref[(T - 1 - s) * B:(T - s) * B, 4 * H:8 * H]
                     + jnp.dot(h_b.astype(jnp.bfloat16), whhb_ref[...],
                               preferred_element_type=jnp.float32))    # (B, 4H)
                i_g = jax.nn.sigmoid(g[:, 0 * H:1 * H])
                f_g = jax.nn.sigmoid(g[:, 1 * H:2 * H])
                g_g = jnp.tanh(g[:, 2 * H:3 * H])
                o_g = jax.nn.sigmoid(g[:, 3 * H:4 * H])
                c_b = f_g * c_b + i_g * g_g
                h_b = o_g * jnp.tanh(c_b)
                seq_ref[(T - 1 - s) * B:(T - s) * B, H:2 * H] = h_b    # output pos T-1-s

            # final (h, c) for this layer: [fwd rows | bwd rows]
            hn_ref[2 * B * l:2 * B * l + B, :] = h_f
            hn_ref[2 * B * l + B:2 * B * (l + 1), :] = h_b
            cn_ref[2 * B * l:2 * B * l + B, :] = c_f
            cn_ref[2 * B * l + B:2 * B * (l + 1), :] = c_b

            x_bf = seq_ref[...].astype(jnp.bfloat16)        # next layer input (T*B, 2H)

        # ----------------------------- attention + FC head -----------------------------
        lstm_bf = x_bf                                      # (T*B, 2H) bf16
        a = jnp.tanh(jnp.dot(lstm_bf, wa1_ref[...],
                             preferred_element_type=jnp.float32) + ba1_ref[...])  # (T*B,H)
        sc_ref[...] = (jnp.sum(a * wa2_ref[...], axis=-1, keepdims=True)
                       + ba2_ref[...])                      # (T*B, 1) scores

        # softmax over T per batch element (max-subtracted), fully unrolled
        m = sc_ref[0:B, :]
        for t in range(1, T):
            m = jnp.maximum(m, sc_ref[t * B:(t + 1) * B, :])
        denom = jnp.zeros((B, 1), jnp.float32)
        ctx = jnp.zeros((B, 2 * H), jnp.float32)
        for t in range(T):
            e_t = jnp.exp(sc_ref[t * B:(t + 1) * B, :] - m)            # (B, 1)
            denom = denom + e_t
            ctx = ctx + e_t * seq_ref[t * B:(t + 1) * B, :]
        context = ctx * pl.reciprocal(denom, approx=True)   # (B, 2H) == attn^T @ lstm_out

        # combined = lstm_out + context (broadcast over T), done in place
        for t in range(T):
            seq_ref[t * B:(t + 1) * B, :] = seq_ref[t * B:(t + 1) * B, :] + context

        combined_bf = seq_ref[...].astype(jnp.bfloat16)     # (T*B, 2H)
        h1 = (jnp.dot(combined_bf, wf1_ref[...], preferred_element_type=jnp.float32)
              + bf1_ref[...])                               # (T*B, H) f32
        mu = jnp.mean(h1, axis=-1, keepdims=True)
        var = jnp.mean(jnp.square(h1 - mu), axis=-1, keepdims=True)
        hnorm = (h1 - mu) * jax.lax.rsqrt(var + 1e-5) * lnw_ref[...] + lnb_ref[...]
        hrelu = jnp.maximum(hnorm, 0.0).astype(jnp.bfloat16)
        logits_ref[...] = (jnp.dot(hrelu, wf2_ref[...],
                                   preferred_element_type=jnp.float32)
                           + bf2_ref[...]).astype(logits_ref.dtype)

    return kernel


# ----------------------------------------------------------------------------
# Parameter init (deterministic, PyTorch-like shapes; matmul weights stored
# pre-transposed, fwd/bwd-concatenated where useful, and cast to bfloat16).
# ----------------------------------------------------------------------------
def init_params(key, vocab_size, embedding_dim, hidden_dim, num_layers):
    E = embedding_dim // 2
    H = hidden_dim // 2

    def u(key, shape, fan_in):
        s = 1.0 / jnp.sqrt(jnp.float32(fan_in))
        return jax.random.uniform(key, shape, jnp.float32, -s, s)

    keys = iter(jax.random.split(key, 64))
    params = {"embedding": jax.random.normal(next(keys), (vocab_size, E), jnp.float32)}

    lstm = []
    for layer in range(num_layers):
        in_dim = E if layer == 0 else 2 * H
        wih_t, whh_t, bias = [], [], []
        for _ in range(2):                                  # fwd, bwd
            w_ih = u(next(keys), (4 * H, in_dim), H)
            w_hh = u(next(keys), (4 * H, H), H)
            b_ih = u(next(keys), (4 * H,), H)
            b_hh = u(next(keys), (4 * H,), H)
            wih_t.append(jnp.transpose(w_ih))               # (in, 4H)
            whh_t.append(jnp.transpose(w_hh))               # (H, 4H)
            bias.append((b_ih + b_hh).reshape(1, 4 * H))
        lstm.append({
            "wih_cat": jnp.concatenate(wih_t, axis=1).astype(jnp.bfloat16),  # (in, 8H)
            "whh_f": whh_t[0].astype(jnp.bfloat16),                          # (H, 4H)
            "whh_b": whh_t[1].astype(jnp.bfloat16),                          # (H, 4H)
            "b_cat": jnp.concatenate(bias, axis=1),                          # (1, 8H) f32
        })
    params["lstm"] = lstm

    params["w_att1"] = jnp.transpose(u(next(keys), (H, 2 * H), 2 * H)).astype(jnp.bfloat16)
    params["b_att1"] = u(next(keys), (1, H), 2 * H)
    params["w_att2"] = u(next(keys), (1, H), H)                          # (1, H) weight row
    params["b_att2"] = u(next(keys), (1, 1), H)
    params["w_fc1"] = jnp.transpose(u(next(keys), (H, 2 * H), 2 * H)).astype(jnp.bfloat16)
    params["b_fc1"] = u(next(keys), (1, H), 2 * H)
    params["ln_w"] = jnp.ones((1, H), jnp.float32)
    params["ln_b"] = jnp.zeros((1, H), jnp.float32)
    params["w_fc2"] = jnp.transpose(u(next(keys), (vocab_size, H), H)).astype(jnp.bfloat16)
    params["b_fc2"] = u(next(keys), (1, vocab_size), H)
    return params


# ----------------------------------------------------------------------------
# Full forward: embedding gather + final reshapes are plain-JAX glue; the LSTM
# stack, attention, LayerNorm and FC matmuls run in one fused Pallas kernel.
# ----------------------------------------------------------------------------
@functools.partial(jax.jit, static_argnames=("num_layers",))
def forward(params, x, num_layers=2):
    emb = params["embedding"][x]                      # (B, T, E); dropout == identity (eval)
    B, T, E = emb.shape
    H = params["lstm"][0]["whh_f"].shape[0]
    V = params["w_fc2"].shape[1]
    emb2d = (jnp.transpose(emb, (1, 0, 2))
             .reshape(T * B, E).astype(jnp.bfloat16))       # row = t*B + b

    args = [emb2d]
    for l in range(num_layers):
        lp = params["lstm"][l]
        args += [lp["wih_cat"], lp["whh_f"], lp["whh_b"], lp["b_cat"]]
    args += [params["w_att1"], params["b_att1"], params["w_att2"], params["b_att2"],
             params["w_fc1"], params["b_fc1"], params["ln_w"], params["ln_b"],
             params["w_fc2"], params["b_fc2"]]

    out_shapes = (jax.ShapeDtypeStruct((T * B, V), jnp.float32),
                  jax.ShapeDtypeStruct((num_layers * 2 * B, H), jnp.float32),
                  jax.ShapeDtypeStruct((num_layers * 2 * B, H), jnp.float32))
    zero2 = lambda i: (0, 0)
    grid_spec = pltpu.PrefetchScalarGridSpec(
        num_scalar_prefetch=0,
        grid=(1,),
        in_specs=[pl.BlockSpec(a.shape, zero2) for a in args],
        out_specs=[pl.BlockSpec(s.shape, zero2) for s in out_shapes],
        scratch_shapes=[
            pltpu.VMEM((T * B, 8 * H), jnp.float32),   # xp: hoisted input projections
            pltpu.VMEM((T * B, 2 * H), jnp.float32),   # layer output sequence / lstm_out
            pltpu.VMEM((T * B, 1), jnp.float32),       # attention scores
        ],
    )
    kernel = _make_fused_kernel(T, B, H, num_layers)
    logits2d, hn2d, cn2d = pl.pallas_call(
        kernel,
        out_shape=out_shapes,
        grid_spec=grid_spec,
        compiler_params=pltpu.CompilerParams(
            dimension_semantics=("arbitrary",),
            vmem_limit_bytes=32 * 1024 * 1024),
    )(*args)

    logits = logits2d.reshape(T, B, V).transpose(1, 0, 2)     # (B, T, V)
    h_n = hn2d.reshape(num_layers * 2, B, H)                  # (L*2, B, H)
    c_n = cn2d.reshape(num_layers * 2, B, H)
    return logits, (h_n, c_n)


if __name__ == "__main__":
    # Shapes consistent with the module: vocab=128, embedding_dim=256 -> E=128,
    # hidden_dim=256 -> H=128, num_layers=2, batch=2, seq=8.
    vocab_size = 128
    embedding_dim = 256
    hidden_dim = 256
    num_layers = 2
    B, T = 2, 8

    key = jax.random.PRNGKey(0)
    pkey, xkey = jax.random.split(key)
    params = init_params(pkey, vocab_size, embedding_dim, hidden_dim, num_layers)
    x = jax.random.randint(xkey, (B, T), 0, vocab_size, dtype=jnp.int32)

    logits, (h_n, c_n) = forward(params, x, num_layers=num_layers)
    jax.block_until_ready((logits, h_n, c_n))

    assert logits.shape == (B, T, vocab_size)
    assert h_n.shape == (num_layers * 2, B, hidden_dim // 2)
    assert c_n.shape == (num_layers * 2, B, hidden_dim // 2)
    print("KERNEL_OK")
</pallas_src>

<mosaic_0001>
module attributes {stable_mosaic.version = 11 : i64} {
  func.func @kernel(%arg0: i32, %arg1: memref<16x128xbf16, #tpu.memory_space<vmem>>, %arg2: memref<128x1024xbf16, #tpu.memory_space<vmem>>, %arg3: memref<128x512xbf16, #tpu.memory_space<vmem>>, %arg4: memref<128x512xbf16, #tpu.memory_space<vmem>>, %arg5: memref<1x1024xf32, #tpu.memory_space<vmem>>, %arg6: memref<256x1024xbf16, #tpu.memory_space<vmem>>, %arg7: memref<128x512xbf16, #tpu.memory_space<vmem>>, %arg8: memref<128x512xbf16, #tpu.memory_space<vmem>>, %arg9: memref<1x1024xf32, #tpu.memory_space<vmem>>, %arg10: memref<256x128xbf16, #tpu.memory_space<vmem>>, %arg11: memref<1x128xf32, #tpu.memory_space<vmem>>, %arg12: memref<1x128xf32, #tpu.memory_space<vmem>>, %arg13: memref<1x1xf32, #tpu.memory_space<vmem>>, %arg14: memref<256x128xbf16, #tpu.memory_space<vmem>>, %arg15: memref<1x128xf32, #tpu.memory_space<vmem>>, %arg16: memref<1x128xf32, #tpu.memory_space<vmem>>, %arg17: memref<1x128xf32, #tpu.memory_space<vmem>>, %arg18: memref<128x128xbf16, #tpu.memory_space<vmem>>, %arg19: memref<1x128xf32, #tpu.memory_space<vmem>>, %arg20: memref<16x128xf32, #tpu.memory_space<vmem>>, %arg21: memref<8x128xf32, #tpu.memory_space<vmem>>, %arg22: memref<8x128xf32, #tpu.memory_space<vmem>>, %arg23: memref<16x1024xf32, #tpu.memory_space<vmem>>, %arg24: memref<16x256xf32, #tpu.memory_space<vmem>>, %arg25: memref<16x1xf32, #tpu.memory_space<vmem>>) attributes {dimension_semantics = [#tpu.dimension_semantics<arbitrary>], iteration_bounds = array<i64: 1>, scalar_prefetch = 0 : i64, scratch_operands = 3 : i64, tpu.core_type = #tpu.core_type<tc>, window_params = [{pipeline_mode = #tpu.pipeline_mode<synchronous>, transform_indices = @transform_0, window_bounds = array<i64: 16, 128>}, {pipeline_mode = #tpu.pipeline_mode<synchronous>, transform_indices = @transform_1, window_bounds = array<i64: 128, 1024>}, {pipeline_mode = #tpu.pipeline_mode<synchronous>, transform_indices = @transform_2, window_bounds = array<i64: 128, 512>}, {pipeline_mode = #tpu.pipeline_mode<synchronous>, transform_indices = @transform_3, window_bounds = array<i64: 128, 512>}, {pipeline_mode = #tpu.pipeline_mode<synchronous>, transform_indices = @transform_4, window_bounds = array<i64: 1, 1024>}, {pipeline_mode = #tpu.pipeline_mode<synchronous>, transform_indices = @transform_5, window_bounds = array<i64: 256, 1024>}, {pipeline_mode = #tpu.pipeline_mode<synchronous>, transform_indices = @transform_6, window_bounds = array<i64: 128, 512>}, {pipeline_mode = #tpu.pipeline_mode<synchronous>, transform_indices = @transform_7, window_bounds = array<i64: 128, 512>}, {pipeline_mode = #tpu.pipeline_mode<synchronous>, transform_indices = @transform_8, window_bounds = array<i64: 1, 1024>}, {pipeline_mode = #tpu.pipeline_mode<synchronous>, transform_indices = @transform_9, window_bounds = array<i64: 256, 128>}, {pipeline_mode = #tpu.pipeline_mode<synchronous>, transform_indices = @transform_10, window_bounds = array<i64: 1, 128>}, {pipeline_mode = #tpu.pipeline_mode<synchronous>, transform_indices = @transform_11, window_bounds = array<i64: 1, 128>}, {pipeline_mode = #tpu.pipeline_mode<synchronous>, transform_indices = @transform_12, window_bounds = array<i64: 1, 1>}, {pipeline_mode = #tpu.pipeline_mode<synchronous>, transform_indices = @transform_13, window_bounds = array<i64: 256, 128>}, {pipeline_mode = #tpu.pipeline_mode<synchronous>, transform_indices = @transform_14, window_bounds = array<i64: 1, 128>}, {pipeline_mode = #tpu.pipeline_mode<synchronous>, transform_indices = @transform_15, window_bounds = array<i64: 1, 128>}, {pipeline_mode = #tpu.pipeline_mode<synchronous>, transform_indices = @transform_16, window_bounds = array<i64: 1, 128>}, {pipeline_mode = #tpu.pipeline_mode<synchronous>, transform_indices = @transform_17, window_bounds = array<i64: 128, 128>}, {pipeline_mode = #tpu.pipeline_mode<synchronous>, transform_indices = @transform_18, window_bounds = array<i64: 1, 128>}, {pipeline_mode = #tpu.pipeline_mode<synchronous>, transform_indices = @transform_19, window_bounds = array<i64: 16, 128>}, {pipeline_mode = #tpu.pipeline_mode<synchronous>, transform_indices = @transform_20, window_bounds = array<i64: 8, 128>}, {pipeline_mode = #tpu.pipeline_mode<synchronous>, transform_indices = @transform_21, window_bounds = array<i64: 8, 128>}]} {
    %c0 = arith.constant 0 : index
    %c0_0 = arith.constant 0 : index
    %0 = vector.load %arg1[%c0, %c0_0] : memref<16x128xbf16, #tpu.memory_space<vmem>>, vector<16x128xbf16>
    %c0_1 = arith.constant 0 : index
    %c0_2 = arith.constant 0 : index
    %1 = vector.load %arg2[%c0_1, %c0_2] : memref<128x1024xbf16, #tpu.memory_space<vmem>>, vector<128x1024xbf16>
    %cst = arith.constant dense<0.000000e+00> : vector<16x1024xf32>
    %2 = tpu.matmul %0, %1, %cst {dimension_numbers = #tpu.dot_dimension_numbers<[1], [0], [0], [1], [0, 0, 1, 1], [], []>} : vector<16x128xbf16>, vector<128x1024xbf16>, vector<16x1024xf32> -> vector<16x1024xf32>
    %c0_3 = arith.constant 0 : index
    %c0_4 = arith.constant 0 : index
    %3 = vector.load %arg5[%c0_3, %c0_4] : memref<1x1024xf32, #tpu.memory_space<vmem>>, vector<1x1024xf32>
    %4 = vector.broadcast %3 : vector<1x1024xf32> to vector<16x1024xf32>
    %5 = arith.addf %2, %4 : vector<16x1024xf32>
    %c0_5 = arith.constant 0 : index
    %c0_6 = arith.constant 0 : index
    %6 = vector.load %arg23[%c0_5, %c0_6] : memref<16x1024xf32, #tpu.memory_space<vmem>>, vector<16x1024xf32>
    tpu.vector_store %arg23[%c0_5, %c0_6], %5 {strides = array<i32>} : memref<16x1024xf32, #tpu.memory_space<vmem>>, vector<16x1024xf32>,
    %cst_7 = arith.constant 0.000000e+00 : f32
    %7 = vector.broadcast %cst_7 : f32 to vector<2x128xf32>
    %cst_8 = arith.constant 0.000000e+00 : f32
    %8 = vector.broadcast %cst_8 : f32 to vector<2x128xf32>
    %cst_9 = arith.constant 0.000000e+00 : f32
    %9 = vector.broadcast %cst_9 : f32 to vector<2x128xf32>
    %cst_10 = arith.constant 0.000000e+00 : f32
    %10 = vector.broadcast %cst_10 : f32 to vector<2x128xf32>
    %c0_11 = arith.constant 0 : index
    %c0_12 = arith.constant 0 : index
    %11 = vector.load %arg23[%c0_11, %c0_12] : memref<16x1024xf32, #tpu.memory_space<vmem>>, vector<2x512xf32>
    %12 = arith.truncf %7 : vector<2x128xf32> to vector<2x128xbf16>
    %c0_13 = arith.constant 0 : index
    %c0_14 = arith.constant 0 : index
    %13 = vector.load %arg3[%c0_13, %c0_14] : memref<128x512xbf16, #tpu.memory_space<vmem>>, vector<128x512xbf16>
    %cst_15 = arith.constant dense<0.000000e+00> : vector<2x512xf32>
    %14 = tpu.matmul %12, %13, %cst_15 {dimension_numbers = #tpu.dot_dimension_numbers<[1], [0], [0], [1], [0, 0, 1, 1], [], []>} : vector<2x128xbf16>, vector<128x512xbf16>, vector<2x512xf32> -> vector<2x512xf32>
    %15 = arith.addf %11, %14 : vector<2x512xf32>
    %16 = vector.extract_strided_slice %15 {offsets = [0, 0], sizes = [2, 128], strides = [1, 1]} : vector<2x512xf32> to vector<2x128xf32>
    %17 = arith.negf %16 : vector<2x128xf32>
    %18 = math.exp %17 : vector<2x128xf32>
    %cst_16 = arith.constant 1.000000e+00 : f32
    %19 = vector.broadcast %cst_16 : f32 to vector<2x128xf32>
    %20 = arith.addf %19, %18 : vector<2x128xf32>
    %21 = arith.divf %19, %20 : vector<2x128xf32>
    %22 = vector.extract_strided_slice %15 {offsets = [0, 128], sizes = [2, 128], strides = [1, 1]} : vector<2x512xf32> to vector<2x128xf32>
    %23 = arith.negf %22 : vector<2x128xf32>
    %24 = math.exp %23 : vector<2x128xf32>
    %cst_17 = arith.constant 1.000000e+00 : f32
    %25 = vector.broadcast %cst_17 : f32 to vector<2x128xf32>
    %26 = arith.addf %25, %24 : vector<2x128xf32>
    %27 = arith.divf %25, %26 : vector<2x128xf32>
    %28 = vector.extract_strided_slice %15 {offsets = [0, 256], sizes = [2, 128], strides = [1, 1]} : vector<2x512xf32> to vector<2x128xf32>
    %29 = math.tanh %28 : vector<2x128xf32>
    %30 = vector.extract_strided_slice %15 {offsets = [0, 384], sizes = [2, 128], strides = [1, 1]} : vector<2x512xf32> to vector<2x128xf32>
    %31 = arith.negf %30 : vector<2x128xf32>
    %32 = math.exp %31 : vector<2x128xf32>
    %cst_18 = arith.constant 1.000000e+00 : f32
    %33 = vector.broadcast %cst_18 : f32 to vector<2x128xf32>
    %34 = arith.addf %33, %32 : vector<2x128xf32>
    %35 = arith.divf %33, %34 : vector<2x128xf32>
    %36 = arith.mulf %27, %8 : vector<2x128xf32>
    %37 = arith.mulf %21, %29 : vector<2x128xf32>
    %38 = arith.addf %36, %37 : vector<2x128xf32>
    %39 = math.tanh %38 : vector<2x128xf32>
    %40 = arith.mulf %35, %39 : vector<2x128xf32>
    %c0_19 = arith.constant 0 : index
    %c0_20 = arith.constant 0 : index
    %41 = vector.load %arg24[%c0_19, %c0_20] : memref<16x256xf32, #tpu.memory_space<vmem>>, vector<2x128xf32>
    tpu.vector_store %arg24[%c0_19, %c0_20], %40 {strides = array<i32>} : memref<16x256xf32, #tpu.memory_space<vmem>>, vector<2x128xf32>,
    %c14 = arith.constant 14 : index
    %c512 = arith.constant 512 : index
    %42 = vector.load %arg23[%c14, %c512] : memref<16x1024xf32, #tpu.memory_space<vmem>>, vector<2x512xf32>
    %43 = arith.truncf %9 : vector<2x128xf32> to vector<2x128xbf16>
    %c0_21 = arith.constant 0 : index
    %c0_22 = arith.constant 0 : index
    %44 = vector.load %arg4[%c0_21, %c0_22] : memref<128x512xbf16, #tpu.memory_space<vmem>>, vector<128x512xbf16>
    %cst_23 = arith.constant dense<0.000000e+00> : vector<2x512xf32>
    %45 = tpu.matmul %43, %44, %cst_23 {dimension_numbers = #tpu.dot_dimension_numbers<[1], [0], [0], [1], [0, 0, 1, 1], [], []>} : vector<2x128xbf16>, vector<128x512xbf16>, vector<2x512xf32> -> vector<2x512xf32>
    %46 = arith.addf %42, %45 : vector<2x512xf32>
    %47 = vector.extract_strided_slice %46 {offsets = [0, 0], sizes = [2, 128], strides = [1, 1]} : vector<2x512xf32> to vector<2x128xf32>
    %48 = arith.negf %47 : vector<2x128xf32>
    %49 = math.exp %48 : vector<2x128xf32>
    %cst_24 = arith.constant 1.000000e+00 : f32
    %50 = vector.broadcast %cst_24 : f32 to vector<2x128xf32>
    %51 = arith.addf %50, %49 : vector<2x128xf32>
    %52 = arith.divf %50, %51 : vector<2x128xf32>
    %53 = vector.extract_strided_slice %46 {offsets = [0, 128], sizes = [2, 128], strides = [1, 1]} : vector<2x512xf32> to vector<2x128xf32>
    %54 = arith.negf %53 : vector<2x128xf32>
    %55 = math.exp %54 : vector<2x128xf32>
    %cst_25 = arith.constant 1.000000e+00 : f32
    %56 = vector.broadcast %cst_25 : f32 to vector<2x128xf32>
    %57 = arith.addf %56, %55 : vector<2x128xf32>
    %58 = arith.divf %56, %57 : vector<2x128xf32>
    %59 = vector.extract_strided_slice %46 {offsets = [0, 256], sizes = [2, 128], strides = [1, 1]} : vector<2x512xf32> to vector<2x128xf32>
    %60 = math.tanh %59 : vector<2x128xf32>
    %61 = vector.extract_strided_slice %46 {offsets = [0, 384], sizes = [2, 128], strides = [1, 1]} : vector<2x512xf32> to vector<2x128xf32>
    %62 = arith.negf %61 : vector<2x128xf32>
    %63 = math.exp %62 : vector<2x128xf32>
    %cst_26 = arith.constant 1.000000e+00 : f32
    %64 = vector.broadcast %cst_26 : f32 to vector<2x128xf32>
    %65 = arith.addf %64, %63 : vector<2x128xf32>
    %66 = arith.divf %64, %65 : vector<2x128xf32>
    %67 = arith.mulf %58, %10 : vector<2x128xf32>
    %68 = arith.mulf %52, %60 : vector<2x128xf32>
    %69 = arith.addf %67, %68 : vector<2x128xf32>
    %70 = math.tanh %69 : vector<2x128xf32>
    %71 = arith.mulf %66, %70 : vector<2x128xf32>
    %c14_27 = arith.constant 14 : index
    %c128 = arith.constant 128 : index
    %72 = vector.load %arg24[%c14_27, %c128] : memref<16x256xf32, #tpu.memory_space<vmem>>, vector<2x128xf32>
    tpu.vector_store %arg24[%c14_27, %c128], %71 {strides = array<i32>} : memref<16x256xf32, #tpu.memory_space<vmem>>, vector<2x128xf32>,
    %c2 = arith.constant 2 : index
    %c0_28 = arith.constant 0 : index
    %73 = vector.load %arg23[%c2, %c0_28] : memref<16x1024xf32, #tpu.memory_space<vmem>>, vector<2x512xf32>
    %74 = arith.truncf %40 : vector<2x128xf32> to vector<2x128xbf16>
    %c0_29 = arith.constant 0 : index
    %c0_30 = arith.constant 0 : index
    %75 = vector.load %arg3[%c0_29, %c0_30] : memref<128x512xbf16, #tpu.memory_space<vmem>>, vector<128x512xbf16>
    %cst_31 = arith.constant dense<0.000000e+00> : vector<2x512xf32>
    %76 = tpu.matmul %74, %75, %cst_31 {dimension_numbers = #tpu.dot_dimension_numbers<[1], [0], [0], [1], [0, 0, 1, 1], [], []>} : vector<2x128xbf16>, vector<128x512xbf16>, vector<2x512xf32> -> vector<2x512xf32>
    %77 = arith.addf %73, %76 : vector<2x512xf32>
    %78 = vector.extract_strided_slice %77 {offsets = [0, 0], sizes = [2, 128], strides = [1, 1]} : vector<2x512xf32> to vector<2x128xf32>
    %79 = arith.negf %78 : vector<2x128xf32>
    %80 = math.exp %79 : vector<2x128xf32>
    %cst_32 = arith.constant 1.000000e+00 : f32
    %81 = vector.broadcast %cst_32 : f32 to vector<2x128xf32>
    %82 = arith.addf %81, %80 : vector<2x128xf32>
    %83 = arith.divf %81, %82 : vector<2x128xf32>
    %84 = vector.extract_strided_slice %77 {offsets = [0, 128], sizes = [2, 128], strides = [1, 1]} : vector<2x512xf32> to vector<2x128xf32>
    %85 = arith.negf %84 : vector<2x128xf32>
    %86 = math.exp %85 : vector<2x128xf32>
    %cst_33 = arith.constant 1.000000e+00 : f32
    %87 = vector.broadcast %cst_33 : f32 to vector<2x128xf32>
    %88 = arith.addf %87, %86 : vector<2x128xf32>
    %89 = arith.divf %87, %88 : vector<2x128xf32>
    %90 = vector.extract_strided_slice %77 {offsets = [0, 256], sizes = [2, 128], strides = [1, 1]} : vector<2x512xf32> to vector<2x128xf32>
    %91 = math.tanh %90 : vector<2x128xf32>
    %92 = vector.extract_strided_slice %77 {offsets = [0, 384], sizes = [2, 128], strides = [1, 1]} : vector<2x512xf32> to vector<2x128xf32>
    %93 = arith.negf %92 : vector<2x128xf32>
    %94 = math.exp %93 : vector<2x128xf32>
    %cst_34 = arith.constant 1.000000e+00 : f32
    %95 = vector.broadcast %cst_34 : f32 to vector<2x128xf32>
    %96 = arith.addf %95, %94 : vector<2x128xf32>
    %97 = arith.divf %95, %96 : vector<2x128xf32>
    %98 = arith.mulf %89, %38 : vector<2x128xf32>
    %99 = arith.mulf %83, %91 : vector<2x128xf32>
    %100 = arith.addf %98, %99 : vector<2x128xf32>
    %101 = math.tanh %100 : vector<2x128xf32>
    %102 = arith.mulf %97, %101 : vector<2x128xf32>
    %c2_35 = arith.constant 2 : index
    %c0_36 = arith.constant 0 : index
    %103 = vector.load %arg24[%c2_35, %c0_36] : memref<16x256xf32, #tpu.memory_space<vmem>>, vector<2x128xf32>
    tpu.vector_store %arg24[%c2_35, %c0_36], %102 {strides = array<i32>} : memref<16x256xf32, #tpu.memory_space<vmem>>, vector<2x128xf32>,
    %c12 = arith.constant 12 : index
    %c512_37 = arith.constant 512 : index
    %104 = vector.load %arg23[%c12, %c512_37] : memref<16x1024xf32, #tpu.memory_space<vmem>>, vector<2x512xf32>
    %105 = arith.truncf %71 : vector<2x128xf32> to vector<2x128xbf16>
    %c0_38 = arith.constant 0 : index
    %c0_39 = arith.constant 0 : index
    %106 = vector.load %arg4[%c0_38, %c0_39] : memref<128x512xbf16, #tpu.memory_space<vmem>>, vector<128x512xbf16>
    %cst_40 = arith.constant dense<0.000000e+00> : vector<2x512xf32>
    %107 = tpu.matmul %105, %106, %cst_40 {dimension_numbers = #tpu.dot_dimension_numbers<[1], [0], [0], [1], [0, 0, 1, 1], [], []>} : vector<2x128xbf16>, vector<128x512xbf16>, vector<2x512xf32> -> vector<2x512xf32>
    %108 = arith.addf %104, %107 : vector<2x512xf32>
    %109 = vector.extract_strided_slice %108 {offsets = [0, 0], sizes = [2, 128], strides = [1, 1]} : vector<2x512xf32> to vector<2x128xf32>
    %110 = arith.negf %109 : vector<2x128xf32>
    %111 = math.exp %110 : vector<2x128xf32>
    %cst_41 = arith.constant 1.000000e+00 : f32
    %112 = vector.broadcast %cst_41 : f32 to vector<2x128xf32>
    %113 = arith.addf %112, %111 : vector<2x128xf32>
    %114 = arith.divf %112, %113 : vector<2x128xf32>
    %115 = vector.extract_strided_slice %108 {offsets = [0, 128], sizes = [2, 128], strides = [1, 1]} : vector<2x512xf32> to vector<2x128xf32>
    %116 = arith.negf %115 : vector<2x128xf32>
    %117 = math.exp %116 : vector<2x128xf32>
    %cst_42 = arith.constant 1.000000e+00 : f32
    %118 = vector.broadcast %cst_42 : f32 to vector<2x128xf32>
    %119 = arith.addf %118, %117 : vector<2x128xf32>
    %120 = arith.divf %118, %119 : vector<2x128xf32>
    %121 = vector.extract_strided_slice %108 {offsets = [0, 256], sizes = [2, 128], strides = [1, 1]} : vector<2x512xf32> to vector<2x128xf32>
    %122 = math.tanh %121 : vector<2x128xf32>
    %123 = vector.extract_strided_slice %108 {offsets = [0, 384], sizes = [2, 128], strides = [1, 1]} : vector<2x512xf32> to vector<2x128xf32>
    %124 = arith.negf %123 : vector<2x128xf32>
    %125 = math.exp %124 : vector<2x128xf32>
    %cst_43 = arith.constant 1.000000e+00 : f32
    %126 = vector.broadcast %cst_43 : f32 to vector<2x128xf32>
    %127 = arith.addf %126, %125 : vector<2x128xf32>
    %128 = arith.divf %126, %127 : vector<2x128xf32>
    %129 = arith.mulf %120, %69 : vector<2x128xf32>
    %130 = arith.mulf %114, %122 : vector<2x128xf32>
    %131 = arith.addf %129, %130 : vector<2x128xf32>
    %132 = math.tanh %131 : vector<2x128xf32>
    %133 = arith.mulf %128, %132 : vector<2x128xf32>
    %c12_44 = arith.constant 12 : index
    %c128_45 = arith.constant 128 : index
    %134 = vector.load %arg24[%c12_44, %c128_45] : memref<16x256xf32, #tpu.memory_space<vmem>>, vector<2x128xf32>
    tpu.vector_store %arg24[%c12_44, %c128_45], %133 {strides = array<i32>} : memref<16x256xf32, #tpu.memory_space<vmem>>, vector<2x128xf32>,
    %c4 = arith.constant 4 : index
    %c0_46 = arith.constant 0 : index
    %135 = vector.load %arg23[%c4, %c0_46] : memref<16x1024xf32, #tpu.memory_space<vmem>>, vector<2x512xf32>
    %136 = arith.truncf %102 : vector<2x128xf32> to vector<2x128xbf16>
    %c0_47 = arith.constant 0 : index
    %c0_48 = arith.constant 0 : index
    %137 = vector.load %arg3[%c0_47, %c0_48] : memref<128x512xbf16, #tpu.memory_space<vmem>>, vector<128x512xbf16>
    %cst_49 = arith.constant dense<0.000000e+00> : vector<2x512xf32>
    %138 = tpu.matmul %136, %137, %cst_49 {dimension_numbers = #tpu.dot_dimension_numbers<[1], [0], [0], [1], [0, 0, 1, 1], [], []>} : vector<2x128xbf16>, vector<128x512xbf16>, vector<2x512xf32> -> vector<2x512xf32>
    %139 = arith.addf %135, %138 : vector<2x512xf32>
    %140 = vector.extract_strided_slice %139 {offsets = [0, 0], sizes = [2, 128], strides = [1, 1]} : vector<2x512xf32> to vector<2x128xf32>
    %141 = arith.negf %140 : vector<2x128xf32>
    %142 = math.exp %141 : vector<2x128xf32>
    %cst_50 = arith.constant 1.000000e+00 : f32
    %143 = vector.broadcast %cst_50 : f32 to vector<2x128xf32>
    %144 = arith.addf %143, %142 : vector<2x128xf32>
    %145 = arith.divf %143, %144 : vector<2x128xf32>
    %146 = vector.extract_strided_slice %139 {offsets = [0, 128], sizes = [2, 128], strides = [1, 1]} : vector<2x512xf32> to vector<2x128xf32>
    %147 = arith.negf %146 : vector<2x128xf32>
    %148 = math.exp %147 : vector<2x128xf32>
    %cst_51 = arith.constant 1.000000e+00 : f32
    %149 = vector.broadcast %cst_51 : f32 to vector<2x128xf32>
    %150 = arith.addf %149, %148 : vector<2x128xf32>
    %151 = arith.divf %149, %150 : vector<2x128xf32>
    %152 = vector.extract_strided_slice %139 {offsets = [0, 256], sizes = [2, 128], strides = [1, 1]} : vector<2x512xf32> to vector<2x128xf32>
    %153 = math.tanh %152 : vector<2x128xf32>
    %154 = vector.extract_strided_slice %139 {offsets = [0, 384], sizes = [2, 128], strides = [1, 1]} : vector<2x512xf32> to vector<2x128xf32>
    %155 = arith.negf %154 : vector<2x128xf32>
    %156 = math.exp %155 : vector<2x128xf32>
    %cst_52 = arith.constant 1.000000e+00 : f32
    %157 = vector.broadcast %cst_52 : f32 to vector<2x128xf32>
    %158 = arith.addf %157, %156 : vector<2x128xf32>
    %159 = arith.divf %157, %158 : vector<2x128xf32>
    %160 = arith.mulf %151, %100 : vector<2x128xf32>
    %161 = arith.mulf %145, %153 : vector<2x128xf32>
    %162 = arith.addf %160, %161 : vector<2x128xf32>
    %163 = math.tanh %162 : vector<2x128xf32>
    %164 = arith.mulf %159, %163 : vector<2x128xf32>
    %c4_53 = arith.constant 4 : index
    %c0_54 = arith.constant 0 : index
    %165 = vector.load %arg24[%c4_53, %c0_54] : memref<16x256xf32, #tpu.memory_space<vmem>>, vector<2x128xf32>
    tpu.vector_store %arg24[%c4_53, %c0_54], %164 {strides = array<i32>} : memref<16x256xf32, #tpu.memory_space<vmem>>, vector<2x128xf32>,
    %c10 = arith.constant 10 : index
    %c512_55 = arith.constant 512 : index
    %166 = vector.load %arg23[%c10, %c512_55] : memref<16x1024xf32, #tpu.memory_space<vmem>>, vector<2x512xf32>
    %167 = arith.truncf %133 : vector<2x128xf32> to vector<2x128xbf16>
    %c0_56 = arith.constant 0 : index
    %c0_57 = arith.constant 0 : index
    %168 = vector.load %arg4[%c0_56, %c0_57] : memref<128x512xbf16, #tpu.memory_space<vmem>>, vector<128x512xbf16>
    %cst_58 = arith.constant dense<0.000000e+00> : vector<2x512xf32>
    %169 = tpu.matmul %167, %168, %cst_58 {dimension_numbers = #tpu.dot_dimension_numbers<[1], [0], [0], [1], [0, 0, 1, 1], [], []>} : vector<2x128xbf16>, vector<128x512xbf16>, vector<2x512xf32> -> vector<2x512xf32>
    %170 = arith.addf %166, %169 : vector<2x512xf32>
    %171 = vector.extract_strided_slice %170 {offsets = [0, 0], sizes = [2, 128], strides = [1, 1]} : vector<2x512xf32> to vector<2x128xf32>
    %172 = arith.negf %171 : vector<2x128xf32>
    %173 = math.exp %172 : vector<2x128xf32>
    %cst_59 = arith.constant 1.000000e+00 : f32
    %174 = vector.broadcast %cst_59 : f32 to vector<2x128xf32>
    %175 = arith.addf %174, %173 : vector<2x128xf32>
    %176 = arith.divf %174, %175 : vector<2x128xf32>
    %177 = vector.extract_strided_slice %170 {offsets = [0, 128], sizes = [2, 128], strides = [1, 1]} : vector<2x512xf32> to vector<2x128xf32>
    %178 = arith.negf %177 : vector<2x128xf32>
    %179 = math.exp %178 : vector<2x128xf32>
    %cst_60 = arith.constant 1.000000e+00 : f32
    %180 = vector.broadcast %cst_60 : f32 to vector<2x128xf32>
    %181 = arith.addf %180, %179 : vector<2x128xf32>
    %182 = arith.divf %180, %181 : vector<2x128xf32>
    %183 = vector.extract_strided_slice %170 {offsets = [0, 256], sizes = [2, 128], strides = [1, 1]} : vector<2x512xf32> to vector<2x128xf32>
    %184 = math.tanh %183 : vector<2x128xf32>
    %185 = vector.extract_strided_slice %170 {offsets = [0, 384], sizes = [2, 128], strides = [1, 1]} : vector<2x512xf32> to vector<2x128xf32>
    %186 = arith.negf %185 : vector<2x128xf32>
    %187 = math.exp %186 : vector<2x128xf32>
    %cst_61 = arith.constant 1.000000e+00 : f32
    %188 = vector.broadcast %cst_61 : f32 to vector<2x128xf32>
    %189 = arith.addf %188, %187 : vector<2x128xf32>
    %190 = arith.divf %188, %189 : vector<2x128xf32>
    %191 = arith.mulf %182, %131 : vector<2x128xf32>
    %192 = arith.mulf %176, %184 : vector<2x128xf32>
    %193 = arith.addf %191, %192 : vector<2x128xf32>
    %194 = math.tanh %193 : vector<2x128xf32>
    %195 = arith.mulf %190, %194 : vector<2x128xf32>
    %c10_62 = arith.constant 10 : index
    %c128_63 = arith.constant 128 : index
    %196 = vector.load %arg24[%c10_62, %c128_63] : memref<16x256xf32, #tpu.memory_space<vmem>>, vector<2x128xf32>
    tpu.vector_store %arg24[%c10_62, %c128_63], %195 {strides = array<i32>} : memref<16x256xf32, #tpu.memory_space<vmem>>, vector<2x128xf32>,
    %c6 = arith.constant 6 : index
    %c0_64 = arith.constant 0 : index
    %197 = vector.load %arg23[%c6, %c0_64] : memref<16x1024xf32, #tpu.memory_space<vmem>>, vector<2x512xf32>
    %198 = arith.truncf %164 : vector<2x128xf32> to vector<2x128xbf16>
    %c0_65 = arith.constant 0 : index
    %c0_66 = arith.constant 0 : index
    %199 = vector.load %arg3[%c0_65, %c0_66] : memref<128x512xbf16, #tpu.memory_space<vmem>>, vector<128x512xbf16>
    %cst_67 = arith.constant dense<0.000000e+00> : vector<2x512xf32>
    %200 = tpu.matmul %198, %199, %cst_67 {dimension_numbers = #tpu.dot_dimension_numbers<[1], [0], [0], [1], [0, 0, 1, 1], [], []>} : vector<2x128xbf16>, vector<128x512xbf16>, vector<2x512xf32> -> vector<2x512xf32>
    %201 = arith.addf %197, %200 : vector<2x512xf32>
    %202 = vector.extract_strided_slice %201 {offsets = [0, 0], sizes = [2, 128], strides = [1, 1]} : vector<2x512xf32> to vector<2x128xf32>
    %203 = arith.negf %202 : vector<2x128xf32>
    %204 = math.exp %203 : vector<2x128xf32>
    %cst_68 = arith.constant 1.000000e+00 : f32
    %205 = vector.broadcast %cst_68 : f32 to vector<2x128xf32>
    %206 = arith.addf %205, %204 : vector<2x128xf32>
    %207 = arith.divf %205, %206 : vector<2x128xf32>
    %208 = vector.extract_strided_slice %201 {offsets = [0, 128], sizes = [2, 128], strides = [1, 1]} : vector<2x512xf32> to vector<2x128xf32>
    %209 = arith.negf %208 : vector<2x128xf32>
    %210 = math.exp %209 : vector<2x128xf32>
    %cst_69 = arith.constant 1.000000e+00 : f32
    %211 = vector.broadcast %cst_69 : f32 to vector<2x128xf32>
    %212 = arith.addf %211, %210 : vector<2x128xf32>
    %213 = arith.divf %211, %212 : vector<2x128xf32>
    %214 = vector.extract_strided_slice %201 {offsets = [0, 256], sizes = [2, 128], strides = [1, 1]} : vector<2x512xf32> to vector<2x128xf32>
    %215 = math.tanh %214 : vector<2x128xf32>
    %216 = vector.extract_strided_slice %201 {offsets = [0, 384], sizes = [2, 128], strides = [1, 1]} : vector<2x512xf32> to vector<2x128xf32>
    %217 = arith.negf %216 : vector<2x128xf32>
    %218 = math.exp %217 : vector<2x128xf32>
    %cst_70 = arith.constant 1.000000e+00 : f32
    %219 = vector.broadcast %cst_70 : f32 to vector<2x128xf32>
    %220 = arith.addf %219, %218 : vector<2x128xf32>
    %221 = arith.divf %219, %220 : vector<2x128xf32>
    %222 = arith.mulf %213, %162 : vector<2x128xf32>
    %223 = arith.mulf %207, %215 : vector<2x128xf32>
    %224 = arith.addf %222, %223 : vector<2x128xf32>
    %225 = math.tanh %224 : vector<2x128xf32>
    %226 = arith.mulf %221, %225 : vector<2x128xf32>
    %c6_71 = arith.constant 6 : index
    %c0_72 = arith.constant 0 : index
    %227 = vector.load %arg24[%c6_71, %c0_72] : memref<16x256xf32, #tpu.memory_space<vmem>>, vector<2x128xf32>
    tpu.vector_store %arg24[%c6_71, %c0_72], %226 {strides = array<i32>} : memref<16x256xf32, #tpu.memory_space<vmem>>, vector<2x128xf32>,
    %c8 = arith.constant 8 : index
    %c512_73 = arith.constant 512 : index
    %228 = vector.load %arg23[%c8, %c512_73] : memref<16x1024xf32, #tpu.memory_space<vmem>>, vector<2x512xf32>
    %229 = arith.truncf %195 : vector<2x128xf32> to vector<2x128xbf16>
    %c0_74 = arith.constant 0 : index
    %c0_75 = arith.constant 0 : index
    %230 = vector.load %arg4[%c0_74, %c0_75] : memref<128x512xbf16, #tpu.memory_space<vmem>>, vector<128x512xbf16>
    %cst_76 = arith.constant dense<0.000000e+00> : vector<2x512xf32>
    %231 = tpu.matmul %229, %230, %cst_76 {dimension_numbers = #tpu.dot_dimension_numbers<[1], [0], [0], [1], [0, 0, 1, 1], [], []>} : vector<2x128xbf16>, vector<128x512xbf16>, vector<2x512xf32> -> vector<2x512xf32>
    %232 = arith.addf %228, %231 : vector<2x512xf32>
    %233 = vector.extract_strided_slice %232 {offsets = [0, 0], sizes = [2, 128], strides = [1, 1]} : vector<2x512xf32> to vector<2x128xf32>
    %234 = arith.negf %233 : vector<2x128xf32>
    %235 = math.exp %234 : vector<2x128xf32>
    %cst_77 = arith.constant 1.000000e+00 : f32
    %236 = vector.broadcast %cst_77 : f32 to vector<2x128xf32>
    %237 = arith.addf %236, %235 : vector<2x128xf32>
    %238 = arith.divf %236, %237 : vector<2x128xf32>
    %239 = vector.extract_strided_slice %232 {offsets = [0, 128], sizes = [2, 128], strides = [1, 1]} : vector<2x512xf32> to vector<2x128xf32>
    %240 = arith.negf %239 : vector<2x128xf32>
    %241 = math.exp %240 : vector<2x128xf32>
    %cst_78 = arith.constant 1.000000e+00 : f32
    %242 = vector.broadcast %cst_78 : f32 to vector<2x128xf32>
    %243 = arith.addf %242, %241 : vector<2x128xf32>
    %244 = arith.divf %242, %243 : vector<2x128xf32>
    %245 = vector.extract_strided_slice %232 {offsets = [0, 256], sizes = [2, 128], strides = [1, 1]} : vector<2x512xf32> to vector<2x128xf32>
    %246 = math.tanh %245 : vector<2x128xf32>
    %247 = vector.extract_strided_slice %232 {offsets = [0, 384], sizes = [2, 128], strides = [1, 1]} : vector<2x512xf32> to vector<2x128xf32>
    %248 = arith.negf %247 : vector<2x128xf32>
    %249 = math.exp %248 : vector<2x128xf32>
    %cst_79 = arith.constant 1.000000e+00 : f32
    %250 = vector.broadcast %cst_79 : f32 to vector<2x128xf32>
    %251 = arith.addf %250, %249 : vector<2x128xf32>
    %252 = arith.divf %250, %251 : vector<2x128xf32>
    %253 = arith.mulf %244, %193 : vector<2x128xf32>
    %254 = arith.mulf %238, %246 : vector<2x128xf32>
    %255 = arith.addf %253, %254 : vector<2x128xf32>
    %256 = math.tanh %255 : vector<2x128xf32>
    %257 = arith.mulf %252, %256 : vector<2x128xf32>
    %c8_80 = arith.constant 8 : index
    %c128_81 = arith.constant 128 : index
    %258 = vector.load %arg24[%c8_80, %c128_81] : memref<16x256xf32, #tpu.memory_space<vmem>>, vector<2x128xf32>
    tpu.vector_store %arg24[%c8_80, %c128_81], %257 {strides = array<i32>} : memref<16x256xf32, #tpu.memory_space<vmem>>, vector<2x128xf32>,
    %c8_82 = arith.constant 8 : index
    %c0_83 = arith.constant 0 : index
    %259 = vector.load %arg23[%c8_82, %c0_83] : memref<16x1024xf32, #tpu.memory_space<vmem>>, vector<2x512xf32>
    %260 = arith.truncf %226 : vector<2x128xf32> to vector<2x128xbf16>
    %c0_84 = arith.constant 0 : index
    %c0_85 = arith.constant 0 : index
    %261 = vector.load %arg3[%c0_84, %c0_85] : memref<128x512xbf16, #tpu.memory_space<vmem>>, vector<128x512xbf16>
    %cst_86 = arith.constant dense<0.000000e+00> : vector<2x512xf32>
    %262 = tpu.matmul %260, %261, %cst_86 {dimension_numbers = #tpu.dot_dimension_numbers<[1], [0], [0], [1], [0, 0, 1, 1], [], []>} : vector<2x128xbf16>, vector<128x512xbf16>, vector<2x512xf32> -> vector<2x512xf32>
    %263 = arith.addf %259, %262 : vector<2x512xf32>
    %264 = vector.extract_strided_slice %263 {offsets = [0, 0], sizes = [2, 128], strides = [1, 1]} : vector<2x512xf32> to vector<2x128xf32>
    %265 = arith.negf %264 : vector<2x128xf32>
    %266 = math.exp %265 : vector<2x128xf32>
    %cst_87 = arith.constant 1.000000e+00 : f32
    %267 = vector.broadcast %cst_87 : f32 to vector<2x128xf32>
    %268 = arith.addf %267, %266 : vector<2x128xf32>
    %269 = arith.divf %267, %268 : vector<2x128xf32>
    %270 = vector.extract_strided_slice %263 {offsets = [0, 128], sizes = [2, 128], strides = [1, 1]} : vector<2x512xf32> to vector<2x128xf32>
    %271 = arith.negf %270 : vector<2x128xf32>
    %272 = math.exp %271 : vector<2x128xf32>
    %cst_88 = arith.constant 1.000000e+00 : f32
    %273 = vector.broadcast %cst_88 : f32 to vector<2x128xf32>
    %274 = arith.addf %273, %272 : vector<2x128xf32>
    %275 = arith.divf %273, %274 : vector<2x128xf32>
    %276 = vector.extract_strided_slice %263 {offsets = [0, 256], sizes = [2, 128], strides = [1, 1]} : vector<2x512xf32> to vector<2x128xf32>
    %277 = math.tanh %276 : vector<2x128xf32>
    %278 = vector.extract_strided_slice %263 {offsets = [0, 384], sizes = [2, 128], strides = [1, 1]} : vector<2x512xf32> to vector<2x128xf32>
    %279 = arith.negf %278 : vector<2x128xf32>
    %280 = math.exp %279 : vector<2x128xf32>
    %cst_89 = arith.constant 1.000000e+00 : f32
    %281 = vector.broadcast %cst_89 : f32 to vector<2x128xf32>
    %282 = arith.addf %281, %280 : vector<2x128xf32>
    %283 = arith.divf %281, %282 : vector<2x128xf32>
    %284 = arith.mulf %275, %224 : vector<2x128xf32>
    %285 = arith.mulf %269, %277 : vector<2x128xf32>
    %286 = arith.addf %284, %285 : vector<2x128xf32>
    %287 = math.tanh %286 : vector<2x128xf32>
    %288 = arith.mulf %283, %287 : vector<2x128xf32>
    %c8_90 = arith.constant 8 : index
    %c0_91 = arith.constant 0 : index
    %289 = vector.load %arg24[%c8_90, %c0_91] : memref<16x256xf32, #tpu.memory_space<vmem>>, vector<2x128xf32>
    tpu.vector_store %arg24[%c8_90, %c0_91], %288 {strides = array<i32>} : memref<16x256xf32, #tpu.memory_space<vmem>>, vector<2x128xf32>,
    %c6_92 = arith.constant 6 : index
    %c512_93 = arith.constant 512 : index
    %290 = vector.load %arg23[%c6_92, %c512_93] : memref<16x1024xf32, #tpu.memory_space<vmem>>, vector<2x512xf32>
    %291 = arith.truncf %257 : vector<2x128xf32> to vector<2x128xbf16>
    %c0_94 = arith.constant 0 : index
    %c0_95 = arith.constant 0 : index
    %292 = vector.load %arg4[%c0_94, %c0_95] : memref<128x512xbf16, #tpu.memory_space<vmem>>, vector<128x512xbf16>
    %cst_96 = arith.constant dense<0.000000e+00> : vector<2x512xf32>
    %293 = tpu.matmul %291, %292, %cst_96 {dimension_numbers = #tpu.dot_dimension_numbers<[1], [0], [0], [1], [0, 0, 1, 1], [], []>} : vector<2x128xbf16>, vector<128x512xbf16>, vector<2x512xf32> -> vector<2x512xf32>
    %294 = arith.addf %290, %293 : vector<2x512xf32>
    %295 = vector.extract_strided_slice %294 {offsets = [0, 0], sizes = [2, 128], strides = [1, 1]} : vector<2x512xf32> to vector<2x128xf32>
    %296 = arith.negf %295 : vector<2x128xf32>
    %297 = math.exp %296 : vector<2x128xf32>
    %cst_97 = arith.constant 1.000000e+00 : f32
    %298 = vector.broadcast %cst_97 : f32 to vector<2x128xf32>
    %299 = arith.addf %298, %297 : vector<2x128xf32>
    %300 = arith.divf %298, %299 : vector<2x128xf32>
    %301 = vector.extract_strided_slice %294 {offsets = [0, 128], sizes = [2, 128], strides = [1, 1]} : vector<2x512xf32> to vector<2x128xf32>
    %302 = arith.negf %301 : vector<2x128xf32>
    %303 = math.exp %302 : vector<2x128xf32>
    %cst_98 = arith.constant 1.000000e+00 : f32
    %304 = vector.broadcast %cst_98 : f32 to vector<2x128xf32>
    %305 = arith.addf %304, %303 : vector<2x128xf32>
    %306 = arith.divf %304, %305 : vector<2x128xf32>
    %307 = vector.extract_strided_slice %294 {offsets = [0, 256], sizes = [2, 128], strides = [1, 1]} : vector<2x512xf32> to vector<2x128xf32>
    %308 = math.tanh %307 : vector<2x128xf32>
    %309 = vector.extract_strided_slice %294 {offsets = [0, 384], sizes = [2, 128], strides = [1, 1]} : vector<2x512xf32> to vector<2x128xf32>
    %310 = arith.negf %309 : vector<2x128xf32>
    %311 = math.exp %310 : vector<2x128xf32>
    %cst_99 = arith.constant 1.000000e+00 : f32
    %312 = vector.broadcast %cst_99 : f32 to vector<2x128xf32>
    %313 = arith.addf %312, %311 : vector<2x128xf32>
    %314 = arith.divf %312, %313 : vector<2x128xf32>
    %315 = arith.mulf %306, %255 : vector<2x128xf32>
    %316 = arith.mulf %300, %308 : vector<2x128xf32>
    %317 = arith.addf %315, %316 : vector<2x128xf32>
    %318 = math.tanh %317 : vector<2x128xf32>
    %319 = arith.mulf %314, %318 : vector<2x128xf32>
    %c6_100 = arith.constant 6 : index
    %c128_101 = arith.constant 128 : index
    %320 = vector.load %arg24[%c6_100, %c128_101] : memref<16x256xf32, #tpu.memory_space<vmem>>, vector<2x128xf32>
    tpu.vector_store %arg24[%c6_100, %c128_101], %319 {strides = array<i32>} : memref<16x256xf32, #tpu.memory_space<vmem>>, vector<2x128xf32>,
    %c10_102 = arith.constant 10 : index
    %c0_103 = arith.constant 0 : index
    %321 = vector.load %arg23[%c10_102, %c0_103] : memref<16x1024xf32, #tpu.memory_space<vmem>>, vector<2x512xf32>
    %322 = arith.truncf %288 : vector<2x128xf32> to vector<2x128xbf16>
    %c0_104 = arith.constant 0 : index
    %c0_105 = arith.constant 0 : index
    %323 = vector.load %arg3[%c0_104, %c0_105] : memref<128x512xbf16, #tpu.memory_space<vmem>>, vector<128x512xbf16>
    %cst_106 = arith.constant dense<0.000000e+00> : vector<2x512xf32>
    %324 = tpu.matmul %322, %323, %cst_106 {dimension_numbers = #tpu.dot_dimension_numbers<[1], [0], [0], [1], [0, 0, 1, 1], [], []>} : vector<2x128xbf16>, vector<128x512xbf16>, vector<2x512xf32> -> vector<2x512xf32>
    %325 = arith.addf %321, %324 : vector<2x512xf32>
    %326 = vector.extract_strided_slice %325 {offsets = [0, 0], sizes = [2, 128], strides = [1, 1]} : vector<2x512xf32> to vector<2x128xf32>
    %327 = arith.negf %326 : vector<2x128xf32>
    %328 = math.exp %327 : vector<2x128xf32>
    %cst_107 = arith.constant 1.000000e+00 : f32
    %329 = vector.broadcast %cst_107 : f32 to vector<2x128xf32>
    %330 = arith.addf %329, %328 : vector<2x128xf32>
    %331 = arith.divf %329, %330 : vector<2x128xf32>
    %332 = vector.extract_strided_slice %325 {offsets = [0, 128], sizes = [2, 128], strides = [1, 1]} : vector<2x512xf32> to vector<2x128xf32>
    %333 = arith.negf %332 : vector<2x128xf32>
    %334 = math.exp %333 : vector<2x128xf32>
    %cst_108 = arith.constant 1.000000e+00 : f32
    %335 = vector.broadcast %cst_108 : f32 to vector<2x128xf32>
    %336 = arith.addf %335, %334 : vector<2x128xf32>
    %337 = arith.divf %335, %336 : vector<2x128xf32>
    %338 = vector.extract_strided_slice %325 {offsets = [0, 256], sizes = [2, 128], strides = [1, 1]} : vector<2x512xf32> to vector<2x128xf32>
    %339 = math.tanh %338 : vector<2x128xf32>
    %340 = vector.extract_strided_slice %325 {offsets = [0, 384], sizes = [2, 128], strides = [1, 1]} : vector<2x512xf32> to vector<2x128xf32>
    %341 = arith.negf %340 : vector<2x128xf32>
    %342 = math.exp %341 : vector<2x128xf32>
    %cst_109 = arith.constant 1.000000e+00 : f32
    %343 = vector.broadcast %cst_109 : f32 to vector<2x128xf32>
    %344 = arith.addf %343, %342 : vector<2x128xf32>
    %345 = arith.divf %343, %344 : vector<2x128xf32>
    %346 = arith.mulf %337, %286 : vector<2x128xf32>
    %347 = arith.mulf %331, %339 : vector<2x128xf32>
    %348 = arith.addf %346, %347 : vector<2x128xf32>
    %349 = math.tanh %348 : vector<2x128xf32>
    %350 = arith.mulf %345, %349 : vector<2x128xf32>
    %c10_110 = arith.constant 10 : index
    %c0_111 = arith.constant 0 : index
    %351 = vector.load %arg24[%c10_110, %c0_111] : memref<16x256xf32, #tpu.memory_space<vmem>>, vector<2x128xf32>
    tpu.vector_store %arg24[%c10_110, %c0_111], %350 {strides = array<i32>} : memref<16x256xf32, #tpu.memory_space<vmem>>, vector<2x128xf32>,
    %c4_112 = arith.constant 4 : index
    %c512_113 = arith.constant 512 : index
    %352 = vector.load %arg23[%c4_112, %c512_113] : memref<16x1024xf32, #tpu.memory_space<vmem>>, vector<2x512xf32>
    %353 = arith.truncf %319 : vector<2x128xf32> to vector<2x128xbf16>
    %c0_114 = arith.constant 0 : index
    %c0_115 = arith.constant 0 : index
    %354 = vector.load %arg4[%c0_114, %c0_115] : memref<128x512xbf16, #tpu.memory_space<vmem>>, vector<128x512xbf16>
    %cst_116 = arith.constant dense<0.000000e+00> : vector<2x512xf32>
    %355 = tpu.matmul %353, %354, %cst_116 {dimension_numbers = #tpu.dot_dimension_numbers<[1], [0], [0], [1], [0, 0, 1, 1], [], []>} : vector<2x128xbf16>, vector<128x512xbf16>, vector<2x512xf32> -> vector<2x512xf32>
    %356 = arith.addf %352, %355 : vector<2x512xf32>
    %357 = vector.extract_strided_slice %356 {offsets = [0, 0], sizes = [2, 128], strides = [1, 1]} : vector<2x512xf32> to vector<2x128xf32>
    %358 = arith.negf %357 : vector<2x128xf32>
    %359 = math.exp %358 : vector<2x128xf32>
    %cst_117 = arith.constant 1.000000e+00 : f32
    %360 = vector.broadcast %cst_117 : f32 to vector<2x128xf32>
    %361 = arith.addf %360, %359 : vector<2x128xf32>
    %362 = arith.divf %360, %361 : vector<2x128xf32>
    %363 = vector.extract_strided_slice %356 {offsets = [0, 128], sizes = [2, 128], strides = [1, 1]} : vector<2x512xf32> to vector<2x128xf32>
    %364 = arith.negf %363 : vector<2x128xf32>
    %365 = math.exp %364 : vector<2x128xf32>
    %cst_118 = arith.constant 1.000000e+00 : f32
    %366 = vector.broadcast %cst_118 : f32 to vector<2x128xf32>
    %367 = arith.addf %366, %365 : vector<2x128xf32>
    %368 = arith.divf %366, %367 : vector<2x128xf32>
    %369 = vector.extract_strided_slice %356 {offsets = [0, 256], sizes = [2, 128], strides = [1, 1]} : vector<2x512xf32> to vector<2x128xf32>
    %370 = math.tanh %369 : vector<2x128xf32>
    %371 = vector.extract_strided_slice %356 {offsets = [0, 384], sizes = [2, 128], strides = [1, 1]} : vector<2x512xf32> to vector<2x128xf32>
    %372 = arith.negf %371 : vector<2x128xf32>
    %373 = math.exp %372 : vector<2x128xf32>
    %cst_119 = arith.constant 1.000000e+00 : f32
    %374 = vector.broadcast %cst_119 : f32 to vector<2x128xf32>
    %375 = arith.addf %374, %373 : vector<2x128xf32>
    %376 = arith.divf %374, %375 : vector<2x128xf32>
    %377 = arith.mulf %368, %317 : vector<2x128xf32>
    %378 = arith.mulf %362, %370 : vector<2x128xf32>
    %379 = arith.addf %377, %378 : vector<2x128xf32>
    %380 = math.tanh %379 : vector<2x128xf32>
    %381 = arith.mulf %376, %380 : vector<2x128xf32>
    %c4_120 = arith.constant 4 : index
    %c128_121 = arith.constant 128 : index
    %382 = vector.load %arg24[%c4_120, %c128_121] : memref<16x256xf32, #tpu.memory_space<vmem>>, vector<2x128xf32>
    tpu.vector_store %arg24[%c4_120, %c128_121], %381 {strides = array<i32>} : memref<16x256xf32, #tpu.memory_space<vmem>>, vector<2x128xf32>,
    %c12_122 = arith.constant 12 : index
    %c0_123 = arith.constant 0 : index
    %383 = vector.load %arg23[%c12_122, %c0_123] : memref<16x1024xf32, #tpu.memory_space<vmem>>, vector<2x512xf32>
    %384 = arith.truncf %350 : vector<2x128xf32> to vector<2x128xbf16>
    %c0_124 = arith.constant 0 : index
    %c0_125 = arith.constant 0 : index
    %385 = vector.load %arg3[%c0_124, %c0_125] : memref<128x512xbf16, #tpu.memory_space<vmem>>, vector<128x512xbf16>
    %cst_126 = arith.constant dense<0.000000e+00> : vector<2x512xf32>
    %386 = tpu.matmul %384, %385, %cst_126 {dimension_numbers = #tpu.dot_dimension_numbers<[1], [0], [0], [1], [0, 0, 1, 1], [], []>} : vector<2x128xbf16>, vector<128x512xbf16>, vector<2x512xf32> -> vector<2x512xf32>
    %387 = arith.addf %383, %386 : vector<2x512xf32>
    %388 = vector.extract_strided_slice %387 {offsets = [0, 0], sizes = [2, 128], strides = [1, 1]} : vector<2x512xf32> to vector<2x128xf32>
    %389 = arith.negf %388 : vector<2x128xf32>
    %390 = math.exp %389 : vector<2x128xf32>
    %cst_127 = arith.constant 1.000000e+00 : f32
    %391 = vector.broadcast %cst_127 : f32 to vector<2x128xf32>
    %392 = arith.addf %391, %390 : vector<2x128xf32>
    %393 = arith.divf %391, %392 : vector<2x128xf32>
    %394 = vector.extract_strided_slice %387 {offsets = [0, 128], sizes = [2, 128], strides = [1, 1]} : vector<2x512xf32> to vector<2x128xf32>
    %395 = arith.negf %394 : vector<2x128xf32>
    %396 = math.exp %395 : vector<2x128xf32>
    %cst_128 = arith.constant 1.000000e+00 : f32
    %397 = vector.broadcast %cst_128 : f32 to vector<2x128xf32>
    %398 = arith.addf %397, %396 : vector<2x128xf32>
    %399 = arith.divf %397, %398 : vector<2x128xf32>
    %400 = vector.extract_strided_slice %387 {offsets = [0, 256], sizes = [2, 128], strides = [1, 1]} : vector<2x512xf32> to vector<2x128xf32>
    %401 = math.tanh %400 : vector<2x128xf32>
    %402 = vector.extract_strided_slice %387 {offsets = [0, 384], sizes = [2, 128], strides = [1, 1]} : vector<2x512xf32> to vector<2x128xf32>
    %403 = arith.negf %402 : vector<2x128xf32>
    %404 = math.exp %403 : vector<2x128xf32>
    %cst_129 = arith.constant 1.000000e+00 : f32
    %405 = vector.broadcast %cst_129 : f32 to vector<2x128xf32>
    %406 = arith.addf %405, %404 : vector<2x128xf32>
    %407 = arith.divf %405, %406 : vector<2x128xf32>
    %408 = arith.mulf %399, %348 : vector<2x128xf32>
    %409 = arith.mulf %393, %401 : vector<2x128xf32>
    %410 = arith.addf %408, %409 : vector<2x128xf32>
    %411 = math.tanh %410 : vector<2x128xf32>
    %412 = arith.mulf %407, %411 : vector<2x128xf32>
    %c12_130 = arith.constant 12 : index
    %c0_131 = arith.constant 0 : index
    %413 = vector.load %arg24[%c12_130, %c0_131] : memref<16x256xf32, #tpu.memory_space<vmem>>, vector<2x128xf32>
    tpu.vector_store %arg24[%c12_130, %c0_131], %412 {strides = array<i32>} : memref<16x256xf32, #tpu.memory_space<vmem>>, vector<2x128xf32>,
    %c2_132 = arith.constant 2 : index
    %c512_133 = arith.constant 512 : index
    %414 = vector.load %arg23[%c2_132, %c512_133] : memref<16x1024xf32, #tpu.memory_space<vmem>>, vector<2x512xf32>
    %415 = arith.truncf %381 : vector<2x128xf32> to vector<2x128xbf16>
    %c0_134 = arith.constant 0 : index
    %c0_135 = arith.constant 0 : index
    %416 = vector.load %arg4[%c0_134, %c0_135] : memref<128x512xbf16, #tpu.memory_space<vmem>>, vector<128x512xbf16>
    %cst_136 = arith.constant dense<0.000000e+00> : vector<2x512xf32>
    %417 = tpu.matmul %415, %416, %cst_136 {dimension_numbers = #tpu.dot_dimension_numbers<[1], [0], [0], [1], [0, 0, 1, 1], [], []>} : vector<2x128xbf16>, vector<128x512xbf16>, vector<2x512xf32> -> vector<2x512xf32>
    %418 = arith.addf %414, %417 : vector<2x512xf32>
    %419 = vector.extract_strided_slice %418 {offsets = [0, 0], sizes = [2, 128], strides = [1, 1]} : vector<2x512xf32> to vector<2x128xf32>
    %420 = arith.negf %419 : vector<2x128xf32>
    %421 = math.exp %420 : vector<2x128xf32>
    %cst_137 = arith.constant 1.000000e+00 : f32
    %422 = vector.broadcast %cst_137 : f32 to vector<2x128xf32>
    %423 = arith.addf %422, %421 : vector<2x128xf32>
    %424 = arith.divf %422, %423 : vector<2x128xf32>
    %425 = vector.extract_strided_slice %418 {offsets = [0, 128], sizes = [2, 128], strides = [1, 1]} : vector<2x512xf32> to vector<2x128xf32>
    %426 = arith.negf %425 : vector<2x128xf32>
    %427 = math.exp %426 : vector<2x128xf32>
    %cst_138 = arith.constant 1.000000e+00 : f32
    %428 = vector.broadcast %cst_138 : f32 to vector<2x128xf32>
    %429 = arith.addf %428, %427 : vector<2x128xf32>
    %430 = arith.divf %428, %429 : vector<2x128xf32>
    %431 = vector.extract_strided_slice %418 {offsets = [0, 256], sizes = [2, 128], strides = [1, 1]} : vector<2x512xf32> to vector<2x128xf32>
    %432 = math.tanh %431 : vector<2x128xf32>
    %433 = vector.extract_strided_slice %418 {offsets = [0, 384], sizes = [2, 128], strides = [1, 1]} : vector<2x512xf32> to vector<2x128xf32>
    %434 = arith.negf %433 : vector<2x128xf32>
    %435 = math.exp %434 : vector<2x128xf32>
    %cst_139 = arith.constant 1.000000e+00 : f32
    %436 = vector.broadcast %cst_139 : f32 to vector<2x128xf32>
    %437 = arith.addf %436, %435 : vector<2x128xf32>
    %438 = arith.divf %436, %437 : vector<2x128xf32>
    %439 = arith.mulf %430, %379 : vector<2x128xf32>
    %440 = arith.mulf %424, %432 : vector<2x128xf32>
    %441 = arith.addf %439, %440 : vector<2x128xf32>
    %442 = math.tanh %441 : vector<2x128xf32>
    %443 = arith.mulf %438, %442 : vector<2x128xf32>
    %c2_140 = arith.constant 2 : index
    %c128_141 = arith.constant 128 : index
    %444 = vector.load %arg24[%c2_140, %c128_141] : memref<16x256xf32, #tpu.memory_space<vmem>>, vector<2x128xf32>
    tpu.vector_store %arg24[%c2_140, %c128_141], %443 {strides = array<i32>} : memref<16x256xf32, #tpu.memory_space<vmem>>, vector<2x128xf32>,
    %c14_142 = arith.constant 14 : index
    %c0_143 = arith.constant 0 : index
    %445 = vector.load %arg23[%c14_142, %c0_143] : memref<16x1024xf32, #tpu.memory_space<vmem>>, vector<2x512xf32>
    %446 = arith.truncf %412 : vector<2x128xf32> to vector<2x128xbf16>
    %c0_144 = arith.constant 0 : index
    %c0_145 = arith.constant 0 : index
    %447 = vector.load %arg3[%c0_144, %c0_145] : memref<128x512xbf16, #tpu.memory_space<vmem>>, vector<128x512xbf16>
    %cst_146 = arith.constant dense<0.000000e+00> : vector<2x512xf32>
    %448 = tpu.matmul %446, %447, %cst_146 {dimension_numbers = #tpu.dot_dimension_numbers<[1], [0], [0], [1], [0, 0, 1, 1], [], []>} : vector<2x128xbf16>, vector<128x512xbf16>, vector<2x512xf32> -> vector<2x512xf32>
    %449 = arith.addf %445, %448 : vector<2x512xf32>
    %450 = vector.extract_strided_slice %449 {offsets = [0, 0], sizes = [2, 128], strides = [1, 1]} : vector<2x512xf32> to vector<2x128xf32>
    %451 = arith.negf %450 : vector<2x128xf32>
    %452 = math.exp %451 : vector<2x128xf32>
    %cst_147 = arith.constant 1.000000e+00 : f32
    %453 = vector.broadcast %cst_147 : f32 to vector<2x128xf32>
    %454 = arith.addf %453, %452 : vector<2x128xf32>
    %455 = arith.divf %453, %454 : vector<2x128xf32>
    %456 = vector.extract_strided_slice %449 {offsets = [0, 128], sizes = [2, 128], strides = [1, 1]} : vector<2x512xf32> to vector<2x128xf32>
    %457 = arith.negf %456 : vector<2x128xf32>
    %458 = math.exp %457 : vector<2x128xf32>
    %cst_148 = arith.constant 1.000000e+00 : f32
    %459 = vector.broadcast %cst_148 : f32 to vector<2x128xf32>
    %460 = arith.addf %459, %458 : vector<2x128xf32>
    %461 = arith.divf %459, %460 : vector<2x128xf32>
    %462 = vector.extract_strided_slice %449 {offsets = [0, 256], sizes = [2, 128], strides = [1, 1]} : vector<2x512xf32> to vector<2x128xf32>
    %463 = math.tanh %462 : vector<2x128xf32>
    %464 = vector.extract_strided_slice %449 {offsets = [0, 384], sizes = [2, 128], strides = [1, 1]} : vector<2x512xf32> to vector<2x128xf32>
    %465 = arith.negf %464 : vector<2x128xf32>
    %466 = math.exp %465 : vector<2x128xf32>
    %cst_149 = arith.constant 1.000000e+00 : f32
    %467 = vector.broadcast %cst_149 : f32 to vector<2x128xf32>
    %468 = arith.addf %467, %466 : vector<2x128xf32>
    %469 = arith.divf %467, %468 : vector<2x128xf32>
    %470 = arith.mulf %461, %410 : vector<2x128xf32>
    %471 = arith.mulf %455, %463 : vector<2x128xf32>
    %472 = arith.addf %470, %471 : vector<2x128xf32>
    %473 = math.tanh %472 : vector<2x128xf32>
    %474 = arith.mulf %469, %473 : vector<2x128xf32>
    %c14_150 = arith.constant 14 : index
    %c0_151 = arith.constant 0 : index
    %475 = vector.load %arg24[%c14_150, %c0_151] : memref<16x256xf32, #tpu.memory_space<vmem>>, vector<2x128xf32>
    tpu.vector_store %arg24[%c14_150, %c0_151], %474 {strides = array<i32>} : memref<16x256xf32, #tpu.memory_space<vmem>>, vector<2x128xf32>,
    %c0_152 = arith.constant 0 : index
    %c512_153 = arith.constant 512 : index
    %476 = vector.load %arg23[%c0_152, %c512_153] : memref<16x1024xf32, #tpu.memory_space<vmem>>, vector<2x512xf32>
    %477 = arith.truncf %443 : vector<2x128xf32> to vector<2x128xbf16>
    %c0_154 = arith.constant 0 : index
    %c0_155 = arith.constant 0 : index
    %478 = vector.load %arg4[%c0_154, %c0_155] : memref<128x512xbf16, #tpu.memory_space<vmem>>, vector<128x512xbf16>
    %cst_156 = arith.constant dense<0.000000e+00> : vector<2x512xf32>
    %479 = tpu.matmul %477, %478, %cst_156 {dimension_numbers = #tpu.dot_dimension_numbers<[1], [0], [0], [1], [0, 0, 1, 1], [], []>} : vector<2x128xbf16>, vector<128x512xbf16>, vector<2x512xf32> -> vector<2x512xf32>
    %480 = arith.addf %476, %479 : vector<2x512xf32>
    %481 = vector.extract_strided_slice %480 {offsets = [0, 0], sizes = [2, 128], strides = [1, 1]} : vector<2x512xf32> to vector<2x128xf32>
    %482 = arith.negf %481 : vector<2x128xf32>
    %483 = math.exp %482 : vector<2x128xf32>
    %cst_157 = arith.constant 1.000000e+00 : f32
    %484 = vector.broadcast %cst_157 : f32 to vector<2x128xf32>
    %485 = arith.addf %484, %483 : vector<2x128xf32>
    %486 = arith.divf %484, %485 : vector<2x128xf32>
    %487 = vector.extract_strided_slice %480 {offsets = [0, 128], sizes = [2, 128], strides = [1, 1]} : vector<2x512xf32> to vector<2x128xf32>
    %488 = arith.negf %487 : vector<2x128xf32>
    %489 = math.exp %488 : vector<2x128xf32>
    %cst_158 = arith.constant 1.000000e+00 : f32
    %490 = vector.broadcast %cst_158 : f32 to vector<2x128xf32>
    %491 = arith.addf %490, %489 : vector<2x128xf32>
    %492 = arith.divf %490, %491 : vector<2x128xf32>
    %493 = vector.extract_strided_slice %480 {offsets = [0, 256], sizes = [2, 128], strides = [1, 1]} : vector<2x512xf32> to vector<2x128xf32>
    %494 = math.tanh %493 : vector<2x128xf32>
    %495 = vector.extract_strided_slice %480 {offsets = [0, 384], sizes = [2, 128], strides = [1, 1]} : vector<2x512xf32> to vector<2x128xf32>
    %496 = arith.negf %495 : vector<2x128xf32>
    %497 = math.exp %496 : vector<2x128xf32>
    %cst_159 = arith.constant 1.000000e+00 : f32
    %498 = vector.broadcast %cst_159 : f32 to vector<2x128xf32>
    %499 = arith.addf %498, %497 : vector<2x128xf32>
    %500 = arith.divf %498, %499 : vector<2x128xf32>
    %501 = arith.mulf %492, %441 : vector<2x128xf32>
    %502 = arith.mulf %486, %494 : vector<2x128xf32>
    %503 = arith.addf %501, %502 : vector<2x128xf32>
    %504 = math.tanh %503 : vector<2x128xf32>
    %505 = arith.mulf %500, %504 : vector<2x128xf32>
    %c0_160 = arith.constant 0 : index
    %c128_161 = arith.constant 128 : index
    %506 = vector.load %arg24[%c0_160, %c128_161] : memref<16x256xf32, #tpu.memory_space<vmem>>, vector<2x128xf32>
    tpu.vector_store %arg24[%c0_160, %c128_161], %505 {strides = array<i32>} : memref<16x256xf32, #tpu.memory_space<vmem>>, vector<2x128xf32>,
    %c0_162 = arith.constant 0 : index
    %c0_163 = arith.constant 0 : index
    %507 = vector.load %arg21[%c0_162, %c0_163] : memref<8x128xf32, #tpu.memory_space<vmem>>, vector<2x128xf32>
    tpu.vector_store %arg21[%c0_162, %c0_163], %474 {strides = array<i32>} : memref<8x128xf32, #tpu.memory_space<vmem>>, vector<2x128xf32>,
    %c2_164 = arith.constant 2 : index
    %c0_165 = arith.constant 0 : index
    %508 = vector.load %arg21[%c2_164, %c0_165] : memref<8x128xf32, #tpu.memory_space<vmem>>, vector<2x128xf32>
    tpu.vector_store %arg21[%c2_164, %c0_165], %505 {strides = array<i32>} : memref<8x128xf32, #tpu.memory_space<vmem>>, vector<2x128xf32>,
    %c0_166 = arith.constant 0 : index
    %c0_167 = arith.constant 0 : index
    %509 = vector.load %arg22[%c0_166, %c0_167] : memref<8x128xf32, #tpu.memory_space<vmem>>, vector<2x128xf32>
    tpu.vector_store %arg22[%c0_166, %c0_167], %472 {strides = array<i32>} : memref<8x128xf32, #tpu.memory_space<vmem>>, vector<2x128xf32>,
    %c2_168 = arith.constant 2 : index
    %c0_169 = arith.constant 0 : index
    %510 = vector.load %arg22[%c2_168, %c0_169] : memref<8x128xf32, #tpu.memory_space<vmem>>, vector<2x128xf32>
    tpu.vector_store %arg22[%c2_168, %c0_169], %503 {strides = array<i32>} : memref<8x128xf32, #tpu.memory_space<vmem>>, vector<2x128xf32>,
    %c0_170 = arith.constant 0 : index
    %c0_171 = arith.constant 0 : index
    %511 = vector.load %arg24[%c0_170, %c0_171] : memref<16x256xf32, #tpu.memory_space<vmem>>, vector<16x256xf32>
    %512 = arith.truncf %511 : vector<16x256xf32> to vector<16x256xbf16>
    %c0_172 = arith.constant 0 : index
    %c0_173 = arith.constant 0 : index
    %513 = vector.load %arg6[%c0_172, %c0_173] : memref<256x1024xbf16, #tpu.memory_space<vmem>>, vector<256x1024xbf16>
    %cst_174 = arith.constant dense<0.000000e+00> : vector<16x1024xf32>
    %514 = tpu.matmul %512, %513, %cst_174 {dimension_numbers = #tpu.dot_dimension_numbers<[1], [0], [0], [1], [0, 0, 1, 1], [], []>} : vector<16x256xbf16>, vector<256x1024xbf16>, vector<16x1024xf32> -> vector<16x1024xf32>
    %c0_175 = arith.constant 0 : index
    %c0_176 = arith.constant 0 : index
    %515 = vector.load %arg9[%c0_175, %c0_176] : memref<1x1024xf32, #tpu.memory_space<vmem>>, vector<1x1024xf32>
    %516 = vector.broadcast %515 : vector<1x1024xf32> to vector<16x1024xf32>
    %517 = arith.addf %514, %516 : vector<16x1024xf32>
    %c0_177 = arith.constant 0 : index
    %c0_178 = arith.constant 0 : index
    %518 = vector.load %arg23[%c0_177, %c0_178] : memref<16x1024xf32, #tpu.memory_space<vmem>>, vector<16x1024xf32>
    tpu.vector_store %arg23[%c0_177, %c0_178], %517 {strides = array<i32>} : memref<16x1024xf32, #tpu.memory_space<vmem>>, vector<16x1024xf32>,
    %cst_179 = arith.constant 0.000000e+00 : f32
    %519 = vector.broadcast %cst_179 : f32 to vector<2x128xf32>
    %cst_180 = arith.constant 0.000000e+00 : f32
    %520 = vector.broadcast %cst_180 : f32 to vector<2x128xf32>
    %cst_181 = arith.constant 0.000000e+00 : f32
    %521 = vector.broadcast %cst_181 : f32 to vector<2x128xf32>
    %cst_182 = arith.constant 0.000000e+00 : f32
    %522 = vector.broadcast %cst_182 : f32 to vector<2x128xf32>
    %c0_183 = arith.constant 0 : index
    %c0_184 = arith.constant 0 : index
    %523 = vector.load %arg23[%c0_183, %c0_184] : memref<16x1024xf32, #tpu.memory_space<vmem>>, vector<2x512xf32>
    %524 = arith.truncf %519 : vector<2x128xf32> to vector<2x128xbf16>
    %c0_185 = arith.constant 0 : index
    %c0_186 = arith.constant 0 : index
    %525 = vector.load %arg7[%c0_185, %c0_186] : memref<128x512xbf16, #tpu.memory_space<vmem>>, vector<128x512xbf16>
    %cst_187 = arith.constant dense<0.000000e+00> : vector<2x512xf32>
    %526 = tpu.matmul %524, %525, %cst_187 {dimension_numbers = #tpu.dot_dimension_numbers<[1], [0], [0], [1], [0, 0, 1, 1], [], []>} : vector<2x128xbf16>, vector<128x512xbf16>, vector<2x512xf32> -> vector<2x512xf32>
    %527 = arith.addf %523, %526 : vector<2x512xf32>
    %528 = vector.extract_strided_slice %527 {offsets = [0, 0], sizes = [2, 128], strides = [1, 1]} : vector<2x512xf32> to vector<2x128xf32>
    %529 = arith.negf %528 : vector<2x128xf32>
    %530 = math.exp %529 : vector<2x128xf32>
    %cst_188 = arith.constant 1.000000e+00 : f32
    %531 = vector.broadcast %cst_188 : f32 to vector<2x128xf32>
    %532 = arith.addf %531, %530 : vector<2x128xf32>
    %533 = arith.divf %531, %532 : vector<2x128xf32>
    %534 = vector.extract_strided_slice %527 {offsets = [0, 128], sizes = [2, 128], strides = [1, 1]} : vector<2x512xf32> to vector<2x128xf32>
    %535 = arith.negf %534 : vector<2x128xf32>
    %536 = math.exp %535 : vector<2x128xf32>
    %cst_189 = arith.constant 1.000000e+00 : f32
    %537 = vector.broadcast %cst_189 : f32 to vector<2x128xf32>
    %538 = arith.addf %537, %536 : vector<2x128xf32>
    %539 = arith.divf %537, %538 : vector<2x128xf32>
    %540 = vector.extract_strided_slice %527 {offsets = [0, 256], sizes = [2, 128], strides = [1, 1]} : vector<2x512xf32> to vector<2x128xf32>
    %541 = math.tanh %540 : vector<2x128xf32>
    %542 = vector.extract_strided_slice %527 {offsets = [0, 384], sizes = [2, 128], strides = [1, 1]} : vector<2x512xf32> to vector<2x128xf32>
    %543 = arith.negf %542 : vector<2x128xf32>
    %544 = math.exp %543 : vector<2x128xf32>
    %cst_190 = arith.constant 1.000000e+00 : f32
    %545 = vector.broadcast %cst_190 : f32 to vector<2x128xf32>
    %546 = arith.addf %545, %544 : vector<2x128xf32>
    %547 = arith.divf %545, %546 : vector<2x128xf32>
    %548 = arith.mulf %539, %520 : vector<2x128xf32>
    %549 = arith.mulf %533, %541 : vector<2x128xf32>
    %550 = arith.addf %548, %549 : vector<2x128xf32>
    %551 = math.tanh %550 : vector<2x128xf32>
    %552 = arith.mulf %547, %551 : vector<2x128xf32>
    %c0_191 = arith.constant 0 : index
    %c0_192 = arith.constant 0 : index
    %553 = vector.load %arg24[%c0_191, %c0_192] : memref<16x256xf32, #tpu.memory_space<vmem>>, vector<2x128xf32>
    tpu.vector_store %arg24[%c0_191, %c0_192], %552 {strides = array<i32>} : memref<16x256xf32, #tpu.memory_space<vmem>>, vector<2x128xf32>,
    %c14_193 = arith.constant 14 : index
    %c512_194 = arith.constant 512 : index
    %554 = vector.load %arg23[%c14_193, %c512_194] : memref<16x1024xf32, #tpu.memory_space<vmem>>, vector<2x512xf32>
    %555 = arith.truncf %521 : vector<2x128xf32> to vector<2x128xbf16>
    %c0_195 = arith.constant 0 : index
    %c0_196 = arith.constant 0 : index
    %556 = vector.load %arg8[%c0_195, %c0_196] : memref<128x512xbf16, #tpu.memory_space<vmem>>, vector<128x512xbf16>
    %cst_197 = arith.constant dense<0.000000e+00> : vector<2x512xf32>
    %557 = tpu.matmul %555, %556, %cst_197 {dimension_numbers = #tpu.dot_dimension_numbers<[1], [0], [0], [1], [0, 0, 1, 1], [], []>} : vector<2x128xbf16>, vector<128x512xbf16>, vector<2x512xf32> -> vector<2x512xf32>
    %558 = arith.addf %554, %557 : vector<2x512xf32>
    %559 = vector.extract_strided_slice %558 {offsets = [0, 0], sizes = [2, 128], strides = [1, 1]} : vector<2x512xf32> to vector<2x128xf32>
    %560 = arith.negf %559 : vector<2x128xf32>
    %561 = math.exp %560 : vector<2x128xf32>
    %cst_198 = arith.constant 1.000000e+00 : f32
    %562 = vector.broadcast %cst_198 : f32 to vector<2x128xf32>
    %563 = arith.addf %562, %561 : vector<2x128xf32>
    %564 = arith.divf %562, %563 : vector<2x128xf32>
    %565 = vector.extract_strided_slice %558 {offsets = [0, 128], sizes = [2, 128], strides = [1, 1]} : vector<2x512xf32> to vector<2x128xf32>
    %566 = arith.negf %565 : vector<2x128xf32>
    %567 = math.exp %566 : vector<2x128xf32>
    %cst_199 = arith.constant 1.000000e+00 : f32
    %568 = vector.broadcast %cst_199 : f32 to vector<2x128xf32>
    %569 = arith.addf %568, %567 : vector<2x128xf32>
    %570 = arith.divf %568, %569 : vector<2x128xf32>
    %571 = vector.extract_strided_slice %558 {offsets = [0, 256], sizes = [2, 128], strides = [1, 1]} : vector<2x512xf32> to vector<2x128xf32>
    %572 = math.tanh %571 : vector<2x128xf32>
    %573 = vector.extract_strided_slice %558 {offsets = [0, 384], sizes = [2, 128], strides = [1, 1]} : vector<2x512xf32> to vector<2x128xf32>
    %574 = arith.negf %573 : vector<2x128xf32>
    %575 = math.exp %574 : vector<2x128xf32>
    %cst_200 = arith.constant 1.000000e+00 : f32
    %576 = vector.broadcast %cst_200 : f32 to vector<2x128xf32>
    %577 = arith.addf %576, %575 : vector<2x128xf32>
    %578 = arith.divf %576, %577 : vector<2x128xf32>
    %579 = arith.mulf %570, %522 : vector<2x128xf32>
    %580 = arith.mulf %564, %572 : vector<2x128xf32>
    %581 = arith.addf %579, %580 : vector<2x128xf32>
    %582 = math.tanh %581 : vector<2x128xf32>
    %583 = arith.mulf %578, %582 : vector<2x128xf32>
    %c14_201 = arith.constant 14 : index
    %c128_202 = arith.constant 128 : index
    %584 = vector.load %arg24[%c14_201, %c128_202] : memref<16x256xf32, #tpu.memory_space<vmem>>, vector<2x128xf32>
    tpu.vector_store %arg24[%c14_201, %c128_202], %583 {strides = array<i32>} : memref<16x256xf32, #tpu.memory_space<vmem>>, vector<2x128xf32>,
    %c2_203 = arith.constant 2 : index
    %c0_204 = arith.constant 0 : index
    %585 = vector.load %arg23[%c2_203, %c0_204] : memref<16x1024xf32, #tpu.memory_space<vmem>>, vector<2x512xf32>
    %586 = arith.truncf %552 : vector<2x128xf32> to vector<2x128xbf16>
    %c0_205 = arith.constant 0 : index
    %c0_206 = arith.constant 0 : index
    %587 = vector.load %arg7[%c0_205, %c0_206] : memref<128x512xbf16, #tpu.memory_space<vmem>>, vector<128x512xbf16>
    %cst_207 = arith.constant dense<0.000000e+00> : vector<2x512xf32>
    %588 = tpu.matmul %586, %587, %cst_207 {dimension_numbers = #tpu.dot_dimension_numbers<[1], [0], [0], [1], [0, 0, 1, 1], [], []>} : vector<2x128xbf16>, vector<128x512xbf16>, vector<2x512xf32> -> vector<2x512xf32>
    %589 = arith.addf %585, %588 : vector<2x512xf32>
    %590 = vector.extract_strided_slice %589 {offsets = [0, 0], sizes = [2, 128], strides = [1, 1]} : vector<2x512xf32> to vector<2x128xf32>
    %591 = arith.negf %590 : vector<2x128xf32>
    %592 = math.exp %591 : vector<2x128xf32>
    %cst_208 = arith.constant 1.000000e+00 : f32
    %593 = vector.broadcast %cst_208 : f32 to vector<2x128xf32>
    %594 = arith.addf %593, %592 : vector<2x128xf32>
    %595 = arith.divf %593, %594 : vector<2x128xf32>
    %596 = vector.extract_strided_slice %589 {offsets = [0, 128], sizes = [2, 128], strides = [1, 1]} : vector<2x512xf32> to vector<2x128xf32>
    %597 = arith.negf %596 : vector<2x128xf32>
    %598 = math.exp %597 : vector<2x128xf32>
    %cst_209 = arith.constant 1.000000e+00 : f32
    %599 = vector.broadcast %cst_209 : f32 to vector<2x128xf32>
    %600 = arith.addf %599, %598 : vector<2x128xf32>
    %601 = arith.divf %599, %600 : vector<2x128xf32>
    %602 = vector.extract_strided_slice %589 {offsets = [0, 256], sizes = [2, 128], strides = [1, 1]} : vector<2x512xf32> to vector<2x128xf32>
    %603 = math.tanh %602 : vector<2x128xf32>
    %604 = vector.extract_strided_slice %589 {offsets = [0, 384], sizes = [2, 128], strides = [1, 1]} : vector<2x512xf32> to vector<2x128xf32>
    %605 = arith.negf %604 : vector<2x128xf32>
    %606 = math.exp %605 : vector<2x128xf32>
    %cst_210 = arith.constant 1.000000e+00 : f32
    %607 = vector.broadcast %cst_210 : f32 to vector<2x128xf32>
    %608 = arith.addf %607, %606 : vector<2x128xf32>
    %609 = arith.divf %607, %608 : vector<2x128xf32>
    %610 = arith.mulf %601, %550 : vector<2x128xf32>
    %611 = arith.mulf %595, %603 : vector<2x128xf32>
    %612 = arith.addf %610, %611 : vector<2x128xf32>
    %613 = math.tanh %612 : vector<2x128xf32>
    %614 = arith.mulf %609, %613 : vector<2x128xf32>
    %c2_211 = arith.constant 2 : index
    %c0_212 = arith.constant 0 : index
    %615 = vector.load %arg24[%c2_211, %c0_212] : memref<16x256xf32, #tpu.memory_space<vmem>>, vector<2x128xf32>
    tpu.vector_store %arg24[%c2_211, %c0_212], %614 {strides = array<i32>} : memref<16x256xf32, #tpu.memory_space<vmem>>, vector<2x128xf32>,
    %c12_213 = arith.constant 12 : index
    %c512_214 = arith.constant 512 : index
    %616 = vector.load %arg23[%c12_213, %c512_214] : memref<16x1024xf32, #tpu.memory_space<vmem>>, vector<2x512xf32>
    %617 = arith.truncf %583 : vector<2x128xf32> to vector<2x128xbf16>
    %c0_215 = arith.constant 0 : index
    %c0_216 = arith.constant 0 : index
    %618 = vector.load %arg8[%c0_215, %c0_216] : memref<128x512xbf16, #tpu.memory_space<vmem>>, vector<128x512xbf16>
    %cst_217 = arith.constant dense<0.000000e+00> : vector<2x512xf32>
    %619 = tpu.matmul %617, %618, %cst_217 {dimension_numbers = #tpu.dot_dimension_numbers<[1], [0], [0], [1], [0, 0, 1, 1], [], []>} : vector<2x128xbf16>, vector<128x512xbf16>, vector<2x512xf32> -> vector<2x512xf32>
    %620 = arith.addf %616, %619 : vector<2x512xf32>
    %621 = vector.extract_strided_slice %620 {offsets = [0, 0], sizes = [2, 128], strides = [1, 1]} : vector<2x512xf32> to vector<2x128xf32>
    %622 = arith.negf %621 : vector<2x128xf32>
    %623 = math.exp %622 : vector<2x128xf32>
    %cst_218 = arith.constant 1.000000e+00 : f32
    %624 = vector.broadcast %cst_218 : f32 to vector<2x128xf32>
    %625 = arith.addf %624, %623 : vector<2x128xf32>
    %626 = arith.divf %624, %625 : vector<2x128xf32>
    %627 = vector.extract_strided_slice %620 {offsets = [0, 128], sizes = [2, 128], strides = [1, 1]} : vector<2x512xf32> to vector<2x128xf32>
    %628 = arith.negf %627 : vector<2x128xf32>
    %629 = math.exp %628 : vector<2x128xf32>
    %cst_219 = arith.constant 1.000000e+00 : f32
    %630 = vector.broadcast %cst_219 : f32 to vector<2x128xf32>
    %631 = arith.addf %630, %629 : vector<2x128xf32>
    %632 = arith.divf %630, %631 : vector<2x128xf32>
    %633 = vector.extract_strided_slice %620 {offsets = [0, 256], sizes = [2, 128], strides = [1, 1]} : vector<2x512xf32> to vector<2x128xf32>
    %634 = math.tanh %633 : vector<2x128xf32>
    %635 = vector.extract_strided_slice %620 {offsets = [0, 384], sizes = [2, 128], strides = [1, 1]} : vector<2x512xf32> to vector<2x128xf32>
    %636 = arith.negf %635 : vector<2x128xf32>
    %637 = math.exp %636 : vector<2x128xf32>
    %cst_220 = arith.constant 1.000000e+00 : f32
    %638 = vector.broadcast %cst_220 : f32 to vector<2x128xf32>
    %639 = arith.addf %638, %637 : vector<2x128xf32>
    %640 = arith.divf %638, %639 : vector<2x128xf32>
    %641 = arith.mulf %632, %581 : vector<2x128xf32>
    %642 = arith.mulf %626, %634 : vector<2x128xf32>
    %643 = arith.addf %641, %642 : vector<2x128xf32>
    %644 = math.tanh %643 : vector<2x128xf32>
    %645 = arith.mulf %640, %644 : vector<2x128xf32>
    %c12_221 = arith.constant 12 : index
    %c128_222 = arith.constant 128 : index
    %646 = vector.load %arg24[%c12_221, %c128_222] : memref<16x256xf32, #tpu.memory_space<vmem>>, vector<2x128xf32>
    tpu.vector_store %arg24[%c12_221, %c128_222], %645 {strides = array<i32>} : memref<16x256xf32, #tpu.memory_space<vmem>>, vector<2x128xf32>,
    %c4_223 = arith.constant 4 : index
    %c0_224 = arith.constant 0 : index
    %647 = vector.load %arg23[%c4_223, %c0_224] : memref<16x1024xf32, #tpu.memory_space<vmem>>, vector<2x512xf32>
    %648 = arith.truncf %614 : vector<2x128xf32> to vector<2x128xbf16>
    %c0_225 = arith.constant 0 : index
    %c0_226 = arith.constant 0 : index
    %649 = vector.load %arg7[%c0_225, %c0_226] : memref<128x512xbf16, #tpu.memory_space<vmem>>, vector<128x512xbf16>
    %cst_227 = arith.constant dense<0.000000e+00> : vector<2x512xf32>
    %650 = tpu.matmul %648, %649, %cst_227 {dimension_numbers = #tpu.dot_dimension_numbers<[1], [0], [0], [1], [0, 0, 1, 1], [], []>} : vector<2x128xbf16>, vector<128x512xbf16>, vector<2x512xf32> -> vector<2x512xf32>
    %651 = arith.addf %647, %650 : vector<2x512xf32>
    %652 = vector.extract_strided_slice %651 {offsets = [0, 0], sizes = [2, 128], strides = [1, 1]} : vector<2x512xf32> to vector<2x128xf32>
    %653 = arith.negf %652 : vector<2x128xf32>
    %654 = math.exp %653 : vector<2x128xf32>
    %cst_228 = arith.constant 1.000000e+00 : f32
    %655 = vector.broadcast %cst_228 : f32 to vector<2x128xf32>
    %656 = arith.addf %655, %654 : vector<2x128xf32>
    %657 = arith.divf %655, %656 : vector<2x128xf32>
    %658 = vector.extract_strided_slice %651 {offsets = [0, 128], sizes = [2, 128], strides = [1, 1]} : vector<2x512xf32> to vector<2x128xf32>
    %659 = arith.negf %658 : vector<2x128xf32>
    %660 = math.exp %659 : vector<2x128xf32>
    %cst_229 = arith.constant 1.000000e+00 : f32
    %661 = vector.broadcast %cst_229 : f32 to vector<2x128xf32>
    %662 = arith.addf %661, %660 : vector<2x128xf32>
    %663 = arith.divf %661, %662 : vector<2x128xf32>
    %664 = vector.extract_strided_slice %651 {offsets = [0, 256], sizes = [2, 128], strides = [1, 1]} : vector<2x512xf32> to vector<2x128xf32>
    %665 = math.tanh %664 : vector<2x128xf32>
    %666 = vector.extract_strided_slice %651 {offsets = [0, 384], sizes = [2, 128], strides = [1, 1]} : vector<2x512xf32> to vector<2x128xf32>
    %667 = arith.negf %666 : vector<2x128xf32>
    %668 = math.exp %667 : vector<2x128xf32>
    %cst_230 = arith.constant 1.000000e+00 : f32
    %669 = vector.broadcast %cst_230 : f32 to vector<2x128xf32>
    %670 = arith.addf %669, %668 : vector<2x128xf32>
    %671 = arith.divf %669, %670 : vector<2x128xf32>
    %672 = arith.mulf %663, %612 : vector<2x128xf32>
    %673 = arith.mulf %657, %665 : vector<2x128xf32>
    %674 = arith.addf %672, %673 : vector<2x128xf32>
    %675 = math.tanh %674 : vector<2x128xf32>
    %676 = arith.mulf %671, %675 : vector<2x128xf32>
    %c4_231 = arith.constant 4 : index
    %c0_232 = arith.constant 0 : index
    %677 = vector.load %arg24[%c4_231, %c0_232] : memref<16x256xf32, #tpu.memory_space<vmem>>, vector<2x128xf32>
    tpu.vector_store %arg24[%c4_231, %c0_232], %676 {strides = array<i32>} : memref<16x256xf32, #tpu.memory_space<vmem>>, vector<2x128xf32>,
    %c10_233 = arith.constant 10 : index
    %c512_234 = arith.constant 512 : index
    %678 = vector.load %arg23[%c10_233, %c512_234] : memref<16x1024xf32, #tpu.memory_space<vmem>>, vector<2x512xf32>
    %679 = arith.truncf %645 : vector<2x128xf32> to vector<2x128xbf16>
    %c0_235 = arith.constant 0 : index
    %c0_236 = arith.constant 0 : index
    %680 = vector.load %arg8[%c0_235, %c0_236] : memref<128x512xbf16, #tpu.memory_space<vmem>>, vector<128x512xbf16>
    %cst_237 = arith.constant dense<0.000000e+00> : vector<2x512xf32>
    %681 = tpu.matmul %679, %680, %cst_237 {dimension_numbers = #tpu.dot_dimension_numbers<[1], [0], [0], [1], [0, 0, 1, 1], [], []>} : vector<2x128xbf16>, vector<128x512xbf16>, vector<2x512xf32> -> vector<2x512xf32>
    %682 = arith.addf %678, %681 : vector<2x512xf32>
    %683 = vector.extract_strided_slice %682 {offsets = [0, 0], sizes = [2, 128], strides = [1, 1]} : vector<2x512xf32> to vector<2x128xf32>
    %684 = arith.negf %683 : vector<2x128xf32>
    %685 = math.exp %684 : vector<2x128xf32>
    %cst_238 = arith.constant 1.000000e+00 : f32
    %686 = vector.broadcast %cst_238 : f32 to vector<2x128xf32>
    %687 = arith.addf %686, %685 : vector<2x128xf32>
    %688 = arith.divf %686, %687 : vector<2x128xf32>
    %689 = vector.extract_strided_slice %682 {offsets = [0, 128], sizes = [2, 128], strides = [1, 1]} : vector<2x512xf32> to vector<2x128xf32>
    %690 = arith.negf %689 : vector<2x128xf32>
    %691 = math.exp %690 : vector<2x128xf32>
    %cst_239 = arith.constant 1.000000e+00 : f32
    %692 = vector.broadcast %cst_239 : f32 to vector<2x128xf32>
    %693 = arith.addf %692, %691 : vector<2x128xf32>
    %694 = arith.divf %692, %693 : vector<2x128xf32>
    %695 = vector.extract_strided_slice %682 {offsets = [0, 256], sizes = [2, 128], strides = [1, 1]} : vector<2x512xf32> to vector<2x128xf32>
    %696 = math.tanh %695 : vector<2x128xf32>
    %697 = vector.extract_strided_slice %682 {offsets = [0, 384], sizes = [2, 128], strides = [1, 1]} : vector<2x512xf32> to vector<2x128xf32>
    %698 = arith.negf %697 : vector<2x128xf32>
    %699 = math.exp %698 : vector<2x128xf32>
    %cst_240 = arith.constant 1.000000e+00 : f32
    %700 = vector.broadcast %cst_240 : f32 to vector<2x128xf32>
    %701 = arith.addf %700, %699 : vector<2x128xf32>
    %702 = arith.divf %700, %701 : vector<2x128xf32>
    %703 = arith.mulf %694, %643 : vector<2x128xf32>
    %704 = arith.mulf %688, %696 : vector<2x128xf32>
    %705 = arith.addf %703, %704 : vector<2x128xf32>
    %706 = math.tanh %705 : vector<2x128xf32>
    %707 = arith.mulf %702, %706 : vector<2x128xf32>
    %c10_241 = arith.constant 10 : index
    %c128_242 = arith.constant 128 : index
    %708 = vector.load %arg24[%c10_241, %c128_242] : memref<16x256xf32, #tpu.memory_space<vmem>>, vector<2x128xf32>
    tpu.vector_store %arg24[%c10_241, %c128_242], %707 {strides = array<i32>} : memref<16x256xf32, #tpu.memory_space<vmem>>, vector<2x128xf32>,
    %c6_243 = arith.constant 6 : index
    %c0_244 = arith.constant 0 : index
    %709 = vector.load %arg23[%c6_243, %c0_244] : memref<16x1024xf32, #tpu.memory_space<vmem>>, vector<2x512xf32>
    %710 = arith.truncf %676 : vector<2x128xf32> to vector<2x128xbf16>
    %c0_245 = arith.constant 0 : index
    %c0_246 = arith.constant 0 : index
    %711 = vector.load %arg7[%c0_245, %c0_246] : memref<128x512xbf16, #tpu.memory_space<vmem>>, vector<128x512xbf16>
    %cst_247 = arith.constant dense<0.000000e+00> : vector<2x512xf32>
    %712 = tpu.matmul %710, %711, %cst_247 {dimension_numbers = #tpu.dot_dimension_numbers<[1], [0], [0], [1], [0, 0, 1, 1], [], []>} : vector<2x128xbf16>, vector<128x512xbf16>, vector<2x512xf32> -> vector<2x512xf32>
    %713 = arith.addf %709, %712 : vector<2x512xf32>
    %714 = vector.extract_strided_slice %713 {offsets = [0, 0], sizes = [2, 128], strides = [1, 1]} : vector<2x512xf32> to vector<2x128xf32>
    %715 = arith.negf %714 : vector<2x128xf32>
    %716 = math.exp %715 : vector<2x128xf32>
    %cst_248 = arith.constant 1.000000e+00 : f32
    %717 = vector.broadcast %cst_248 : f32 to vector<2x128xf32>
    %718 = arith.addf %717, %716 : vector<2x128xf32>
    %719 = arith.divf %717, %718 : vector<2x128xf32>
    %720 = vector.extract_strided_slice %713 {offsets = [0, 128], sizes = [2, 128], strides = [1, 1]} : vector<2x512xf32> to vector<2x128xf32>
    %721 = arith.negf %720 : vector<2x128xf32>
    %722 = math.exp %721 : vector<2x128xf32>
    %cst_249 = arith.constant 1.000000e+00 : f32
    %723 = vector.broadcast %cst_249 : f32 to vector<2x128xf32>
    %724 = arith.addf %723, %722 : vector<2x128xf32>
    %725 = arith.divf %723, %724 : vector<2x128xf32>
    %726 = vector.extract_strided_slice %713 {offsets = [0, 256], sizes = [2, 128], strides = [1, 1]} : vector<2x512xf32> to vector<2x128xf32>
    %727 = math.tanh %726 : vector<2x128xf32>
    %728 = vector.extract_strided_slice %713 {offsets = [0, 384], sizes = [2, 128], strides = [1, 1]} : vector<2x512xf32> to vector<2x128xf32>
    %729 = arith.negf %728 : vector<2x128xf32>
    %730 = math.exp %729 : vector<2x128xf32>
    %cst_250 = arith.constant 1.000000e+00 : f32
    %731 = vector.broadcast %cst_250 : f32 to vector<2x128xf32>
    %732 = arith.addf %731, %730 : vector<2x128xf32>
    %733 = arith.divf %731, %732 : vector<2x128xf32>
    %734 = arith.mulf %725, %674 : vector<2x128xf32>
    %735 = arith.mulf %719, %727 : vector<2x128xf32>
    %736 = arith.addf %734, %735 : vector<2x128xf32>
    %737 = math.tanh %736 : vector<2x128xf32>
    %738 = arith.mulf %733, %737 : vector<2x128xf32>
    %c6_251 = arith.constant 6 : index
    %c0_252 = arith.constant 0 : index
    %739 = vector.load %arg24[%c6_251, %c0_252] : memref<16x256xf32, #tpu.memory_space<vmem>>, vector<2x128xf32>
    tpu.vector_store %arg24[%c6_251, %c0_252], %738 {strides = array<i32>} : memref<16x256xf32, #tpu.memory_space<vmem>>, vector<2x128xf32>,
    %c8_253 = arith.constant 8 : index
    %c512_254 = arith.constant 512 : index
    %740 = vector.load %arg23[%c8_253, %c512_254] : memref<16x1024xf32, #tpu.memory_space<vmem>>, vector<2x512xf32>
    %741 = arith.truncf %707 : vector<2x128xf32> to vector<2x128xbf16>
    %c0_255 = arith.constant 0 : index
    %c0_256 = arith.constant 0 : index
    %742 = vector.load %arg8[%c0_255, %c0_256] : memref<128x512xbf16, #tpu.memory_space<vmem>>, vector<128x512xbf16>
    %cst_257 = arith.constant dense<0.000000e+00> : vector<2x512xf32>
    %743 = tpu.matmul %741, %742, %cst_257 {dimension_numbers = #tpu.dot_dimension_numbers<[1], [0], [0], [1], [0, 0, 1, 1], [], []>} : vector<2x128xbf16>, vector<128x512xbf16>, vector<2x512xf32> -> vector<2x512xf32>
    %744 = arith.addf %740, %743 : vector<2x512xf32>
    %745 = vector.extract_strided_slice %744 {offsets = [0, 0], sizes = [2, 128], strides = [1, 1]} : vector<2x512xf32> to vector<2x128xf32>
    %746 = arith.negf %745 : vector<2x128xf32>
    %747 = math.exp %746 : vector<2x128xf32>
    %cst_258 = arith.constant 1.000000e+00 : f32
    %748 = vector.broadcast %cst_258 : f32 to vector<2x128xf32>
    %749 = arith.addf %748, %747 : vector<2x128xf32>
    %750 = arith.divf %748, %749 : vector<2x128xf32>
    %751 = vector.extract_strided_slice %744 {offsets = [0, 128], sizes = [2, 128], strides = [1, 1]} : vector<2x512xf32> to vector<2x128xf32>
    %752 = arith.negf %751 : vector<2x128xf32>
    %753 = math.exp %752 : vector<2x128xf32>
    %cst_259 = arith.constant 1.000000e+00 : f32
    %754 = vector.broadcast %cst_259 : f32 to vector<2x128xf32>
    %755 = arith.addf %754, %753 : vector<2x128xf32>
    %756 = arith.divf %754, %755 : vector<2x128xf32>
    %757 = vector.extract_strided_slice %744 {offsets = [0, 256], sizes = [2, 128], strides = [1, 1]} : vector<2x512xf32> to vector<2x128xf32>
    %758 = math.tanh %757 : vector<2x128xf32>
    %759 = vector.extract_strided_slice %744 {offsets = [0, 384], sizes = [2, 128], strides = [1, 1]} : vector<2x512xf32> to vector<2x128xf32>
    %760 = arith.negf %759 : vector<2x128xf32>
    %761 = math.exp %760 : vector<2x128xf32>
    %cst_260 = arith.constant 1.000000e+00 : f32
    %762 = vector.broadcast %cst_260 : f32 to vector<2x128xf32>
    %763 = arith.addf %762, %761 : vector<2x128xf32>
    %764 = arith.divf %762, %763 : vector<2x128xf32>
    %765 = arith.mulf %756, %705 : vector<2x128xf32>
    %766 = arith.mulf %750, %758 : vector<2x128xf32>
    %767 = arith.addf %765, %766 : vector<2x128xf32>
    %768 = math.tanh %767 : vector<2x128xf32>
    %769 = arith.mulf %764, %768 : vector<2x128xf32>
    %c8_261 = arith.constant 8 : index
    %c128_262 = arith.constant 128 : index
    %770 = vector.load %arg24[%c8_261, %c128_262] : memref<16x256xf32, #tpu.memory_space<vmem>>, vector<2x128xf32>
    tpu.vector_store %arg24[%c8_261, %c128_262], %769 {strides = array<i32>} : memref<16x256xf32, #tpu.memory_space<vmem>>, vector<2x128xf32>,
    %c8_263 = arith.constant 8 : index
    %c0_264 = arith.constant 0 : index
    %771 = vector.load %arg23[%c8_263, %c0_264] : memref<16x1024xf32, #tpu.memory_space<vmem>>, vector<2x512xf32>
    %772 = arith.truncf %738 : vector<2x128xf32> to vector<2x128xbf16>
    %c0_265 = arith.constant 0 : index
    %c0_266 = arith.constant 0 : index
    %773 = vector.load %arg7[%c0_265, %c0_266] : memref<128x512xbf16, #tpu.memory_space<vmem>>, vector<128x512xbf16>
    %cst_267 = arith.constant dense<0.000000e+00> : vector<2x512xf32>
    %774 = tpu.matmul %772, %773, %cst_267 {dimension_numbers = #tpu.dot_dimension_numbers<[1], [0], [0], [1], [0, 0, 1, 1], [], []>} : vector<2x128xbf16>, vector<128x512xbf16>, vector<2x512xf32> -> vector<2x512xf32>
    %775 = arith.addf %771, %774 : vector<2x512xf32>
    %776 = vector.extract_strided_slice %775 {offsets = [0, 0], sizes = [2, 128], strides = [1, 1]} : vector<2x512xf32> to vector<2x128xf32>
    %777 = arith.negf %776 : vector<2x128xf32>
    %778 = math.exp %777 : vector<2x128xf32>
    %cst_268 = arith.constant 1.000000e+00 : f32
    %779 = vector.broadcast %cst_268 : f32 to vector<2x128xf32>
    %780 = arith.addf %779, %778 : vector<2x128xf32>
    %781 = arith.divf %779, %780 : vector<2x128xf32>
    %782 = vector.extract_strided_slice %775 {offsets = [0, 128], sizes = [2, 128], strides = [1, 1]} : vector<2x512xf32> to vector<2x128xf32>
    %783 = arith.negf %782 : vector<2x128xf32>
    %784 = math.exp %783 : vector<2x128xf32>
    %cst_269 = arith.constant 1.000000e+00 : f32
    %785 = vector.broadcast %cst_269 : f32 to vector<2x128xf32>
    %786 = arith.addf %785, %784 : vector<2x128xf32>
    %787 = arith.divf %785, %786 : vector<2x128xf32>
    %788 = vector.extract_strided_slice %775 {offsets = [0, 256], sizes = [2, 128], strides = [1, 1]} : vector<2x512xf32> to vector<2x128xf32>
    %789 = math.tanh %788 : vector<2x128xf32>
    %790 = vector.extract_strided_slice %775 {offsets = [0, 384], sizes = [2, 128], strides = [1, 1]} : vector<2x512xf32> to vector<2x128xf32>
    %791 = arith.negf %790 : vector<2x128xf32>
    %792 = math.exp %791 : vector<2x128xf32>
    %cst_270 = arith.constant 1.000000e+00 : f32
    %793 = vector.broadcast %cst_270 : f32 to vector<2x128xf32>
    %794 = arith.addf %793, %792 : vector<2x128xf32>
    %795 = arith.divf %793, %794 : vector<2x128xf32>
    %796 = arith.mulf %787, %736 : vector<2x128xf32>
    %797 = arith.mulf %781, %789 : vector<2x128xf32>
    %798 = arith.addf %796, %797 : vector<2x128xf32>
    %799 = math.tanh %798 : vector<2x128xf32>
    %800 = arith.mulf %795, %799 : vector<2x128xf32>
    %c8_271 = arith.constant 8 : index
    %c0_272 = arith.constant 0 : index
    %801 = vector.load %arg24[%c8_271, %c0_272] : memref<16x256xf32, #tpu.memory_space<vmem>>, vector<2x128xf32>
    tpu.vector_store %arg24[%c8_271, %c0_272], %800 {strides = array<i32>} : memref<16x256xf32, #tpu.memory_space<vmem>>, vector<2x128xf32>,
    %c6_273 = arith.constant 6 : index
    %c512_274 = arith.constant 512 : index
    %802 = vector.load %arg23[%c6_273, %c512_274] : memref<16x1024xf32, #tpu.memory_space<vmem>>, vector<2x512xf32>
    %803 = arith.truncf %769 : vector<2x128xf32> to vector<2x128xbf16>
    %c0_275 = arith.constant 0 : index
    %c0_276 = arith.constant 0 : index
    %804 = vector.load %arg8[%c0_275, %c0_276] : memref<128x512xbf16, #tpu.memory_space<vmem>>, vector<128x512xbf16>
    %cst_277 = arith.constant dense<0.000000e+00> : vector<2x512xf32>
    %805 = tpu.matmul %803, %804, %cst_277 {dimension_numbers = #tpu.dot_dimension_numbers<[1], [0], [0], [1], [0, 0, 1, 1], [], []>} : vector<2x128xbf16>, vector<128x512xbf16>, vector<2x512xf32> -> vector<2x512xf32>
    %806 = arith.addf %802, %805 : vector<2x512xf32>
    %807 = vector.extract_strided_slice %806 {offsets = [0, 0], sizes = [2, 128], strides = [1, 1]} : vector<2x512xf32> to vector<2x128xf32>
    %808 = arith.negf %807 : vector<2x128xf32>
    %809 = math.exp %808 : vector<2x128xf32>
    %cst_278 = arith.constant 1.000000e+00 : f32
    %810 = vector.broadcast %cst_278 : f32 to vector<2x128xf32>
    %811 = arith.addf %810, %809 : vector<2x128xf32>
    %812 = arith.divf %810, %811 : vector<2x128xf32>
    %813 = vector.extract_strided_slice %806 {offsets = [0, 128], sizes = [2, 128], strides = [1, 1]} : vector<2x512xf32> to vector<2x128xf32>
    %814 = arith.negf %813 : vector<2x128xf32>
    %815 = math.exp %814 : vector<2x128xf32>
    %cst_279 = arith.constant 1.000000e+00 : f32
    %816 = vector.broadcast %cst_279 : f32 to vector<2x128xf32>
    %817 = arith.addf %816, %815 : vector<2x128xf32>
    %818 = arith.divf %816, %817 : vector<2x128xf32>
    %819 = vector.extract_strided_slice %806 {offsets = [0, 256], sizes = [2, 128], strides = [1, 1]} : vector<2x512xf32> to vector<2x128xf32>
    %820 = math.tanh %819 : vector<2x128xf32>
    %821 = vector.extract_strided_slice %806 {offsets = [0, 384], sizes = [2, 128], strides = [1, 1]} : vector<2x512xf32> to vector<2x128xf32>
    %822 = arith.negf %821 : vector<2x128xf32>
    %823 = math.exp %822 : vector<2x128xf32>
    %cst_280 = arith.constant 1.000000e+00 : f32
    %824 = vector.broadcast %cst_280 : f32 to vector<2x128xf32>
    %825 = arith.addf %824, %823 : vector<2x128xf32>
    %826 = arith.divf %824, %825 : vector<2x128xf32>
    %827 = arith.mulf %818, %767 : vector<2x128xf32>
    %828 = arith.mulf %812, %820 : vector<2x128xf32>
    %829 = arith.addf %827, %828 : vector<2x128xf32>
    %830 = math.tanh %829 : vector<2x128xf32>
    %831 = arith.mulf %826, %830 : vector<2x128xf32>
    %c6_281 = arith.constant 6 : index
    %c128_282 = arith.constant 128 : index
    %832 = vector.load %arg24[%c6_281, %c128_282] : memref<16x256xf32, #tpu.memory_space<vmem>>, vector<2x128xf32>
    tpu.vector_store %arg24[%c6_281, %c128_282], %831 {strides = array<i32>} : memref<16x256xf32, #tpu.memory_space<vmem>>, vector<2x128xf32>,
    %c10_283 = arith.constant 10 : index
    %c0_284 = arith.constant 0 : index
    %833 = vector.load %arg23[%c10_283, %c0_284] : memref<16x1024xf32, #tpu.memory_space<vmem>>, vector<2x512xf32>
    %834 = arith.truncf %800 : vector<2x128xf32> to vector<2x128xbf16>
    %c0_285 = arith.constant 0 : index
    %c0_286 = arith.constant 0 : index
    %835 = vector.load %arg7[%c0_285, %c0_286] : memref<128x512xbf16, #tpu.memory_space<vmem>>, vector<128x512xbf16>
    %cst_287 = arith.constant dense<0.000000e+00> : vector<2x512xf32>
    %836 = tpu.matmul %834, %835, %cst_287 {dimension_numbers = #tpu.dot_dimension_numbers<[1], [0], [0], [1], [0, 0, 1, 1], [], []>} : vector<2x128xbf16>, vector<128x512xbf16>, vector<2x512xf32> -> vector<2x512xf32>
    %837 = arith.addf %833, %836 : vector<2x512xf32>
    %838 = vector.extract_strided_slice %837 {offsets = [0, 0], sizes = [2, 128], strides = [1, 1]} : vector<2x512xf32> to vector<2x128xf32>
    %839 = arith.negf %838 : vector<2x128xf32>
    %840 = math.exp %839 : vector<2x128xf32>
    %cst_288 = arith.constant 1.000000e+00 : f32
    %841 = vector.broadcast %cst_288 : f32 to vector<2x128xf32>
    %842 = arith.addf %841, %840 : vector<2x128xf32>
    %843 = arith.divf %841, %842 : vector<2x128xf32>
    %844 = vector.extract_strided_slice %837 {offsets = [0, 128], sizes = [2, 128], strides = [1, 1]} : vector<2x512xf32> to vector<2x128xf32>
    %845 = arith.negf %844 : vector<2x128xf32>
    %846 = math.exp %845 : vector<2x128xf32>
    %cst_289 = arith.constant 1.000000e+00 : f32
    %847 = vector.broadcast %cst_289 : f32 to vector<2x128xf32>
    %848 = arith.addf %847, %846 : vector<2x128xf32>
    %849 = arith.divf %847, %848 : vector<2x128xf32>
    %850 = vector.extract_strided_slice %837 {offsets = [0, 256], sizes = [2, 128], strides = [1, 1]} : vector<2x512xf32> to vector<2x128xf32>
    %851 = math.tanh %850 : vector<2x128xf32>
    %852 = vector.extract_strided_slice %837 {offsets = [0, 384], sizes = [2, 128], strides = [1, 1]} : vector<2x512xf32> to vector<2x128xf32>
    %853 = arith.negf %852 : vector<2x128xf32>
    %854 = math.exp %853 : vector<2x128xf32>
    %cst_290 = arith.constant 1.000000e+00 : f32
    %855 = vector.broadcast %cst_290 : f32 to vector<2x128xf32>
    %856 = arith.addf %855, %854 : vector<2x128xf32>
    %857 = arith.divf %855, %856 : vector<2x128xf32>
    %858 = arith.mulf %849, %798 : vector<2x128xf32>
    %859 = arith.mulf %843, %851 : vector<2x128xf32>
    %860 = arith.addf %858, %859 : vector<2x128xf32>
    %861 = math.tanh %860 : vector<2x128xf32>
    %862 = arith.mulf %857, %861 : vector<2x128xf32>
    %c10_291 = arith.constant 10 : index
    %c0_292 = arith.constant 0 : index
    %863 = vector.load %arg24[%c10_291, %c0_292] : memref<16x256xf32, #tpu.memory_space<vmem>>, vector<2x128xf32>
    tpu.vector_store %arg24[%c10_291, %c0_292], %862 {strides = array<i32>} : memref<16x256xf32, #tpu.memory_space<vmem>>, vector<2x128xf32>,
    %c4_293 = arith.constant 4 : index
    %c512_294 = arith.constant 512 : index
    %864 = vector.load %arg23[%c4_293, %c512_294] : memref<16x1024xf32, #tpu.memory_space<vmem>>, vector<2x512xf32>
    %865 = arith.truncf %831 : vector<2x128xf32> to vector<2x128xbf16>
    %c0_295 = arith.constant 0 : index
    %c0_296 = arith.constant 0 : index
    %866 = vector.load %arg8[%c0_295, %c0_296] : memref<128x512xbf16, #tpu.memory_space<vmem>>, vector<128x512xbf16>
    %cst_297 = arith.constant dense<0.000000e+00> : vector<2x512xf32>
    %867 = tpu.matmul %865, %866, %cst_297 {dimension_numbers = #tpu.dot_dimension_numbers<[1], [0], [0], [1], [0, 0, 1, 1], [], []>} : vector<2x128xbf16>, vector<128x512xbf16>, vector<2x512xf32> -> vector<2x512xf32>
    %868 = arith.addf %864, %867 : vector<2x512xf32>
    %869 = vector.extract_strided_slice %868 {offsets = [0, 0], sizes = [2, 128], strides = [1, 1]} : vector<2x512xf32> to vector<2x128xf32>
    %870 = arith.negf %869 : vector<2x128xf32>
    %871 = math.exp %870 : vector<2x128xf32>
    %cst_298 = arith.constant 1.000000e+00 : f32
    %872 = vector.broadcast %cst_298 : f32 to vector<2x128xf32>
    %873 = arith.addf %872, %871 : vector<2x128xf32>
    %874 = arith.divf %872, %873 : vector<2x128xf32>
    %875 = vector.extract_strided_slice %868 {offsets = [0, 128], sizes = [2, 128], strides = [1, 1]} : vector<2x512xf32> to vector<2x128xf32>
    %876 = arith.negf %875 : vector<2x128xf32>
    %877 = math.exp %876 : vector<2x128xf32>
    %cst_299 = arith.constant 1.000000e+00 : f32
    %878 = vector.broadcast %cst_299 : f32 to vector<2x128xf32>
    %879 = arith.addf %878, %877 : vector<2x128xf32>
    %880 = arith.divf %878, %879 : vector<2x128xf32>
    %881 = vector.extract_strided_slice %868 {offsets = [0, 256], sizes = [2, 128], strides = [1, 1]} : vector<2x512xf32> to vector<2x128xf32>
    %882 = math.tanh %881 : vector<2x128xf32>
    %883 = vector.extract_strided_slice %868 {offsets = [0, 384], sizes = [2, 128], strides = [1, 1]} : vector<2x512xf32> to vector<2x128xf32>
    %884 = arith.negf %883 : vector<2x128xf32>
    %885 = math.exp %884 : vector<2x128xf32>
    %cst_300 = arith.constant 1.000000e+00 : f32
    %886 = vector.broadcast %cst_300 : f32 to vector<2x128xf32>
    %887 = arith.addf %886, %885 : vector<2x128xf32>
    %888 = arith.divf %886, %887 : vector<2x128xf32>
    %889 = arith.mulf %880, %829 : vector<2x128xf32>
    %890 = arith.mulf %874, %882 : vector<2x128xf32>
    %891 = arith.addf %889, %890 : vector<2x128xf32>
    %892 = math.tanh %891 : vector<2x128xf32>
    %893 = arith.mulf %888, %892 : vector<2x128xf32>
    %c4_301 = arith.constant 4 : index
    %c128_302 = arith.constant 128 : index
    %894 = vector.load %arg24[%c4_301, %c128_302] : memref<16x256xf32, #tpu.memory_space<vmem>>, vector<2x128xf32>
    tpu.vector_store %arg24[%c4_301, %c128_302], %893 {strides = array<i32>} : memref<16x256xf32, #tpu.memory_space<vmem>>, vector<2x128xf32>,
    %c12_303 = arith.constant 12 : index
    %c0_304 = arith.constant 0 : index
    %895 = vector.load %arg23[%c12_303, %c0_304] : memref<16x1024xf32, #tpu.memory_space<vmem>>, vector<2x512xf32>
    %896 = arith.truncf %862 : vector<2x128xf32> to vector<2x128xbf16>
    %c0_305 = arith.constant 0 : index
    %c0_306 = arith.constant 0 : index
    %897 = vector.load %arg7[%c0_305, %c0_306] : memref<128x512xbf16, #tpu.memory_space<vmem>>, vector<128x512xbf16>
    %cst_307 = arith.constant dense<0.000000e+00> : vector<2x512xf32>
    %898 = tpu.matmul %896, %897, %cst_307 {dimension_numbers = #tpu.dot_dimension_numbers<[1], [0], [0], [1], [0, 0, 1, 1], [], []>} : vector<2x128xbf16>, vector<128x512xbf16>, vector<2x512xf32> -> vector<2x512xf32>
    %899 = arith.addf %895, %898 : vector<2x512xf32>
    %900 = vector.extract_strided_slice %899 {offsets = [0, 0], sizes = [2, 128], strides = [1, 1]} : vector<2x512xf32> to vector<2x128xf32>
    %901 = arith.negf %900 : vector<2x128xf32>
    %902 = math.exp %901 : vector<2x128xf32>
    %cst_308 = arith.constant 1.000000e+00 : f32
    %903 = vector.broadcast %cst_308 : f32 to vector<2x128xf32>
    %904 = arith.addf %903, %902 : vector<2x128xf32>
    %905 = arith.divf %903, %904 : vector<2x128xf32>
    %906 = vector.extract_strided_slice %899 {offsets = [0, 128], sizes = [2, 128], strides = [1, 1]} : vector<2x512xf32> to vector<2x128xf32>
    %907 = arith.negf %906 : vector<2x128xf32>
    %908 = math.exp %907 : vector<2x128xf32>
    %cst_309 = arith.constant 1.000000e+00 : f32
    %909 = vector.broadcast %cst_309 : f32 to vector<2x128xf32>
    %910 = arith.addf %909, %908 : vector<2x128xf32>
    %911 = arith.divf %909, %910 : vector<2x128xf32>
    %912 = vector.extract_strided_slice %899 {offsets = [0, 256], sizes = [2, 128], strides = [1, 1]} : vector<2x512xf32> to vector<2x128xf32>
    %913 = math.tanh %912 : vector<2x128xf32>
    %914 = vector.extract_strided_slice %899 {offsets = [0, 384], sizes = [2, 128], strides = [1, 1]} : vector<2x512xf32> to vector<2x128xf32>
    %915 = arith.negf %914 : vector<2x128xf32>
    %916 = math.exp %915 : vector<2x128xf32>
    %cst_310 = arith.constant 1.000000e+00 : f32
    %917 = vector.broadcast %cst_310 : f32 to vector<2x128xf32>
    %918 = arith.addf %917, %916 : vector<2x128xf32>
    %919 = arith.divf %917, %918 : vector<2x128xf32>
    %920 = arith.mulf %911, %860 : vector<2x128xf32>
    %921 = arith.mulf %905, %913 : vector<2x128xf32>
    %922 = arith.addf %920, %921 : vector<2x128xf32>
    %923 = math.tanh %922 : vector<2x128xf32>
    %924 = arith.mulf %919, %923 : vector<2x128xf32>
    %c12_311 = arith.constant 12 : index
    %c0_312 = arith.constant 0 : index
    %925 = vector.load %arg24[%c12_311, %c0_312] : memref<16x256xf32, #tpu.memory_space<vmem>>, vector<2x128xf32>
    tpu.vector_store %arg24[%c12_311, %c0_312], %924 {strides = array<i32>} : memref<16x256xf32, #tpu.memory_space<vmem>>, vector<2x128xf32>,
    %c2_313 = arith.constant 2 : index
    %c512_314 = arith.constant 512 : index
    %926 = vector.load %arg23[%c2_313, %c512_314] : memref<16x1024xf32, #tpu.memory_space<vmem>>, vector<2x512xf32>
    %927 = arith.truncf %893 : vector<2x128xf32> to vector<2x128xbf16>
    %c0_315 = arith.constant 0 : index
    %c0_316 = arith.constant 0 : index
    %928 = vector.load %arg8[%c0_315, %c0_316] : memref<128x512xbf16, #tpu.memory_space<vmem>>, vector<128x512xbf16>
    %cst_317 = arith.constant dense<0.000000e+00> : vector<2x512xf32>
    %929 = tpu.matmul %927, %928, %cst_317 {dimension_numbers = #tpu.dot_dimension_numbers<[1], [0], [0], [1], [0, 0, 1, 1], [], []>} : vector<2x128xbf16>, vector<128x512xbf16>, vector<2x512xf32> -> vector<2x512xf32>
    %930 = arith.addf %926, %929 : vector<2x512xf32>
    %931 = vector.extract_strided_slice %930 {offsets = [0, 0], sizes = [2, 128], strides = [1, 1]} : vector<2x512xf32> to vector<2x128xf32>
    %932 = arith.negf %931 : vector<2x128xf32>
    %933 = math.exp %932 : vector<2x128xf32>
    %cst_318 = arith.constant 1.000000e+00 : f32
    %934 = vector.broadcast %cst_318 : f32 to vector<2x128xf32>
    %935 = arith.addf %934, %933 : vector<2x128xf32>
    %936 = arith.divf %934, %935 : vector<2x128xf32>
    %937 = vector.extract_strided_slice %930 {offsets = [0, 128], sizes = [2, 128], strides = [1, 1]} : vector<2x512xf32> to vector<2x128xf32>
    %938 = arith.negf %937 : vector<2x128xf32>
    %939 = math.exp %938 : vector<2x128xf32>
    %cst_319 = arith.constant 1.000000e+00 : f32
    %940 = vector.broadcast %cst_319 : f32 to vector<2x128xf32>
    %941 = arith.addf %940, %939 : vector<2x128xf32>
    %942 = arith.divf %940, %941 : vector<2x128xf32>
    %943 = vector.extract_strided_slice %930 {offsets = [0, 256], sizes = [2, 128], strides = [1, 1]} : vector<2x512xf32> to vector<2x128xf32>
    %944 = math.tanh %943 : vector<2x128xf32>
    %945 = vector.extract_strided_slice %930 {offsets = [0, 384], sizes = [2, 128], strides = [1, 1]} : vector<2x512xf32> to vector<2x128xf32>
    %946 = arith.negf %945 : vector<2x128xf32>
    %947 = math.exp %946 : vector<2x128xf32>
    %cst_320 = arith.constant 1.000000e+00 : f32
    %948 = vector.broadcast %cst_320 : f32 to vector<2x128xf32>
    %949 = arith.addf %948, %947 : vector<2x128xf32>
    %950 = arith.divf %948, %949 : vector<2x128xf32>
    %951 = arith.mulf %942, %891 : vector<2x128xf32>
    %952 = arith.mulf %936, %944 : vector<2x128xf32>
    %953 = arith.addf %951, %952 : vector<2x128xf32>
    %954 = math.tanh %953 : vector<2x128xf32>
    %955 = arith.mulf %950, %954 : vector<2x128xf32>
    %c2_321 = arith.constant 2 : index
    %c128_322 = arith.constant 128 : index
    %956 = vector.load %arg24[%c2_321, %c128_322] : memref<16x256xf32, #tpu.memory_space<vmem>>, vector<2x128xf32>
    tpu.vector_store %arg24[%c2_321, %c128_322], %955 {strides = array<i32>} : memref<16x256xf32, #tpu.memory_space<vmem>>, vector<2x128xf32>,
    %c14_323 = arith.constant 14 : index
    %c0_324 = arith.constant 0 : index
    %957 = vector.load %arg23[%c14_323, %c0_324] : memref<16x1024xf32, #tpu.memory_space<vmem>>, vector<2x512xf32>
    %958 = arith.truncf %924 : vector<2x128xf32> to vector<2x128xbf16>
    %c0_325 = arith.constant 0 : index
    %c0_326 = arith.constant 0 : index
    %959 = vector.load %arg7[%c0_325, %c0_326] : memref<128x512xbf16, #tpu.memory_space<vmem>>, vector<128x512xbf16>
    %cst_327 = arith.constant dense<0.000000e+00> : vector<2x512xf32>
    %960 = tpu.matmul %958, %959, %cst_327 {dimension_numbers = #tpu.dot_dimension_numbers<[1], [0], [0], [1], [0, 0, 1, 1], [], []>} : vector<2x128xbf16>, vector<128x512xbf16>, vector<2x512xf32> -> vector<2x512xf32>
    %961 = arith.addf %957, %960 : vector<2x512xf32>
    %962 = vector.extract_strided_slice %961 {offsets = [0, 0], sizes = [2, 128], strides = [1, 1]} : vector<2x512xf32> to vector<2x128xf32>
    %963 = arith.negf %962 : vector<2x128xf32>
    %964 = math.exp %963 : vector<2x128xf32>
    %cst_328 = arith.constant 1.000000e+00 : f32
    %965 = vector.broadcast %cst_328 : f32 to vector<2x128xf32>
    %966 = arith.addf %965, %964 : vector<2x128xf32>
    %967 = arith.divf %965, %966 : vector<2x128xf32>
    %968 = vector.extract_strided_slice %961 {offsets = [0, 128], sizes = [2, 128], strides = [1, 1]} : vector<2x512xf32> to vector<2x128xf32>
    %969 = arith.negf %968 : vector<2x128xf32>
    %970 = math.exp %969 : vector<2x128xf32>
    %cst_329 = arith.constant 1.000000e+00 : f32
    %971 = vector.broadcast %cst_329 : f32 to vector<2x128xf32>
    %972 = arith.addf %971, %970 : vector<2x128xf32>
    %973 = arith.divf %971, %972 : vector<2x128xf32>
    %974 = vector.extract_strided_slice %961 {offsets = [0, 256], sizes = [2, 128], strides = [1, 1]} : vector<2x512xf32> to vector<2x128xf32>
    %975 = math.tanh %974 : vector<2x128xf32>
    %976 = vector.extract_strided_slice %961 {offsets = [0, 384], sizes = [2, 128], strides = [1, 1]} : vector<2x512xf32> to vector<2x128xf32>
    %977 = arith.negf %976 : vector<2x128xf32>
    %978 = math.exp %977 : vector<2x128xf32>
    %cst_330 = arith.constant 1.000000e+00 : f32
    %979 = vector.broadcast %cst_330 : f32 to vector<2x128xf32>
    %980 = arith.addf %979, %978 : vector<2x128xf32>
    %981 = arith.divf %979, %980 : vector<2x128xf32>
    %982 = arith.mulf %973, %922 : vector<2x128xf32>
    %983 = arith.mulf %967, %975 : vector<2x128xf32>
    %984 = arith.addf %982, %983 : vector<2x128xf32>
    %985 = math.tanh %984 : vector<2x128xf32>
    %986 = arith.mulf %981, %985 : vector<2x128xf32>
    %c14_331 = arith.constant 14 : index
    %c0_332 = arith.constant 0 : index
    %987 = vector.load %arg24[%c14_331, %c0_332] : memref<16x256xf32, #tpu.memory_space<vmem>>, vector<2x128xf32>
    tpu.vector_store %arg24[%c14_331, %c0_332], %986 {strides = array<i32>} : memref<16x256xf32, #tpu.memory_space<vmem>>, vector<2x128xf32>,
    %c0_333 = arith.constant 0 : index
    %c512_334 = arith.constant 512 : index
    %988 = vector.load %arg23[%c0_333, %c512_334] : memref<16x1024xf32, #tpu.memory_space<vmem>>, vector<2x512xf32>
    %989 = arith.truncf %955 : vector<2x128xf32> to vector<2x128xbf16>
    %c0_335 = arith.constant 0 : index
    %c0_336 = arith.constant 0 : index
    %990 = vector.load %arg8[%c0_335, %c0_336] : memref<128x512xbf16, #tpu.memory_space<vmem>>, vector<128x512xbf16>
    %cst_337 = arith.constant dense<0.000000e+00> : vector<2x512xf32>
    %991 = tpu.matmul %989, %990, %cst_337 {dimension_numbers = #tpu.dot_dimension_numbers<[1], [0], [0], [1], [0, 0, 1, 1], [], []>} : vector<2x128xbf16>, vector<128x512xbf16>, vector<2x512xf32> -> vector<2x512xf32>
    %992 = arith.addf %988, %991 : vector<2x512xf32>
    %993 = vector.extract_strided_slice %992 {offsets = [0, 0], sizes = [2, 128], strides = [1, 1]} : vector<2x512xf32> to vector<2x128xf32>
    %994 = arith.negf %993 : vector<2x128xf32>
    %995 = math.exp %994 : vector<2x128xf32>
    %cst_338 = arith.constant 1.000000e+00 : f32
    %996 = vector.broadcast %cst_338 : f32 to vector<2x128xf32>
    %997 = arith.addf %996, %995 : vector<2x128xf32>
    %998 = arith.divf %996, %997 : vector<2x128xf32>
    %999 = vector.extract_strided_slice %992 {offsets = [0, 128], sizes = [2, 128], strides = [1, 1]} : vector<2x512xf32> to vector<2x128xf32>
    %1000 = arith.negf %999 : vector<2x128xf32>
    %1001 = math.exp %1000 : vector<2x128xf32>
    %cst_339 = arith.constant 1.000000e+00 : f32
    %1002 = vector.broadcast %cst_339 : f32 to vector<2x128xf32>
    %1003 = arith.addf %1002, %1001 : vector<2x128xf32>
    %1004 = arith.divf %1002, %1003 : vector<2x128xf32>
    %1005 = vector.extract_strided_slice %992 {offsets = [0, 256], sizes = [2, 128], strides = [1, 1]} : vector<2x512xf32> to vector<2x128xf32>
    %1006 = math.tanh %1005 : vector<2x128xf32>
    %1007 = vector.extract_strided_slice %992 {offsets = [0, 384], sizes = [2, 128], strides = [1, 1]} : vector<2x512xf32> to vector<2x128xf32>
    %1008 = arith.negf %1007 : vector<2x128xf32>
    %1009 = math.exp %1008 : vector<2x128xf32>
    %cst_340 = arith.constant 1.000000e+00 : f32
    %1010 = vector.broadcast %cst_340 : f32 to vector<2x128xf32>
    %1011 = arith.addf %1010, %1009 : vector<2x128xf32>
    %1012 = arith.divf %1010, %1011 : vector<2x128xf32>
    %1013 = arith.mulf %1004, %953 : vector<2x128xf32>
    %1014 = arith.mulf %998, %1006 : vector<2x128xf32>
    %1015 = arith.addf %1013, %1014 : vector<2x128xf32>
    %1016 = math.tanh %1015 : vector<2x128xf32>
    %1017 = arith.mulf %1012, %1016 : vector<2x128xf32>
    %c0_341 = arith.constant 0 : index
    %c128_342 = arith.constant 128 : index
    %1018 = vector.load %arg24[%c0_341, %c128_342] : memref<16x256xf32, #tpu.memory_space<vmem>>, vector<2x128xf32>
    tpu.vector_store %arg24[%c0_341, %c128_342], %1017 {strides = array<i32>} : memref<16x256xf32, #tpu.memory_space<vmem>>, vector<2x128xf32>,
    %c4_343 = arith.constant 4 : index
    %c0_344 = arith.constant 0 : index
    %1019 = vector.load %arg21[%c4_343, %c0_344] : memref<8x128xf32, #tpu.memory_space<vmem>>, vector<2x128xf32>
    tpu.vector_store %arg21[%c4_343, %c0_344], %986 {strides = array<i32>} : memref<8x128xf32, #tpu.memory_space<vmem>>, vector<2x128xf32>,
    %c6_345 = arith.constant 6 : index
    %c0_346 = arith.constant 0 : index
    %1020 = vector.load %arg21[%c6_345, %c0_346] : memref<8x128xf32, #tpu.memory_space<vmem>>, vector<2x128xf32>
    tpu.vector_store %arg21[%c6_345, %c0_346], %1017 {strides = array<i32>} : memref<8x128xf32, #tpu.memory_space<vmem>>, vector<2x128xf32>,
    %c4_347 = arith.constant 4 : index
    %c0_348 = arith.constant 0 : index
    %1021 = vector.load %arg22[%c4_347, %c0_348] : memref<8x128xf32, #tpu.memory_space<vmem>>, vector<2x128xf32>
    tpu.vector_store %arg22[%c4_347, %c0_348], %984 {strides = array<i32>} : memref<8x128xf32, #tpu.memory_space<vmem>>, vector<2x128xf32>,
    %c6_349 = arith.constant 6 : index
    %c0_350 = arith.constant 0 : index
    %1022 = vector.load %arg22[%c6_349, %c0_350] : memref<8x128xf32, #tpu.memory_space<vmem>>, vector<2x128xf32>
    tpu.vector_store %arg22[%c6_349, %c0_350], %1015 {strides = array<i32>} : memref<8x128xf32, #tpu.memory_space<vmem>>, vector<2x128xf32>,
    %c0_351 = arith.constant 0 : index
    %c0_352 = arith.constant 0 : index
    %1023 = vector.load %arg24[%c0_351, %c0_352] : memref<16x256xf32, #tpu.memory_space<vmem>>, vector<16x256xf32>
    %1024 = arith.truncf %1023 : vector<16x256xf32> to vector<16x256xbf16>
    %c0_353 = arith.constant 0 : index
    %c0_354 = arith.constant 0 : index
    %1025 = vector.load %arg10[%c0_353, %c0_354] : memref<256x128xbf16, #tpu.memory_space<vmem>>, vector<256x128xbf16>
    %cst_355 = arith.constant dense<0.000000e+00> : vector<16x128xf32>
    %1026 = tpu.matmul %1024, %1025, %cst_355 {dimension_numbers = #tpu.dot_dimension_numbers<[1], [0], [0], [1], [0, 0, 1, 1], [], []>} : vector<16x256xbf16>, vector<256x128xbf16>, vector<16x128xf32> -> vector<16x128xf32>
    %c0_356 = arith.constant 0 : index
    %c0_357 = arith.constant 0 : index
    %1027 = vector.load %arg11[%c0_356, %c0_357] : memref<1x128xf32, #tpu.memory_space<vmem>>, vector<1x128xf32>
    %1028 = vector.broadcast %1027 : vector<1x128xf32> to vector<16x128xf32>
    %1029 = arith.addf %1026, %1028 : vector<16x128xf32>
    %1030 = math.tanh %1029 : vector<16x128xf32>
    %c0_358 = arith.constant 0 : index
    %c0_359 = arith.constant 0 : index
    %1031 = vector.load %arg12[%c0_358, %c0_359] : memref<1x128xf32, #tpu.memory_space<vmem>>, vector<1x128xf32>
    %1032 = vector.broadcast %1031 : vector<1x128xf32> to vector<16x128xf32>
    %1033 = arith.mulf %1030, %1032 : vector<16x128xf32>
    %cst_360 = arith.constant dense<0.000000e+00> : vector<16xf32>
    %1034 = vector.multi_reduction <add>, %1033, %cst_360 [1] : vector<16x128xf32> to vector<16xf32>
    %1035 = vector.shape_cast %1034 : vector<16xf32> to vector<16x1xf32>
    %c0_361 = arith.constant 0 : index
    %c0_362 = arith.constant 0 : index
    %1036 = vector.load %arg13[%c0_361, %c0_362] : memref<1x1xf32, #tpu.memory_space<vmem>>, vector<1x1xf32>
    %1037 = vector.broadcast %1036 : vector<1x1xf32> to vector<16x1xf32>
    %1038 = arith.addf %1035, %1037 : vector<16x1xf32>
    %c0_363 = arith.constant 0 : index
    %c0_364 = arith.constant 0 : index
    %1039 = vector.load %arg25[%c0_363, %c0_364] : memref<16x1xf32, #tpu.memory_space<vmem>>, vector<16x1xf32>
    tpu.vector_store %arg25[%c0_363, %c0_364], %1038 {strides = array<i32>} : memref<16x1xf32, #tpu.memory_space<vmem>>, vector<16x1xf32>,
    %c0_365 = arith.constant 0 : index
    %c0_366 = arith.constant 0 : index
    %1040 = vector.load %arg25[%c0_365, %c0_366] : memref<16x1xf32, #tpu.memory_space<vmem>>, vector<2x1xf32>
    %c2_367 = arith.constant 2 : index
    %c0_368 = arith.constant 0 : index
    %1041 = vector.load %arg25[%c2_367, %c0_368] : memref<16x1xf32, #tpu.memory_space<vmem>>, vector<2x1xf32>
    %1042 = arith.maximumf %1040, %1041 : vector<2x1xf32>
    %c4_369 = arith.constant 4 : index
    %c0_370 = arith.constant 0 : index
    %1043 = vector.load %arg25[%c4_369, %c0_370] : memref<16x1xf32, #tpu.memory_space<vmem>>, vector<2x1xf32>
    %1044 = arith.maximumf %1042, %1043 : vector<2x1xf32>
    %c6_371 = arith.constant 6 : index
    %c0_372 = arith.constant 0 : index
    %1045 = vector.load %arg25[%c6_371, %c0_372] : memref<16x1xf32, #tpu.memory_space<vmem>>, vector<2x1xf32>
    %1046 = arith.maximumf %1044, %1045 : vector<2x1xf32>
    %c8_373 = arith.constant 8 : index
    %c0_374 = arith.constant 0 : index
    %1047 = vector.load %arg25[%c8_373, %c0_374] : memref<16x1xf32, #tpu.memory_space<vmem>>, vector<2x1xf32>
    %1048 = arith.maximumf %1046, %1047 : vector<2x1xf32>
    %c10_375 = arith.constant 10 : index
    %c0_376 = arith.constant 0 : index
    %1049 = vector.load %arg25[%c10_375, %c0_376] : memref<16x1xf32, #tpu.memory_space<vmem>>, vector<2x1xf32>
    %1050 = arith.maximumf %1048, %1049 : vector<2x1xf32>
    %c12_377 = arith.constant 12 : index
    %c0_378 = arith.constant 0 : index
    %1051 = vector.load %arg25[%c12_377, %c0_378] : memref<16x1xf32, #tpu.memory_space<vmem>>, vector<2x1xf32>
    %1052 = arith.maximumf %1050, %1051 : vector<2x1xf32>
    %c14_379 = arith.constant 14 : index
    %c0_380 = arith.constant 0 : index
    %1053 = vector.load %arg25[%c14_379, %c0_380] : memref<16x1xf32, #tpu.memory_space<vmem>>, vector<2x1xf32>
    %1054 = arith.maximumf %1052, %1053 : vector<2x1xf32>
    %cst_381 = arith.constant 0.000000e+00 : f32
    %1055 = vector.broadcast %cst_381 : f32 to vector<2x1xf32>
    %cst_382 = arith.constant 0.000000e+00 : f32
    %1056 = vector.broadcast %cst_382 : f32 to vector<2x256xf32>
    %c0_383 = arith.constant 0 : index
    %c0_384 = arith.constant 0 : index
    %1057 = vector.load %arg25[%c0_383, %c0_384] : memref<16x1xf32, #tpu.memory_space<vmem>>, vector<2x1xf32>
    %1058 = arith.subf %1057, %1054 : vector<2x1xf32>
    %1059 = math.exp %1058 : vector<2x1xf32>
    %1060 = arith.addf %1055, %1059 : vector<2x1xf32>
    %c0_385 = arith.constant 0 : index
    %c0_386 = arith.constant 0 : index
    %1061 = vector.load %arg24[%c0_385, %c0_386] : memref<16x256xf32, #tpu.memory_space<vmem>>, vector<2x256xf32>
    %1062 = vector.broadcast %1059 : vector<2x1xf32> to vector<2x256xf32>
    %1063 = arith.mulf %1062, %1061 : vector<2x256xf32>
    %1064 = arith.addf %1056, %1063 : vector<2x256xf32>
    %c2_387 = arith.constant 2 : index
    %c0_388 = arith.constant 0 : index
    %1065 = vector.load %arg25[%c2_387, %c0_388] : memref<16x1xf32, #tpu.memory_space<vmem>>, vector<2x1xf32>
    %1066 = arith.subf %1065, %1054 : vector<2x1xf32>
    %1067 = math.exp %1066 : vector<2x1xf32>
    %1068 = arith.addf %1060, %1067 : vector<2x1xf32>
    %c2_389 = arith.constant 2 : index
    %c0_390 = arith.constant 0 : index
    %1069 = vector.load %arg24[%c2_389, %c0_390] : memref<16x256xf32, #tpu.memory_space<vmem>>, vector<2x256xf32>
    %1070 = vector.broadcast %1067 : vector<2x1xf32> to vector<2x256xf32>
    %1071 = arith.mulf %1070, %1069 : vector<2x256xf32>
    %1072 = arith.addf %1064, %1071 : vector<2x256xf32>
    %c4_391 = arith.constant 4 : index
    %c0_392 = arith.constant 0 : index
    %1073 = vector.load %arg25[%c4_391, %c0_392] : memref<16x1xf32, #tpu.memory_space<vmem>>, vector<2x1xf32>
    %1074 = arith.subf %1073, %1054 : vector<2x1xf32>
    %1075 = math.exp %1074 : vector<2x1xf32>
    %1076 = arith.addf %1068, %1075 : vector<2x1xf32>
    %c4_393 = arith.constant 4 : index
    %c0_394 = arith.constant 0 : index
    %1077 = vector.load %arg24[%c4_393, %c0_394] : memref<16x256xf32, #tpu.memory_space<vmem>>, vector<2x256xf32>
    %1078 = vector.broadcast %1075 : vector<2x1xf32> to vector<2x256xf32>
    %1079 = arith.mulf %1078, %1077 : vector<2x256xf32>
    %1080 = arith.addf %1072, %1079 : vector<2x256xf32>
    %c6_395 = arith.constant 6 : index
    %c0_396 = arith.constant 0 : index
    %1081 = vector.load %arg25[%c6_395, %c0_396] : memref<16x1xf32, #tpu.memory_space<vmem>>, vector<2x1xf32>
    %1082 = arith.subf %1081, %1054 : vector<2x1xf32>
    %1083 = math.exp %1082 : vector<2x1xf32>
    %1084 = arith.addf %1076, %1083 : vector<2x1xf32>
    %c6_397 = arith.constant 6 : index
    %c0_398 = arith.constant 0 : index
    %1085 = vector.load %arg24[%c6_397, %c0_398] : memref<16x256xf32, #tpu.memory_space<vmem>>, vector<2x256xf32>
    %1086 = vector.broadcast %1083 : vector<2x1xf32> to vector<2x256xf32>
    %1087 = arith.mulf %1086, %1085 : vector<2x256xf32>
    %1088 = arith.addf %1080, %1087 : vector<2x256xf32>
    %c8_399 = arith.constant 8 : index
    %c0_400 = arith.constant 0 : index
    %1089 = vector.load %arg25[%c8_399, %c0_400] : memref<16x1xf32, #tpu.memory_space<vmem>>, vector<2x1xf32>
    %1090 = arith.subf %1089, %1054 : vector<2x1xf32>
    %1091 = math.exp %1090 : vector<2x1xf32>
    %1092 = arith.addf %1084, %1091 : vector<2x1xf32>
    %c8_401 = arith.constant 8 : index
    %c0_402 = arith.constant 0 : index
    %1093 = vector.load %arg24[%c8_401, %c0_402] : memref<16x256xf32, #tpu.memory_space<vmem>>, vector<2x256xf32>
    %1094 = vector.broadcast %1091 : vector<2x1xf32> to vector<2x256xf32>
    %1095 = arith.mulf %1094, %1093 : vector<2x256xf32>
    %1096 = arith.addf %1088, %1095 : vector<2x256xf32>
    %c10_403 = arith.constant 10 : index
    %c0_404 = arith.constant 0 : index
    %1097 = vector.load %arg25[%c10_403, %c0_404] : memref<16x1xf32, #tpu.memory_space<vmem>>, vector<2x1xf32>
    %1098 = arith.subf %1097, %1054 : vector<2x1xf32>
    %1099 = math.exp %1098 : vector<2x1xf32>
    %1100 = arith.addf %1092, %1099 : vector<2x1xf32>
    %c10_405 = arith.constant 10 : index
    %c0_406 = arith.constant 0 : index
    %1101 = vector.load %arg24[%c10_405, %c0_406] : memref<16x256xf32, #tpu.memory_space<vmem>>, vector<2x256xf32>
    %1102 = vector.broadcast %1099 : vector<2x1xf32> to vector<2x256xf32>
    %1103 = arith.mulf %1102, %1101 : vector<2x256xf32>
    %1104 = arith.addf %1096, %1103 : vector<2x256xf32>
    %c12_407 = arith.constant 12 : index
    %c0_408 = arith.constant 0 : index
    %1105 = vector.load %arg25[%c12_407, %c0_408] : memref<16x1xf32, #tpu.memory_space<vmem>>, vector<2x1xf32>
    %1106 = arith.subf %1105, %1054 : vector<2x1xf32>
    %1107 = math.exp %1106 : vector<2x1xf32>
    %1108 = arith.addf %1100, %1107 : vector<2x1xf32>
    %c12_409 = arith.constant 12 : index
    %c0_410 = arith.constant 0 : index
    %1109 = vector.load %arg24[%c12_409, %c0_410] : memref<16x256xf32, #tpu.memory_space<vmem>>, vector<2x256xf32>
    %1110 = vector.broadcast %1107 : vector<2x1xf32> to vector<2x256xf32>
    %1111 = arith.mulf %1110, %1109 : vector<2x256xf32>
    %1112 = arith.addf %1104, %1111 : vector<2x256xf32>
    %c14_411 = arith.constant 14 : index
    %c0_412 = arith.constant 0 : index
    %1113 = vector.load %arg25[%c14_411, %c0_412] : memref<16x1xf32, #tpu.memory_space<vmem>>, vector<2x1xf32>
    %1114 = arith.subf %1113, %1054 : vector<2x1xf32>
    %1115 = math.exp %1114 : vector<2x1xf32>
    %1116 = arith.addf %1108, %1115 : vector<2x1xf32>
    %c14_413 = arith.constant 14 : index
    %c0_414 = arith.constant 0 : index
    %1117 = vector.load %arg24[%c14_413, %c0_414] : memref<16x256xf32, #tpu.memory_space<vmem>>, vector<2x256xf32>
    %1118 = vector.broadcast %1115 : vector<2x1xf32> to vector<2x256xf32>
    %1119 = arith.mulf %1118, %1117 : vector<2x256xf32>
    %1120 = arith.addf %1112, %1119 : vector<2x256xf32>
    %1121 = tpu.reciprocal %1116 {approx = true} : vector<2x1xf32> -> vector<2x1xf32>
    %1122 = vector.broadcast %1121 : vector<2x1xf32> to vector<2x256xf32>
    %1123 = arith.mulf %1120, %1122 : vector<2x256xf32>
    %c0_415 = arith.constant 0 : index
    %c0_416 = arith.constant 0 : index
    %1124 = vector.load %arg24[%c0_415, %c0_416] : memref<16x256xf32, #tpu.memory_space<vmem>>, vector<2x256xf32>
    %1125 = arith.addf %1124, %1123 : vector<2x256xf32>
    %c0_417 = arith.constant 0 : index
    %c0_418 = arith.constant 0 : index
    %1126 = vector.load %arg24[%c0_417, %c0_418] : memref<16x256xf32, #tpu.memory_space<vmem>>, vector<2x256xf32>
    tpu.vector_store %arg24[%c0_417, %c0_418], %1125 {strides = array<i32>} : memref<16x256xf32, #tpu.memory_space<vmem>>, vector<2x256xf32>,
    %c2_419 = arith.constant 2 : index
    %c0_420 = arith.constant 0 : index
    %1127 = vector.load %arg24[%c2_419, %c0_420] : memref<16x256xf32, #tpu.memory_space<vmem>>, vector<2x256xf32>
    %1128 = arith.addf %1127, %1123 : vector<2x256xf32>
    %c2_421 = arith.constant 2 : index
    %c0_422 = arith.constant 0 : index
    %1129 = vector.load %arg24[%c2_421, %c0_422] : memref<16x256xf32, #tpu.memory_space<vmem>>, vector<2x256xf32>
    tpu.vector_store %arg24[%c2_421, %c0_422], %1128 {strides = array<i32>} : memref<16x256xf32, #tpu.memory_space<vmem>>, vector<2x256xf32>,
    %c4_423 = arith.constant 4 : index
    %c0_424 = arith.constant 0 : index
    %1130 = vector.load %arg24[%c4_423, %c0_424] : memref<16x256xf32, #tpu.memory_space<vmem>>, vector<2x256xf32>
    %1131 = arith.addf %1130, %1123 : vector<2x256xf32>
    %c4_425 = arith.constant 4 : index
    %c0_426 = arith.constant 0 : index
    %1132 = vector.load %arg24[%c4_425, %c0_426] : memref<16x256xf32, #tpu.memory_space<vmem>>, vector<2x256xf32>
    tpu.vector_store %arg24[%c4_425, %c0_426], %1131 {strides = array<i32>} : memref<16x256xf32, #tpu.memory_space<vmem>>, vector<2x256xf32>,
    %c6_427 = arith.constant 6 : index
    %c0_428 = arith.constant 0 : index
    %1133 = vector.load %arg24[%c6_427, %c0_428] : memref<16x256xf32, #tpu.memory_space<vmem>>, vector<2x256xf32>
    %1134 = arith.addf %1133, %1123 : vector<2x256xf32>
    %c6_429 = arith.constant 6 : index
    %c0_430 = arith.constant 0 : index
    %1135 = vector.load %arg24[%c6_429, %c0_430] : memref<16x256xf32, #tpu.memory_space<vmem>>, vector<2x256xf32>
    tpu.vector_store %arg24[%c6_429, %c0_430], %1134 {strides = array<i32>} : memref<16x256xf32, #tpu.memory_space<vmem>>, vector<2x256xf32>,
    %c8_431 = arith.constant 8 : index
    %c0_432 = arith.constant 0 : index
    %1136 = vector.load %arg24[%c8_431, %c0_432] : memref<16x256xf32, #tpu.memory_space<vmem>>, vector<2x256xf32>
    %1137 = arith.addf %1136, %1123 : vector<2x256xf32>
    %c8_433 = arith.constant 8 : index
    %c0_434 = arith.constant 0 : index
    %1138 = vector.load %arg24[%c8_433, %c0_434] : memref<16x256xf32, #tpu.memory_space<vmem>>, vector<2x256xf32>
    tpu.vector_store %arg24[%c8_433, %c0_434], %1137 {strides = array<i32>} : memref<16x256xf32, #tpu.memory_space<vmem>>, vector<2x256xf32>,
    %c10_435 = arith.constant 10 : index
    %c0_436 = arith.constant 0 : index
    %1139 = vector.load %arg24[%c10_435, %c0_436] : memref<16x256xf32, #tpu.memory_space<vmem>>, vector<2x256xf32>
    %1140 = arith.addf %1139, %1123 : vector<2x256xf32>
    %c10_437 = arith.constant 10 : index
    %c0_438 = arith.constant 0 : index
    %1141 = vector.load %arg24[%c10_437, %c0_438] : memref<16x256xf32, #tpu.memory_space<vmem>>, vector<2x256xf32>
    tpu.vector_store %arg24[%c10_437, %c0_438], %1140 {strides = array<i32>} : memref<16x256xf32, #tpu.memory_space<vmem>>, vector<2x256xf32>,
    %c12_439 = arith.constant 12 : index
    %c0_440 = arith.constant 0 : index
    %1142 = vector.load %arg24[%c12_439, %c0_440] : memref<16x256xf32, #tpu.memory_space<vmem>>, vector<2x256xf32>
    %1143 = arith.addf %1142, %1123 : vector<2x256xf32>
    %c12_441 = arith.constant 12 : index
    %c0_442 = arith.constant 0 : index
    %1144 = vector.load %arg24[%c12_441, %c0_442] : memref<16x256xf32, #tpu.memory_space<vmem>>, vector<2x256xf32>
    tpu.vector_store %arg24[%c12_441, %c0_442], %1143 {strides = array<i32>} : memref<16x256xf32, #tpu.memory_space<vmem>>, vector<2x256xf32>,
    %c14_443 = arith.constant 14 : index
    %c0_444 = arith.constant 0 : index
    %1145 = vector.load %arg24[%c14_443, %c0_444] : memref<16x256xf32, #tpu.memory_space<vmem>>, vector<2x256xf32>
    %1146 = arith.addf %1145, %1123 : vector<2x256xf32>
    %c14_445 = arith.constant 14 : index
    %c0_446 = arith.constant 0 : index
    %1147 = vector.load %arg24[%c14_445, %c0_446] : memref<16x256xf32, #tpu.memory_space<vmem>>, vector<2x256xf32>
    tpu.vector_store %arg24[%c14_445, %c0_446], %1146 {strides = array<i32>} : memref<16x256xf32, #tpu.memory_space<vmem>>, vector<2x256xf32>,
    %c0_447 = arith.constant 0 : index
    %c0_448 = arith.constant 0 : index
    %1148 = vector.load %arg24[%c0_447, %c0_448] : memref<16x256xf32, #tpu.memory_space<vmem>>, vector<16x256xf32>
    %1149 = arith.truncf %1148 : vector<16x256xf32> to vector<16x256xbf16>
    %c0_449 = arith.constant 0 : index
    %c0_450 = arith.constant 0 : index
    %1150 = vector.load %arg14[%c0_449, %c0_450] : memref<256x128xbf16, #tpu.memory_space<vmem>>, vector<256x128xbf16>
    %cst_451 = arith.constant dense<0.000000e+00> : vector<16x128xf32>
    %1151 = tpu.matmul %1149, %1150, %cst_451 {dimension_numbers = #tpu.dot_dimension_numbers<[1], [0], [0], [1], [0, 0, 1, 1], [], []>} : vector<16x256xbf16>, vector<256x128xbf16>, vector<16x128xf32> -> vector<16x128xf32>
    %c0_452 = arith.constant 0 : index
    %c0_453 = arith.constant 0 : index
    %1152 = vector.load %arg15[%c0_452, %c0_453] : memref<1x128xf32, #tpu.memory_space<vmem>>, vector<1x128xf32>
    %1153 = vector.broadcast %1152 : vector<1x128xf32> to vector<16x128xf32>
    %1154 = arith.addf %1151, %1153 : vector<16x128xf32>
    %cst_454 = arith.constant dense<0.000000e+00> : vector<16xf32>
    %1155 = vector.multi_reduction <add>, %1154, %cst_454 [1] : vector<16x128xf32> to vector<16xf32>
    %1156 = vector.shape_cast %1155 : vector<16xf32> to vector<16x1xf32>
    %cst_455 = arith.constant 1.280000e+02 : f32
    %1157 = vector.broadcast %cst_455 : f32 to vector<16x1xf32>
    %1158 = arith.divf %1156, %1157 : vector<16x1xf32>
    %1159 = vector.broadcast %1158 : vector<16x1xf32> to vector<16x128xf32>
    %1160 = arith.subf %1154, %1159 : vector<16x128xf32>
    %1161 = arith.mulf %1160, %1160 : vector<16x128xf32>
    %cst_456 = arith.constant dense<0.000000e+00> : vector<16xf32>
    %1162 = vector.multi_reduction <add>, %1161, %cst_456 [1] : vector<16x128xf32> to vector<16xf32>
    %1163 = vector.shape_cast %1162 : vector<16xf32> to vector<16x1xf32>
    %cst_457 = arith.constant 1.280000e+02 : f32
    %1164 = vector.broadcast %cst_457 : f32 to vector<16x1xf32>
    %1165 = arith.divf %1163, %1164 : vector<16x1xf32>
    %1166 = vector.broadcast %1158 : vector<16x1xf32> to vector<16x128xf32>
    %1167 = arith.subf %1154, %1166 : vector<16x128xf32>
    %cst_458 = arith.constant 9.99999974E-6 : f32
    %1168 = vector.broadcast %cst_458 : f32 to vector<16x1xf32>
    %1169 = arith.addf %1165, %1168 : vector<16x1xf32>
    %1170 = math.rsqrt %1169 : vector<16x1xf32>
    %1171 = vector.broadcast %1170 : vector<16x1xf32> to vector<16x128xf32>
    %1172 = arith.mulf %1167, %1171 : vector<16x128xf32>
    %c0_459 = arith.constant 0 : index
    %c0_460 = arith.constant 0 : index
    %1173 = vector.load %arg16[%c0_459, %c0_460] : memref<1x128xf32, #tpu.memory_space<vmem>>, vector<1x128xf32>
    %1174 = vector.broadcast %1173 : vector<1x128xf32> to vector<16x128xf32>
    %1175 = arith.mulf %1172, %1174 : vector<16x128xf32>
    %c0_461 = arith.constant 0 : index
    %c0_462 = arith.constant 0 : index
    %1176 = vector.load %arg17[%c0_461, %c0_462] : memref<1x128xf32, #tpu.memory_space<vmem>>, vector<1x128xf32>
    %1177 = vector.broadcast %1176 : vector<1x128xf32> to vector<16x128xf32>
    %1178 = arith.addf %1175, %1177 : vector<16x128xf32>
    %cst_463 = arith.constant 0.000000e+00 : f32
    %1179 = vector.broadcast %cst_463 : f32 to vector<16x128xf32>
    %1180 = arith.maximumf %1178, %1179 : vector<16x128xf32>
    %1181 = arith.truncf %1180 : vector<16x128xf32> to vector<16x128xbf16>
    %c0_464 = arith.constant 0 : index
    %c0_465 = arith.constant 0 : index
    %1182 = vector.load %arg18[%c0_464, %c0_465] : memref<128x128xbf16, #tpu.memory_space<vmem>>, vector<128x128xbf16>
    %cst_466 = arith.constant dense<0.000000e+00> : vector<16x128xf32>
    %1183 = tpu.matmul %1181, %1182, %cst_466 {dimension_numbers = #tpu.dot_dimension_numbers<[1], [0], [0], [1], [0, 0, 1, 1], [], []>} : vector<16x128xbf16>, vector<128x128xbf16>, vector<16x128xf32> -> vector<16x128xf32>
    %c0_467 = arith.constant 0 : index
    %c0_468 = arith.constant 0 : index
    %1184 = vector.load %arg19[%c0_467, %c0_468] : memref<1x128xf32, #tpu.memory_space<vmem>>, vector<1x128xf32>
    %1185 = vector.broadcast %1184 : vector<1x128xf32> to vector<16x128xf32>
    %1186 = arith.addf %1183, %1185 : vector<16x128xf32>
    %c0_469 = arith.constant 0 : index
    %c0_470 = arith.constant 0 : index
    %1187 = vector.load %arg20[%c0_469, %c0_470] : memref<16x128xf32, #tpu.memory_space<vmem>>, vector<16x128xf32>
    tpu.vector_store %arg20[%c0_469, %c0_470], %1186 {strides = array<i32>} : memref<16x128xf32, #tpu.memory_space<vmem>>, vector<16x128xf32>,
    return
  }
  func.func @transform_0(%arg0: i32) -> (i32, i32) {
    %c0_i32 = arith.constant 0 : i32
    %c0_i32_0 = arith.constant 0 : i32
    %c0_i32_1 = arith.constant 0 : i32
    return %c0_i32, %c0_i32_0 : i32, i32
  }
  func.func @transform_1(%arg0: i32) -> (i32, i32) {
    %c0_i32 = arith.constant 0 : i32
    %c0_i32_0 = arith.constant 0 : i32
    %c0_i32_1 = arith.constant 0 : i32
    return %c0_i32, %c0_i32_0 : i32, i32
  }
  func.func @transform_2(%arg0: i32) -> (i32, i32) {
    %c0_i32 = arith.constant 0 : i32
    %c0_i32_0 = arith.constant 0 : i32
    %c0_i32_1 = arith.constant 0 : i32
    return %c0_i32, %c0_i32_0 : i32, i32
  }
  func.func @transform_3(%arg0: i32) -> (i32, i32) {
    %c0_i32 = arith.constant 0 : i32
    %c0_i32_0 = arith.constant 0 : i32
    %c0_i32_1 = arith.constant 0 : i32
    return %c0_i32, %c0_i32_0 : i32, i32
  }
  func.func @transform_4(%arg0: i32) -> (i32, i32) {
    %c0_i32 = arith.constant 0 : i32
    %c0_i32_0 = arith.constant 0 : i32
    %c0_i32_1 = arith.constant 0 : i32
    return %c0_i32, %c0_i32_0 : i32, i32
  }
  func.func @transform_5(%arg0: i32) -> (i32, i32) {
    %c0_i32 = arith.constant 0 : i32
    %c0_i32_0 = arith.constant 0 : i32
    %c0_i32_1 = arith.constant 0 : i32
    return %c0_i32, %c0_i32_0 : i32, i32
  }
  func.func @transform_6(%arg0: i32) -> (i32, i32) {
    %c0_i32 = arith.constant 0 : i32
    %c0_i32_0 = arith.constant 0 : i32
    %c0_i32_1 = arith.constant 0 : i32
    return %c0_i32, %c0_i32_0 : i32, i32
  }
  func.func @transform_7(%arg0: i32) -> (i32, i32) {
    %c0_i32 = arith.constant 0 : i32
    %c0_i32_0 = arith.constant 0 : i32
    %c0_i32_1 = arith.constant 0 : i32
    return %c0_i32, %c0_i32_0 : i32, i32
  }
  func.func @transform_8(%arg0: i32) -> (i32, i32) {
    %c0_i32 = arith.constant 0 : i32
    %c0_i32_0 = arith.constant 0 : i32
    %c0_i32_1 = arith.constant 0 : i32
    return %c0_i32, %c0_i32_0 : i32, i32
  }
  func.func @transform_9(%arg0: i32) -> (i32, i32) {
    %c0_i32 = arith.constant 0 : i32
    %c0_i32_0 = arith.constant 0 : i32
    %c0_i32_1 = arith.constant 0 : i32
    return %c0_i32, %c0_i32_0 : i32, i32
  }
  func.func @transform_10(%arg0: i32) -> (i32, i32) {
    %c0_i32 = arith.constant 0 : i32
    %c0_i32_0 = arith.constant 0 : i32
    %c0_i32_1 = arith.constant 0 : i32
    return %c0_i32, %c0_i32_0 : i32, i32
  }
  func.func @transform_11(%arg0: i32) -> (i32, i32) {
    %c0_i32 = arith.constant 0 : i32
    %c0_i32_0 = arith.constant 0 : i32
    %c0_i32_1 = arith.constant 0 : i32
    return %c0_i32, %c0_i32_0 : i32, i32
  }
  func.func @transform_12(%arg0: i32) -> (i32, i32) {
    %c0_i32 = arith.constant 0 : i32
    %c0_i32_0 = arith.constant 0 : i32
    %c0_i32_1 = arith.constant 0 : i32
    return %c0_i32, %c0_i32_0 : i32, i32
  }
  func.func @transform_13(%arg0: i32) -> (i32, i32) {
    %c0_i32 = arith.constant 0 : i32
    %c0_i32_0 = arith.constant 0 : i32
    %c0_i32_1 = arith.constant 0 : i32
    return %c0_i32, %c0_i32_0 : i32, i32
  }
  func.func @transform_14(%arg0: i32) -> (i32, i32) {
    %c0_i32 = arith.constant 0 : i32
    %c0_i32_0 = arith.constant 0 : i32
    %c0_i32_1 = arith.constant 0 : i32
    return %c0_i32, %c0_i32_0 : i32, i32
  }
  func.func @transform_15(%arg0: i32) -> (i32, i32) {
    %c0_i32 = arith.constant 0 : i32
    %c0_i32_0 = arith.constant 0 : i32
    %c0_i32_1 = arith.constant 0 : i32
    return %c0_i32, %c0_i32_0 : i32, i32
  }
  func.func @transform_16(%arg0: i32) -> (i32, i32) {
    %c0_i32 = arith.constant 0 : i32
    %c0_i32_0 = arith.constant 0 : i32
    %c0_i32_1 = arith.constant 0 : i32
    return %c0_i32, %c0_i32_0 : i32, i32
  }
  func.func @transform_17(%arg0: i32) -> (i32, i32) {
    %c0_i32 = arith.constant 0 : i32
    %c0_i32_0 = arith.constant 0 : i32
    %c0_i32_1 = arith.constant 0 : i32
    return %c0_i32, %c0_i32_0 : i32, i32
  }
  func.func @transform_18(%arg0: i32) -> (i32, i32) {
    %c0_i32 = arith.constant 0 : i32
    %c0_i32_0 = arith.constant 0 : i32
    %c0_i32_1 = arith.constant 0 : i32
    return %c0_i32, %c0_i32_0 : i32, i32
  }
  func.func @transform_19(%arg0: i32) -> (i32, i32) {
    %c0_i32 = arith.constant 0 : i32
    %c0_i32_0 = arith.constant 0 : i32
    %c0_i32_1 = arith.constant 0 : i32
    return %c0_i32, %c0_i32_0 : i32, i32
  }
  func.func @transform_20(%arg0: i32) -> (i32, i32) {
    %c0_i32 = arith.constant 0 : i32
    %c0_i32_0 = arith.constant 0 : i32
    %c0_i32_1 = arith.constant 0 : i32
    return %c0_i32, %c0_i32_0 : i32, i32
  }
  func.func @transform_21(%arg0: i32) -> (i32, i32) {
    %c0_i32 = arith.constant 0 : i32
    %c0_i32_0 = arith.constant 0 : i32
    %c0_i32_1 = arith.constant 0 : i32
    return %c0_i32, %c0_i32_0 : i32, i32
  }
}

</mosaic_0001>

<bundles_post_ra>
// kernel: forward.1
= control target key start
LH: loop header
LB: loop body
LE: loop exit
PB: predicated region body
PF: predicated region fallthrough
CT: control target
= control target key end

     0   :  { %s18546_s0 = inlined_call_operand.vmem [shape: bf16[16,128], index: 0, kind: input, shape index: {}]   ;;  %s18547_s1 = inlined_call_operand.hbm [shape: bf16[128,1024], index: 1, kind: input, shape index: {}]   ;;  %s18548_s2 = inlined_call_operand.hbm [shape: bf16[128,512], index: 2, kind: input, shape index: {}]   ;;  %s18549_s3 = inlined_call_operand.hbm [shape: bf16[128,512], index: 3, kind: input, shape index: {}]   ;;  %s18550_s4 = inlined_call_operand.vmem [shape: f32[1,1024], index: 4, kind: input, shape index: {}]   ;;  %s18551_s5 = inlined_call_operand.hbm [shape: bf16[256,1024], index: 5, kind: input, shape index: {}]   ;;  %s18552_s6 = inlined_call_operand.hbm [shape: bf16[128,512], index: 6, kind: input, shape index: {}]   ;;  %s18553_s7 = inlined_call_operand.hbm [shape: bf16[128,512], index: 7, kind: input, shape index: {}]   ;;  %s18554_s8 = inlined_call_operand.vmem [shape: f32[1,1024], index: 8, kind: input, shape index: {}]   ;;  %s18555_s9 = inlined_call_operand.vmem [shape: bf16[256,128], index: 9, kind: input, shape index: {}]   ;;  %s18556_s10 = inlined_call_operand.vmem [shape: f32[1,128], index: 10, kind: input, shape index: {}]   ;;  %s18557_s11 = inlined_call_operand.vmem [shape: f32[1,128], index: 11, kind: input, shape index: {}]   ;;  %s18558_s12 = inlined_call_operand.<no memory space> [shape: f32[1,1], index: 12, kind: input, shape index: {}]   ;;  %s18559_s13 = inlined_call_operand.hbm [shape: bf16[256,128], index: 13, kind: input, shape index: {}]   ;;  %s18560_s14 = inlined_call_operand.vmem [shape: f32[1,128], index: 14, kind: input, shape index: {}]   ;;  %s18561_s15 = inlined_call_operand.vmem [shape: f32[1,128], index: 15, kind: input, shape index: {}]   ;;  %s18562_s16 = inlined_call_operand.vmem [shape: f32[1,128], index: 16, kind: input, shape index: {}]   ;;  %s18563_s17 = inlined_call_operand.hbm [shape: bf16[128,128], index: 17, kind: input, shape index: {}]   ;;  %s18564_s18 = inlined_call_operand.vmem [shape: f32[1,128], index: 18, kind: input, shape index: {}]   ;;  %s18565_s19 = inlined_call_operand.vmem [shape: f32[16,128], index: 19, kind: output, shape index: {0}]   ;;  %s18566_s20 = inlined_call_operand.hbm [shape: f32[8,128], index: 20, kind: output, shape index: {1}]   ;;  %s18567_s21 = inlined_call_operand.hbm [shape: f32[8,128], index: 21, kind: output, shape index: {2}]  }
   0x1   :  { %18633 = sst [smem:[#allocation39_spill]] %s18546_s0  ;;  %v27_v0 = vstv %s18558_s12 }
   0x2   :  { %18634 = sst [smem:[#allocation40_spill]] %s18547_s1  ;;  %28 = vst [vmem:[#allocation5] sm:$0x1] %v27_v0 }
   0x3   :  { %18635 = sst [smem:[#allocation41_spill]] %s18548_s2 }
   0x4   :  { %18636 = sst [smem:[#allocation42_spill]] %s18549_s3 }
   0x5   :  { %18637 = sst [smem:[#allocation43_spill]] %s18550_s4 }
   0x6   :  { %18638 = sst [smem:[#allocation44_spill]] %s18551_s5 }
   0x7   :  { %18639 = sst [smem:[#allocation45_spill]] %s18564_s18 }
   0x8   :  { %18640 = sst [smem:[#allocation46_spill]] %s18565_s19 }
   0x9   :  { %29 = vsyncpa [#allocation7], 0 }
   0xa   :  { %30 = vsyncpa [#allocation10], 0 }
   0xb   :  { %31 = vsyncpa [#allocation13], 0 }
   0xc   :  { %32 = vsyncpa [#allocation16], 0 }
   0xd   :  { %33 = vsyncpa [#allocation19], 0 }
   0xe   :  { %34 = vsyncpa [#allocation8], 0 }
   0xf   :  { %35 = vsyncpa [#allocation22], 0  ;;  %s15993_s26 = smov [#allocation9]   ;;  %s18641_s29 = sld [smem:[#allocation41_spill]] }
  0x10   :  { %s55_s27 = sshll.u32 %s15993_s26, 4  ;;  %s56_s27 = int_to_ptr.vmem [resolvable:$true] %s55_s27 }
  0x15   :  { %s15759_s0 = scalar_lea.hbm %s18641_s29, 4096 }
  0x16   :  { %p15760_p0 = scmp.ne.s32.totalorder %s18641_s29, %s15759_s0  ;;  %p15763_p1 = scmp.lt.u32.totalorder %s15759_s0, %s18641_s29 }
  0x18   :  { %p15765_p2 = pnand %p15763_p1, %p15760_p0 }
  0x1a   :  { %15768 = shalt.err (!%p15765_p2)
}
  0x1b   :  { %s15769_s22 = scalar_lea.vmem %s56_s27, 4096  ;;  %p15774_p4 = scmp.lt.s32.totalorder %s56_s27, %s56_s27 }
  0x1c   :  { %p15770_p3 = scmp.ne.s32.totalorder %s56_s27, %s15769_s22  ;;  %p15775_p5 = scmp.lt.s32.totalorder %s15769_s22, %s15769_s22 }
  0x1e   :  { %p15776_p6 = por %p15775_p5, %p15774_p4 }
  0x20   :  { %p15777_p7 = pnand %p15776_p6, %p15770_p3 }
  0x22   :  { %15780 = shalt.err (!%p15777_p7)
}
  0x23   :  { %s15994_s23 = smov 256   ;;  %s15995_s1 = smov 16  }
  0x24   :  { %61 = dma.hbm_to_vmem [thread:$0]  %s18641_s29, 4096, %s56_s27, [#allocation10], %s15994_s23, %s15994_s23, %s15995_s1  }
  0x25   :  { %s15996_s25 = smov [#allocation12]   ;;  %s15997_s3 = smov [#allocation15]  }
  0x26   :  { %s81_s26 = sshll.u32 %s15996_s25, 4  ;;  %s105_s28 = sshll.u32 %s15997_s3, 4  ;;  %s82_s26 = int_to_ptr.vmem [resolvable:$true] %s81_s26  ;;  %s106_s28 = int_to_ptr.vmem [resolvable:$true] %s105_s28 }
  0x27   :  { %s18642_s30 = sld [smem:[#allocation44_spill]] }
  0x2d   :  { %s15781_s12 = scalar_lea.hbm %s18642_s30, 16384 }
  0x2e   :  { %p15782_p8 = scmp.ne.s32.totalorder %s18642_s30, %s15781_s12  ;;  %p15785_p9 = scmp.lt.u32.totalorder %s15781_s12, %s18642_s30 }
  0x30   :  { %p15787_p10 = pnand %p15785_p9, %p15782_p8 }
  0x32   :  { %15790 = shalt.err (!%p15787_p10)
}
  0x33   :  { %s15791_s27 = scalar_lea.vmem %s82_s26, 16384  ;;  %p15796_p12 = scmp.lt.s32.totalorder %s82_s26, %s82_s26 }
  0x34   :  { %p15792_p11 = scmp.ne.s32.totalorder %s82_s26, %s15791_s27  ;;  %p15797_p13 = scmp.lt.s32.totalorder %s15791_s27, %s15791_s27 }
  0x36   :  { %p15798_p0 = por %p15797_p13, %p15796_p12 }
  0x38   :  { %p15799_p1 = pnand %p15798_p0, %p15792_p11 }
  0x3a   :  { %15802 = shalt.err (!%p15799_p1)
}
  0x3b   :  { %s18573_s29 = smov 512   ;;  %s15999_s24 = smov 32  }
  0x3c   :  { %87 = dma.hbm_to_vmem [thread:$0]  %s18642_s30, 16384, %s82_s26, [#allocation13], %s18573_s29, %s18573_s29, %s15999_s24  }
  0x3d   :  { %s15803_s3 = scalar_lea.hbm %s18553_s7, 4096 }
  0x3e   :  { %p15804_p2 = scmp.ne.s32.totalorder %s18553_s7, %s15803_s3  ;;  %p15807_p3 = scmp.lt.u32.totalorder %s15803_s3, %s18553_s7 }
  0x40   :  { %p15809_p4 = pnand %p15807_p3, %p15804_p2 }
  0x42   :  { %15812 = shalt.err (!%p15809_p4)
}
  0x43   :  { %s15813_s22 = scalar_lea.vmem %s106_s28, 4096  ;;  %p15818_p6 = scmp.lt.s32.totalorder %s106_s28, %s106_s28 }
  0x44   :  { %p15814_p5 = scmp.ne.s32.totalorder %s106_s28, %s15813_s22  ;;  %p15819_p7 = scmp.lt.s32.totalorder %s15813_s22, %s15813_s22 }
  0x46   :  { %p15820_p8 = por %p15819_p7, %p15818_p6 }
  0x48   :  { %p15821_p9 = pnand %p15820_p8, %p15814_p5 }
  0x4a   :  { %15824 = shalt.err (!%p15821_p9)
}
  0x4b   :  { %111 = dma.hbm_to_vmem [thread:$0]  %s18553_s7, 4096, %s106_s28, [#allocation16], %s15994_s23, %s15994_s23, %s15995_s1  }
  0x4c   :  { %s16000_s27 = smov [#allocation6]   ;;  %s16001_s25 = smov [#allocation11]  }
  0x4d   :  { %s43_s2 = sshll.u32 %s16000_s27, 4  ;;  %s67_s18 = sshll.u32 %s16001_s25, 4  ;;  %s44_s2 = int_to_ptr.vmem [resolvable:$true] %s43_s2  ;;  %s68_s18 = int_to_ptr.vmem [resolvable:$true] %s67_s18 }
  0x4e   :  { %s18643_s0 = sld [smem:[#allocation40_spill]] }
  0x54   :  { %s15825_s4 = scalar_lea.hbm %s18643_s0, 8192 }
  0x55   :  { %p15826_p10 = scmp.ne.s32.totalorder %s18643_s0, %s15825_s4  ;;  %p15829_p11 = scmp.lt.u32.totalorder %s15825_s4, %s18643_s0 }
  0x57   :  { %p15831_p12 = pnand %p15829_p11, %p15826_p10 }
  0x59   :  { %15834 = shalt.err (!%p15831_p12)
}
  0x5a   :  { %s15835_s7 = scalar_lea.vmem %s44_s2, 8192  ;;  %p15840_p0 = scmp.lt.s32.totalorder %s44_s2, %s44_s2 }
  0x5b   :  { %p15836_p13 = scmp.ne.s32.totalorder %s44_s2, %s15835_s7  ;;  %p15841_p1 = scmp.lt.s32.totalorder %s15835_s7, %s15835_s7 }
  0x5d   :  { %p15842_p2 = por %p15841_p1, %p15840_p0 }
  0x5f   :  { %p15843_p3 = pnand %p15842_p2, %p15836_p13 }
  0x61   :  { %15846 = shalt.err (!%p15843_p3)
}
  0x62   :  { %s18644_s28 = smov 512   ;;  %s18645_s25 = sld [smem:[#allocation42_spill]] }
  0x63   :  { %49 = dma.hbm_to_vmem [thread:$0]  %s18643_s0, 8192, %s44_s2, [#allocation7], %s18644_s28, %s18644_s28, %s15999_s24  }
  0x68   :  { %s15847_s19 = scalar_lea.hbm %s18645_s25, 4096 }
  0x69   :  { %p15848_p4 = scmp.ne.s32.totalorder %s18645_s25, %s15847_s19  ;;  %p15851_p5 = scmp.lt.u32.totalorder %s15847_s19, %s18645_s25 }
  0x6b   :  { %p15853_p6 = pnand %p15851_p5, %p15848_p4 }
  0x6d   :  { %15856 = shalt.err (!%p15853_p6)
}
  0x6e   :  { %s15857_s22 = scalar_lea.vmem %s68_s18, 4096  ;;  %p15862_p8 = scmp.lt.s32.totalorder %s68_s18, %s68_s18 }
  0x6f   :  { %p15858_p7 = scmp.ne.s32.totalorder %s68_s18, %s15857_s22  ;;  %p15863_p9 = scmp.lt.s32.totalorder %s15857_s22, %s15857_s22 }
  0x71   :  { %p15864_p10 = por %p15863_p9, %p15862_p8 }
  0x73   :  { %p15865_p11 = pnand %p15864_p10, %p15858_p7 }
  0x75   :  { %15868 = shalt.err (!%p15865_p11)
}
  0x76   :  { %73 = dma.hbm_to_vmem [thread:$0]  %s18645_s25, 4096, %s68_s18, [#allocation10], %s15994_s23, %s15994_s23, %s15995_s1  }
  0x77   :  { %s16002_s0 = smov [#allocation14]   ;;  %s16003_s28 = smov [#allocation17]  }
  0x78   :  { %s93_s7 = sshll.u32 %s16002_s0, 4  ;;  %s127_s26 = sshll.u32 %s16003_s28, 4  ;;  %s94_s7 = int_to_ptr.vmem [resolvable:$true] %s93_s7  ;;  %s128_s26 = int_to_ptr.vmem [resolvable:$true] %s127_s26 }
  0x79   :  { %s15869_s29 = scalar_lea.hbm %s18552_s6, 4096 }
  0x7a   :  { %p15870_p12 = scmp.ne.s32.totalorder %s18552_s6, %s15869_s29  ;;  %p15873_p13 = scmp.lt.u32.totalorder %s15869_s29, %s18552_s6 }
  0x7c   :  { %p15875_p0 = pnand %p15873_p13, %p15870_p12 }
  0x7e   :  { %15878 = shalt.err (!%p15875_p0)
}
  0x7f   :  { %s15879_s18 = scalar_lea.vmem %s94_s7, 4096  ;;  %p15884_p2 = scmp.lt.s32.totalorder %s94_s7, %s94_s7 }
  0x80   :  { %p15880_p1 = scmp.ne.s32.totalorder %s94_s7, %s15879_s18  ;;  %p15885_p3 = scmp.lt.s32.totalorder %s15879_s18, %s15879_s18 }
  0x82   :  { %p15886_p4 = por %p15885_p3, %p15884_p2 }
  0x84   :  { %p15887_p5 = pnand %p15886_p4, %p15880_p1 }
  0x86   :  { %15890 = shalt.err (!%p15887_p5)
}
  0x87   :  { %99 = dma.hbm_to_vmem [thread:$0]  %s18552_s6, 4096, %s94_s7, [#allocation13], %s15994_s23, %s15994_s23, %s15995_s1  }
  0x88   :  { %s15891_s2 = scalar_lea.hbm %s18559_s13, 2048 }
  0x89   :  { %p15892_p6 = scmp.ne.s32.totalorder %s18559_s13, %s15891_s2  ;;  %p15895_p7 = scmp.lt.u32.totalorder %s15891_s2, %s18559_s13 }
  0x8b   :  { %p15897_p8 = pnand %p15895_p7, %p15892_p6 }
  0x8d   :  { %15900 = shalt.err (!%p15897_p8)
}
  0x8e   :  { %s15901_s29 = scalar_lea.vmem %s128_s26, 2048  ;;  %p15906_p10 = scmp.lt.s32.totalorder %s128_s26, %s128_s26 }
  0x8f   :  { %p15902_p9 = scmp.ne.s32.totalorder %s128_s26, %s15901_s29  ;;  %p15907_p11 = scmp.lt.s32.totalorder %s15901_s29, %s15901_s29 }
  0x91   :  { %p15908_p12 = por %p15907_p11, %p15906_p10 }
  0x93   :  { %p15909_p13 = pnand %p15908_p12, %p15902_p9 }
  0x95   :  { %15912 = shalt.err (!%p15909_p13)
}
  0x96   :  { %s16004_s6 = smov 64   ;;  %s16005_s23 = smov 4  }
  0x97   :  { %133 = dma.hbm_to_vmem [thread:$0]  %s18559_s13, 2048, %s128_s26, [#allocation16], %s16004_s6, %s16004_s6, %s16005_s23  }
  0x98   :  { %s16006_s19 = smov [#allocation18]   ;;  %s15913_s18 = scalar_lea.hbm %s18563_s17, 1024 }
  0x99   :  { %s145_s3 = sshll.u32 %s16006_s19, 4  ;;  %p15914_p0 = scmp.ne.s32.totalorder %s18563_s17, %s15913_s18  ;;  %s146_s3 = int_to_ptr.vmem [resolvable:$true] %s145_s3 }
  0x9a   :  { %p15917_p1 = scmp.lt.u32.totalorder %s15913_s18, %s18563_s17 }
  0x9c   :  { %p15919_p2 = pnand %p15917_p1, %p15914_p0 }
  0x9e   :  { %15922 = shalt.err (!%p15919_p2)
}
  0x9f   :  { %s15923_s2 = scalar_lea.vmem %s146_s3, 1024  ;;  %p15928_p4 = scmp.lt.s32.totalorder %s146_s3, %s146_s3 }
  0xa0   :  { %p15924_p3 = scmp.ne.s32.totalorder %s146_s3, %s15923_s2  ;;  %p15929_p5 = scmp.lt.s32.totalorder %s15923_s2, %s15923_s2 }
  0xa2   :  { %p15930_p6 = por %p15929_p5, %p15928_p4 }
  0xa4   :  { %p15931_p7 = pnand %p15930_p6, %p15924_p3 }
  0xa6   :  { %15934 = shalt.err (!%p15931_p7)
}
  0xa7   :  { %151 = dma.hbm_to_vmem [thread:$0]  %s18563_s17, 1024, %s146_s3, [#allocation19], %s16004_s6, %s16004_s6, %s16005_s23  }
  0xa8   :  { %15979 = dma.done.wait [#allocation7], 8192  }
  0xa9   :  { %15980 = vsyncadd [#allocation7], 4294959104 }
  0xaa   :  { %15981 = dma.done.wait [#allocation10], 8192  }
  0xab   :  { %15982 = vsyncadd [#allocation10], 4294959104 }
  0xac   :  { %15983 = dma.done.wait [#allocation13], 20480  }
  0xad   :  { %15984 = vsyncadd [#allocation13], 4294946816 }
  0xae   :  { %15985 = dma.done.wait [#allocation16], 6144  }
  0xaf   :  { %15986 = vsyncadd [#allocation16], 4294961152 }
  0xb0   :  { %15987 = dma.done.wait [#allocation19], 1024  }
  0xb1   :  { %15988 = vsyncadd [#allocation19], 4294966272  ;;  %v18582_v1 = vmov 0   ;;  %v181_v2 = vld [vmem:[#allocation6] sm:$0xff]  ;;  %v182_v4 = vld [vmem:[#allocation6 + $0x8] sm:$0xff]  ;;  %s18646_s28 = sld [smem:[#allocation39_spill]] }
  0xb2   :  { %645 = vmatprep.mubr.bf16.mxu0 %v18582_v1  ;;  %688 = vmatprep.mubr.bf16.mxu1 %v18582_v1  ;;  %v185_v3 = vld [vmem:[#allocation6 + $0x20] sm:$0xff]  ;;  %v186_v6 = vld [vmem:[#allocation6 + $0x28] sm:$0xff]  ;;  %v183_v63 = vld [vmem:[#allocation6 + $0x10] sm:$0xff]  ;;  %s18648_s29 = sld [smem:[#allocation43_spill]]  ;;  %vm12309_vm0 = vcmask 7168   ;;  %vm16009_vm1 = vmmov 0  }
  0xb3   :  { %14381 = vset.pattern.permute.xlu0 %v18582_v1  ;;  %14380 = vset.pattern.permute.xlu1 %v18582_v1  ;;  %v12930_v5 = vcombine.high %v181_v2, %v185_v3  ;;  %v12929_v7 = vcombine.low %v181_v2, %v185_v3  ;;  %v189_v8 = vld [vmem:[#allocation6 + $0x40] sm:$0xff]  ;;  %v12932_v10 = vcombine.high %v182_v4, %v186_v6  ;;  %v190_v13 = vld [vmem:[#allocation6 + $0x48] sm:$0xff]  ;;  %v187_v2 = vld [vmem:[#allocation6 + $0x30] sm:$0xff]  ;;  %s16010_s17 = smov [#allocation20]  }
  0xb4   :  { %v193_v9 = vld [vmem:[#allocation6 + $0x60] sm:$0xff]  ;;  %v12931_v11 = vcombine.low %v182_v4, %v186_v6  ;;  %v194_v14 = vld [vmem:[#allocation6 + $0x68] sm:$0xff]  ;;  %v184_v3 = vld [vmem:[#allocation6 + $0x18] sm:$0xff]  ;;  %s12899_s0 = sshll.u32 %s16010_s17, 4  ;;  %s12900_s0 = int_to_ptr.vmem [resolvable:$true] %s12899_s0 }
  0xb5   :  { %v12938_v12 = vcombine.high %v189_v8, %v193_v9  ;;  %v197_v15 = vld [vmem:[#allocation6 + $0x80] sm:$0xff]  ;;  %613 = vmatprep.subr.bf16.mxu0 %v12930_v5  ;;  %v12940_v16 = vcombine.high %v190_v13, %v194_v14  ;;  %v198_v18 = vld [vmem:[#allocation6 + $0x88] sm:$0xff]  ;;  %656 = vmatprep.subr.bf16.mxu1 %v12932_v10  ;;  %v12937_v20 = vcombine.low %v189_v8, %v193_v9  ;;  %v188_v4 = vld [vmem:[#allocation6 + $0x38] sm:$0xff]  ;;  %p15940_p9 = scmp.lt.s32.totalorder %s12900_s0, %s12900_s0 }
  0xb6   :  { %v201_v17 = vld [vmem:[#allocation6 + $0xa0] sm:$0xff]  ;;  %v202_v19 = vld [vmem:[#allocation6 + $0xa8] sm:$0xff]  ;;  %614 = vmatpush1.bf16.msra.mxu0 %v12929_v7  ;;  %657 = vmatpush1.bf16.msra.mxu1 %v12931_v11  ;;  %v12939_v21 = vcombine.low %v190_v13, %v194_v14  ;;  %v12934_v8 = vcombine.high %v183_v63, %v187_v2  ;;  %v191_v9 = vld [vmem:[#allocation6 + $0x50] sm:$0xff]  ;;  %v12936_v10 = vcombine.high %v184_v3, %v188_v4 }
  0xb7   :  { %615 = vmatprep.subr.bf16.mxu0 %v12938_v12  ;;  %v12946_v22 = vcombine.high %v197_v15, %v201_v17  ;;  %658 = vmatprep.subr.bf16.mxu1 %v12940_v16  ;;  %v12948_v23 = vcombine.high %v198_v18, %v202_v19  ;;  %v205_v24 = vld [vmem:[#allocation6 + $0xc0] sm:$0xff]  ;;  %v206_v26 = vld [vmem:[#allocation6 + $0xc8] sm:$0xff]  ;;  %v12945_v28 = vcombine.low %v197_v15, %v201_v17  ;;  %v195_v11 = vld [vmem:[#allocation6 + $0x70] sm:$0xff] }
  0xb8   :  { %v209_v25 = vld [vmem:[#allocation6 + $0xe0] sm:$0xff]  ;;  %v210_v27 = vld [vmem:[#allocation6 + $0xe8] sm:$0xff]  ;;  %v12947_v29 = vcombine.low %v198_v18, %v202_v19  ;;  %v192_v12 = vld [vmem:[#allocation6 + $0x58] sm:$0xff]  ;;  %v12933_v14 = vcombine.low %v183_v63, %v187_v2  ;;  %v12935_v15 = vcombine.low %v184_v3, %v188_v4  ;;  %v12942_v16 = vcombine.high %v191_v9, %v195_v11 }
  0xb9   :  { %v12954_v30 = vcombine.high %v205_v24, %v209_v25  ;;  %v12956_v31 = vcombine.high %v206_v26, %v210_v27  ;;  %v213_v32 = vld [vmem:[#allocation6 + $0x100] sm:$0xff]  ;;  %v214_v34 = vld [vmem:[#allocation6 + $0x108] sm:$0xff]  ;;  %v12953_v36 = vcombine.low %v205_v24, %v209_v25  ;;  %v12955_v37 = vcombine.low %v206_v26, %v210_v27  ;;  %v196_v13 = vld [vmem:[#allocation6 + $0x78] sm:$0xff] }
  0xba   :  { %616 = vmatpush1.bf16.msra.mxu0 %v12937_v20  ;;  %659 = vmatpush1.bf16.msra.mxu1 %v12939_v21  ;;  %v217_v33 = vld [vmem:[#allocation6 + $0x120] sm:$0xff]  ;;  %v218_v35 = vld [vmem:[#allocation6 + $0x128] sm:$0xff]  ;;  %v199_v17 = vld [vmem:[#allocation6 + $0x90] sm:$0xff]  ;;  %v12944_v18 = vcombine.high %v192_v12, %v196_v13 }
  0xbb   :  { %617 = vmatprep.subr.bf16.mxu0 %v12946_v22  ;;  %660 = vmatprep.subr.bf16.mxu1 %v12948_v23  ;;  %v12962_v38 = vcombine.high %v213_v32, %v217_v33  ;;  %v12964_v39 = vcombine.high %v214_v34, %v218_v35  ;;  %v221_v40 = vld [vmem:[#allocation6 + $0x140] sm:$0xff]  ;;  %v222_v42 = vld [vmem:[#allocation6 + $0x148] sm:$0xff]  ;;  %v12961_v44 = vcombine.low %v213_v32, %v217_v33  ;;  %v203_v19 = vld [vmem:[#allocation6 + $0xb0] sm:$0xff] }
  0xbc   :  { %v225_v41 = vld [vmem:[#allocation6 + $0x160] sm:$0xff]  ;;  %v226_v43 = vld [vmem:[#allocation6 + $0x168] sm:$0xff]  ;;  %v12963_v45 = vcombine.low %v214_v34, %v218_v35  ;;  %v200_v20 = vld [vmem:[#allocation6 + $0x98] sm:$0xff]  ;;  %v12941_v22 = vcombine.low %v191_v9, %v195_v11  ;;  %v12943_v23 = vcombine.low %v192_v12, %v196_v13  ;;  %v12950_v24 = vcombine.high %v199_v17, %v203_v19 }
  0xbd   :  { %v12970_v46 = vcombine.high %v221_v40, %v225_v41  ;;  %v12972_v47 = vcombine.high %v222_v42, %v226_v43  ;;  %v229_v48 = vld [vmem:[#allocation6 + $0x180] sm:$0xff]  ;;  %v230_v50 = vld [vmem:[#allocation6 + $0x188] sm:$0xff]  ;;  %v12969_v52 = vcombine.low %v221_v40, %v225_v41  ;;  %v12971_v53 = vcombine.low %v222_v42, %v226_v43  ;;  %v204_v21 = vld [vmem:[#allocation6 + $0xb8] sm:$0xff] }
  0xbe   :  { %618 = vmatpush1.bf16.msra.mxu0 %v12945_v28  ;;  %661 = vmatpush1.bf16.msra.mxu1 %v12947_v29  ;;  %v233_v49 = vld [vmem:[#allocation6 + $0x1a0] sm:$0xff]  ;;  %v234_v51 = vld [vmem:[#allocation6 + $0x1a8] sm:$0xff]  ;;  %v207_v25 = vld [vmem:[#allocation6 + $0xd0] sm:$0xff]  ;;  %v12952_v26 = vcombine.high %v200_v20, %v204_v21 }
  0xbf   :  { %619 = vmatprep.subr.bf16.mxu0 %v12954_v30  ;;  %662 = vmatprep.subr.bf16.mxu1 %v12956_v31  ;;  %v12978_v54 = vcombine.high %v229_v48, %v233_v49  ;;  %v237_v55 = vld [vmem:[#allocation6 + $0x1c0] sm:$0xff]  ;;  %v12980_v56 = vcombine.high %v230_v50, %v234_v51  ;;  %v238_v58 = vld [vmem:[#allocation6 + $0x1c8] sm:$0xff]  ;;  %v12977_v60 = vcombine.low %v229_v48, %v233_v49  ;;  %v211_v27 = vld [vmem:[#allocation6 + $0xf0] sm:$0xff] }
  0xc0   :  { %v241_v57 = vld [vmem:[#allocation6 + $0x1e0] sm:$0xff]  ;;  %v242_v59 = vld [vmem:[#allocation6 + $0x1e8] sm:$0xff]  ;;  %v12979_v61 = vcombine.low %v230_v50, %v234_v51  ;;  %v208_v28 = vld [vmem:[#allocation6 + $0xd8] sm:$0xff]  ;;  %v12949_v30 = vcombine.low %v199_v17, %v203_v19  ;;  %v12951_v31 = vcombine.low %v200_v20, %v204_v21  ;;  %v12958_v32 = vcombine.high %v207_v25, %v211_v27 }
  0xc1   :  { %v12986_v62 = vcombine.high %v237_v55, %v241_v57  ;;  %v12988_v0 = vcombine.high %v238_v58, %v242_v59  ;;  %v12985_v5 = vcombine.low %v237_v55, %v241_v57  ;;  %v12987_v6 = vcombine.low %v238_v58, %v242_v59  ;;  %v16246_v7 = vld [vmem:[%s18646_s28] sm:$0xff]   ;;  %v212_v29 = vld [vmem:[#allocation6 + $0xf8] sm:$0xff]  ;;  %s16011_s28 = smov [#allocation21]  }
  0xc2   :  { %620 = vmatpush1.bf16.msra.mxu0 %v12953_v36  ;;  %663 = vmatpush1.bf16.msra.mxu1 %v12955_v37  ;;  %v215_v33 = vld [vmem:[#allocation6 + $0x110] sm:$0xff]  ;;  %v12960_v34 = vcombine.high %v208_v28, %v212_v29  ;;  %v216_v36 = vld [vmem:[#allocation6 + $0x118] sm:$0xff]  ;;  %s12909_s30 = sshll.u32 %s16011_s28, 4  ;;  %s12910_s30 = int_to_ptr.vmem [resolvable:$true] %s12909_s30 }
  0xc3   :  { %621 = vmatprep.subr.bf16.mxu0 %v12962_v38  ;;  %664 = vmatprep.subr.bf16.mxu1 %v12964_v39  ;;  %v219_v35 = vld [vmem:[#allocation6 + $0x130] sm:$0xff]  ;;  %v220_v37 = vld [vmem:[#allocation6 + $0x138] sm:$0xff]  ;;  %v12957_v38 = vcombine.low %v207_v25, %v211_v27  ;;  %v12959_v39 = vcombine.low %v208_v28, %v212_v29 }
  0xc4   :  { %v12966_v40 = vcombine.high %v215_v33, %v219_v35  ;;  %v223_v41 = vld [vmem:[#allocation6 + $0x150] sm:$0xff]  ;;  %v12968_v42 = vcombine.high %v216_v36, %v220_v37  ;;  %v16258_v9 = vld [vmem:[#allocation9 + $0x8] ss:$16 sps:$4 sm:$0xff]   ;;  %v16263_v11 = vld [vmem:[#allocation9 + $0x2c] ss:$16 sps:$4 sm:$0xff]  }
  0xc5   :  { %v227_v43 = vld [vmem:[#allocation6 + $0x170] sm:$0xff]  ;;  %v16269_v13 = vld [vmem:[#allocation9 + $0x28] ss:$16 sps:$4 sm:$0xff]  }
  0xc6   :  { %622 = vmatpush1.bf16.msra.mxu0 %v12961_v44  ;;  %665 = vmatpush1.bf16.msra.mxu1 %v12963_v45  ;;  %v224_v44 = vld [vmem:[#allocation6 + $0x158] sm:$0xff]  ;;  %v12974_v48 = vcombine.high %v223_v41, %v227_v43  ;;  %v231_v49 = vld [vmem:[#allocation6 + $0x190] sm:$0xff] }
  0xc7   :  { %623 = vmatprep.subr.bf16.mxu0 %v12970_v46  ;;  %666 = vmatprep.subr.bf16.mxu1 %v12972_v47  ;;  %v228_v45 = vld [vmem:[#allocation6 + $0x178] sm:$0xff]  ;;  %v12965_v46 = vcombine.low %v215_v33, %v219_v35  ;;  %v12967_v47 = vcombine.low %v216_v36, %v220_v37  ;;  %v235_v51 = vld [vmem:[#allocation6 + $0x1b0] sm:$0xff] }
  0xc8   :  { %v12976_v50 = vcombine.high %v224_v44, %v228_v45  ;;  %v12975_v55 = vcombine.low %v224_v44, %v228_v45  ;;  %v239_v57 = vld [vmem:[#allocation6 + $0x1d0] sm:$0xff]  ;;  %v16283_v17 = vld [vmem:[#allocation9 + $0x48] ss:$16 sps:$4 sm:$0xff]  }
  0xc9   :  { %v243_v59 = vld [vmem:[#allocation6 + $0x1f0] sm:$0xff]  ;;  %v16296_v20 = vld [vmem:[#allocation9 + $0x68] ss:$16 sps:$4 sm:$0xff]  }
  0xca   :  { %624 = vmatpush1.bf16.msra.mxu0 %v12969_v52  ;;  %667 = vmatpush1.bf16.msra.mxu1 %v12971_v53  ;;  %v232_v52 = vld [vmem:[#allocation6 + $0x198] sm:$0xff]  ;;  %v12989_v3 = vcombine.low %v239_v57, %v243_v59  ;;  %v16266_v12 = vld [vmem:[#allocation9 + $0x20] ss:$16 sps:$4 sm:$0xff]   ;;  %v16298_v21 = vld [vmem:[#allocation9 + $0x84] ss:$16 sps:$4 sm:$0xff]  }
  0xcb   :  { %625 = vmatprep.subr.bf16.mxu0 %v12978_v54  ;;  %668 = vmatprep.subr.bf16.mxu1 %v12980_v56  ;;  %v236_v53 = vld [vmem:[#allocation6 + $0x1b8] sm:$0xff]  ;;  %v12973_v54 = vcombine.low %v223_v41, %v227_v43  ;;  %v12982_v56 = vcombine.high %v231_v49, %v235_v51  ;;  %v16294_v19 = vld [vmem:[#allocation9 + $0x60] ss:$16 sps:$4 sm:$0xff]   ;;  %v16310_v25 = vld [vmem:[#allocation9 + $0xa4] ss:$16 sps:$4 sm:$0xff]  }
  0xcc   :  { %v12984_v58 = vcombine.high %v232_v52, %v236_v53  ;;  %v12983_v63 = vcombine.low %v232_v52, %v236_v53  ;;  %v16318_v27 = vld [vmem:[#allocation9 + $0xa0] ss:$16 sps:$4 sm:$0xff]   ;;  %v16320_v28 = vld [vmem:[#allocation9 + $0xa8] ss:$16 sps:$4 sm:$0xff]   ;;  %v16322_v29 = vld [vmem:[#allocation9 + $0xc4] ss:$16 sps:$4 sm:$0xff]  }
  0xcd   :  { %v16334_v33 = vld [vmem:[#allocation9 + $0xe4] ss:$16 sps:$4 sm:$0xff]   ;;  %v16342_v35 = vld [vmem:[#allocation9 + $0xe0] ss:$16 sps:$4 sm:$0xff]   ;;  %v16344_v36 = vld [vmem:[#allocation9 + $0xe8] ss:$16 sps:$4 sm:$0xff]  }
  0xce   :  { %626 = vmatpush1.bf16.msra.mxu0 %v12977_v60  ;;  %669 = vmatpush1.bf16.msra.mxu1 %v12979_v61  ;;  %v240_v60 = vld [vmem:[#allocation6 + $0x1d8] sm:$0xff]  ;;  %v16346_v37 = vld [vmem:[#allocation11 + $0x4] ss:$16 sps:$4 sm:$0xff]   ;;  %v14437_v43 = vld [vmem:[#allocation11 + $0x20] ss:$16 sps:$4 sm:$0xff]  }
  0xcf   :  { %627 = vmatprep.subr.bf16.mxu0 %v12986_v62  ;;  %670 = vmatprep.subr.bf16.mxu1 %v12988_v0  ;;  %v244_v61 = vld [vmem:[#allocation6 + $0x1f8] sm:$0xff]  ;;  %v12981_v62 = vcombine.low %v231_v49, %v235_v51  ;;  %v12990_v0 = vcombine.high %v239_v57, %v243_v59  ;;  %v14439_v41 = vld [vmem:[#allocation11 + $0x24] ss:$16 sps:$4 sm:$0xff]   ;;  %v14449_v51 = vld [vmem:[#allocation11 + $0x60] ss:$16 sps:$4 sm:$0xff]  }
  0xd0   :  { %v12992_v2 = vcombine.high %v240_v60, %v244_v61  ;;  %v12991_v4 = vcombine.low %v240_v60, %v244_v61  ;;  %v14440_v44 = vld [vmem:[#allocation11 + $0x28] ss:$16 sps:$4 sm:$0xff]   ;;  %v14445_v45 = vld [vmem:[#allocation11 + $0x44] ss:$16 sps:$4 sm:$0xff]   ;;  %v14461_v59 = vld [vmem:[#allocation11 + $0xa0] ss:$16 sps:$4 sm:$0xff]  }
  0xd1   :  { %v14451_v49 = vld [vmem:[#allocation11 + $0x64] ss:$16 sps:$4 sm:$0xff]   ;;  %v14452_v52 = vld [vmem:[#allocation11 + $0x68] ss:$16 sps:$4 sm:$0xff]  }
  0xd2   :  { %628 = vmatpush1.bf16.msra.mxu0 %v12985_v5  ;;  %671 = vmatpush1.bf16.msra.mxu1 %v12987_v6  ;;  %v16252_v5 = vld [vmem:[#allocation9 + $0x4] ss:$16 sps:$4 sm:$0xff]   ;;  %v16254_v6 = vld [vmem:[#allocation9 + $0xc] ss:$16 sps:$4 sm:$0xff]   ;;  %v14464_v60 = vld [vmem:[#allocation11 + $0xa8] ss:$16 sps:$4 sm:$0xff]  }
  0xd3   :  { %699 = vmatprep.subr.bf16.mxu0 %v12934_v8  ;;  %742 = vmatprep.subr.bf16.mxu1 %v12936_v10  ;;  %v16256_v8 = vld [vmem:[#allocation9] ss:$16 sps:$4 sm:$0xff]   ;;  %v16260_v10 = vld [vmem:[#allocation9 + $0x24] ss:$16 sps:$4 sm:$0xff]  }
  0xd4   :  { %v14457_v53 = vld [vmem:[#allocation11 + $0x84] ss:$16 sps:$4 sm:$0xff]  }
  0xd5   :  { %646 = vmatmul.mubr.bf16.vlgmr.msra.gmra.mrb[0].mxu0 %v16246_v7  ;;  %689 = vmatmul.mubr.bf16.vlgmr.msra.gmra.mrb[0].mxu1 %v16246_v7  ;;  %v14463_v57 = vld [vmem:[#allocation11 + $0xa4] ss:$16 sps:$4 sm:$0xff]  }
  0xd6   :  { %700 = vmatpush1.bf16.msra.mxu0 %v12933_v14  ;;  %743 = vmatpush1.bf16.msra.mxu1 %v12935_v15  ;;  %v16271_v14 = vld [vmem:[#allocation9 + $0x44] ss:$16 sps:$4 sm:$0xff]   ;;  %v16275_v15 = vld [vmem:[#allocation9 + $0x4c] ss:$16 sps:$4 sm:$0xff]  }
  0xd7   :  { %701 = vmatprep.subr.bf16.mxu0 %v12942_v16  ;;  %744 = vmatprep.subr.bf16.mxu1 %v12944_v18  ;;  %v16280_v16 = vld [vmem:[#allocation9 + $0x40] ss:$16 sps:$4 sm:$0xff]   ;;  %v16285_v18 = vld [vmem:[#allocation9 + $0x64] ss:$16 sps:$4 sm:$0xff]  }
  0xd8   :  { %731 = vmatprep.mubr.bf16.mxu0 %v18582_v1  ;;  %774 = vmatprep.mubr.bf16.mxu1 %v18582_v1  ;;  %v14469_v61 = vld [vmem:[#allocation11 + $0xc4] ss:$16 sps:$4 sm:$0xff]  }
  0xda   :  { %702 = vmatpush1.bf16.msra.mxu0 %v12941_v22  ;;  %745 = vmatpush1.bf16.msra.mxu1 %v12943_v23  ;;  %v16301_v22 = vld [vmem:[#allocation9 + $0x8c] ss:$16 sps:$4 sm:$0xff]   ;;  %v16306_v23 = vld [vmem:[#allocation9 + $0x80] ss:$16 sps:$4 sm:$0xff]  }
  0xdb   :  { %703 = vmatprep.subr.bf16.mxu0 %v12950_v24  ;;  %746 = vmatprep.subr.bf16.mxu1 %v12952_v26  ;;  %v16308_v24 = vld [vmem:[#allocation9 + $0x88] ss:$16 sps:$4 sm:$0xff]   ;;  %v16313_v26 = vld [vmem:[#allocation9 + $0xac] ss:$16 sps:$4 sm:$0xff]  }
  0xde   :  { %704 = vmatpush1.bf16.msra.mxu0 %v12949_v30  ;;  %747 = vmatpush1.bf16.msra.mxu1 %v12951_v31  ;;  %v16325_v30 = vld [vmem:[#allocation9 + $0xcc] ss:$16 sps:$4 sm:$0xff]   ;;  %v16330_v31 = vld [vmem:[#allocation9 + $0xc0] ss:$16 sps:$4 sm:$0xff]  }
  0xdf   :  { %705 = vmatprep.subr.bf16.mxu0 %v12958_v32  ;;  %748 = vmatprep.subr.bf16.mxu1 %v12960_v34  ;;  %v16332_v32 = vld [vmem:[#allocation9 + $0xc8] ss:$16 sps:$4 sm:$0xff]   ;;  %v16337_v34 = vld [vmem:[#allocation9 + $0xec] ss:$16 sps:$4 sm:$0xff]  }
  0xe2   :  { %706 = vmatpush1.bf16.msra.mxu0 %v12957_v38  ;;  %749 = vmatpush1.bf16.msra.mxu1 %v12959_v39  ;;  %v16349_v38 = vld [vmem:[#allocation11 + $0xc] ss:$16 sps:$4 sm:$0xff]   ;;  %v14431_v39 = vld [vmem:[#allocation11] ss:$16 sps:$4 sm:$0xff]  }
  0xe3   :  { %707 = vmatprep.subr.bf16.mxu0 %v12966_v40  ;;  %750 = vmatprep.subr.bf16.mxu1 %v12968_v42  ;;  %v14434_v40 = vld [vmem:[#allocation11 + $0x8] ss:$16 sps:$4 sm:$0xff]   ;;  %v14442_v42 = vld [vmem:[#allocation11 + $0x2c] ss:$16 sps:$4 sm:$0xff]  }
  0xe6   :  { %708 = vmatpush1.bf16.msra.mxu0 %v12965_v46  ;;  %751 = vmatpush1.bf16.msra.mxu1 %v12967_v47  ;;  %v14448_v46 = vld [vmem:[#allocation11 + $0x4c] ss:$16 sps:$4 sm:$0xff]   ;;  %v14443_v47 = vld [vmem:[#allocation11 + $0x40] ss:$16 sps:$4 sm:$0xff]  }
  0xe7   :  { %709 = vmatprep.subr.bf16.mxu0 %v12974_v48  ;;  %752 = vmatprep.subr.bf16.mxu1 %v12976_v50  ;;  %v14446_v48 = vld [vmem:[#allocation11 + $0x48] ss:$16 sps:$4 sm:$0xff]   ;;  %v14454_v50 = vld [vmem:[#allocation11 + $0x6c] ss:$16 sps:$4 sm:$0xff]  }
  0xea   :  { %710 = vmatpush1.bf16.msra.mxu0 %v12973_v54  ;;  %753 = vmatpush1.bf16.msra.mxu1 %v12975_v55  ;;  %v14460_v54 = vld [vmem:[#allocation11 + $0x8c] ss:$16 sps:$4 sm:$0xff]   ;;  %v14455_v55 = vld [vmem:[#allocation11 + $0x80] ss:$16 sps:$4 sm:$0xff]  }
  0xeb   :  { %711 = vmatprep.subr.bf16.mxu0 %v12982_v56  ;;  %754 = vmatprep.subr.bf16.mxu1 %v12984_v58  ;;  %v14458_v56 = vld [vmem:[#allocation11 + $0x88] ss:$16 sps:$4 sm:$0xff]   ;;  %v14466_v58 = vld [vmem:[#allocation11 + $0xac] ss:$16 sps:$4 sm:$0xff]  }
  0xee   :  { %712 = vmatpush1.bf16.msra.mxu0 %v12981_v62  ;;  %755 = vmatpush1.bf16.msra.mxu1 %v12983_v63  ;;  %v14472_v62 = vld [vmem:[#allocation11 + $0xcc] ss:$16 sps:$4 sm:$0xff]   ;;  %v14467_v63 = vld [vmem:[#allocation11 + $0xc0] ss:$16 sps:$4 sm:$0xff]  }
  0xef   :  { %713 = vmatprep.subr.bf16.mxu0 %v12990_v0  ;;  %756 = vmatprep.subr.bf16.mxu1 %v12992_v2  ;;  %v14470_v0 = vld [vmem:[#allocation11 + $0xc8] ss:$16 sps:$4 sm:$0xff]   ;;  %v14475_v2 = vld [vmem:[#allocation11 + $0xe4] ss:$16 sps:$4 sm:$0xff]  }
  0xf2   :  { %714 = vmatpush1.bf16.msra.mxu0 %v12989_v3  ;;  %757 = vmatpush1.bf16.msra.mxu1 %v12991_v4  ;;  %v14478_v3 = vld [vmem:[#allocation11 + $0xec] ss:$16 sps:$4 sm:$0xff]   ;;  %v14473_v4 = vld [vmem:[#allocation11 + $0xe0] ss:$16 sps:$4 sm:$0xff]  }
  0xf3   :  { %997 = vmatprep.subr.bf16.mxu0 %v16252_v5  ;;  %1038 = vmatprep.subr.bf16.mxu1 %v16254_v6 }
  0xf5   :  { %732 = vmatmul.mubr.bf16.vlgmr.msra.gmra.mrb[4].mxu0 %v16246_v7  ;;  %775 = vmatmul.mubr.bf16.vlgmr.msra.gmra.mrb[4].mxu1 %v16246_v7  ;;  %v16289_v7 = vld [vmem:[#allocation9 + $0x6c] ss:$16 sps:$4 sm:$0xff]  }
  0xf6   :  { %998 = vmatpush1.bf16.msra.mxu0 %v16256_v8  ;;  %1039 = vmatpush1.bf16.msra.mxu1 %v16258_v9 }
  0xf7   :  { %999 = vmatprep.subr.bf16.mxu0 %v16260_v10  ;;  %1040 = vmatprep.subr.bf16.mxu1 %v16263_v11 }
  0xf8   :  { %1029 = vmatprep.mubr.bf16.mxu0 %v18582_v1  ;;  %1070 = vmatprep.mubr.bf16.mxu1 %v18582_v1 }
  0xfa   :  { %1000 = vmatpush1.bf16.msra.mxu0 %v16266_v12  ;;  %1041 = vmatpush1.bf16.msra.mxu1 %v16269_v13 }
  0xfb   :  { %1001 = vmatprep.subr.bf16.mxu0 %v16271_v14  ;;  %1042 = vmatprep.subr.bf16.mxu1 %v16275_v15 }
  0xfe   :  { %1002 = vmatpush1.bf16.msra.mxu0 %v16280_v16  ;;  %1043 = vmatpush1.bf16.msra.mxu1 %v16283_v17 }
  0xff   :  { %1003 = vmatprep.subr.bf16.mxu0 %v16285_v18  ;;  %1044 = vmatprep.subr.bf16.mxu1 %v16289_v7 }
 0x102   :  { %1004 = vmatpush1.bf16.msra.mxu0 %v16294_v19  ;;  %1045 = vmatpush1.bf16.msra.mxu1 %v16296_v20 }
 0x103   :  { %1005 = vmatprep.subr.bf16.mxu0 %v16298_v21  ;;  %1046 = vmatprep.subr.bf16.mxu1 %v16301_v22 }
 0x106   :  { %1006 = vmatpush1.bf16.msra.mxu0 %v16306_v23  ;;  %1047 = vmatpush1.bf16.msra.mxu1 %v16308_v24 }
 0x107   :  { %1007 = vmatprep.subr.bf16.mxu0 %v16310_v25  ;;  %1048 = vmatprep.subr.bf16.mxu1 %v16313_v26 }
 0x10a   :  { %1008 = vmatpush1.bf16.msra.mxu0 %v16318_v27  ;;  %1049 = vmatpush1.bf16.msra.mxu1 %v16320_v28 }
 0x10b   :  { %1009 = vmatprep.subr.bf16.mxu0 %v16322_v29  ;;  %1050 = vmatprep.subr.bf16.mxu1 %v16325_v30 }
 0x10e   :  { %1010 = vmatpush1.bf16.msra.mxu0 %v16330_v31  ;;  %1051 = vmatpush1.bf16.msra.mxu1 %v16332_v32 }
 0x10f   :  { %1011 = vmatprep.subr.bf16.mxu0 %v16334_v33  ;;  %1052 = vmatprep.subr.bf16.mxu1 %v16337_v34 }
 0x112   :  { %1012 = vmatpush1.bf16.msra.mxu0 %v16342_v35  ;;  %1053 = vmatpush1.bf16.msra.mxu1 %v16344_v36 }
 0x113   :  { %1304 = vmatprep.subr.bf16.mxu0 %v16346_v37  ;;  %1345 = vmatprep.subr.bf16.mxu1 %v16349_v38 }
 0x115   :  { %1030 = vmatmul.mubr.bf16.vlgmr.msra.gmra.mrb[8].mxu0 %v18582_v1  ;;  %1071 = vmatmul.mubr.bf16.vlgmr.msra.gmra.mrb[8].mxu1 %v18582_v1 }
 0x116   :  { %1305 = vmatpush1.bf16.msra.mxu0 %v14431_v39  ;;  %1346 = vmatpush1.bf16.msra.mxu1 %v14434_v40  ;;  %v14476_v39 = vld [vmem:[#allocation11 + $0xe8] ss:$16 sps:$4 sm:$0xff]  }
 0x117   :  { %1306 = vmatprep.subr.bf16.mxu0 %v14439_v41  ;;  %1347 = vmatprep.subr.bf16.mxu1 %v14442_v42 }
 0x118   :  { %1336 = vmatprep.mubr.bf16.mxu0 %v18582_v1  ;;  %1377 = vmatprep.mubr.bf16.mxu1 %v18582_v1 }
 0x11a   :  { %1307 = vmatpush1.bf16.msra.mxu0 %v14437_v43  ;;  %1348 = vmatpush1.bf16.msra.mxu1 %v14440_v44 }
 0x11b   :  { %1308 = vmatprep.subr.bf16.mxu0 %v14445_v45  ;;  %1349 = vmatprep.subr.bf16.mxu1 %v14448_v46 }
 0x11e   :  { %1309 = vmatpush1.bf16.msra.mxu0 %v14443_v47  ;;  %1350 = vmatpush1.bf16.msra.mxu1 %v14446_v48 }
 0x11f   :  { %1310 = vmatprep.subr.bf16.mxu0 %v14451_v49  ;;  %1351 = vmatprep.subr.bf16.mxu1 %v14454_v50 }
 0x122   :  { %1311 = vmatpush1.bf16.msra.mxu0 %v14449_v51  ;;  %1352 = vmatpush1.bf16.msra.mxu1 %v14452_v52 }
 0x123   :  { %1312 = vmatprep.subr.bf16.mxu0 %v14457_v53  ;;  %1353 = vmatprep.subr.bf16.mxu1 %v14460_v54 }
 0x126   :  { %1313 = vmatpush1.bf16.msra.mxu0 %v14455_v55  ;;  %1354 = vmatpush1.bf16.msra.mxu1 %v14458_v56 }
 0x127   :  { %1314 = vmatprep.subr.bf16.mxu0 %v14463_v57  ;;  %1355 = vmatprep.subr.bf16.mxu1 %v14466_v58 }
 0x12a   :  { %1315 = vmatpush1.bf16.msra.mxu0 %v14461_v59  ;;  %1356 = vmatpush1.bf16.msra.mxu1 %v14464_v60 }
 0x12b   :  { %1316 = vmatprep.subr.bf16.mxu0 %v14469_v61  ;;  %1357 = vmatprep.subr.bf16.mxu1 %v14472_v62 }
 0x12e   :  { %1317 = vmatpush1.bf16.msra.mxu0 %v14467_v63  ;;  %1358 = vmatpush1.bf16.msra.mxu1 %v14470_v0 }
 0x12f   :  { %1318 = vmatprep.subr.bf16.mxu0 %v14475_v2  ;;  %1359 = vmatprep.subr.bf16.mxu1 %v14478_v3 }
 0x132   :  { %1319 = vmatpush1.bf16.msra.mxu0 %v14473_v4  ;;  %1360 = vmatpush1.bf16.msra.mxu1 %v14476_v39 }
 0x133   :  { %1624 = vmatprep.subr.bf16.mxu0 %v16252_v5  ;;  %1665 = vmatprep.subr.bf16.mxu1 %v16254_v6  ;;  %v247_v5 = vlaneseq }
 0x135   :  { %1337 = vmatmul.mubr.bf16.vlgmr.msra.gmra.mrb[12].mxu0 %v18582_v1  ;;  %1378 = vmatmul.mubr.bf16.vlgmr.msra.gmra.mrb[12].mxu1 %v18582_v1  ;;  %v16400_v6 = vshrl.u32 %v247_v5, 7 }
 0x136   :  { %1625 = vmatpush1.bf16.msra.mxu0 %v16256_v8  ;;  %1666 = vmatpush1.bf16.msra.mxu1 %v16258_v9 }
 0x137   :  { %1626 = vmatprep.subr.bf16.mxu0 %v16260_v10  ;;  %1667 = vmatprep.subr.bf16.mxu1 %v16263_v11  ;;  %18647 = vst [vmem:[#allocation30_spill] sm:$0xff] %v16400_v6  ;;  %v18581_v8 = vsub.s32 0, %v16400_v6  ;;  %v18579_v9 = vsub.s32 1, %v16400_v6  ;;  %v18580_v10 = vsub.s32 2, %v16400_v6  ;;  %v245_v11 = vld [vmem:[%s18648_s29] sm:$0xff] }
 0x138   :  { %1656 = vmatprep.mubr.bf16.mxu0 %v18582_v1  ;;  %1697 = vmatprep.mubr.bf16.mxu1 %v18582_v1 }
 0x13a   :  { %1627 = vmatpush1.bf16.msra.mxu0 %v16266_v12  ;;  %1668 = vmatpush1.bf16.msra.mxu1 %v16269_v13  ;;  %v18578_v12 = vsub.s32 3, %v16400_v6  ;;  %v250_v13 = vrot.slane %v245_v11, %v18581_v8  ;;  %v16600_v8 = vld [vmem:[#allocation11 + $0xa4] ss:$16 sps:$4 sm:$0xff]  }
 0x13b   :  { %1628 = vmatprep.subr.bf16.mxu0 %v16271_v14  ;;  %1669 = vmatprep.subr.bf16.mxu1 %v16275_v15  ;;  %v254_v14 = vrot.slane %v245_v11, %v18579_v9  ;;  %v258_v15 = vrot.slane %v245_v11, %v18580_v10 }
 0x13e   :  { %1629 = vmatpush1.bf16.msra.mxu0 %v16280_v16  ;;  %1670 = vmatpush1.bf16.msra.mxu1 %v16283_v17  ;;  %v262_v16 = vrot.slane %v245_v11, %v18578_v12 }
 0x13f   :  { %1630 = vmatprep.subr.bf16.mxu0 %v16285_v18  ;;  %1671 = vmatprep.subr.bf16.mxu1 %v16289_v7 }
 0x142   :  { %1631 = vmatpush1.bf16.msra.mxu0 %v16294_v19  ;;  %1672 = vmatpush1.bf16.msra.mxu1 %v16296_v20 }
 0x143   :  { %1632 = vmatprep.subr.bf16.mxu0 %v16298_v21  ;;  %1673 = vmatprep.subr.bf16.mxu1 %v16301_v22 }
 0x146   :  { %1633 = vmatpush1.bf16.msra.mxu0 %v16306_v23  ;;  %1674 = vmatpush1.bf16.msra.mxu1 %v16308_v24 }
 0x147   :  { %1634 = vmatprep.subr.bf16.mxu0 %v16310_v25  ;;  %1675 = vmatprep.subr.bf16.mxu1 %v16313_v26 }
 0x14a   :  { %1635 = vmatpush1.bf16.msra.mxu0 %v16318_v27  ;;  %1676 = vmatpush1.bf16.msra.mxu1 %v16320_v28 }
 0x14b   :  { %1636 = vmatprep.subr.bf16.mxu0 %v16322_v29  ;;  %1677 = vmatprep.subr.bf16.mxu1 %v16325_v30 }
 0x14e   :  { %1637 = vmatpush1.bf16.msra.mxu0 %v16330_v31  ;;  %1678 = vmatpush1.bf16.msra.mxu1 %v16332_v32  ;;  %v18577_v32 = vsub.s32 4, %v16400_v6 }
 0x14f   :  { %1638 = vmatprep.subr.bf16.mxu0 %v16334_v33  ;;  %1679 = vmatprep.subr.bf16.mxu1 %v16337_v34  ;;  %v18575_v33 = vsub.s32 5, %v16400_v6  ;;  %v18576_v34 = vsub.s32 6, %v16400_v6 }
 0x152   :  { %1639 = vmatpush1.bf16.msra.mxu0 %v16342_v35  ;;  %1680 = vmatpush1.bf16.msra.mxu1 %v16344_v36  ;;  %v18574_v35 = vsub.s32 7, %v16400_v6  ;;  %v266_v36 = vrot.slane %v245_v11, %v18577_v32 }
 0x153   :  { %1950 = vmatprep.subr.bf16.mxu0 %v16346_v37  ;;  %1991 = vmatprep.subr.bf16.mxu1 %v16349_v38  ;;  %v270_v37 = vrot.slane %v245_v11, %v18575_v33  ;;  %v274_v38 = vrot.slane %v245_v11, %v18576_v34 }
 0x154   :  { %v278_v40 = vrot.slane %v245_v11, %v18574_v35 }
 0x1a8   :  { %v647_v17 = vpop.f32.mrb[0].mxu0  ;;  %v690_v19 = vpop.f32.mrb[0].mxu1 }
 0x1a9   :  { %v648_v18 = vadd.f32 %v647_v17, %v250_v13  ;;  %v649_v7 = vpop.f32.mrb[1].mxu0  ;;  %v691_v22 = vadd.f32 %v690_v19, %v258_v15  ;;  %v692_v23 = vpop.f32.mrb[1].mxu1 }
 0x1aa   :  { %v650_v20 = vadd.f32 %v649_v7, %v254_v14  ;;  %v651_v21 = vpop.f32.mrb[2].mxu0  ;;  %v693_v26 = vadd.f32 %v692_v23, %v262_v16  ;;  %v694_v27 = vpop.f32.mrb[2].mxu1 }
 0x1ab   :  { %785 = vst [vmem:[#allocation2] sm:$0xff] %v648_v18  ;;  %v652_v24 = vadd.f32 %v651_v21, %v250_v13  ;;  %v653_v25 = vpop.f32.mrb[3].mxu0  ;;  %787 = vst [vmem:[#allocation2 + $0x10] sm:$0xff] %v691_v22  ;;  %v695_v29 = vadd.f32 %v694_v27, %v258_v15  ;;  %v696_v30 = vpop.f32.mrb[3].mxu1 }
 0x1ac   :  { %786 = vst [vmem:[#allocation2 + $0x8] sm:$0xff] %v650_v20  ;;  %v654_v28 = vadd.f32 %v653_v25, %v254_v14  ;;  %788 = vst [vmem:[#allocation2 + $0x18] sm:$0xff] %v693_v26  ;;  %v697_v31 = vadd.f32 %v696_v30, %v262_v16 }
 0x1ad   :  { %793 = vst [vmem:[#allocation2 + $0x40] sm:$0xff] %v652_v24  ;;  %795 = vst [vmem:[#allocation2 + $0x50] sm:$0xff] %v695_v29 }
 0x1ae   :  { %794 = vst [vmem:[#allocation2 + $0x48] sm:$0xff] %v654_v28  ;;  %796 = vst [vmem:[#allocation2 + $0x58] sm:$0xff] %v697_v31 }
 0x1b2   :  { %v801_v57 = vld [vmem:[#allocation2] sm:$0x3]  ;;  %v803_v15 = vld [vmem:[#allocation2 + $0x10] sm:$0x3] }
 0x1b3   :  { %v802_v61 = vld [vmem:[#allocation2 + $0x8] sm:$0x3]  ;;  %v804_v13 = vld [vmem:[#allocation2 + $0x18] sm:$0x3] }
 0x1c8   :  { %v733_v41 = vpop.f32.mrb[4].mxu0  ;;  %v776_v44 = vpop.f32.mrb[4].mxu1 }
 0x1c9   :  { %v734_v42 = vadd.f32 %v733_v41, %v266_v36  ;;  %v735_v43 = vpop.f32.mrb[5].mxu0  ;;  %v777_v47 = vadd.f32 %v776_v44, %v274_v38  ;;  %v778_v48 = vpop.f32.mrb[5].mxu1 }
 0x1ca   :  { %v736_v45 = vadd.f32 %v735_v43, %v270_v37  ;;  %v737_v46 = vpop.f32.mrb[6].mxu0  ;;  %v779_v51 = vadd.f32 %v778_v48, %v278_v40  ;;  %v780_v52 = vpop.f32.mrb[6].mxu1 }
 0x1cb   :  { %789 = vst [vmem:[#allocation2 + $0x20] sm:$0xff] %v734_v42  ;;  %v738_v49 = vadd.f32 %v737_v46, %v266_v36  ;;  %v739_v50 = vpop.f32.mrb[7].mxu0  ;;  %791 = vst [vmem:[#allocation2 + $0x30] sm:$0xff] %v777_v47  ;;  %v781_v54 = vadd.f32 %v780_v52, %v274_v38  ;;  %v782_v55 = vpop.f32.mrb[7].mxu1 }
 0x1cc   :  { %790 = vst [vmem:[#allocation2 + $0x28] sm:$0xff] %v736_v45  ;;  %v740_v53 = vadd.f32 %v739_v50, %v270_v37  ;;  %792 = vst [vmem:[#allocation2 + $0x38] sm:$0xff] %v779_v51  ;;  %v783_v56 = vadd.f32 %v782_v55, %v278_v40 }
 0x1cd   :  { %797 = vst [vmem:[#allocation2 + $0x60] sm:$0xff] %v738_v49  ;;  %799 = vst [vmem:[#allocation2 + $0x70] sm:$0xff] %v781_v54 }
 0x1ce   :  { %798 = vst [vmem:[#allocation2 + $0x68] sm:$0xff] %v740_v53  ;;  %800 = vst [vmem:[#allocation2 + $0x78] sm:$0xff] %v783_v56 }
 0x1d4   :  { %v1108_v37 = vld [vmem:[#allocation2 + $0x60] sm:$0xc0] }
 0x1d5   :  { %v1109_v43 = vld [vmem:[#allocation2 + $0x68] sm:$0xc0]  ;;  %v1111_v51 = vld [vmem:[#allocation2 + $0x78] sm:$0xc0] }
 0x1e8   :  { %v1031_v58 = vpop.f32.mrb[8].mxu0  ;;  %v1072_v60 = vpop.f32.mrb[8].mxu1 }
 0x1e9   :  { %v1079_v59 = vadd.f32 %v1031_v58, %v801_v57  ;;  %v1033_v62 = vpop.f32.mrb[9].mxu0  ;;  %v1074_v0 = vpop.f32.mrb[9].mxu1  ;;  %v1081_v17 = vadd.f32 %v1072_v60, %v803_v15  ;;  %v1110_v57 = vld [vmem:[#allocation2 + $0x70] sm:$0xc0]  ;;  %v15737_v15 = vld [vmem:[#allocation11 + $0x40] ss:$16 sps:$4 sm:$0xff]  }
 0x1ea   :  { %v1080_v63 = vadd.f32 %v1033_v62, %v802_v61  ;;  %v1035_v2 = vpop.f32.mrb[10].mxu0  ;;  %v1076_v39 = vpop.f32.mrb[10].mxu1  ;;  %v1082_v14 = vadd.f32 %v1074_v0, %v804_v13  ;;  %v15729_v0 = vld [vmem:[#allocation11] ss:$16 sps:$4 sm:$0xff]   ;;  %v15735_v13 = vld [vmem:[#allocation11 + $0x44] ss:$16 sps:$4 sm:$0xff]  }
 0x1eb   :  { %v13025_v3 = vmul.f32 -1.442695, %v1079_v59  ;;  %v1036_v4 = vpop.f32.mrb[11].mxu0  ;;  %v1077_v11 = vpop.f32.mrb[11].mxu1  ;;  %v15730_v2 = vld [vmem:[#allocation11 + $0x8] ss:$16 sps:$4 sm:$0xff]  }
 0x1ec   :  { %v13026_v5 = vmul.f32 -1.442695, %v1080_v63  ;;  %v13027_v16 = vmul.f32 -1.442695, %v1082_v14  ;;  %v15731_v4 = vld [vmem:[#allocation11 + $0x24] ss:$16 sps:$4 sm:$0xff]  }
 0x1ed   :  { %15191 = vpow2.f32 %v13025_v3  ;;  %v15732_v39 = vld [vmem:[#allocation11 + $0x2c] ss:$16 sps:$4 sm:$0xff]   ;;  %v15734_v11 = vld [vmem:[#allocation11 + $0x28] ss:$16 sps:$4 sm:$0xff]  }
 0x1ee   :  { %15193 = vpow2.f32 %v13026_v5  ;;  %v15733_v5 = vld [vmem:[#allocation11 + $0x20] ss:$16 sps:$4 sm:$0xff]   ;;  %v15736_v14 = vld [vmem:[#allocation11 + $0x4c] ss:$16 sps:$4 sm:$0xff]  }
 0x1ef   :  { %15195 = vpow2.f32 %v13027_v16  ;;  %v15738_v16 = vld [vmem:[#allocation11 + $0x48] ss:$16 sps:$4 sm:$0xff]  }
 0x1f0   :  { %15197 = vtanh.f32 %v1081_v17  ;;  %v15739_v17 = vld [vmem:[#allocation11 + $0x64] ss:$16 sps:$4 sm:$0xff]  }
 0x1f7   :  { %v15192_v18 = vpop.eup %15191 }
 0x1f8   :  { %v15194_v7 = vpop.eup %15193  ;;  %v1086_v19 = vadd.f32 1.0, %v15192_v18  ;;  %v15740_v18 = vld [vmem:[#allocation11 + $0x6c] ss:$16 sps:$4 sm:$0xff]  }
 0x1f9   :  { %v1092_v20 = vadd.f32 1.0, %v15194_v7  ;;  %v15196_v21 = vpop.eup %15195 }
 0x1fa   :  { %15199 = vrcp.f32 %v1086_v19  ;;  %v15198_v22 = vpop.eup %15197  ;;  %v1099_v26 = vadd.f32 1.0, %v15196_v21  ;;  %v15741_v21 = vld [vmem:[#allocation11 + $0x60] ss:$16 sps:$4 sm:$0xff]  }
 0x1fb   :  { %15201 = vrcp.f32 %v1092_v20 }
 0x1fc   :  { %15203 = vrcp.f32 %v1099_v26  ;;  %v15743_v26 = vld [vmem:[#allocation11 + $0x84] ss:$16 sps:$4 sm:$0xff]  }
 0x204   :  { %v15200_v23 = vpop.eup %15199 }
 0x205   :  { %v15202_v24 = vpop.eup %15201  ;;  %v1103_v25 = vmul.f32 %v15200_v23, %v15198_v22  ;;  %v15742_v22 = vld [vmem:[#allocation11 + $0x68] ss:$16 sps:$4 sm:$0xff]  }
 0x206   :  { %v1102_v27 = vmul.f32 0.0, %v15202_v24  ;;  %v15204_v53 = vpop.eup %15203 }
 0x208   :  { %v16429_v28 = vadd.f32 %v1103_v25, %v1102_v27  ;;  %v1338_v29 = vpop.f32.mrb[12].mxu0  ;;  %v1379_v31 = vpop.f32.mrb[12].mxu1  ;;  %v15744_v27 = vld [vmem:[#allocation11 + $0x8c] ss:$16 sps:$4 sm:$0xff]  }
 0x209   :  { %v1390_v30 = vrot.slane %v1338_v29, 2  ;;  %v1340_v36 = vpop.f32.mrb[13].mxu0  ;;  %v1381_v40 = vpop.f32.mrb[13].mxu1  ;;  %v1392_v54 = vrot.slane %v1379_v31, 2  ;;  %v15745_v31 = vld [vmem:[#allocation11 + $0x80] ss:$16 sps:$4 sm:$0xff]  }
 0x20a   :  { %15205 = vtanh.f32 %v16429_v28  ;;  %v1391_v38 = vrot.slane %v1340_v36, 2  ;;  %v1342_v41 = vpop.f32.mrb[14].mxu0  ;;  %v1383_v45 = vpop.f32.mrb[14].mxu1  ;;  %v1393_v50 = vrot.slane %v1381_v40, 2  ;;  %v15746_v36 = vld [vmem:[#allocation11 + $0x88] ss:$16 sps:$4 sm:$0xff]  }
 0x20b   :  { %v1398_v42 = vadd.f32 %v1390_v30, %v1108_v37  ;;  %v1343_v44 = vpop.f32.mrb[15].mxu0  ;;  %v1384_v47 = vpop.f32.mrb[15].mxu1  ;;  %v1400_v59 = vadd.f32 %v1392_v54, %v1110_v57  ;;  %v15747_v37 = vld [vmem:[#allocation11 + $0xa4] ss:$16 sps:$4 sm:$0xff]   ;;  %v15749_v40 = vld [vmem:[#allocation11 + $0xa0] ss:$16 sps:$4 sm:$0xff]  }
 0x20c   :  { %v1399_v46 = vadd.f32 %v1391_v38, %v1109_v43  ;;  %v1401_v52 = vadd.f32 %v1393_v50, %v1111_v51  ;;  %v15748_v38 = vld [vmem:[#allocation11 + $0xac] ss:$16 sps:$4 sm:$0xff]   ;;  %v15750_v41 = vld [vmem:[#allocation11 + $0xa8] ss:$16 sps:$4 sm:$0xff]   ;;  %v15753_v44 = vld [vmem:[#allocation11 + $0xc0] ss:$16 sps:$4 sm:$0xff]  }
 0x20d   :  { %v13060_v48 = vmul.f32 -1.442695, %v1398_v42  ;;  %v15751_v42 = vld [vmem:[#allocation11 + $0xc4] ss:$16 sps:$4 sm:$0xff]   ;;  %v15752_v43 = vld [vmem:[#allocation11 + $0xcc] ss:$16 sps:$4 sm:$0xff]  }
 0x20e   :  { %v13061_v49 = vmul.f32 -1.442695, %v1399_v46  ;;  %v13062_v58 = vmul.f32 -1.442695, %v1401_v52  ;;  %v15754_v45 = vld [vmem:[#allocation11 + $0xc8] ss:$16 sps:$4 sm:$0xff]  }
 0x20f   :  { %15207 = vpow2.f32 %v13060_v48  ;;  %v15755_v46 = vld [vmem:[#allocation11 + $0xe4] ss:$16 sps:$4 sm:$0xff]   ;;  %v15756_v47 = vld [vmem:[#allocation11 + $0xec] ss:$16 sps:$4 sm:$0xff]   ;;  %v15757_v50 = vld [vmem:[#allocation11 + $0xe0] ss:$16 sps:$4 sm:$0xff]  }
 0x210   :  { %15209 = vpow2.f32 %v13061_v49  ;;  %v15758_v51 = vld [vmem:[#allocation11 + $0xe8] ss:$16 sps:$4 sm:$0xff]   ;;  %v16443_v57 = vld [vmem:[#allocation9] ss:$16 sps:$4 sm:$0xff]  }
 0x211   :  { %15211 = vpow2.f32 %v13062_v58  ;;  %v16445_v58 = vld [vmem:[#allocation9 + $0x8] ss:$16 sps:$4 sm:$0xff]  }
 0x212   :  { %15213 = vtanh.f32 %v1400_v59  ;;  %v16451_v59 = vld [vmem:[#allocation9 + $0x24] ss:$16 sps:$4 sm:$0xff]  }
 0x214   :  { %v15206_v55 = vpop.eup %15205 }
 0x215   :  { %v1106_v56 = vmul.f32 %v15206_v55, %v15204_v53  ;;  %v16439_v55 = vld [vmem:[#allocation9 + $0x4] ss:$16 sps:$4 sm:$0xff]  }
 0x217   :  { %1107 = vst [vmem:[#allocation3] sm:$0x3] %v1106_v56  ;;  %v1431_v60 = vpack.c.bf16 %v1106_v56, %v1106_v56  ;;  %v16441_v56 = vld [vmem:[#allocation9 + $0xc] ss:$16 sps:$4 sm:$0xff]  }
 0x219   :  { %v15208_v61 = vpop.eup %15207  ;;  %1657 = vmatmul.mubr.bf16.vlgmr.msra.gmra.mrb[16].mxu0 %v1431_v60  ;;  %1698 = vmatmul.mubr.bf16.vlgmr.msra.gmra.mrb[16].mxu1 %v1431_v60  ;;  %v16453_v60 = vld [vmem:[#allocation9 + $0x2c] ss:$16 sps:$4 sm:$0xff]  }
 0x21a   :  { %v15210_v62 = vpop.eup %15209  ;;  %v1405_v63 = vadd.f32 1.0, %v15208_v61  ;;  %1951 = vmatpush1.bf16.msra.mxu0 %v15729_v0  ;;  %1992 = vmatpush1.bf16.msra.mxu1 %v15730_v2  ;;  %v16455_v61 = vld [vmem:[#allocation9 + $0x20] ss:$16 sps:$4 sm:$0xff]   ;;  %v16465_v0 = vld [vmem:[#allocation9 + $0x4c] ss:$16 sps:$4 sm:$0xff]  }
 0x21b   :  { %v1411_v3 = vadd.f32 1.0, %v15210_v62  ;;  %1952 = vmatprep.subr.bf16.mxu0 %v15731_v4  ;;  %1993 = vmatprep.subr.bf16.mxu1 %v15732_v39  ;;  %v15212_v7 = vpop.eup %15211  ;;  %v16457_v62 = vld [vmem:[#allocation9 + $0x28] ss:$16 sps:$4 sm:$0xff]   ;;  %v16467_v2 = vld [vmem:[#allocation9 + $0x40] ss:$16 sps:$4 sm:$0xff]  }
 0x21c   :  { %15215 = vrcp.f32 %v1405_v63  ;;  %1982 = vmatprep.mubr.bf16.mxu0 %v18582_v1  ;;  %2023 = vmatprep.mubr.bf16.mxu1 %v18582_v1  ;;  %v15214_v19 = vpop.eup %15213  ;;  %v1418_v25 = vadd.f32 1.0, %v15212_v7  ;;  %v16463_v63 = vld [vmem:[#allocation9 + $0x44] ss:$16 sps:$4 sm:$0xff]   ;;  %v16477_v39 = vld [vmem:[#allocation9 + $0x6c] ss:$16 sps:$4 sm:$0xff]  }
 0x21d   :  { %15217 = vrcp.f32 %v1411_v3  ;;  %v16469_v3 = vld [vmem:[#allocation9 + $0x48] ss:$16 sps:$4 sm:$0xff]   ;;  %v16475_v4 = vld [vmem:[#allocation9 + $0x64] ss:$16 sps:$4 sm:$0xff]   ;;  %v16503_v7 = vld [vmem:[#allocation9 + $0xa0] ss:$16 sps:$4 sm:$0xff]  }
 0x21e   :  { %1953 = vmatpush1.bf16.msra.mxu0 %v15733_v5  ;;  %1994 = vmatpush1.bf16.msra.mxu1 %v15734_v11  ;;  %15219 = vrcp.f32 %v1418_v25  ;;  %v16479_v5 = vld [vmem:[#allocation9 + $0x60] ss:$16 sps:$4 sm:$0xff]   ;;  %v16481_v11 = vld [vmem:[#allocation9 + $0x68] ss:$16 sps:$4 sm:$0xff]   ;;  %v16525_v25 = vld [vmem:[#allocation9 + $0xec] ss:$16 sps:$4 sm:$0xff]  }
 0x21f   :  { %1954 = vmatprep.subr.bf16.mxu0 %v15735_v13  ;;  %1995 = vmatprep.subr.bf16.mxu1 %v15736_v14  ;;  %v16487_v13 = vld [vmem:[#allocation9 + $0x84] ss:$16 sps:$4 sm:$0xff]   ;;  %v16489_v14 = vld [vmem:[#allocation9 + $0x8c] ss:$16 sps:$4 sm:$0xff]  }
 0x222   :  { %1955 = vmatpush1.bf16.msra.mxu0 %v15737_v15  ;;  %1996 = vmatpush1.bf16.msra.mxu1 %v15738_v16  ;;  %v16491_v15 = vld [vmem:[#allocation9 + $0x80] ss:$16 sps:$4 sm:$0xff]   ;;  %v16493_v16 = vld [vmem:[#allocation9 + $0x88] ss:$16 sps:$4 sm:$0xff]  }
 0x223   :  { %1956 = vmatprep.subr.bf16.mxu0 %v15739_v17  ;;  %1997 = vmatprep.subr.bf16.mxu1 %v15740_v18  ;;  %v16499_v17 = vld [vmem:[#allocation9 + $0xa4] ss:$16 sps:$4 sm:$0xff]   ;;  %v16501_v18 = vld [vmem:[#allocation9 + $0xac] ss:$16 sps:$4 sm:$0xff]  }
 0x226   :  { %v15216_v20 = vpop.eup %15215  ;;  %1957 = vmatpush1.bf16.msra.mxu0 %v15741_v21  ;;  %1998 = vmatpush1.bf16.msra.mxu1 %v15742_v22  ;;  %v16513_v21 = vld [vmem:[#allocation9 + $0xcc] ss:$16 sps:$4 sm:$0xff]   ;;  %v16515_v22 = vld [vmem:[#allocation9 + $0xc0] ss:$16 sps:$4 sm:$0xff]  }
 0x227   :  { %v15218_v23 = vpop.eup %15217  ;;  %v1422_v24 = vmul.f32 %v15216_v20, %v15214_v19  ;;  %1958 = vmatprep.subr.bf16.mxu0 %v15743_v26  ;;  %1999 = vmatprep.subr.bf16.mxu1 %v15744_v27  ;;  %v16505_v19 = vld [vmem:[#allocation9 + $0xa8] ss:$16 sps:$4 sm:$0xff]   ;;  %v16511_v20 = vld [vmem:[#allocation9 + $0xc4] ss:$16 sps:$4 sm:$0xff]   ;;  %v16527_v26 = vld [vmem:[#allocation9 + $0xe0] ss:$16 sps:$4 sm:$0xff]  }
 0x228   :  { %v1421_v29 = vmul.f32 0.0, %v15218_v23  ;;  %v15220_v48 = vpop.eup %15219  ;;  %v16517_v23 = vld [vmem:[#allocation9 + $0xc8] ss:$16 sps:$4 sm:$0xff]  }
 0x229   :  { %v16529_v27 = vld [vmem:[#allocation9 + $0xe8] ss:$16 sps:$4 sm:$0xff]  }
 0x22a   :  { %v16434_v30 = vadd.f32 %v1422_v24, %v1421_v29  ;;  %1959 = vmatpush1.bf16.msra.mxu0 %v15745_v31  ;;  %2000 = vmatpush1.bf16.msra.mxu1 %v15746_v36  ;;  %v16523_v24 = vld [vmem:[#allocation9 + $0xe4] ss:$16 sps:$4 sm:$0xff]   ;;  %v16537_v31 = vld [vmem:[#allocation11 + $0xc] ss:$16 sps:$4 sm:$0xff]  }
 0x22b   :  { %1960 = vmatprep.subr.bf16.mxu0 %v15747_v37  ;;  %2001 = vmatprep.subr.bf16.mxu1 %v15748_v38  ;;  %v16535_v29 = vld [vmem:[#allocation11 + $0x4] ss:$16 sps:$4 sm:$0xff]  }
 0x22c   :  { %15221 = vtanh.f32 %v16434_v30 }
 0x22e   :  { %1961 = vmatpush1.bf16.msra.mxu0 %v15749_v40  ;;  %2002 = vmatpush1.bf16.msra.mxu1 %v15750_v41 }
 0x22f   :  { %1962 = vmatprep.subr.bf16.mxu0 %v15751_v42  ;;  %2003 = vmatprep.subr.bf16.mxu1 %v15752_v43  ;;  %v1427_v42 = vld [vmem:[#allocation2] sm:$0xc] }
 0x232   :  { %1963 = vmatpush1.bf16.msra.mxu0 %v15753_v44  ;;  %2004 = vmatpush1.bf16.msra.mxu1 %v15754_v45 }
 0x233   :  { %1964 = vmatprep.subr.bf16.mxu0 %v15755_v46  ;;  %2005 = vmatprep.subr.bf16.mxu1 %v15756_v47  ;;  %v1428_v47 = vld [vmem:[#allocation2 + $0x8] sm:$0xc] }
 0x236   :  { %v15222_v49 = vpop.eup %15221  ;;  %1965 = vmatpush1.bf16.msra.mxu0 %v15757_v50  ;;  %2006 = vmatpush1.bf16.msra.mxu1 %v15758_v51 }
 0x237   :  { %v1425_v52 = vmul.f32 %v15222_v49, %v15220_v48  ;;  %2276 = vmatprep.subr.bf16.mxu0 %v16439_v55  ;;  %2317 = vmatprep.subr.bf16.mxu1 %v16441_v56 }
 0x239   :  { %1426 = vst [vmem:[#allocation3 + $0x18] sm:$0xc0] %v1425_v52  ;;  %v1754_v53 = vpack.c.bf16 %v1425_v52, %v1425_v52 }
 0x23b   :  { %v1788_v54 = vrot.slane %v1754_v53, 3 }
 0x23d   :  { %1983 = vmatmul.mubr.bf16.vlgmr.msra.gmra.mrb[20].mxu0 %v1788_v54  ;;  %2024 = vmatmul.mubr.bf16.vlgmr.msra.gmra.mrb[20].mxu1 %v1788_v54  ;;  %v1430_v54 = vld [vmem:[#allocation2 + $0x18] sm:$0xc] }
 0x23e   :  { %2308 = vmatprep.mubr.bf16.mxu0 %v18582_v1  ;;  %2349 = vmatprep.mubr.bf16.mxu1 %v18582_v1 }
 0x23f   :  { %2277 = vmatpush1.bf16.msra.mxu0 %v16443_v57  ;;  %2318 = vmatpush1.bf16.msra.mxu1 %v16445_v58 }
 0x240   :  { %2278 = vmatprep.subr.bf16.mxu0 %v16451_v59  ;;  %2319 = vmatprep.subr.bf16.mxu1 %v16453_v60 }
 0x243   :  { %2279 = vmatpush1.bf16.msra.mxu0 %v16455_v61  ;;  %2320 = vmatpush1.bf16.msra.mxu1 %v16457_v62 }
 0x244   :  { %2280 = vmatprep.subr.bf16.mxu0 %v16463_v63  ;;  %2321 = vmatprep.subr.bf16.mxu1 %v16465_v0 }
 0x247   :  { %2281 = vmatpush1.bf16.msra.mxu0 %v16467_v2  ;;  %2322 = vmatpush1.bf16.msra.mxu1 %v16469_v3 }
 0x248   :  { %2282 = vmatprep.subr.bf16.mxu0 %v16475_v4  ;;  %2323 = vmatprep.subr.bf16.mxu1 %v16477_v39 }
 0x24b   :  { %2283 = vmatpush1.bf16.msra.mxu0 %v16479_v5  ;;  %2324 = vmatpush1.bf16.msra.mxu1 %v16481_v11 }
 0x24c   :  { %2284 = vmatprep.subr.bf16.mxu0 %v16487_v13  ;;  %2325 = vmatprep.subr.bf16.mxu1 %v16489_v14 }
 0x24f   :  { %2285 = vmatpush1.bf16.msra.mxu0 %v16491_v15  ;;  %2326 = vmatpush1.bf16.msra.mxu1 %v16493_v16 }
 0x250   :  { %2286 = vmatprep.subr.bf16.mxu0 %v16499_v17  ;;  %2327 = vmatprep.subr.bf16.mxu1 %v16501_v18 }
 0x253   :  { %2287 = vmatpush1.bf16.msra.mxu0 %v16503_v7  ;;  %2328 = vmatpush1.bf16.msra.mxu1 %v16505_v19 }
 0x254   :  { %2288 = vmatprep.subr.bf16.mxu0 %v16511_v20  ;;  %2329 = vmatprep.subr.bf16.mxu1 %v16513_v21 }
 0x257   :  { %2289 = vmatpush1.bf16.msra.mxu0 %v16515_v22  ;;  %2330 = vmatpush1.bf16.msra.mxu1 %v16517_v23 }
 0x258   :  { %2290 = vmatprep.subr.bf16.mxu0 %v16523_v24  ;;  %2331 = vmatprep.subr.bf16.mxu1 %v16525_v25 }
 0x25b   :  { %2291 = vmatpush1.bf16.msra.mxu0 %v16527_v26  ;;  %2332 = vmatpush1.bf16.msra.mxu1 %v16529_v27 }
 0x25c   :  { %2602 = vmatprep.subr.bf16.mxu0 %v16535_v29  ;;  %2643 = vmatprep.subr.bf16.mxu1 %v16537_v31 }
 0x2ec   :  { %v1658_v36 = vpop.f32.mrb[16].mxu0  ;;  %v1699_v37 = vpop.f32.mrb[16].mxu1 }
 0x2ed   :  { %v1710_v38 = vrot.slane %v1658_v36, 6  ;;  %v1660_v40 = vpop.f32.mrb[17].mxu0  ;;  %v1701_v41 = vpop.f32.mrb[17].mxu1  ;;  %v1712_v33 = vrot.slane %v1699_v37, 6  ;;  %v1429_v36 = vld [vmem:[#allocation2 + $0x10] sm:$0xc] }
 0x2ee   :  { %v1711_v43 = vrot.slane %v1660_v40, 6  ;;  %v1662_v44 = vpop.f32.mrb[18].mxu0  ;;  %v1703_v45 = vpop.f32.mrb[18].mxu1  ;;  %v1713_v53 = vrot.slane %v1701_v41, 6  ;;  %v1742_v41 = vrot.slane %v16429_v28, 6 }
 0x2ef   :  { %v1718_v46 = vadd.f32 %v1710_v38, %v1427_v42  ;;  %v1663_v48 = vpop.f32.mrb[19].mxu0  ;;  %v1704_v49 = vpop.f32.mrb[19].mxu1  ;;  %v1720_v32 = vadd.f32 %v1712_v33, %v1429_v36  ;;  %v1751_v28 = vld [vmem:[#allocation2 + $0x68] sm:$0x30] }
 0x2f0   :  { %v1719_v50 = vadd.f32 %v1711_v43, %v1428_v47  ;;  %v1721_v35 = vadd.f32 %v1713_v53, %v1430_v54 }
 0x2f1   :  { %v13095_v51 = vmul.f32 -1.442695, %v1718_v46 }
 0x2f2   :  { %v13096_v52 = vmul.f32 -1.442695, %v1719_v50  ;;  %v13097_v34 = vmul.f32 -1.442695, %v1721_v35  ;;  %v1750_v50 = vld [vmem:[#allocation2 + $0x60] sm:$0x30] }
 0x2f3   :  { %15223 = vpow2.f32 %v13095_v51 }
 0x2f4   :  { %15225 = vpow2.f32 %v13096_v52 }
 0x2f5   :  { %15227 = vpow2.f32 %v13097_v34 }
 0x2f6   :  { %15229 = vtanh.f32 %v1720_v32 }
 0x2fd   :  { %v15224_v12 = vpop.eup %15223 }
 0x2fe   :  { %v15226_v40 = vpop.eup %15225  ;;  %v1725_v44 = vadd.f32 1.0, %v15224_v12 }
 0x2ff   :  { %v1731_v38 = vadd.f32 1.0, %v15226_v40  ;;  %v15228_v42 = vpop.eup %15227 }
 0x300   :  { %15231 = vrcp.f32 %v1725_v44  ;;  %v15230_v43 = vpop.eup %15229  ;;  %v1738_v48 = vadd.f32 1.0, %v15228_v42 }
 0x301   :  { %15233 = vrcp.f32 %v1731_v38 }
 0x302   :  { %15235 = vrcp.f32 %v1738_v48 }
 0x30a   :  { %v15232_v45 = vpop.eup %15231 }
 0x30b   :  { %v15234_v46 = vpop.eup %15233  ;;  %v1745_v47 = vmul.f32 %v15232_v45, %v15230_v43 }
 0x30c   :  { %v1744_v37 = vmul.f32 %v15234_v46, %v1742_v41  ;;  %v15236_v45 = vpop.eup %15235  ;;  %v1753_v41 = vld [vmem:[#allocation2 + $0x78] sm:$0x30] }
 0x30e   :  { %v16542_v49 = vadd.f32 %v1745_v47, %v1744_v37 }
 0x310   :  { %v1984_v33 = vpop.f32.mrb[20].mxu0  ;;  %v2025_v35 = vpop.f32.mrb[20].mxu1  ;;  %15237 = vtanh.f32 %v16542_v49 }
 0x311   :  { %v2036_v12 = vrot.slane %v1984_v33, 4  ;;  %v1986_v32 = vpop.f32.mrb[21].mxu0  ;;  %v2027_v34 = vpop.f32.mrb[21].mxu1  ;;  %v2038_v48 = vrot.slane %v2025_v35, 4  ;;  %v1752_v33 = vld [vmem:[#allocation2 + $0x70] sm:$0x30] }
 0x312   :  { %v2037_v51 = vrot.slane %v1986_v32, 4  ;;  %v1988_v52 = vpop.f32.mrb[22].mxu0  ;;  %v2029_v53 = vpop.f32.mrb[22].mxu1  ;;  %v2039_v43 = vrot.slane %v2027_v34, 4  ;;  %v16551_v34 = vld [vmem:[#allocation11 + $0x2c] ss:$16 sps:$4 sm:$0xff]  }
 0x313   :  { %v2044_v54 = vadd.f32 %v2036_v12, %v1750_v50  ;;  %v1989_v36 = vpop.f32.mrb[23].mxu0  ;;  %v2030_v40 = vpop.f32.mrb[23].mxu1  ;;  %v16545_v12 = vld [vmem:[#allocation11] ss:$16 sps:$4 sm:$0xff]   ;;  %v16547_v50 = vld [vmem:[#allocation11 + $0x8] ss:$16 sps:$4 sm:$0xff]  }
 0x314   :  { %v2045_v44 = vadd.f32 %v2037_v51, %v1751_v28  ;;  %v2047_v47 = vadd.f32 %v2039_v43, %v1753_v41  ;;  %v2046_v51 = vadd.f32 %v2038_v48, %v1752_v33  ;;  %v16555_v40 = vld [vmem:[#allocation11 + $0x20] ss:$16 sps:$4 sm:$0xff]   ;;  %v16563_v43 = vld [vmem:[#allocation11 + $0x4c] ss:$16 sps:$4 sm:$0xff]   ;;  %v16571_v41 = vld [vmem:[#allocation11 + $0x48] ss:$16 sps:$4 sm:$0xff]  }
 0x315   :  { %v13130_v38 = vmul.f32 -1.442695, %v2044_v54  ;;  %v16549_v54 = vld [vmem:[#allocation11 + $0x24] ss:$16 sps:$4 sm:$0xff]   ;;  %v16581_v48 = vld [vmem:[#allocation11 + $0x60] ss:$16 sps:$4 sm:$0xff]  }
 0x316   :  { %v13131_v42 = vmul.f32 -1.442695, %v2045_v44  ;;  %v13132_v52 = vmul.f32 -1.442695, %v2047_v47  ;;  %v16557_v44 = vld [vmem:[#allocation11 + $0x28] ss:$16 sps:$4 sm:$0xff]  }
 0x317   :  { %15239 = vpow2.f32 %v13130_v38  ;;  %v16577_v47 = vld [vmem:[#allocation11 + $0x6c] ss:$16 sps:$4 sm:$0xff]   ;;  %18649 = vst [vmem:[#allocation31_spill] sm:$0xff] %v16581_v48  ;;  %v16587_v33 = vld [vmem:[#allocation11 + $0x84] ss:$16 sps:$4 sm:$0xff]  }
 0x318   :  { %15241 = vpow2.f32 %v13131_v42  ;;  %v16561_v42 = vld [vmem:[#allocation11 + $0x44] ss:$16 sps:$4 sm:$0xff]  }
 0x319   :  { %15243 = vpow2.f32 %v13132_v52 }
 0x31a   :  { %v15238_v46 = vpop.eup %15237  ;;  %15245 = vtanh.f32 %v2046_v51 }
 0x31b   :  { %v1748_v37 = vmul.f32 %v15238_v46, %v15236_v45  ;;  %v16569_v45 = vld [vmem:[#allocation11 + $0x40] ss:$16 sps:$4 sm:$0xff]   ;;  %v16575_v46 = vld [vmem:[#allocation11 + $0x64] ss:$16 sps:$4 sm:$0xff]  }
 0x31d   :  { %1749 = vst [vmem:[#allocation3] sm:$0xc] %v1748_v37  ;;  %v2080_v32 = vpack.c.bf16 %v1748_v37, %v1748_v37  ;;  %v16583_v37 = vld [vmem:[#allocation11 + $0x68] ss:$16 sps:$4 sm:$0xff]  }
 0x31e   :  { %18650 = vst [vmem:[#allocation32_spill] sm:$0xff] %v16583_v37 }
 0x31f   :  { %v2114_v53 = vrot.slane %v2080_v32, 1  ;;  %v16589_v32 = vld [vmem:[#allocation11 + $0x8c] ss:$16 sps:$4 sm:$0xff]  }
 0x321   :  { %v15240_v28 = vpop.eup %15239  ;;  %2309 = vmatmul.mubr.bf16.vlgmr.msra.gmra.mrb[24].mxu0 %v2114_v53  ;;  %2350 = vmatmul.mubr.bf16.vlgmr.msra.gmra.mrb[24].mxu1 %v2114_v53 }
 0x322   :  { %v15242_v36 = vpop.eup %15241  ;;  %v2051_v35 = vadd.f32 1.0, %v15240_v28  ;;  %2603 = vmatpush1.bf16.msra.mxu0 %v16545_v12  ;;  %2644 = vmatpush1.bf16.msra.mxu1 %v16547_v50  ;;  %v2068_v28 = vrot.slane %v16434_v30, 2 }
 0x323   :  { %v2057_v38 = vadd.f32 1.0, %v15242_v36  ;;  %2604 = vmatprep.subr.bf16.mxu0 %v16549_v54  ;;  %2645 = vmatprep.subr.bf16.mxu1 %v16551_v34  ;;  %v15244_v52 = vpop.eup %15243  ;;  %v16594_v36 = vld [vmem:[#allocation11 + $0x80] ss:$16 sps:$4 sm:$0xff]  }
 0x324   :  { %15247 = vrcp.f32 %v2051_v35  ;;  %2634 = vmatprep.mubr.bf16.mxu0 %v18582_v1  ;;  %2675 = vmatprep.mubr.bf16.mxu1 %v18582_v1  ;;  %v15246_v51 = vpop.eup %15245  ;;  %v16596_v35 = vld [vmem:[#allocation11 + $0x88] ss:$16 sps:$4 sm:$0xff]   ;;  %v2064_v10 = vadd.f32 1.0, %v15244_v52  ;;  %v16602_v1 = vld [vmem:[#allocation11 + $0xac] ss:$16 sps:$4 sm:$0xff]  }
 0x325   :  { %15249 = vrcp.f32 %v2057_v38  ;;  %v16614_v52 = vld [vmem:[#allocation11 + $0xc4] ss:$16 sps:$4 sm:$0xff]  }
 0x326   :  { %2605 = vmatpush1.bf16.msra.mxu0 %v16555_v40  ;;  %2646 = vmatpush1.bf16.msra.mxu1 %v16557_v44  ;;  %15251 = vrcp.f32 %v2064_v10  ;;  %18652 = vst [vmem:[#allocation34_spill] sm:$0xff] %v16614_v52  ;;  %v16627_v10 = vld [vmem:[#allocation11 + $0xe4] ss:$16 sps:$4 sm:$0xff]  }
 0x327   :  { %2606 = vmatprep.subr.bf16.mxu0 %v16561_v42  ;;  %2647 = vmatprep.subr.bf16.mxu1 %v16563_v43 }
 0x32a   :  { %2607 = vmatpush1.bf16.msra.mxu0 %v16569_v45  ;;  %2648 = vmatpush1.bf16.msra.mxu1 %v16571_v41 }
 0x32b   :  { %2608 = vmatprep.subr.bf16.mxu0 %v16575_v46  ;;  %2649 = vmatprep.subr.bf16.mxu1 %v16577_v47 }
 0x32e   :  { %v15248_v53 = vpop.eup %15247  ;;  %2609 = vmatpush1.bf16.msra.mxu0 %v16581_v48  ;;  %2650 = vmatpush1.bf16.msra.mxu1 %v16583_v37  ;;  %v16608_v37 = vld [vmem:[#allocation11 + $0xa0] ss:$16 sps:$4 sm:$0xff]   ;;  %v16610_v48 = vld [vmem:[#allocation11 + $0xa8] ss:$16 sps:$4 sm:$0xff]  }
 0x32f   :  { %v15250_v38 = vpop.eup %15249  ;;  %v2071_v9 = vmul.f32 %v15248_v53, %v15246_v51  ;;  %2610 = vmatprep.subr.bf16.mxu0 %v16587_v33  ;;  %2651 = vmatprep.subr.bf16.mxu1 %v16589_v32  ;;  %18651 = vst [vmem:[#allocation33_spill] sm:$0xff] %v16610_v48  ;;  %v16616_v51 = vld [vmem:[#allocation11 + $0xcc] ss:$16 sps:$4 sm:$0xff]   ;;  %v16623_v53 = vld [vmem:[#allocation11 + $0xc8] ss:$16 sps:$4 sm:$0xff]  }
 0x330   :  { %v2070_v30 = vmul.f32 %v15250_v38, %v2068_v28  ;;  %18653 = vst [vmem:[#allocation35_spill] sm:$0xff] %v16616_v51  ;;  %18655 = vst [vmem:[#allocation37_spill] sm:$0xff] %v16623_v53  ;;  %v16629_v28 = vld [vmem:[#allocation11 + $0xec] ss:$16 sps:$4 sm:$0xff]   ;;  %v16633_v38 = vld [vmem:[#allocation11 + $0xe0] ss:$16 sps:$4 sm:$0xff]  }
 0x331   :  { %18656 = vst [vmem:[#allocation38_spill] sm:$0xff] %v16633_v38 }
 0x332   :  { %v16604_v6 = vadd.f32 %v2071_v9, %v2070_v30  ;;  %2611 = vmatpush1.bf16.msra.mxu0 %v16594_v36  ;;  %2652 = vmatpush1.bf16.msra.mxu1 %v16596_v35  ;;  %v16621_v9 = vld [vmem:[#allocation11 + $0xc0] ss:$16 sps:$4 sm:$0xff]   ;;  %v16635_v30 = vld [vmem:[#allocation11 + $0xe8] ss:$16 sps:$4 sm:$0xff]  }
 0x333   :  { %2612 = vmatprep.subr.bf16.mxu0 %v16600_v8  ;;  %2653 = vmatprep.subr.bf16.mxu1 %v16602_v1  ;;  %18654 = vst [vmem:[#allocation36_spill] sm:$0xff] %v16621_v9 }
 0x334   :  { %15253 = vtanh.f32 %v16604_v6 }
 0x336   :  { %2613 = vmatpush1.bf16.msra.mxu0 %v16608_v37  ;;  %2654 = vmatpush1.bf16.msra.mxu1 %v16610_v48  ;;  %v15252_v48 = vpop.eup %15251 }
 0x337   :  { %2614 = vmatprep.subr.bf16.mxu0 %v16614_v52  ;;  %2655 = vmatprep.subr.bf16.mxu1 %v16616_v51 }
 0x33a   :  { %2615 = vmatpush1.bf16.msra.mxu0 %v16621_v9  ;;  %2656 = vmatpush1.bf16.msra.mxu1 %v16623_v53 }
 0x33b   :  { %2616 = vmatprep.subr.bf16.mxu0 %v16627_v10  ;;  %2657 = vmatprep.subr.bf16.mxu1 %v16629_v28 }
 0x33e   :  { %v15254_v52 = vpop.eup %15253  ;;  %2617 = vmatpush1.bf16.msra.mxu0 %v16633_v38  ;;  %2658 = vmatpush1.bf16.msra.mxu1 %v16635_v30  ;;  %v18657_v38 = vmov 0  }
 0x33f   :  { %v2074_v51 = vmul.f32 %v15254_v52, %v15252_v48  ;;  %2928 = vmatprep.subr.bf16.mxu0 %v16439_v55  ;;  %2969 = vmatprep.subr.bf16.mxu1 %v16441_v56 }
 0x341   :  { %2075 = vst [vmem:[#allocation3 + $0x18] sm:$0x30] %v2074_v51  ;;  %v2406_v53 = vpack.c.bf16 %v2074_v51, %v2074_v51 }
 0x343   :  { %v2440_v9 = vrot.slane %v2406_v53, 2 }
 0x345   :  { %2635 = vmatmul.mubr.bf16.vlgmr.msra.gmra.mrb[28].mxu0 %v2440_v9  ;;  %2676 = vmatmul.mubr.bf16.vlgmr.msra.gmra.mrb[28].mxu1 %v2440_v9 }
 0x346   :  { %2929 = vmatpush1.bf16.msra.mxu0 %v16443_v57  ;;  %2970 = vmatpush1.bf16.msra.mxu1 %v16445_v58 }
 0x347   :  { %2930 = vmatprep.subr.bf16.mxu0 %v16451_v59  ;;  %2971 = vmatprep.subr.bf16.mxu1 %v16453_v60  ;;  %v2076_v60 = vld [vmem:[#allocation2] sm:$0x30] }
 0x348   :  { %2960 = vmatprep.mubr.bf16.mxu0 %v18657_v38  ;;  %3001 = vmatprep.mubr.bf16.mxu1 %v18657_v38 }
 0x34a   :  { %2931 = vmatpush1.bf16.msra.mxu0 %v16455_v61  ;;  %2972 = vmatpush1.bf16.msra.mxu1 %v16457_v62 }
 0x34b   :  { %2932 = vmatprep.subr.bf16.mxu0 %v16463_v63  ;;  %2973 = vmatprep.subr.bf16.mxu1 %v16465_v0 }
 0x34e   :  { %2933 = vmatpush1.bf16.msra.mxu0 %v16467_v2  ;;  %2974 = vmatpush1.bf16.msra.mxu1 %v16469_v3  ;;  %v2077_v2 = vld [vmem:[#allocation2 + $0x8] sm:$0x30] }
 0x34f   :  { %2934 = vmatprep.subr.bf16.mxu0 %v16475_v4  ;;  %2975 = vmatprep.subr.bf16.mxu1 %v16477_v39 }
 0x352   :  { %2935 = vmatpush1.bf16.msra.mxu0 %v16479_v5  ;;  %2976 = vmatpush1.bf16.msra.mxu1 %v16481_v11 }
 0x353   :  { %2936 = vmatprep.subr.bf16.mxu0 %v16487_v13  ;;  %2977 = vmatprep.subr.bf16.mxu1 %v16489_v14  ;;  %v2079_v14 = vld [vmem:[#allocation2 + $0x18] sm:$0x30] }
 0x356   :  { %2937 = vmatpush1.bf16.msra.mxu0 %v16491_v15  ;;  %2978 = vmatpush1.bf16.msra.mxu1 %v16493_v16 }
 0x357   :  { %2938 = vmatprep.subr.bf16.mxu0 %v16499_v17  ;;  %2979 = vmatprep.subr.bf16.mxu1 %v16501_v18  ;;  %v2078_v17 = vld [vmem:[#allocation2 + $0x10] sm:$0x30] }
 0x35a   :  { %2939 = vmatpush1.bf16.msra.mxu0 %v16503_v7  ;;  %2980 = vmatpush1.bf16.msra.mxu1 %v16505_v19 }
 0x35b   :  { %2940 = vmatprep.subr.bf16.mxu0 %v16511_v20  ;;  %2981 = vmatprep.subr.bf16.mxu1 %v16513_v21 }
 0x35e   :  { %2941 = vmatpush1.bf16.msra.mxu0 %v16515_v22  ;;  %2982 = vmatpush1.bf16.msra.mxu1 %v16517_v23 }
 0x35f   :  { %2942 = vmatprep.subr.bf16.mxu0 %v16523_v24  ;;  %2983 = vmatprep.subr.bf16.mxu1 %v16525_v25 }
 0x362   :  { %2943 = vmatpush1.bf16.msra.mxu0 %v16527_v26  ;;  %2984 = vmatpush1.bf16.msra.mxu1 %v16529_v27  ;;  %v2394_v26 = vrot.slane %v16542_v49, 6  ;;  %v2403_v49 = vld [vmem:[#allocation2 + $0x68] sm:$0xc] }
 0x363   :  { %3254 = vmatprep.subr.bf16.mxu0 %v16535_v29  ;;  %3295 = vmatprep.subr.bf16.mxu1 %v16537_v31 }
 0x3f4   :  { %v2310_v55 = vpop.f32.mrb[24].mxu0  ;;  %v2351_v56 = vpop.f32.mrb[24].mxu1 }
 0x3f5   :  { %v2362_v57 = vrot.slane %v2310_v55, 4  ;;  %v2312_v58 = vpop.f32.mrb[25].mxu0  ;;  %v2353_v59 = vpop.f32.mrb[25].mxu1  ;;  %v2364_v16 = vrot.slane %v2351_v56, 4 }
 0x3f6   :  { %v2363_v61 = vrot.slane %v2312_v58, 4  ;;  %v2314_v62 = vpop.f32.mrb[26].mxu0  ;;  %v2355_v63 = vpop.f32.mrb[26].mxu1  ;;  %v2365_v13 = vrot.slane %v2353_v59, 4 }
 0x3f7   :  { %v2370_v0 = vadd.f32 %v2362_v57, %v2076_v60  ;;  %v2315_v3 = vpop.f32.mrb[27].mxu0  ;;  %v2356_v4 = vpop.f32.mrb[27].mxu1  ;;  %v2372_v7 = vadd.f32 %v2364_v16, %v2078_v17  ;;  %v2402_v57 = vld [vmem:[#allocation2 + $0x60] sm:$0xc]  ;;  %v2404_v17 = vld [vmem:[#allocation2 + $0x70] sm:$0xc] }
 0x3f8   :  { %v2371_v39 = vadd.f32 %v2363_v61, %v2077_v2  ;;  %v2373_v15 = vadd.f32 %v2365_v13, %v2079_v14 }
 0x3f9   :  { %v13165_v5 = vmul.f32 -1.442695, %v2370_v0 }
 0x3fa   :  { %v13166_v11 = vmul.f32 -1.442695, %v2371_v39  ;;  %v13167_v18 = vmul.f32 -1.442695, %v2373_v15 }
 0x3fb   :  { %15255 = vpow2.f32 %v13165_v5  ;;  %v2405_v5 = vld [vmem:[#allocation2 + $0x78] sm:$0xc] }
 0x3fc   :  { %15257 = vpow2.f32 %v13166_v11 }
 0x3fd   :  { %15259 = vpow2.f32 %v13167_v18 }
 0x3fe   :  { %15261 = vtanh.f32 %v2372_v7 }
 0x405   :  { %v15256_v19 = vpop.eup %15255 }
 0x406   :  { %v15258_v20 = vpop.eup %15257  ;;  %v2377_v21 = vadd.f32 1.0, %v15256_v19 }
 0x407   :  { %v2383_v22 = vadd.f32 1.0, %v15258_v20  ;;  %v15260_v23 = vpop.eup %15259 }
 0x408   :  { %15263 = vrcp.f32 %v2377_v21  ;;  %v15262_v24 = vpop.eup %15261  ;;  %v2390_v31 = vadd.f32 1.0, %v15260_v23 }
 0x409   :  { %15265 = vrcp.f32 %v2383_v22 }
 0x40a   :  { %15267 = vrcp.f32 %v2390_v31  ;;  %v16735_v31 = vld [vmem:[#allocation9 + $0x20] ss:$16 sps:$4 sm:$0xff]  }
 0x412   :  { %v15264_v25 = vpop.eup %15263 }
 0x413   :  { %v15266_v27 = vpop.eup %15265  ;;  %v2397_v29 = vmul.f32 %v15264_v25, %v15262_v24 }
 0x414   :  { %v2396_v48 = vmul.f32 %v15266_v27, %v2394_v26  ;;  %v15268_v39 = vpop.eup %15267  ;;  %v16719_v26 = vld [vmem:[#allocation9 + $0x4] ss:$16 sps:$4 sm:$0xff]   ;;  %v16725_v27 = vld [vmem:[#allocation9 + $0x8] ss:$16 sps:$4 sm:$0xff]  }
 0x416   :  { %v16678_v52 = vadd.f32 %v2397_v29, %v2396_v48  ;;  %v16733_v29 = vld [vmem:[#allocation9 + $0x2c] ss:$16 sps:$4 sm:$0xff]   ;;  %v16737_v48 = vld [vmem:[#allocation9 + $0x28] ss:$16 sps:$4 sm:$0xff]  }
 0x418   :  { %v2636_v51 = vpop.f32.mrb[28].mxu0  ;;  %v2677_v9 = vpop.f32.mrb[28].mxu1  ;;  %15269 = vtanh.f32 %v16678_v52 }
 0x419   :  { %v2688_v53 = vrot.slane %v2636_v51, 6  ;;  %v2638_v55 = vpop.f32.mrb[29].mxu0  ;;  %v2679_v56 = vpop.f32.mrb[29].mxu1  ;;  %v2690_v14 = vrot.slane %v2677_v9, 6  ;;  %v16743_v51 = vld [vmem:[#allocation9 + $0x44] ss:$16 sps:$4 sm:$0xff]  }
 0x41a   :  { %v2689_v58 = vrot.slane %v2638_v55, 6  ;;  %v2640_v59 = vpop.f32.mrb[30].mxu0  ;;  %v2681_v60 = vpop.f32.mrb[30].mxu1  ;;  %v2691_v4 = vrot.slane %v2679_v56, 6  ;;  %v16745_v9 = vld [vmem:[#allocation9 + $0x4c] ss:$16 sps:$4 sm:$0xff]  }
 0x41b   :  { %v2696_v61 = vadd.f32 %v2688_v53, %v2402_v57  ;;  %v2641_v62 = vpop.f32.mrb[31].mxu0  ;;  %v2682_v63 = vpop.f32.mrb[31].mxu1  ;;  %v2698_v7 = vadd.f32 %v2690_v14, %v2404_v17  ;;  %v16747_v53 = vld [vmem:[#allocation9 + $0x40] ss:$16 sps:$4 sm:$0xff]   ;;  %v16749_v55 = vld [vmem:[#allocation9 + $0x48] ss:$16 sps:$4 sm:$0xff]  }
 0x41c   :  { %v2697_v0 = vadd.f32 %v2689_v58, %v2403_v49  ;;  %v2699_v13 = vadd.f32 %v2691_v4, %v2405_v5  ;;  %v16755_v56 = vld [vmem:[#allocation9 + $0x60] ss:$16 sps:$4 sm:$0xff]   ;;  %v16757_v57 = vld [vmem:[#allocation9 + $0x64] ss:$16 sps:$4 sm:$0xff]   ;;  %v16759_v58 = vld [vmem:[#allocation9 + $0x68] ss:$16 sps:$4 sm:$0xff]  }
 0x41d   :  { %v13200_v2 = vmul.f32 -1.442695, %v2696_v61  ;;  %v16761_v59 = vld [vmem:[#allocation9 + $0x6c] ss:$16 sps:$4 sm:$0xff]   ;;  %v16767_v60 = vld [vmem:[#allocation9 + $0x84] ss:$16 sps:$4 sm:$0xff]  }
 0x41e   :  { %v13201_v3 = vmul.f32 -1.442695, %v2697_v0  ;;  %v13202_v18 = vmul.f32 -1.442695, %v2699_v13  ;;  %v16769_v61 = vld [vmem:[#allocation9 + $0x8c] ss:$16 sps:$4 sm:$0xff]  }
 0x41f   :  { %15271 = vpow2.f32 %v13200_v2  ;;  %v16771_v49 = vld [vmem:[#allocation9 + $0x80] ss:$16 sps:$4 sm:$0xff]   ;;  %v16773_v62 = vld [vmem:[#allocation9 + $0x88] ss:$16 sps:$4 sm:$0xff]   ;;  %v16779_v63 = vld [vmem:[#allocation9 + $0xa4] ss:$16 sps:$4 sm:$0xff]  }
 0x420   :  { %15273 = vpow2.f32 %v13201_v3  ;;  %v16781_v0 = vld [vmem:[#allocation9 + $0xac] ss:$16 sps:$4 sm:$0xff]   ;;  %v16783_v2 = vld [vmem:[#allocation9 + $0xa0] ss:$16 sps:$4 sm:$0xff]   ;;  %v16785_v3 = vld [vmem:[#allocation9 + $0xa8] ss:$16 sps:$4 sm:$0xff]  }
 0x421   :  { %15275 = vpow2.f32 %v13202_v18  ;;  %v16791_v4 = vld [vmem:[#allocation9 + $0xc4] ss:$16 sps:$4 sm:$0xff]   ;;  %v16795_v5 = vld [vmem:[#allocation9 + $0xc0] ss:$16 sps:$4 sm:$0xff]   ;;  %v16805_v14 = vld [vmem:[#allocation9 + $0xec] ss:$16 sps:$4 sm:$0xff]  }
 0x422   :  { %v15270_v11 = vpop.eup %15269  ;;  %15277 = vtanh.f32 %v2698_v7  ;;  %v16803_v13 = vld [vmem:[#allocation9 + $0xe4] ss:$16 sps:$4 sm:$0xff]   ;;  %v16817_v18 = vld [vmem:[#allocation11 + $0xc] ss:$16 sps:$4 sm:$0xff]  }
 0x423   :  { %v2400_v15 = vmul.f32 %v15270_v11, %v15268_v39  ;;  %v16793_v39 = vld [vmem:[#allocation9 + $0xcc] ss:$16 sps:$4 sm:$0xff]   ;;  %v16797_v11 = vld [vmem:[#allocation9 + $0xc8] ss:$16 sps:$4 sm:$0xff]   ;;  %v16815_v17 = vld [vmem:[#allocation11 + $0x4] ss:$16 sps:$4 sm:$0xff]  }
 0x425   :  { %2401 = vst [vmem:[#allocation3] sm:$0x30] %v2400_v15  ;;  %v2732_v16 = vpack.c.bf16 %v2400_v15, %v2400_v15  ;;  %v16807_v15 = vld [vmem:[#allocation9 + $0xe0] ss:$16 sps:$4 sm:$0xff]  }
 0x427   :  { %v2766_v19 = vrot.slane %v2732_v16, 2  ;;  %v16809_v16 = vld [vmem:[#allocation9 + $0xe8] ss:$16 sps:$4 sm:$0xff]  }
 0x429   :  { %v15272_v20 = vpop.eup %15271  ;;  %2961 = vmatmul.mubr.bf16.vlgmr.msra.gmra.mrb[32].mxu0 %v2766_v19  ;;  %3002 = vmatmul.mubr.bf16.vlgmr.msra.gmra.mrb[32].mxu1 %v2766_v19 }
 0x42a   :  { %v15274_v21 = vpop.eup %15273  ;;  %v2703_v22 = vadd.f32 1.0, %v15272_v20  ;;  %3255 = vmatpush1.bf16.msra.mxu0 %v16545_v12  ;;  %3296 = vmatpush1.bf16.msra.mxu1 %v16547_v50 }
 0x42b   :  { %v2709_v23 = vadd.f32 1.0, %v15274_v21  ;;  %3256 = vmatprep.subr.bf16.mxu0 %v16549_v54  ;;  %3297 = vmatprep.subr.bf16.mxu1 %v16551_v34  ;;  %v15276_v12 = vpop.eup %15275  ;;  %v2720_v34 = vrot.slane %v16604_v6, 2  ;;  %v18660_v6 = vld [vmem:[#allocation33_spill] sm:$0xff] }
 0x42c   :  { %15279 = vrcp.f32 %v2703_v22  ;;  %3286 = vmatprep.mubr.bf16.mxu0 %v18657_v38  ;;  %3327 = vmatprep.mubr.bf16.mxu1 %v18657_v38  ;;  %v15278_v50 = vpop.eup %15277 }
 0x42d   :  { %15281 = vrcp.f32 %v2709_v23  ;;  %v2728_v23 = vld [vmem:[#allocation2] sm:$0xc0] }
 0x42e   :  { %3257 = vmatpush1.bf16.msra.mxu0 %v16555_v40  ;;  %3298 = vmatpush1.bf16.msra.mxu1 %v16557_v44  ;;  %v18658_v40 = vld [vmem:[#allocation31_spill] sm:$0xff]  ;;  %v18659_v44 = vld [vmem:[#allocation32_spill] sm:$0xff] }
 0x42f   :  { %3258 = vmatprep.subr.bf16.mxu0 %v16561_v42  ;;  %3299 = vmatprep.subr.bf16.mxu1 %v16563_v43  ;;  %v2716_v43 = vadd.f32 1.0, %v15276_v12 }
 0x431   :  { %15283 = vrcp.f32 %v2716_v43 }
 0x432   :  { %3259 = vmatpush1.bf16.msra.mxu0 %v16569_v45  ;;  %3300 = vmatpush1.bf16.msra.mxu1 %v16571_v41 }
 0x433   :  { %3260 = vmatprep.subr.bf16.mxu0 %v16575_v46  ;;  %3301 = vmatprep.subr.bf16.mxu1 %v16577_v47  ;;  %v18661_v46 = vld [vmem:[#allocation34_spill] sm:$0xff]  ;;  %v18662_v47 = vld [vmem:[#allocation35_spill] sm:$0xff] }
 0x436   :  { %v15280_v54 = vpop.eup %15279  ;;  %3261 = vmatpush1.bf16.msra.mxu0 %v18658_v40  ;;  %3302 = vmatpush1.bf16.msra.mxu1 %v18659_v44  ;;  %v2729_v40 = vld [vmem:[#allocation2 + $0x8] sm:$0xc0] }
 0x437   :  { %v15282_v42 = vpop.eup %15281  ;;  %v2723_v24 = vmul.f32 %v15280_v54, %v15278_v50  ;;  %3262 = vmatprep.subr.bf16.mxu0 %v16587_v33  ;;  %3303 = vmatprep.subr.bf16.mxu1 %v16589_v32  ;;  %v18663_v33 = vld [vmem:[#allocation36_spill] sm:$0xff]  ;;  %v18664_v32 = vld [vmem:[#allocation37_spill] sm:$0xff] }
 0x438   :  { %v2722_v45 = vmul.f32 %v15282_v42, %v2720_v34 }
 0x43a   :  { %v16700_v41 = vadd.f32 %v2723_v24, %v2722_v45  ;;  %3263 = vmatpush1.bf16.msra.mxu0 %v16594_v36  ;;  %3304 = vmatpush1.bf16.msra.mxu1 %v16596_v35  ;;  %v18665_v36 = vld [vmem:[#allocation38_spill] sm:$0xff] }
 0x43b   :  { %3264 = vmatprep.subr.bf16.mxu0 %v16600_v8  ;;  %3305 = vmatprep.subr.bf16.mxu1 %v16602_v1  ;;  %v15284_v8 = vpop.eup %15283 }
 0x43c   :  { %15285 = vtanh.f32 %v16700_v41 }
 0x43e   :  { %3265 = vmatpush1.bf16.msra.mxu0 %v16608_v37  ;;  %3306 = vmatpush1.bf16.msra.mxu1 %v18660_v6 }
 0x43f   :  { %3266 = vmatprep.subr.bf16.mxu0 %v18661_v46  ;;  %3307 = vmatprep.subr.bf16.mxu1 %v18662_v47  ;;  %v2731_v46 = vld [vmem:[#allocation2 + $0x18] sm:$0xc0] }
 0x442   :  { %3267 = vmatpush1.bf16.msra.mxu0 %v18663_v33  ;;  %3308 = vmatpush1.bf16.msra.mxu1 %v18664_v32  ;;  %v2730_v32 = vld [vmem:[#allocation2 + $0x10] sm:$0xc0] }
 0x443   :  { %3268 = vmatprep.subr.bf16.mxu0 %v16627_v10  ;;  %3309 = vmatprep.subr.bf16.mxu1 %v16629_v28  ;;  %v16721_v10 = vld [vmem:[#allocation9 + $0xc] ss:$16 sps:$4 sm:$0xff]   ;;  %v16723_v28 = vld [vmem:[#allocation9] ss:$16 sps:$4 sm:$0xff]  }
 0x446   :  { %v15286_v1 = vpop.eup %15285  ;;  %3269 = vmatpush1.bf16.msra.mxu0 %v18665_v36  ;;  %3310 = vmatpush1.bf16.msra.mxu1 %v16635_v30  ;;  %v16731_v30 = vld [vmem:[#allocation9 + $0x24] ss:$16 sps:$4 sm:$0xff]  }
 0x447   :  { %v2726_v37 = vmul.f32 %v15286_v1, %v15284_v8  ;;  %3568 = vmatprep.subr.bf16.mxu0 %v16719_v26  ;;  %3609 = vmatprep.subr.bf16.mxu1 %v16721_v10 }
 0x449   :  { %2727 = vst [vmem:[#allocation3 + $0x18] sm:$0xc] %v2726_v37  ;;  %v3058_v35 = vpack.c.bf16 %v2726_v37, %v2726_v37 }
 0x44b   :  { %v3092_v25 = vrot.slane %v3058_v35, 1 }
 0x44d   :  { %3287 = vmatmul.mubr.bf16.vlgmr.msra.gmra.mrb[36].mxu0 %v3092_v25  ;;  %3328 = vmatmul.mubr.bf16.vlgmr.msra.gmra.mrb[36].mxu1 %v3092_v25 }
 0x44e   :  { %3600 = vmatprep.mubr.bf16.mxu0 %v18657_v38  ;;  %3641 = vmatprep.mubr.bf16.mxu1 %v18657_v38 }
 0x44f   :  { %3569 = vmatpush1.bf16.msra.mxu0 %v16723_v28  ;;  %3610 = vmatpush1.bf16.msra.mxu1 %v16725_v27 }
 0x450   :  { %3570 = vmatprep.subr.bf16.mxu0 %v16731_v30  ;;  %3611 = vmatprep.subr.bf16.mxu1 %v16733_v29 }
 0x453   :  { %3571 = vmatpush1.bf16.msra.mxu0 %v16735_v31  ;;  %3612 = vmatpush1.bf16.msra.mxu1 %v16737_v48 }
 0x454   :  { %3572 = vmatprep.subr.bf16.mxu0 %v16743_v51  ;;  %3613 = vmatprep.subr.bf16.mxu1 %v16745_v9 }
 0x457   :  { %3573 = vmatpush1.bf16.msra.mxu0 %v16747_v53  ;;  %3614 = vmatpush1.bf16.msra.mxu1 %v16749_v55 }
 0x458   :  { %3574 = vmatprep.subr.bf16.mxu0 %v16757_v57  ;;  %3615 = vmatprep.subr.bf16.mxu1 %v16761_v59 }
 0x45b   :  { %3575 = vmatpush1.bf16.msra.mxu0 %v16755_v56  ;;  %3616 = vmatpush1.bf16.msra.mxu1 %v16759_v58 }
 0x45c   :  { %3576 = vmatprep.subr.bf16.mxu0 %v16767_v60  ;;  %3617 = vmatprep.subr.bf16.mxu1 %v16769_v61 }
 0x45f   :  { %3577 = vmatpush1.bf16.msra.mxu0 %v16771_v49  ;;  %3618 = vmatpush1.bf16.msra.mxu1 %v16773_v62 }
 0x460   :  { %3578 = vmatprep.subr.bf16.mxu0 %v16779_v63  ;;  %3619 = vmatprep.subr.bf16.mxu1 %v16781_v0 }
 0x463   :  { %3579 = vmatpush1.bf16.msra.mxu0 %v16783_v2  ;;  %3620 = vmatpush1.bf16.msra.mxu1 %v16785_v3 }
 0x464   :  { %3580 = vmatprep.subr.bf16.mxu0 %v16791_v4  ;;  %3621 = vmatprep.subr.bf16.mxu1 %v16793_v39 }
 0x467   :  { %3581 = vmatpush1.bf16.msra.mxu0 %v16795_v5  ;;  %3622 = vmatpush1.bf16.msra.mxu1 %v16797_v11 }
 0x468   :  { %3582 = vmatprep.subr.bf16.mxu0 %v16803_v13  ;;  %3623 = vmatprep.subr.bf16.mxu1 %v16805_v14 }
 0x46b   :  { %3583 = vmatpush1.bf16.msra.mxu0 %v16807_v15  ;;  %3624 = vmatpush1.bf16.msra.mxu1 %v16809_v16 }
 0x46c   :  { %3879 = vmatprep.subr.bf16.mxu0 %v16815_v17  ;;  %3920 = vmatprep.subr.bf16.mxu1 %v16817_v18 }
 0x4fc   :  { %v2962_v7 = vpop.f32.mrb[32].mxu0  ;;  %v3003_v19 = vpop.f32.mrb[32].mxu1 }
 0x4fd   :  { %v3014_v20 = vrot.slane %v2962_v7, 2  ;;  %v2964_v21 = vpop.f32.mrb[33].mxu0  ;;  %v3005_v22 = vpop.f32.mrb[33].mxu1  ;;  %v3016_v33 = vrot.slane %v3003_v19, 2 }
 0x4fe   :  { %v3015_v12 = vrot.slane %v2964_v21, 2  ;;  %v2966_v50 = vpop.f32.mrb[34].mxu0  ;;  %v3007_v54 = vpop.f32.mrb[34].mxu1  ;;  %v3017_v6 = vrot.slane %v3005_v22, 2  ;;  %v3046_v22 = vrot.slane %v16678_v52, 6 }
 0x4ff   :  { %v3022_v34 = vadd.f32 %v3014_v20, %v2728_v23  ;;  %v2967_v44 = vpop.f32.mrb[35].mxu0  ;;  %v3008_v42 = vpop.f32.mrb[35].mxu1  ;;  %v3024_v1 = vadd.f32 %v3016_v33, %v2730_v32 }
 0x500   :  { %v3023_v24 = vadd.f32 %v3015_v12, %v2729_v40  ;;  %v3025_v47 = vadd.f32 %v3017_v6, %v2731_v46 }
 0x501   :  { %v13235_v43 = vmul.f32 -1.442695, %v3022_v34  ;;  %v3054_v34 = vld [vmem:[#allocation2 + $0x60] sm:$0x3] }
 0x502   :  { %v13236_v45 = vmul.f32 -1.442695, %v3023_v24  ;;  %v13237_v8 = vmul.f32 -1.442695, %v3025_v47  ;;  %v3055_v24 = vld [vmem:[#allocation2 + $0x68] sm:$0x3] }
 0x503   :  { %15287 = vpow2.f32 %v13235_v43 }
 0x504   :  { %15289 = vpow2.f32 %v13236_v45 }
 0x505   :  { %15291 = vpow2.f32 %v13237_v8 }
 0x506   :  { %15293 = vtanh.f32 %v3024_v1  ;;  %v3057_v1 = vld [vmem:[#allocation2 + $0x78] sm:$0x3] }
 0x50d   :  { %v15288_v36 = vpop.eup %15287 }
 0x50e   :  { %v15290_v37 = vpop.eup %15289  ;;  %v3029_v35 = vadd.f32 1.0, %v15288_v36 }
 0x50f   :  { %v3035_v25 = vadd.f32 1.0, %v15290_v37  ;;  %v15292_v7 = vpop.eup %15291 }
 0x510   :  { %15295 = vrcp.f32 %v3029_v35  ;;  %v15294_v20 = vpop.eup %15293  ;;  %v3042_v50 = vadd.f32 1.0, %v15292_v7  ;;  %v3056_v7 = vld [vmem:[#allocation2 + $0x70] sm:$0x3] }
 0x511   :  { %15297 = vrcp.f32 %v3035_v25 }
 0x512   :  { %15299 = vrcp.f32 %v3042_v50 }
 0x51a   :  { %v15296_v21 = vpop.eup %15295 }
 0x51b   :  { %v15298_v23 = vpop.eup %15297  ;;  %v3049_v12 = vmul.f32 %v15296_v21, %v15294_v20 }
 0x51c   :  { %v3048_v19 = vmul.f32 %v15298_v23, %v3046_v22  ;;  %v15300_v37 = vpop.eup %15299  ;;  %v16825_v23 = vld [vmem:[#allocation11] ss:$16 sps:$4 sm:$0xff]  }
 0x51e   :  { %v16822_v54 = vadd.f32 %v3049_v12, %v3048_v19  ;;  %v16827_v12 = vld [vmem:[#allocation11 + $0x8] ss:$16 sps:$4 sm:$0xff]  }
 0x520   :  { %v3288_v40 = vpop.f32.mrb[36].mxu0  ;;  %v3329_v44 = vpop.f32.mrb[36].mxu1  ;;  %15301 = vtanh.f32 %v16822_v54 }
 0x521   :  { %v3336_v42 = vadd.f32 %v3288_v40, %v3054_v34  ;;  %v3290_v43 = vpop.f32.mrb[37].mxu0  ;;  %v3331_v45 = vpop.f32.mrb[37].mxu1  ;;  %v3338_v21 = vadd.f32 %v3329_v44, %v3056_v7  ;;  %v16829_v34 = vld [vmem:[#allocation11 + $0x24] ss:$16 sps:$4 sm:$0xff]   ;;  %v16831_v40 = vld [vmem:[#allocation11 + $0x2c] ss:$16 sps:$4 sm:$0xff]  }
 0x522   :  { %v3337_v6 = vadd.f32 %v3290_v43, %v3055_v24  ;;  %v3292_v46 = vpop.f32.mrb[38].mxu0  ;;  %v3333_v47 = vpop.f32.mrb[38].mxu1  ;;  %v3339_v36 = vadd.f32 %v3331_v45, %v3057_v1  ;;  %v16835_v44 = vld [vmem:[#allocation11 + $0x20] ss:$16 sps:$4 sm:$0xff]   ;;  %v16837_v45 = vld [vmem:[#allocation11 + $0x28] ss:$16 sps:$4 sm:$0xff]  }
 0x523   :  { %v13270_v52 = vmul.f32 -1.442695, %v3336_v42  ;;  %v3293_v33 = vpop.f32.mrb[39].mxu0  ;;  %v3334_v32 = vpop.f32.mrb[39].mxu1  ;;  %v16843_v46 = vld [vmem:[#allocation11 + $0x4c] ss:$16 sps:$4 sm:$0xff]  }
 0x524   :  { %v13271_v8 = vmul.f32 -1.442695, %v3337_v6  ;;  %v13272_v20 = vmul.f32 -1.442695, %v3339_v36  ;;  %v16841_v6 = vld [vmem:[#allocation11 + $0x44] ss:$16 sps:$4 sm:$0xff]  }
 0x525   :  { %15303 = vpow2.f32 %v13270_v52  ;;  %v16849_v47 = vld [vmem:[#allocation11 + $0x40] ss:$16 sps:$4 sm:$0xff]   ;;  %v16851_v52 = vld [vmem:[#allocation11 + $0x48] ss:$16 sps:$4 sm:$0xff]   ;;  %v16855_v33 = vld [vmem:[#allocation11 + $0x64] ss:$16 sps:$4 sm:$0xff]  }
 0x526   :  { %15305 = vpow2.f32 %v13271_v8  ;;  %v16857_v32 = vld [vmem:[#allocation11 + $0x6c] ss:$16 sps:$4 sm:$0xff]   ;;  %v16861_v1 = vld [vmem:[#allocation11 + $0x60] ss:$16 sps:$4 sm:$0xff]   ;;  %v16863_v36 = vld [vmem:[#allocation11 + $0x68] ss:$16 sps:$4 sm:$0xff]  }
 0x527   :  { %15307 = vpow2.f32 %v13272_v20  ;;  %18666 = vst [vmem:[#allocation31_spill] sm:$0xff] %v16857_v32  ;;  %v3360_v20 = vrot.slane %v16700_v41, 2 }
 0x528   :  { %15309 = vtanh.f32 %v3338_v21 }
 0x52a   :  { %v15302_v35 = vpop.eup %15301 }
 0x52b   :  { %v3052_v25 = vmul.f32 %v15302_v35, %v15300_v37  ;;  %v16867_v35 = vld [vmem:[#allocation11 + $0x84] ss:$16 sps:$4 sm:$0xff]  }
 0x52d   :  { %3053 = vst [vmem:[#allocation3] sm:$0xc0] %v3052_v25  ;;  %v3372_v22 = vpack.c.bf16 %v3052_v25, %v3052_v25  ;;  %v16869_v25 = vld [vmem:[#allocation11 + $0x8c] ss:$16 sps:$4 sm:$0xff]  }
 0x52f   :  { %v15304_v50 = vpop.eup %15303  ;;  %v3406_v19 = vrot.slane %v3372_v22, 3 }
 0x530   :  { %v15306_v42 = vpop.eup %15305  ;;  %v3343_v24 = vadd.f32 1.0, %v15304_v50 }
 0x531   :  { %v3349_v43 = vadd.f32 1.0, %v15306_v42  ;;  %3601 = vmatmul.mubr.bf16.vlgmr.msra.gmra.mrb[40].mxu0 %v3406_v19  ;;  %3642 = vmatmul.mubr.bf16.vlgmr.msra.gmra.mrb[40].mxu1 %v3406_v19  ;;  %v15308_v8 = vpop.eup %15307  ;;  %v16874_v42 = vld [vmem:[#allocation11 + $0x80] ss:$16 sps:$4 sm:$0xff]  }
 0x532   :  { %15311 = vrcp.f32 %v3343_v24  ;;  %3880 = vmatpush1.bf16.msra.mxu0 %v16825_v23  ;;  %3921 = vmatpush1.bf16.msra.mxu1 %v16827_v12  ;;  %v15310_v37 = vpop.eup %15309  ;;  %v3356_v50 = vadd.f32 1.0, %v15308_v8  ;;  %v16876_v24 = vld [vmem:[#allocation11 + $0x88] ss:$16 sps:$4 sm:$0xff]   ;;  %v16889_v8 = vld [vmem:[#allocation11 + $0xa0] ss:$16 sps:$4 sm:$0xff]  }
 0x533   :  { %15313 = vrcp.f32 %v3349_v43  ;;  %3881 = vmatprep.subr.bf16.mxu0 %v16829_v34  ;;  %3922 = vmatprep.subr.bf16.mxu1 %v16831_v40  ;;  %v16880_v43 = vld [vmem:[#allocation11 + $0xa4] ss:$16 sps:$4 sm:$0xff]   ;;  %18669 = vst [vmem:[#allocation34_spill] sm:$0xff] %v16889_v8 }
 0x534   :  { %3911 = vmatprep.mubr.bf16.mxu0 %v18657_v38  ;;  %3952 = vmatprep.mubr.bf16.mxu1 %v18657_v38  ;;  %18667 = vst [vmem:[#allocation32_spill] sm:$0xff] %v16880_v43  ;;  %15315 = vrcp.f32 %v3356_v50  ;;  %v16907_v50 = vld [vmem:[#allocation11 + $0xe4] ss:$16 sps:$4 sm:$0xff]  }
 0x536   :  { %3882 = vmatpush1.bf16.msra.mxu0 %v16835_v44  ;;  %3923 = vmatpush1.bf16.msra.mxu1 %v16837_v45 }
 0x537   :  { %3883 = vmatprep.subr.bf16.mxu0 %v16841_v6  ;;  %3924 = vmatprep.subr.bf16.mxu1 %v16843_v46 }
 0x53a   :  { %3884 = vmatpush1.bf16.msra.mxu0 %v16849_v47  ;;  %3925 = vmatpush1.bf16.msra.mxu1 %v16851_v52 }
 0x53b   :  { %3885 = vmatprep.subr.bf16.mxu0 %v16855_v33  ;;  %3926 = vmatprep.subr.bf16.mxu1 %v16857_v32  ;;  %v16882_v32 = vld [vmem:[#allocation11 + $0xac] ss:$16 sps:$4 sm:$0xff]  }
 0x53c   :  { %v15312_v7 = vpop.eup %15311  ;;  %18668 = vst [vmem:[#allocation33_spill] sm:$0xff] %v16882_v32 }
 0x53d   :  { %v15314_v21 = vpop.eup %15313  ;;  %v3363_v22 = vmul.f32 %v15312_v7, %v15310_v37  ;;  %v16891_v37 = vld [vmem:[#allocation11 + $0xa8] ss:$16 sps:$4 sm:$0xff]   ;;  %v16895_v7 = vld [vmem:[#allocation11 + $0xc4] ss:$16 sps:$4 sm:$0xff]  }
 0x53e   :  { %v3362_v19 = vmul.f32 %v15314_v21, %v3360_v20  ;;  %3886 = vmatpush1.bf16.msra.mxu0 %v16861_v1  ;;  %3927 = vmatpush1.bf16.msra.mxu1 %v16863_v36  ;;  %18670 = vst [vmem:[#allocation35_spill] sm:$0xff] %v16891_v37  ;;  %18671 = vst [vmem:[#allocation36_spill] sm:$0xff] %v16895_v7  ;;  %v16897_v20 = vld [vmem:[#allocation11 + $0xcc] ss:$16 sps:$4 sm:$0xff]   ;;  %v16901_v21 = vld [vmem:[#allocation11 + $0xc0] ss:$16 sps:$4 sm:$0xff]  }
 0x53f   :  { %3887 = vmatprep.subr.bf16.mxu0 %v16867_v35  ;;  %3928 = vmatprep.subr.bf16.mxu1 %v16869_v25  ;;  %18672 = vst [vmem:[#allocation37_spill] sm:$0xff] %v16897_v20 }
 0x540   :  { %v16884_v41 = vadd.f32 %v3363_v22, %v3362_v19  ;;  %v16903_v22 = vld [vmem:[#allocation11 + $0xc8] ss:$16 sps:$4 sm:$0xff]   ;;  %v16909_v19 = vld [vmem:[#allocation11 + $0xec] ss:$16 sps:$4 sm:$0xff]  }
 0x542   :  { %15317 = vtanh.f32 %v16884_v41  ;;  %3888 = vmatpush1.bf16.msra.mxu0 %v16874_v42  ;;  %3929 = vmatpush1.bf16.msra.mxu1 %v16876_v24 }
 0x543   :  { %3889 = vmatprep.subr.bf16.mxu0 %v16880_v43  ;;  %3930 = vmatprep.subr.bf16.mxu1 %v16882_v32  ;;  %v16913_v32 = vld [vmem:[#allocation11 + $0xe0] ss:$16 sps:$4 sm:$0xff]  }
 0x546   :  { %3890 = vmatpush1.bf16.msra.mxu0 %v16889_v8  ;;  %3931 = vmatpush1.bf16.msra.mxu1 %v16891_v37  ;;  %v16915_v8 = vld [vmem:[#allocation11 + $0xe8] ss:$16 sps:$4 sm:$0xff]   ;;  %v15316_v37 = vpop.eup %15315 }
 0x547   :  { %3891 = vmatprep.subr.bf16.mxu0 %v16895_v7  ;;  %3932 = vmatprep.subr.bf16.mxu1 %v16897_v20 }
 0x54a   :  { %3892 = vmatpush1.bf16.msra.mxu0 %v16901_v21  ;;  %3933 = vmatpush1.bf16.msra.mxu1 %v16903_v22 }
 0x54b   :  { %3893 = vmatprep.subr.bf16.mxu0 %v16907_v50  ;;  %3934 = vmatprep.subr.bf16.mxu1 %v16909_v19 }
 0x54c   :  { %v15318_v7 = vpop.eup %15317 }
 0x54d   :  { %v3366_v43 = vmul.f32 %v15318_v7, %v15316_v37 }
 0x54e   :  { %3894 = vmatpush1.bf16.msra.mxu0 %v16913_v32  ;;  %3935 = vmatpush1.bf16.msra.mxu1 %v16915_v8 }
 0x54f   :  { %3367 = vst [vmem:[#allocation3 + $0x18] sm:$0x3] %v3366_v43  ;;  %v3686_v20 = vpack.c.bf16 %v3366_v43, %v3366_v43  ;;  %4202 = vmatprep.subr.bf16.mxu0 %v16719_v26  ;;  %4243 = vmatprep.subr.bf16.mxu1 %v16721_v10  ;;  %v3368_v26 = vld [vmem:[#allocation2 + $0x40] sm:$0x3] }
 0x551   :  { %3912 = vmatmul.mubr.bf16.vlgmr.msra.gmra.mrb[44].mxu0 %v3686_v20  ;;  %3953 = vmatmul.mubr.bf16.vlgmr.msra.gmra.mrb[44].mxu1 %v3686_v20  ;;  %v3682_v20 = vld [vmem:[#allocation2 + $0x20] sm:$0xc0] }
 0x552   :  { %4203 = vmatpush1.bf16.msra.mxu0 %v16723_v28  ;;  %4244 = vmatpush1.bf16.msra.mxu1 %v16725_v27 }
 0x553   :  { %4204 = vmatprep.subr.bf16.mxu0 %v16731_v30  ;;  %4245 = vmatprep.subr.bf16.mxu1 %v16733_v29  ;;  %v3369_v30 = vld [vmem:[#allocation2 + $0x48] sm:$0x3] }
 0x554   :  { %4234 = vmatprep.mubr.bf16.mxu0 %v18657_v38  ;;  %4275 = vmatprep.mubr.bf16.mxu1 %v18657_v38 }
 0x556   :  { %4205 = vmatpush1.bf16.msra.mxu0 %v16735_v31  ;;  %4246 = vmatpush1.bf16.msra.mxu1 %v16737_v48 }
 0x557   :  { %4206 = vmatprep.subr.bf16.mxu0 %v16743_v51  ;;  %4247 = vmatprep.subr.bf16.mxu1 %v16745_v9 }
 0x55a   :  { %4207 = vmatpush1.bf16.msra.mxu0 %v16747_v53  ;;  %4248 = vmatpush1.bf16.msra.mxu1 %v16749_v55 }
 0x55b   :  { %4208 = vmatprep.subr.bf16.mxu0 %v16757_v57  ;;  %4249 = vmatprep.subr.bf16.mxu1 %v16761_v59 }
 0x55e   :  { %4209 = vmatpush1.bf16.msra.mxu0 %v16755_v56  ;;  %4250 = vmatpush1.bf16.msra.mxu1 %v16759_v58  ;;  %v3371_v58 = vld [vmem:[#allocation2 + $0x58] sm:$0x3] }
 0x55f   :  { %4210 = vmatprep.subr.bf16.mxu0 %v16767_v60  ;;  %4251 = vmatprep.subr.bf16.mxu1 %v16769_v61  ;;  %v3370_v60 = vld [vmem:[#allocation2 + $0x50] sm:$0x3] }
 0x562   :  { %4211 = vmatpush1.bf16.msra.mxu0 %v16771_v49  ;;  %4252 = vmatpush1.bf16.msra.mxu1 %v16773_v62 }
 0x563   :  { %4212 = vmatprep.subr.bf16.mxu0 %v16779_v63  ;;  %4253 = vmatprep.subr.bf16.mxu1 %v16781_v0 }
 0x566   :  { %4213 = vmatpush1.bf16.msra.mxu0 %v16783_v2  ;;  %4254 = vmatpush1.bf16.msra.mxu1 %v16785_v3 }
 0x567   :  { %4214 = vmatprep.subr.bf16.mxu0 %v16791_v4  ;;  %4255 = vmatprep.subr.bf16.mxu1 %v16793_v39 }
 0x56a   :  { %4215 = vmatpush1.bf16.msra.mxu0 %v16795_v5  ;;  %4256 = vmatpush1.bf16.msra.mxu1 %v16797_v11  ;;  %v3674_v5 = vrot.slane %v16822_v54, 6  ;;  %v3683_v54 = vld [vmem:[#allocation2 + $0x28] sm:$0xc0] }
 0x56b   :  { %4216 = vmatprep.subr.bf16.mxu0 %v16803_v13  ;;  %4257 = vmatprep.subr.bf16.mxu1 %v16805_v14 }
 0x56e   :  { %4217 = vmatpush1.bf16.msra.mxu0 %v16807_v15  ;;  %4258 = vmatpush1.bf16.msra.mxu1 %v16809_v16 }
 0x56f   :  { %4528 = vmatprep.subr.bf16.mxu0 %v16815_v17  ;;  %4569 = vmatprep.subr.bf16.mxu1 %v16817_v18 }
 0x604   :  { %v3602_v10 = vpop.f32.mrb[40].mxu0  ;;  %v3643_v28 = vpop.f32.mrb[40].mxu1 }
 0x605   :  { %v3650_v27 = vadd.f32 %v3602_v10, %v3368_v26  ;;  %v3604_v29 = vpop.f32.mrb[41].mxu0  ;;  %v3645_v31 = vpop.f32.mrb[41].mxu1  ;;  %v3652_v49 = vadd.f32 %v3643_v28, %v3370_v60  ;;  %v3684_v60 = vld [vmem:[#allocation2 + $0x30] sm:$0xc0] }
 0x606   :  { %v3651_v48 = vadd.f32 %v3604_v29, %v3369_v30  ;;  %v3606_v51 = vpop.f32.mrb[42].mxu0  ;;  %v3647_v9 = vpop.f32.mrb[42].mxu1  ;;  %v3653_v59 = vadd.f32 %v3645_v31, %v3371_v58 }
 0x607   :  { %v13305_v53 = vmul.f32 -1.442695, %v3650_v27  ;;  %v3607_v55 = vpop.f32.mrb[43].mxu0  ;;  %v3648_v56 = vpop.f32.mrb[43].mxu1 }
 0x608   :  { %v13306_v57 = vmul.f32 -1.442695, %v3651_v48  ;;  %v13307_v61 = vmul.f32 -1.442695, %v3653_v59 }
 0x609   :  { %15319 = vpow2.f32 %v13305_v53  ;;  %v3685_v53 = vld [vmem:[#allocation2 + $0x38] sm:$0xc0] }
 0x60a   :  { %15321 = vpow2.f32 %v13306_v57 }
 0x60b   :  { %15323 = vpow2.f32 %v13307_v61 }
 0x60c   :  { %15325 = vtanh.f32 %v3652_v49 }
 0x613   :  { %v15320_v62 = vpop.eup %15319 }
 0x614   :  { %v15322_v63 = vpop.eup %15321  ;;  %v3657_v0 = vadd.f32 1.0, %v15320_v62 }
 0x615   :  { %v3663_v2 = vadd.f32 1.0, %v15322_v63  ;;  %v15324_v3 = vpop.eup %15323 }
 0x616   :  { %15327 = vrcp.f32 %v3657_v0  ;;  %v15326_v4 = vpop.eup %15325  ;;  %v3670_v14 = vadd.f32 1.0, %v15324_v3 }
 0x617   :  { %15329 = vrcp.f32 %v3663_v2 }
 0x618   :  { %15331 = vrcp.f32 %v3670_v14  ;;  %v17023_v14 = vld [vmem:[#allocation9 + $0x44] ss:$16 sps:$4 sm:$0xff]  }
 0x620   :  { %v15328_v39 = vpop.eup %15327 }
 0x621   :  { %v15330_v11 = vpop.eup %15329  ;;  %v3677_v13 = vmul.f32 %v15328_v39, %v15326_v4  ;;  %v3997_v4 = vrot.slane %v16884_v41, 2 }
 0x622   :  { %v3676_v15 = vmul.f32 %v15330_v11, %v3674_v5  ;;  %v15332_v56 = vpop.eup %15331  ;;  %v17015_v11 = vld [vmem:[#allocation9 + $0x20] ss:$16 sps:$4 sm:$0xff]  }
 0x624   :  { %v16958_v16 = vadd.f32 %v3677_v13, %v3676_v15  ;;  %v3913_v17 = vpop.f32.mrb[44].mxu0  ;;  %v3954_v18 = vpop.f32.mrb[44].mxu1  ;;  %v17017_v13 = vld [vmem:[#allocation9 + $0x28] ss:$16 sps:$4 sm:$0xff]   ;;  %v17025_v15 = vld [vmem:[#allocation9 + $0x4c] ss:$16 sps:$4 sm:$0xff]  }
 0x625   :  { %v3965_v43 = vrot.slane %v3913_v17, 2  ;;  %v3915_v37 = vpop.f32.mrb[45].mxu0  ;;  %v3956_v7 = vpop.f32.mrb[45].mxu1  ;;  %v3967_v57 = vrot.slane %v3954_v18, 2  ;;  %v17027_v17 = vld [vmem:[#allocation9 + $0x40] ss:$16 sps:$4 sm:$0xff]  }
 0x626   :  { %15333 = vtanh.f32 %v16958_v16  ;;  %v3966_v26 = vrot.slane %v3915_v37, 2  ;;  %v3917_v10 = vpop.f32.mrb[46].mxu0  ;;  %v3958_v28 = vpop.f32.mrb[46].mxu1  ;;  %v3968_v9 = vrot.slane %v3956_v7, 2  ;;  %v17029_v18 = vld [vmem:[#allocation9 + $0x48] ss:$16 sps:$4 sm:$0xff]  }
 0x627   :  { %v3973_v27 = vadd.f32 %v3965_v43, %v3682_v20  ;;  %v3918_v30 = vpop.f32.mrb[47].mxu0  ;;  %v3959_v29 = vpop.f32.mrb[47].mxu1  ;;  %v3975_v49 = vadd.f32 %v3967_v57, %v3684_v60  ;;  %v17035_v43 = vld [vmem:[#allocation9 + $0x60] ss:$16 sps:$4 sm:$0xff]   ;;  %v17037_v37 = vld [vmem:[#allocation9 + $0x64] ss:$16 sps:$4 sm:$0xff]  }
 0x628   :  { %v3974_v31 = vadd.f32 %v3966_v26, %v3683_v54  ;;  %v3976_v55 = vadd.f32 %v3968_v9, %v3685_v53  ;;  %v17039_v7 = vld [vmem:[#allocation9 + $0x68] ss:$16 sps:$4 sm:$0xff]   ;;  %v17041_v20 = vld [vmem:[#allocation9 + $0x6c] ss:$16 sps:$4 sm:$0xff]   ;;  %v17047_v26 = vld [vmem:[#allocation9 + $0x84] ss:$16 sps:$4 sm:$0xff]  }
 0x629   :  { %v13340_v48 = vmul.f32 -1.442695, %v3973_v27  ;;  %v17049_v10 = vld [vmem:[#allocation9 + $0x8c] ss:$16 sps:$4 sm:$0xff]   ;;  %v17051_v28 = vld [vmem:[#allocation9 + $0x80] ss:$16 sps:$4 sm:$0xff]  }
 0x62a   :  { %v13341_v51 = vmul.f32 -1.442695, %v3974_v31  ;;  %v13342_v61 = vmul.f32 -1.442695, %v3976_v55  ;;  %v17053_v27 = vld [vmem:[#allocation9 + $0x88] ss:$16 sps:$4 sm:$0xff]  }
 0x62b   :  { %15335 = vpow2.f32 %v13340_v48  ;;  %v17059_v54 = vld [vmem:[#allocation9 + $0xa4] ss:$16 sps:$4 sm:$0xff]   ;;  %v17061_v30 = vld [vmem:[#allocation9 + $0xac] ss:$16 sps:$4 sm:$0xff]   ;;  %v17063_v29 = vld [vmem:[#allocation9 + $0xa0] ss:$16 sps:$4 sm:$0xff]  }
 0x62c   :  { %15337 = vpow2.f32 %v13341_v51  ;;  %v17065_v31 = vld [vmem:[#allocation9 + $0xa8] ss:$16 sps:$4 sm:$0xff]   ;;  %v17071_v48 = vld [vmem:[#allocation9 + $0xc4] ss:$16 sps:$4 sm:$0xff]   ;;  %v17073_v51 = vld [vmem:[#allocation9 + $0xcc] ss:$16 sps:$4 sm:$0xff]  }
 0x62d   :  { %15339 = vpow2.f32 %v13342_v61  ;;  %v17075_v9 = vld [vmem:[#allocation9 + $0xc0] ss:$16 sps:$4 sm:$0xff]   ;;  %v17077_v53 = vld [vmem:[#allocation9 + $0xc8] ss:$16 sps:$4 sm:$0xff]   ;;  %v17083_v55 = vld [vmem:[#allocation9 + $0xe4] ss:$16 sps:$4 sm:$0xff]  }
 0x62e   :  { %15341 = vtanh.f32 %v3975_v49  ;;  %v17087_v57 = vld [vmem:[#allocation9 + $0xe0] ss:$16 sps:$4 sm:$0xff]   ;;  %v17097_v60 = vld [vmem:[#allocation11 + $0xc] ss:$16 sps:$4 sm:$0xff]  }
 0x630   :  { %v15334_v58 = vpop.eup %15333 }
 0x631   :  { %v3680_v59 = vmul.f32 %v15334_v58, %v15332_v56  ;;  %v17085_v56 = vld [vmem:[#allocation9 + $0xec] ss:$16 sps:$4 sm:$0xff]   ;;  %v17089_v58 = vld [vmem:[#allocation9 + $0xe8] ss:$16 sps:$4 sm:$0xff]  }
 0x633   :  { %3681 = vst [vmem:[#allocation3 + $0x10] sm:$0x3] %v3680_v59  ;;  %v4009_v62 = vpack.c.bf16 %v3680_v59, %v3680_v59  ;;  %v17095_v59 = vld [vmem:[#allocation11 + $0x4] ss:$16 sps:$4 sm:$0xff]  }
 0x635   :  { %v15336_v63 = vpop.eup %15335  ;;  %4235 = vmatmul.mubr.bf16.vlgmr.msra.gmra.mrb[48].mxu0 %v4009_v62  ;;  %4276 = vmatmul.mubr.bf16.vlgmr.msra.gmra.mrb[48].mxu1 %v4009_v62 }
 0x636   :  { %v15338_v0 = vpop.eup %15337  ;;  %v3980_v2 = vadd.f32 1.0, %v15336_v63  ;;  %4529 = vmatpush1.bf16.msra.mxu0 %v16825_v23  ;;  %4570 = vmatpush1.bf16.msra.mxu1 %v16827_v12  ;;  %v18673_v23 = vld [vmem:[#allocation31_spill] sm:$0xff] }
 0x637   :  { %v3986_v3 = vadd.f32 1.0, %v15338_v0  ;;  %4530 = vmatprep.subr.bf16.mxu0 %v16829_v34  ;;  %4571 = vmatprep.subr.bf16.mxu1 %v16831_v40  ;;  %v15340_v12 = vpop.eup %15339 }
 0x638   :  { %15343 = vrcp.f32 %v3980_v2  ;;  %4560 = vmatprep.mubr.bf16.mxu0 %v18657_v38  ;;  %4601 = vmatprep.mubr.bf16.mxu1 %v18657_v38  ;;  %v15342_v34 = vpop.eup %15341  ;;  %v4005_v2 = vld [vmem:[#allocation2 + $0x40] sm:$0xc] }
 0x639   :  { %15345 = vrcp.f32 %v3986_v3 }
 0x63a   :  { %4531 = vmatpush1.bf16.msra.mxu0 %v16835_v44  ;;  %4572 = vmatpush1.bf16.msra.mxu1 %v16837_v45 }
 0x63b   :  { %4532 = vmatprep.subr.bf16.mxu0 %v16841_v6  ;;  %4573 = vmatprep.subr.bf16.mxu1 %v16843_v46  ;;  %v3993_v6 = vadd.f32 1.0, %v15340_v12 }
 0x63d   :  { %15347 = vrcp.f32 %v3993_v6 }
 0x63e   :  { %4533 = vmatpush1.bf16.msra.mxu0 %v16849_v47  ;;  %4574 = vmatpush1.bf16.msra.mxu1 %v16851_v52  ;;  %v18674_v52 = vld [vmem:[#allocation32_spill] sm:$0xff] }
 0x63f   :  { %4534 = vmatprep.subr.bf16.mxu0 %v16855_v33  ;;  %4575 = vmatprep.subr.bf16.mxu1 %v18673_v23  ;;  %v18675_v33 = vld [vmem:[#allocation33_spill] sm:$0xff] }
 0x642   :  { %v15344_v40 = vpop.eup %15343  ;;  %4535 = vmatpush1.bf16.msra.mxu0 %v16861_v1  ;;  %4576 = vmatpush1.bf16.msra.mxu1 %v16863_v36  ;;  %v18676_v1 = vld [vmem:[#allocation34_spill] sm:$0xff]  ;;  %v18677_v36 = vld [vmem:[#allocation35_spill] sm:$0xff] }
 0x643   :  { %v15346_v44 = vpop.eup %15345  ;;  %v4000_v45 = vmul.f32 %v15344_v40, %v15342_v34  ;;  %4536 = vmatprep.subr.bf16.mxu0 %v16867_v35  ;;  %4577 = vmatprep.subr.bf16.mxu1 %v16869_v25  ;;  %v18678_v35 = vld [vmem:[#allocation36_spill] sm:$0xff]  ;;  %v18679_v25 = vld [vmem:[#allocation37_spill] sm:$0xff]  ;;  %v4006_v40 = vld [vmem:[#allocation2 + $0x48] sm:$0xc] }
 0x644   :  { %v3999_v46 = vmul.f32 %v15346_v44, %v3997_v4 }
 0x646   :  { %v16980_v47 = vadd.f32 %v4000_v45, %v3999_v46  ;;  %4537 = vmatpush1.bf16.msra.mxu0 %v16874_v42  ;;  %4578 = vmatpush1.bf16.msra.mxu1 %v16876_v24 }
 0x647   :  { %4538 = vmatprep.subr.bf16.mxu0 %v18674_v52  ;;  %4579 = vmatprep.subr.bf16.mxu1 %v18675_v33  ;;  %v15348_v42 = vpop.eup %15347  ;;  %v4008_v33 = vld [vmem:[#allocation2 + $0x58] sm:$0xc] }
 0x648   :  { %15349 = vtanh.f32 %v16980_v47 }
 0x64a   :  { %4539 = vmatpush1.bf16.msra.mxu0 %v18676_v1  ;;  %4580 = vmatpush1.bf16.msra.mxu1 %v18677_v36 }
 0x64b   :  { %4540 = vmatprep.subr.bf16.mxu0 %v18678_v35  ;;  %4581 = vmatprep.subr.bf16.mxu1 %v18679_v25  ;;  %v4007_v35 = vld [vmem:[#allocation2 + $0x50] sm:$0xc] }
 0x64e   :  { %4541 = vmatpush1.bf16.msra.mxu0 %v16901_v21  ;;  %4582 = vmatpush1.bf16.msra.mxu1 %v16903_v22  ;;  %v16999_v21 = vld [vmem:[#allocation9 + $0x4] ss:$16 sps:$4 sm:$0xff]   ;;  %v17001_v22 = vld [vmem:[#allocation9 + $0xc] ss:$16 sps:$4 sm:$0xff]  }
 0x64f   :  { %4542 = vmatprep.subr.bf16.mxu0 %v16907_v50  ;;  %4583 = vmatprep.subr.bf16.mxu1 %v16909_v19  ;;  %v17003_v50 = vld [vmem:[#allocation9] ss:$16 sps:$4 sm:$0xff]   ;;  %v17005_v19 = vld [vmem:[#allocation9 + $0x8] ss:$16 sps:$4 sm:$0xff]  }
 0x652   :  { %v15350_v24 = vpop.eup %15349  ;;  %4543 = vmatpush1.bf16.msra.mxu0 %v16913_v32  ;;  %4584 = vmatpush1.bf16.msra.mxu1 %v16915_v8  ;;  %v17011_v32 = vld [vmem:[#allocation9 + $0x24] ss:$16 sps:$4 sm:$0xff]   ;;  %v17013_v8 = vld [vmem:[#allocation9 + $0x2c] ss:$16 sps:$4 sm:$0xff]  }
 0x653   :  { %v4003_v41 = vmul.f32 %v15350_v24, %v15348_v42  ;;  %4854 = vmatprep.subr.bf16.mxu0 %v16999_v21  ;;  %4895 = vmatprep.subr.bf16.mxu1 %v17001_v22 }
 0x655   :  { %4004 = vst [vmem:[#allocation3 + $0x8] sm:$0xc0] %v4003_v41  ;;  %v4332_v39 = vpack.c.bf16 %v4003_v41, %v4003_v41 }
 0x657   :  { %v4366_v5 = vrot.slane %v4332_v39, 3 }
 0x659   :  { %4561 = vmatmul.mubr.bf16.vlgmr.msra.gmra.mrb[52].mxu0 %v4366_v5  ;;  %4602 = vmatmul.mubr.bf16.vlgmr.msra.gmra.mrb[52].mxu1 %v4366_v5 }
 0x65a   :  { %4886 = vmatprep.mubr.bf16.mxu0 %v18657_v38  ;;  %4927 = vmatprep.mubr.bf16.mxu1 %v18657_v38 }
 0x65b   :  { %4855 = vmatpush1.bf16.msra.mxu0 %v17003_v50  ;;  %4896 = vmatpush1.bf16.msra.mxu1 %v17005_v19 }
 0x65c   :  { %4856 = vmatprep.subr.bf16.mxu0 %v17011_v32  ;;  %4897 = vmatprep.subr.bf16.mxu1 %v17013_v8 }
 0x65f   :  { %4857 = vmatpush1.bf16.msra.mxu0 %v17015_v11  ;;  %4898 = vmatpush1.bf16.msra.mxu1 %v17017_v13 }
 0x660   :  { %4858 = vmatprep.subr.bf16.mxu0 %v17023_v14  ;;  %4899 = vmatprep.subr.bf16.mxu1 %v17025_v15 }
 0x663   :  { %4859 = vmatpush1.bf16.msra.mxu0 %v17027_v17  ;;  %4900 = vmatpush1.bf16.msra.mxu1 %v17029_v18 }
 0x664   :  { %4860 = vmatprep.subr.bf16.mxu0 %v17037_v37  ;;  %4901 = vmatprep.subr.bf16.mxu1 %v17041_v20 }
 0x667   :  { %4861 = vmatpush1.bf16.msra.mxu0 %v17035_v43  ;;  %4902 = vmatpush1.bf16.msra.mxu1 %v17039_v7 }
 0x668   :  { %4862 = vmatprep.subr.bf16.mxu0 %v17047_v26  ;;  %4903 = vmatprep.subr.bf16.mxu1 %v17049_v10 }
 0x66b   :  { %4863 = vmatpush1.bf16.msra.mxu0 %v17051_v28  ;;  %4904 = vmatpush1.bf16.msra.mxu1 %v17053_v27 }
 0x66c   :  { %4864 = vmatprep.subr.bf16.mxu0 %v17059_v54  ;;  %4905 = vmatprep.subr.bf16.mxu1 %v17061_v30 }
 0x66f   :  { %4865 = vmatpush1.bf16.msra.mxu0 %v17063_v29  ;;  %4906 = vmatpush1.bf16.msra.mxu1 %v17065_v31 }
 0x670   :  { %4866 = vmatprep.subr.bf16.mxu0 %v17071_v48  ;;  %4907 = vmatprep.subr.bf16.mxu1 %v17073_v51 }
 0x673   :  { %4867 = vmatpush1.bf16.msra.mxu0 %v17075_v9  ;;  %4908 = vmatpush1.bf16.msra.mxu1 %v17077_v53 }
 0x674   :  { %4868 = vmatprep.subr.bf16.mxu0 %v17083_v55  ;;  %4909 = vmatprep.subr.bf16.mxu1 %v17085_v56 }
 0x677   :  { %4869 = vmatpush1.bf16.msra.mxu0 %v17087_v57  ;;  %4910 = vmatpush1.bf16.msra.mxu1 %v17089_v58 }
 0x678   :  { %5180 = vmatprep.subr.bf16.mxu0 %v17095_v59  ;;  %5221 = vmatprep.subr.bf16.mxu1 %v17097_v60 }
 0x708   :  { %v4236_v61 = vpop.f32.mrb[48].mxu0  ;;  %v4277_v49 = vpop.f32.mrb[48].mxu1 }
 0x709   :  { %v4288_v62 = vrot.slane %v4236_v61, 6  ;;  %v4238_v63 = vpop.f32.mrb[49].mxu0  ;;  %v4279_v0 = vpop.f32.mrb[49].mxu1  ;;  %v4290_v36 = vrot.slane %v4277_v49, 6 }
 0x70a   :  { %v4289_v3 = vrot.slane %v4238_v63, 6  ;;  %v4240_v23 = vpop.f32.mrb[50].mxu0  ;;  %v4281_v12 = vpop.f32.mrb[50].mxu1  ;;  %v4291_v52 = vrot.slane %v4279_v0, 6  ;;  %v4320_v0 = vrot.slane %v16958_v16, 6 }
 0x70b   :  { %v4296_v34 = vadd.f32 %v4288_v62, %v4005_v2  ;;  %v4241_v4 = vpop.f32.mrb[51].mxu0  ;;  %v4282_v44 = vpop.f32.mrb[51].mxu1  ;;  %v4298_v42 = vadd.f32 %v4290_v36, %v4007_v35  ;;  %v4329_v16 = vld [vmem:[#allocation2 + $0x28] sm:$0x30] }
 0x70c   :  { %v4297_v45 = vadd.f32 %v4289_v3, %v4006_v40  ;;  %v4299_v1 = vadd.f32 %v4291_v52, %v4008_v33 }
 0x70d   :  { %v13375_v6 = vmul.f32 -1.442695, %v4296_v34 }
 0x70e   :  { %v13376_v46 = vmul.f32 -1.442695, %v4297_v45  ;;  %v13377_v25 = vmul.f32 -1.442695, %v4299_v1 }
 0x70f   :  { %15351 = vpow2.f32 %v13375_v6  ;;  %v4328_v6 = vld [vmem:[#allocation2 + $0x20] sm:$0x30] }
 0x710   :  { %15353 = vpow2.f32 %v13376_v46 }
 0x711   :  { %15355 = vpow2.f32 %v13377_v25 }
 0x712   :  { %15357 = vtanh.f32 %v4298_v42 }
 0x719   :  { %v15352_v24 = vpop.eup %15351 }
 0x71a   :  { %v15354_v41 = vpop.eup %15353  ;;  %v4303_v39 = vadd.f32 1.0, %v15352_v24 }
 0x71b   :  { %v4309_v5 = vadd.f32 1.0, %v15354_v41  ;;  %v15356_v61 = vpop.eup %15355 }
 0x71c   :  { %15359 = vrcp.f32 %v4303_v39  ;;  %v15358_v62 = vpop.eup %15357  ;;  %v4316_v23 = vadd.f32 1.0, %v15356_v61 }
 0x71d   :  { %15361 = vrcp.f32 %v4309_v5  ;;  %v4331_v5 = vld [vmem:[#allocation2 + $0x38] sm:$0x30] }
 0x71e   :  { %15363 = vrcp.f32 %v4316_v23 }
 0x726   :  { %v15360_v63 = vpop.eup %15359 }
 0x727   :  { %v15362_v2 = vpop.eup %15361  ;;  %v4323_v3 = vmul.f32 %v15360_v63, %v15358_v62 }
 0x728   :  { %v4322_v49 = vmul.f32 %v15362_v2, %v4320_v0  ;;  %v15364_v39 = vpop.eup %15363  ;;  %v4330_v2 = vld [vmem:[#allocation2 + $0x30] sm:$0x30] }
 0x72a   :  { %v17102_v12 = vadd.f32 %v4323_v3, %v4322_v49  ;;  %v17105_v49 = vld [vmem:[#allocation11] ss:$16 sps:$4 sm:$0xff]  }
 0x72c   :  { %v4562_v34 = vpop.f32.mrb[52].mxu0  ;;  %v4603_v40 = vpop.f32.mrb[52].mxu1  ;;  %15365 = vtanh.f32 %v17102_v12 }
 0x72d   :  { %v4614_v4 = vrot.slane %v4562_v34, 4  ;;  %v4564_v44 = vpop.f32.mrb[53].mxu0  ;;  %v4605_v45 = vpop.f32.mrb[53].mxu1  ;;  %v4616_v63 = vrot.slane %v4603_v40, 4  ;;  %v17107_v34 = vld [vmem:[#allocation11 + $0x8] ss:$16 sps:$4 sm:$0xff]  }
 0x72e   :  { %v4615_v46 = vrot.slane %v4564_v44, 4  ;;  %v4566_v52 = vpop.f32.mrb[54].mxu0  ;;  %v4607_v33 = vpop.f32.mrb[54].mxu1  ;;  %v4617_v41 = vrot.slane %v4605_v45, 4  ;;  %v17111_v45 = vld [vmem:[#allocation11 + $0x2c] ss:$16 sps:$4 sm:$0xff]  }
 0x72f   :  { %v4622_v1 = vadd.f32 %v4614_v4, %v4328_v6  ;;  %v4567_v36 = vpop.f32.mrb[55].mxu0  ;;  %v4608_v35 = vpop.f32.mrb[55].mxu1  ;;  %v4624_v4 = vadd.f32 %v4616_v63, %v4330_v2  ;;  %v17109_v6 = vld [vmem:[#allocation11 + $0x24] ss:$16 sps:$4 sm:$0xff]   ;;  %v17115_v33 = vld [vmem:[#allocation11 + $0x20] ss:$16 sps:$4 sm:$0xff]  }
 0x730   :  { %v4623_v25 = vadd.f32 %v4615_v46, %v4329_v16  ;;  %v4625_v62 = vadd.f32 %v4617_v41, %v4331_v5  ;;  %v17121_v36 = vld [vmem:[#allocation11 + $0x44] ss:$16 sps:$4 sm:$0xff]   ;;  %v17123_v35 = vld [vmem:[#allocation11 + $0x4c] ss:$16 sps:$4 sm:$0xff]   ;;  %v17143_v5 = vld [vmem:[#allocation11 + $0x68] ss:$16 sps:$4 sm:$0xff]  }
 0x731   :  { %v13410_v42 = vmul.f32 -1.442695, %v4622_v1  ;;  %v17117_v1 = vld [vmem:[#allocation11 + $0x28] ss:$16 sps:$4 sm:$0xff]   ;;  %v17137_v41 = vld [vmem:[#allocation11 + $0x6c] ss:$16 sps:$4 sm:$0xff]  }
 0x732   :  { %v13411_v24 = vmul.f32 -1.442695, %v4623_v25  ;;  %v13412_v23 = vmul.f32 -1.442695, %v4625_v62  ;;  %v17129_v25 = vld [vmem:[#allocation11 + $0x40] ss:$16 sps:$4 sm:$0xff]  }
 0x733   :  { %15367 = vpow2.f32 %v13410_v42  ;;  %v17131_v42 = vld [vmem:[#allocation11 + $0x48] ss:$16 sps:$4 sm:$0xff]   ;;  %18680 = vst [vmem:[#allocation38_spill] sm:$0xff] %v17137_v41  ;;  %18682 = vst [vmem:[#allocation32_spill] sm:$0xff] %v17143_v5  ;;  %v17149_v62 = vld [vmem:[#allocation11 + $0x8c] ss:$16 sps:$4 sm:$0xff]  }
 0x734   :  { %15369 = vpow2.f32 %v13411_v24  ;;  %v17135_v24 = vld [vmem:[#allocation11 + $0x64] ss:$16 sps:$4 sm:$0xff]  }
 0x735   :  { %15371 = vpow2.f32 %v13412_v23  ;;  %v17154_v23 = vld [vmem:[#allocation11 + $0x80] ss:$16 sps:$4 sm:$0xff]  }
 0x736   :  { %v15366_v61 = vpop.eup %15365  ;;  %15373 = vtanh.f32 %v4624_v4  ;;  %v17156_v4 = vld [vmem:[#allocation11 + $0x88] ss:$16 sps:$4 sm:$0xff]  }
 0x737   :  { %v4326_v0 = vmul.f32 %v15366_v61, %v15364_v39  ;;  %v17141_v39 = vld [vmem:[#allocation11 + $0x60] ss:$16 sps:$4 sm:$0xff]   ;;  %v17147_v61 = vld [vmem:[#allocation11 + $0x84] ss:$16 sps:$4 sm:$0xff]  }
 0x738   :  { %18681 = vst [vmem:[#allocation31_spill] sm:$0xff] %v17141_v39 }
 0x739   :  { %4327 = vst [vmem:[#allocation3 + $0x10] sm:$0xc] %v4326_v0  ;;  %v4658_v3 = vpack.c.bf16 %v4326_v0, %v4326_v0 }
 0x73b   :  { %v4692_v44 = vrot.slane %v4658_v3, 1  ;;  %v4646_v3 = vrot.slane %v16980_v47, 2 }
 0x73d   :  { %v15368_v46 = vpop.eup %15367  ;;  %4887 = vmatmul.mubr.bf16.vlgmr.msra.gmra.mrb[56].mxu0 %v4692_v44  ;;  %4928 = vmatmul.mubr.bf16.vlgmr.msra.gmra.mrb[56].mxu1 %v4692_v44 }
 0x73e   :  { %v15370_v52 = vpop.eup %15369  ;;  %v4629_v40 = vadd.f32 1.0, %v15368_v46  ;;  %5181 = vmatpush1.bf16.msra.mxu0 %v17105_v49  ;;  %5222 = vmatpush1.bf16.msra.mxu1 %v17107_v34 }
 0x73f   :  { %v4635_v16 = vadd.f32 1.0, %v15370_v52  ;;  %5182 = vmatprep.subr.bf16.mxu0 %v17109_v6  ;;  %5223 = vmatprep.subr.bf16.mxu1 %v17111_v45  ;;  %v15372_v63 = vpop.eup %15371 }
 0x740   :  { %15375 = vrcp.f32 %v4629_v40  ;;  %5212 = vmatprep.mubr.bf16.mxu0 %v18657_v38  ;;  %5253 = vmatprep.mubr.bf16.mxu1 %v18657_v38  ;;  %v15374_v0 = vpop.eup %15373  ;;  %v4642_v52 = vadd.f32 1.0, %v15372_v63  ;;  %v17160_v40 = vld [vmem:[#allocation11 + $0xa4] ss:$16 sps:$4 sm:$0xff]  }
 0x741   :  { %15377 = vrcp.f32 %v4635_v16  ;;  %v17162_v16 = vld [vmem:[#allocation11 + $0xac] ss:$16 sps:$4 sm:$0xff]   ;;  %v17174_v63 = vld [vmem:[#allocation11 + $0xc4] ss:$16 sps:$4 sm:$0xff]  }
 0x742   :  { %5183 = vmatpush1.bf16.msra.mxu0 %v17115_v33  ;;  %5224 = vmatpush1.bf16.msra.mxu1 %v17117_v1  ;;  %15379 = vrcp.f32 %v4642_v52  ;;  %18684 = vst [vmem:[#allocation34_spill] sm:$0xff] %v17174_v63  ;;  %v17193_v52 = vld [vmem:[#allocation11 + $0xe0] ss:$16 sps:$4 sm:$0xff]  }
 0x743   :  { %5184 = vmatprep.subr.bf16.mxu0 %v17121_v36  ;;  %5225 = vmatprep.subr.bf16.mxu1 %v17123_v35 }
 0x746   :  { %5185 = vmatpush1.bf16.msra.mxu0 %v17129_v25  ;;  %5226 = vmatpush1.bf16.msra.mxu1 %v17131_v42 }
 0x747   :  { %5186 = vmatprep.subr.bf16.mxu0 %v17135_v24  ;;  %5227 = vmatprep.subr.bf16.mxu1 %v17137_v41 }
 0x74a   :  { %v15376_v2 = vpop.eup %15375  ;;  %5187 = vmatpush1.bf16.msra.mxu0 %v17141_v39  ;;  %5228 = vmatpush1.bf16.msra.mxu1 %v17143_v5  ;;  %v17168_v5 = vld [vmem:[#allocation11 + $0xa0] ss:$16 sps:$4 sm:$0xff]   ;;  %v17170_v39 = vld [vmem:[#allocation11 + $0xa8] ss:$16 sps:$4 sm:$0xff]  }
 0x74b   :  { %v15378_v44 = vpop.eup %15377  ;;  %v4649_v46 = vmul.f32 %v15376_v2, %v15374_v0  ;;  %5188 = vmatprep.subr.bf16.mxu0 %v17147_v61  ;;  %5229 = vmatprep.subr.bf16.mxu1 %v17149_v62  ;;  %18683 = vst [vmem:[#allocation33_spill] sm:$0xff] %v17170_v39  ;;  %v17176_v0 = vld [vmem:[#allocation11 + $0xcc] ss:$16 sps:$4 sm:$0xff]   ;;  %v17181_v2 = vld [vmem:[#allocation11 + $0xc0] ss:$16 sps:$4 sm:$0xff]  }
 0x74c   :  { %v4648_v47 = vmul.f32 %v15378_v44, %v4646_v3  ;;  %18685 = vst [vmem:[#allocation35_spill] sm:$0xff] %v17176_v0  ;;  %18686 = vst [vmem:[#allocation36_spill] sm:$0xff] %v17181_v2  ;;  %v17183_v3 = vld [vmem:[#allocation11 + $0xc8] ss:$16 sps:$4 sm:$0xff]   ;;  %v17187_v44 = vld [vmem:[#allocation11 + $0xe4] ss:$16 sps:$4 sm:$0xff]  }
 0x74d   :  { %18687 = vst [vmem:[#allocation37_spill] sm:$0xff] %v17183_v3 }
 0x74e   :  { %v17164_v41 = vadd.f32 %v4649_v46, %v4648_v47  ;;  %5189 = vmatpush1.bf16.msra.mxu0 %v17154_v23  ;;  %5230 = vmatpush1.bf16.msra.mxu1 %v17156_v4  ;;  %v17189_v46 = vld [vmem:[#allocation11 + $0xec] ss:$16 sps:$4 sm:$0xff]   ;;  %v17195_v47 = vld [vmem:[#allocation11 + $0xe8] ss:$16 sps:$4 sm:$0xff]  }
 0x74f   :  { %5190 = vmatprep.subr.bf16.mxu0 %v17160_v40  ;;  %5231 = vmatprep.subr.bf16.mxu1 %v17162_v16 }
 0x750   :  { %15381 = vtanh.f32 %v17164_v41 }
 0x752   :  { %5191 = vmatpush1.bf16.msra.mxu0 %v17168_v5  ;;  %5232 = vmatpush1.bf16.msra.mxu1 %v17170_v39  ;;  %v15380_v39 = vpop.eup %15379 }
 0x753   :  { %5192 = vmatprep.subr.bf16.mxu0 %v17174_v63  ;;  %5233 = vmatprep.subr.bf16.mxu1 %v17176_v0 }
 0x756   :  { %5193 = vmatpush1.bf16.msra.mxu0 %v17181_v2  ;;  %5234 = vmatpush1.bf16.msra.mxu1 %v17183_v3 }
 0x757   :  { %5194 = vmatprep.subr.bf16.mxu0 %v17187_v44  ;;  %5235 = vmatprep.subr.bf16.mxu1 %v17189_v46 }
 0x75a   :  { %v15382_v63 = vpop.eup %15381  ;;  %5195 = vmatpush1.bf16.msra.mxu0 %v17193_v52  ;;  %5236 = vmatpush1.bf16.msra.mxu1 %v17195_v47 }
 0x75b   :  { %v4652_v0 = vmul.f32 %v15382_v63, %v15380_v39  ;;  %5506 = vmatprep.subr.bf16.mxu0 %v16999_v21  ;;  %5547 = vmatprep.subr.bf16.mxu1 %v17001_v22 }
 0x75d   :  { %4653 = vst [vmem:[#allocation3 + $0x8] sm:$0x30] %v4652_v0  ;;  %v4984_v3 = vpack.c.bf16 %v4652_v0, %v4652_v0 }
 0x75f   :  { %v5018_v2 = vrot.slane %v4984_v3, 2 }
 0x761   :  { %5213 = vmatmul.mubr.bf16.vlgmr.msra.gmra.mrb[60].mxu0 %v5018_v2  ;;  %5254 = vmatmul.mubr.bf16.vlgmr.msra.gmra.mrb[60].mxu1 %v5018_v2 }
 0x762   :  { %5507 = vmatpush1.bf16.msra.mxu0 %v17003_v50  ;;  %5548 = vmatpush1.bf16.msra.mxu1 %v17005_v19 }
 0x763   :  { %5508 = vmatprep.subr.bf16.mxu0 %v17011_v32  ;;  %5549 = vmatprep.subr.bf16.mxu1 %v17013_v8  ;;  %v4654_v8 = vld [vmem:[#allocation2 + $0x40] sm:$0x30] }
 0x764   :  { %5538 = vmatprep.mubr.bf16.mxu0 %v18657_v38  ;;  %5579 = vmatprep.mubr.bf16.mxu1 %v18657_v38 }
 0x766   :  { %5509 = vmatpush1.bf16.msra.mxu0 %v17015_v11  ;;  %5550 = vmatpush1.bf16.msra.mxu1 %v17017_v13 }
 0x767   :  { %5510 = vmatprep.subr.bf16.mxu0 %v17023_v14  ;;  %5551 = vmatprep.subr.bf16.mxu1 %v17025_v15 }
 0x76a   :  { %5511 = vmatpush1.bf16.msra.mxu0 %v17027_v17  ;;  %5552 = vmatpush1.bf16.msra.mxu1 %v17029_v18  ;;  %v4655_v17 = vld [vmem:[#allocation2 + $0x48] sm:$0x30] }
 0x76b   :  { %5512 = vmatprep.subr.bf16.mxu0 %v17037_v37  ;;  %5553 = vmatprep.subr.bf16.mxu1 %v17041_v20 }
 0x76e   :  { %5513 = vmatpush1.bf16.msra.mxu0 %v17035_v43  ;;  %5554 = vmatpush1.bf16.msra.mxu1 %v17039_v7 }
 0x76f   :  { %5514 = vmatprep.subr.bf16.mxu0 %v17047_v26  ;;  %5555 = vmatprep.subr.bf16.mxu1 %v17049_v10  ;;  %v4657_v10 = vld [vmem:[#allocation2 + $0x58] sm:$0x30] }
 0x772   :  { %5515 = vmatpush1.bf16.msra.mxu0 %v17051_v28  ;;  %5556 = vmatpush1.bf16.msra.mxu1 %v17053_v27 }
 0x773   :  { %5516 = vmatprep.subr.bf16.mxu0 %v17059_v54  ;;  %5557 = vmatprep.subr.bf16.mxu1 %v17061_v30  ;;  %v4656_v54 = vld [vmem:[#allocation2 + $0x50] sm:$0x30] }
 0x776   :  { %5517 = vmatpush1.bf16.msra.mxu0 %v17063_v29  ;;  %5558 = vmatpush1.bf16.msra.mxu1 %v17065_v31 }
 0x777   :  { %5518 = vmatprep.subr.bf16.mxu0 %v17071_v48  ;;  %5559 = vmatprep.subr.bf16.mxu1 %v17073_v51 }
 0x77a   :  { %5519 = vmatpush1.bf16.msra.mxu0 %v17075_v9  ;;  %5560 = vmatpush1.bf16.msra.mxu1 %v17077_v53 }
 0x77b   :  { %5520 = vmatprep.subr.bf16.mxu0 %v17083_v55  ;;  %5561 = vmatprep.subr.bf16.mxu1 %v17085_v56 }
 0x77e   :  { %5521 = vmatpush1.bf16.msra.mxu0 %v17087_v57  ;;  %5562 = vmatpush1.bf16.msra.mxu1 %v17089_v58  ;;  %v4972_v57 = vrot.slane %v17102_v12, 6  ;;  %v4981_v12 = vld [vmem:[#allocation2 + $0x28] sm:$0xc] }
 0x77f   :  { %5832 = vmatprep.subr.bf16.mxu0 %v17095_v59  ;;  %5873 = vmatprep.subr.bf16.mxu1 %v17097_v60 }
 0x810   :  { %v4888_v21 = vpop.f32.mrb[56].mxu0  ;;  %v4929_v22 = vpop.f32.mrb[56].mxu1 }
 0x811   :  { %v4940_v50 = vrot.slane %v4888_v21, 4  ;;  %v4890_v19 = vpop.f32.mrb[57].mxu0  ;;  %v4931_v32 = vpop.f32.mrb[57].mxu1  ;;  %v4942_v27 = vrot.slane %v4929_v22, 4 }
 0x812   :  { %v4941_v11 = vrot.slane %v4890_v19, 4  ;;  %v4892_v13 = vpop.f32.mrb[58].mxu0  ;;  %v4933_v14 = vpop.f32.mrb[58].mxu1  ;;  %v4943_v26 = vrot.slane %v4931_v32, 4 }
 0x813   :  { %v4948_v15 = vadd.f32 %v4940_v50, %v4654_v8  ;;  %v4893_v18 = vpop.f32.mrb[59].mxu0  ;;  %v4934_v43 = vpop.f32.mrb[59].mxu1  ;;  %v4950_v29 = vadd.f32 %v4942_v27, %v4656_v54  ;;  %v4980_v50 = vld [vmem:[#allocation2 + $0x20] sm:$0xc]  ;;  %v4982_v54 = vld [vmem:[#allocation2 + $0x30] sm:$0xc] }
 0x814   :  { %v4949_v37 = vadd.f32 %v4941_v11, %v4655_v17  ;;  %v4951_v28 = vadd.f32 %v4943_v26, %v4657_v10 }
 0x815   :  { %v13445_v7 = vmul.f32 -1.442695, %v4948_v15 }
 0x816   :  { %v13446_v20 = vmul.f32 -1.442695, %v4949_v37  ;;  %v13447_v30 = vmul.f32 -1.442695, %v4951_v28 }
 0x817   :  { %15383 = vpow2.f32 %v13445_v7  ;;  %v4983_v7 = vld [vmem:[#allocation2 + $0x38] sm:$0xc] }
 0x818   :  { %15385 = vpow2.f32 %v13446_v20 }
 0x819   :  { %15387 = vpow2.f32 %v13447_v30 }
 0x81a   :  { %15389 = vtanh.f32 %v4950_v29 }
 0x821   :  { %v15384_v31 = vpop.eup %15383 }
 0x822   :  { %v15386_v48 = vpop.eup %15385  ;;  %v4955_v51 = vadd.f32 1.0, %v15384_v31 }
 0x823   :  { %v4961_v9 = vadd.f32 1.0, %v15386_v48  ;;  %v15388_v53 = vpop.eup %15387 }
 0x824   :  { %15391 = vrcp.f32 %v4955_v51  ;;  %v15390_v55 = vpop.eup %15389  ;;  %v4968_v60 = vadd.f32 1.0, %v15388_v53 }
 0x825   :  { %15393 = vrcp.f32 %v4961_v9 }
 0x826   :  { %15395 = vrcp.f32 %v4968_v60  ;;  %v5957_v60 = vld [vmem:[#allocation12 + $0x8] sm:$0xff] }
 0x82e   :  { %v15392_v56 = vpop.eup %15391 }
 0x82f   :  { %v15394_v58 = vpop.eup %15393  ;;  %v4975_v59 = vmul.f32 %v15392_v56, %v15390_v55  ;;  %v5298_v55 = vrot.slane %v17164_v41, 2  ;;  %v18692_v41 = vld [vmem:[#allocation34_spill] sm:$0xff] }
 0x830   :  { %v4974_v39 = vmul.f32 %v15394_v58, %v4972_v57  ;;  %v15396_v37 = vpop.eup %15395  ;;  %v5956_v58 = vld [vmem:[#allocation12] sm:$0xff] }
 0x832   :  { %v17238_v63 = vadd.f32 %v4975_v59, %v4974_v39  ;;  %v5960_v59 = vld [vmem:[#allocation12 + $0x20] sm:$0xff] }
 0x833   :  { %v13554_v39 = vcombine.high %v5956_v58, %v5960_v59 }
 0x834   :  { %v5214_v0 = vpop.f32.mrb[60].mxu0  ;;  %v5255_v2 = vpop.f32.mrb[60].mxu1  ;;  %15397 = vtanh.f32 %v17238_v63 }
 0x835   :  { %v5266_v3 = vrot.slane %v5214_v0, 6  ;;  %v5216_v21 = vpop.f32.mrb[61].mxu0  ;;  %v5257_v22 = vpop.f32.mrb[61].mxu1  ;;  %v5268_v10 = vrot.slane %v5255_v2, 6  ;;  %v5961_v0 = vld [vmem:[#allocation12 + $0x28] sm:$0xff] }
 0x836   :  { %v5267_v19 = vrot.slane %v5216_v21, 6  ;;  %v5218_v32 = vpop.f32.mrb[62].mxu0  ;;  %v5259_v8 = vpop.f32.mrb[62].mxu1  ;;  %v5269_v43 = vrot.slane %v5257_v22, 6  ;;  %v13555_v2 = vcombine.low %v5957_v60, %v5961_v0  ;;  %v5969_v22 = vld [vmem:[#allocation12 + $0x68] sm:$0xff] }
 0x837   :  { %v5274_v11 = vadd.f32 %v5266_v3, %v4980_v50  ;;  %v5219_v13 = vpop.f32.mrb[63].mxu0  ;;  %v5260_v14 = vpop.f32.mrb[63].mxu1  ;;  %v5276_v29 = vadd.f32 %v5268_v10, %v4982_v54  ;;  %v5968_v3 = vld [vmem:[#allocation12 + $0x60] sm:$0xff] }
 0x838   :  { %v5275_v15 = vadd.f32 %v5267_v19, %v4981_v12  ;;  %v5277_v26 = vadd.f32 %v5269_v43, %v4983_v7  ;;  %v5972_v8 = vld [vmem:[#allocation12 + $0x80] sm:$0xff]  ;;  %v5973_v12 = vld [vmem:[#allocation12 + $0x88] sm:$0xff] }
 0x839   :  { %v13480_v17 = vmul.f32 -1.442695, %v5274_v11  ;;  %v5976_v11 = vld [vmem:[#allocation12 + $0xa0] sm:$0xff]  ;;  %v5977_v14 = vld [vmem:[#allocation12 + $0xa8] sm:$0xff] }
 0x83a   :  { %v13481_v18 = vmul.f32 -1.442695, %v5275_v15  ;;  %v13482_v30 = vmul.f32 -1.442695, %v5277_v26  ;;  %v13570_v13 = vcombine.high %v5972_v8, %v5976_v11  ;;  %v13569_v15 = vcombine.low %v5972_v8, %v5976_v11  ;;  %v5980_v43 = vld [vmem:[#allocation12 + $0xc0] sm:$0xff]  ;;  %v5981_v7 = vld [vmem:[#allocation12 + $0xc8] sm:$0xff] }
 0x83b   :  { %15399 = vpow2.f32 %v13480_v17  ;;  %v13571_v17 = vcombine.low %v5973_v12, %v5977_v14  ;;  %v5985_v26 = vld [vmem:[#allocation12 + $0xe8] sm:$0xff]  ;;  %v5988_v54 = vld [vmem:[#allocation12 + $0x100] sm:$0xff] }
 0x83c   :  { %15401 = vpow2.f32 %v13481_v18  ;;  %v13572_v18 = vcombine.high %v5973_v12, %v5977_v14  ;;  %v6040_v14 = vld [vmem:[#allocation12 + $0x2a0] sm:$0xff] }
 0x83d   :  { %15403 = vpow2.f32 %v13482_v30  ;;  %v5992_v30 = vld [vmem:[#allocation12 + $0x120] sm:$0xff] }
 0x83e   :  { %v15398_v20 = vpop.eup %15397  ;;  %15405 = vtanh.f32 %v5276_v29  ;;  %v5989_v29 = vld [vmem:[#allocation12 + $0x108] sm:$0xff] }
 0x83f   :  { %v4978_v28 = vmul.f32 %v15398_v20, %v15396_v37  ;;  %v5984_v37 = vld [vmem:[#allocation12 + $0xe0] sm:$0xff] }
 0x840   :  { %v13578_v20 = vcombine.high %v5980_v43, %v5984_v37  ;;  %v13577_v10 = vcombine.low %v5980_v43, %v5984_v37 }
 0x841   :  { %4979 = vst [vmem:[#allocation3 + $0x10] sm:$0x30] %v4978_v28  ;;  %v5310_v27 = vpack.c.bf16 %v4978_v28, %v4978_v28  ;;  %v13579_v28 = vcombine.low %v5981_v7, %v5985_v26 }
 0x843   :  { %v5344_v31 = vrot.slane %v5310_v27, 2  ;;  %v13580_v27 = vcombine.high %v5981_v7, %v5985_v26  ;;  %v6048_v26 = vld [vmem:[#allocation12 + $0x2e0] sm:$0xff] }
 0x845   :  { %v15400_v48 = vpop.eup %15399  ;;  %5539 = vmatmul.mubr.bf16.vlgmr.msra.gmra.mrb[64].mxu0 %v5344_v31  ;;  %5580 = vmatmul.mubr.bf16.vlgmr.msra.gmra.mrb[64].mxu1 %v5344_v31  ;;  %v13586_v31 = vcombine.high %v5988_v54, %v5992_v30 }
 0x846   :  { %v15402_v51 = vpop.eup %15401  ;;  %v5281_v9 = vadd.f32 1.0, %v15400_v48  ;;  %5833 = vmatpush1.bf16.msra.mxu0 %v17105_v49  ;;  %5874 = vmatpush1.bf16.msra.mxu1 %v17107_v34  ;;  %v18688_v49 = vld [vmem:[#allocation38_spill] sm:$0xff]  ;;  %v5993_v48 = vld [vmem:[#allocation12 + $0x128] sm:$0xff] }
 0x847   :  { %v5287_v53 = vadd.f32 1.0, %v15402_v51  ;;  %5834 = vmatprep.subr.bf16.mxu0 %v17109_v6  ;;  %5875 = vmatprep.subr.bf16.mxu1 %v17111_v45  ;;  %v15404_v34 = vpop.eup %15403  ;;  %v13585_v51 = vcombine.low %v5988_v54, %v5992_v30 }
 0x848   :  { %15407 = vrcp.f32 %v5281_v9  ;;  %5864 = vmatprep.mubr.bf16.mxu0 %v18657_v38  ;;  %5905 = vmatprep.mubr.bf16.mxu1 %v18657_v38  ;;  %v15406_v6 = vpop.eup %15405  ;;  %v13587_v9 = vcombine.low %v5989_v29, %v5993_v48 }
 0x849   :  { %15409 = vrcp.f32 %v5287_v53  ;;  %v13588_v53 = vcombine.high %v5989_v29, %v5993_v48  ;;  %v6056_v48 = vld [vmem:[#allocation12 + $0x320] sm:$0xff] }
 0x84a   :  { %5835 = vmatpush1.bf16.msra.mxu0 %v17115_v33  ;;  %5876 = vmatpush1.bf16.msra.mxu1 %v17117_v1  ;;  %v18689_v33 = vld [vmem:[#allocation31_spill] sm:$0xff]  ;;  %v18690_v1 = vld [vmem:[#allocation32_spill] sm:$0xff] }
 0x84b   :  { %5836 = vmatprep.subr.bf16.mxu0 %v17121_v36  ;;  %5877 = vmatprep.subr.bf16.mxu1 %v17123_v35  ;;  %v5294_v35 = vadd.f32 1.0, %v15404_v34  ;;  %v6000_v34 = vld [vmem:[#allocation12 + $0x160] sm:$0xff] }
 0x84d   :  { %15411 = vrcp.f32 %v5294_v35  ;;  %v6008_v35 = vld [vmem:[#allocation12 + $0x1a0] sm:$0xff] }
 0x84e   :  { %5837 = vmatpush1.bf16.msra.mxu0 %v17129_v25  ;;  %5878 = vmatpush1.bf16.msra.mxu1 %v17131_v42 }
 0x84f   :  { %5838 = vmatprep.subr.bf16.mxu0 %v17135_v24  ;;  %5879 = vmatprep.subr.bf16.mxu1 %v18688_v49  ;;  %v18691_v24 = vld [vmem:[#allocation33_spill] sm:$0xff]  ;;  %v5996_v49 = vld [vmem:[#allocation12 + $0x140] sm:$0xff] }
 0x852   :  { %v15408_v45 = vpop.eup %15407  ;;  %5839 = vmatpush1.bf16.msra.mxu0 %v18689_v33  ;;  %5880 = vmatpush1.bf16.msra.mxu1 %v18690_v1  ;;  %v13593_v33 = vcombine.low %v5996_v49, %v6000_v34 }
 0x853   :  { %v15410_v36 = vpop.eup %15409  ;;  %v5301_v56 = vmul.f32 %v15408_v45, %v15406_v6  ;;  %5840 = vmatprep.subr.bf16.mxu0 %v17147_v61  ;;  %5881 = vmatprep.subr.bf16.mxu1 %v17149_v62  ;;  %v18693_v61 = vld [vmem:[#allocation35_spill] sm:$0xff]  ;;  %v18694_v62 = vld [vmem:[#allocation36_spill] sm:$0xff]  ;;  %v5997_v6 = vld [vmem:[#allocation12 + $0x148] sm:$0xff]  ;;  %v13594_v45 = vcombine.high %v5996_v49, %v6000_v34 }
 0x854   :  { %v5300_v25 = vmul.f32 %v15410_v36, %v5298_v55  ;;  %v6001_v55 = vld [vmem:[#allocation12 + $0x168] sm:$0xff]  ;;  %v6060_v34 = vld [vmem:[#allocation12 + $0x340] sm:$0xff] }
 0x855   :  { %v13595_v1 = vcombine.low %v5997_v6, %v6001_v55  ;;  %v13596_v36 = vcombine.high %v5997_v6, %v6001_v55  ;;  %v6057_v49 = vld [vmem:[#allocation12 + $0x328] sm:$0xff]  ;;  %v6064_v6 = vld [vmem:[#allocation12 + $0x360] sm:$0xff] }
 0x856   :  { %v17260_v42 = vadd.f32 %v5301_v56, %v5300_v25  ;;  %5841 = vmatpush1.bf16.msra.mxu0 %v17154_v23  ;;  %5882 = vmatpush1.bf16.msra.mxu1 %v17156_v4  ;;  %v18695_v23 = vld [vmem:[#allocation37_spill] sm:$0xff]  ;;  %v6004_v56 = vld [vmem:[#allocation12 + $0x180] sm:$0xff] }
 0x857   :  { %5842 = vmatprep.subr.bf16.mxu0 %v17160_v40  ;;  %5883 = vmatprep.subr.bf16.mxu1 %v17162_v16  ;;  %v15412_v4 = vpop.eup %15411  ;;  %v6005_v25 = vld [vmem:[#allocation12 + $0x188] sm:$0xff] }
 0x858   :  { %15413 = vtanh.f32 %v17260_v42 }
 0x85a   :  { %5843 = vmatpush1.bf16.msra.mxu0 %v17168_v5  ;;  %5884 = vmatpush1.bf16.msra.mxu1 %v18691_v24  ;;  %v13602_v24 = vcombine.high %v6004_v56, %v6008_v35 }
 0x85b   :  { %5844 = vmatprep.subr.bf16.mxu0 %v18692_v41  ;;  %5885 = vmatprep.subr.bf16.mxu1 %v18693_v61  ;;  %v6009_v41 = vld [vmem:[#allocation12 + $0x1a8] sm:$0xff]  ;;  %v13601_v61 = vcombine.low %v6004_v56, %v6008_v35  ;;  %v6068_v56 = vld [vmem:[#allocation12 + $0x380] sm:$0xff] }
 0x85e   :  { %5845 = vmatpush1.bf16.msra.mxu0 %v18694_v62  ;;  %5886 = vmatpush1.bf16.msra.mxu1 %v18695_v23  ;;  %v13603_v62 = vcombine.low %v6005_v25, %v6009_v41  ;;  %v13604_v23 = vcombine.high %v6005_v25, %v6009_v41  ;;  %v6072_v25 = vld [vmem:[#allocation12 + $0x3a0] sm:$0xff]  ;;  %v6073_v41 = vld [vmem:[#allocation12 + $0x3a8] sm:$0xff] }
 0x85f   :  { %5846 = vmatprep.subr.bf16.mxu0 %v17187_v44  ;;  %5887 = vmatprep.subr.bf16.mxu1 %v17189_v46  ;;  %v13553_v44 = vcombine.low %v5956_v58, %v5960_v59  ;;  %v13556_v46 = vcombine.high %v5957_v60, %v5961_v0  ;;  %v6024_v0 = vld [vmem:[#allocation12 + $0x220] sm:$0xff] }
 0x862   :  { %v15414_v40 = vpop.eup %15413  ;;  %5847 = vmatpush1.bf16.msra.mxu0 %v17193_v52  ;;  %5888 = vmatpush1.bf16.msra.mxu1 %v17195_v47  ;;  %v5964_v52 = vld [vmem:[#allocation12 + $0x40] sm:$0xff]  ;;  %v5965_v47 = vld [vmem:[#allocation12 + $0x48] sm:$0xff] }
 0x863   :  { %v5304_v5 = vmul.f32 %v15414_v40, %v15412_v4  ;;  %6766 = vmatprep.subr.bf16.mxu0 %v13554_v39  ;;  %6809 = vmatprep.subr.bf16.mxu1 %v13556_v46  ;;  %v13562_v21 = vcombine.high %v5964_v52, %v5968_v3  ;;  %v13561_v50 = vcombine.low %v5964_v52, %v5968_v3  ;;  %v6012_v4 = vld [vmem:[#allocation12 + $0x1c0] sm:$0xff]  ;;  %v6025_v46 = vld [vmem:[#allocation12 + $0x228] sm:$0xff] }
 0x864   :  { %v13563_v19 = vcombine.low %v5965_v47, %v5969_v22  ;;  %v13564_v32 = vcombine.high %v5965_v47, %v5969_v22  ;;  %v6016_v40 = vld [vmem:[#allocation12 + $0x1e0] sm:$0xff] }
 0x865   :  { %5305 = vst [vmem:[#allocation3 + $0x8] sm:$0xc] %v5304_v5  ;;  %v5636_v16 = vpack.c.bf16 %v5304_v5, %v5304_v5  ;;  %v6013_v5 = vld [vmem:[#allocation12 + $0x1c8] sm:$0xff]  ;;  %v13609_v58 = vcombine.low %v6012_v4, %v6016_v40  ;;  %v6020_v39 = vld [vmem:[#allocation12 + $0x200] sm:$0xff] }
 0x866   :  { %v13617_v52 = vcombine.low %v6020_v39, %v6024_v0  ;;  %v6032_v22 = vld [vmem:[#allocation12 + $0x260] sm:$0xff] }
 0x867   :  { %v5670_v57 = vrot.slane %v5636_v16, 1  ;;  %v13610_v16 = vcombine.high %v6012_v4, %v6016_v40  ;;  %v6076_v40 = vld [vmem:[#allocation12 + $0x3c0] sm:$0xff] }
 0x869   :  { %5865 = vmatmul.mubr.bf16.vlgmr.msra.gmra.mrb[68].mxu0 %v5670_v57  ;;  %5906 = vmatmul.mubr.bf16.vlgmr.msra.gmra.mrb[68].mxu1 %v5670_v57  ;;  %v6017_v57 = vld [vmem:[#allocation12 + $0x1e8] sm:$0xff] }
 0x86a   :  { %6767 = vmatpush1.bf16.msra.mxu0 %v13553_v44  ;;  %6810 = vmatpush1.bf16.msra.mxu1 %v13555_v2  ;;  %v13611_v59 = vcombine.low %v6013_v5, %v6017_v57  ;;  %v13612_v60 = vcombine.high %v6013_v5, %v6017_v57  ;;  %v6021_v44 = vld [vmem:[#allocation12 + $0x208] sm:$0xff]  ;;  %v13618_v2 = vcombine.high %v6020_v39, %v6024_v0  ;;  %v6080_v5 = vld [vmem:[#allocation12 + $0x3e0] sm:$0xff]  ;;  %v17277_v0 = vld [vmem:[#allocation12 + $0x10] sm:$0xff] }
 0x86b   :  { %6768 = vmatprep.subr.bf16.mxu0 %v13562_v21  ;;  %6811 = vmatprep.subr.bf16.mxu1 %v13564_v32  ;;  %v13619_v3 = vcombine.low %v6021_v44, %v6025_v46  ;;  %v13620_v47 = vcombine.high %v6021_v44, %v6025_v46  ;;  %v6028_v21 = vld [vmem:[#allocation12 + $0x240] sm:$0xff]  ;;  %v6033_v32 = vld [vmem:[#allocation12 + $0x268] sm:$0xff]  ;;  %v17279_v44 = vld [vmem:[#allocation12 + $0x30] sm:$0xff] }
 0x86c   :  { %v13625_v8 = vcombine.low %v6028_v21, %v6032_v22  ;;  %v6081_v57 = vld [vmem:[#allocation12 + $0x3e8] sm:$0xff]  ;;  %v13557_v46 = vcombine.low %v17277_v0, %v17279_v44 }
 0x86e   :  { %6769 = vmatpush1.bf16.msra.mxu0 %v13561_v50  ;;  %6812 = vmatpush1.bf16.msra.mxu1 %v13563_v19  ;;  %v6029_v50 = vld [vmem:[#allocation12 + $0x248] sm:$0xff]  ;;  %v13626_v19 = vcombine.high %v6028_v21, %v6032_v22  ;;  %v13558_v22 = vcombine.high %v17277_v0, %v17279_v44 }
 0x86f   :  { %6770 = vmatprep.subr.bf16.mxu0 %v13570_v13  ;;  %6813 = vmatprep.subr.bf16.mxu1 %v13572_v18  ;;  %v13627_v11 = vcombine.low %v6029_v50, %v6033_v32  ;;  %v13628_v12 = vcombine.high %v6029_v50, %v6033_v32  ;;  %v6036_v13 = vld [vmem:[#allocation12 + $0x280] sm:$0xff]  ;;  %v6041_v18 = vld [vmem:[#allocation12 + $0x2a8] sm:$0xff] }
 0x870   :  { %v13633_v43 = vcombine.low %v6036_v13, %v6040_v14 }
 0x872   :  { %6771 = vmatpush1.bf16.msra.mxu0 %v13569_v15  ;;  %6814 = vmatpush1.bf16.msra.mxu1 %v13571_v17  ;;  %v6037_v15 = vld [vmem:[#allocation12 + $0x288] sm:$0xff]  ;;  %v13634_v17 = vcombine.high %v6036_v13, %v6040_v14  ;;  %v5306_v13 = vld [vmem:[#allocation2 + $0x40] sm:$0xc0] }
 0x873   :  { %6772 = vmatprep.subr.bf16.mxu0 %v13578_v20  ;;  %6815 = vmatprep.subr.bf16.mxu1 %v13580_v27  ;;  %v13635_v37 = vcombine.low %v6037_v15, %v6041_v18  ;;  %v13636_v7 = vcombine.high %v6037_v15, %v6041_v18  ;;  %v6044_v20 = vld [vmem:[#allocation12 + $0x2c0] sm:$0xff]  ;;  %v6049_v27 = vld [vmem:[#allocation12 + $0x2e8] sm:$0xff] }
 0x874   :  { %v13641_v54 = vcombine.low %v6044_v20, %v6048_v26 }
 0x876   :  { %6773 = vmatpush1.bf16.msra.mxu0 %v13577_v10  ;;  %6816 = vmatpush1.bf16.msra.mxu1 %v13579_v28  ;;  %v6045_v10 = vld [vmem:[#allocation12 + $0x2c8] sm:$0xff]  ;;  %v13642_v28 = vcombine.high %v6044_v20, %v6048_v26 }
 0x877   :  { %6774 = vmatprep.subr.bf16.mxu0 %v13586_v31  ;;  %6817 = vmatprep.subr.bf16.mxu1 %v13588_v53  ;;  %v13643_v30 = vcombine.low %v6045_v10, %v6049_v27  ;;  %v13644_v29 = vcombine.high %v6045_v10, %v6049_v27  ;;  %v6052_v31 = vld [vmem:[#allocation12 + $0x300] sm:$0xff]  ;;  %v5309_v27 = vld [vmem:[#allocation2 + $0x58] sm:$0xc0] }
 0x878   :  { %v13650_v53 = vcombine.high %v6052_v31, %v6056_v48 }
 0x87a   :  { %6775 = vmatpush1.bf16.msra.mxu0 %v13585_v51  ;;  %6818 = vmatpush1.bf16.msra.mxu1 %v13587_v9  ;;  %v6053_v51 = vld [vmem:[#allocation12 + $0x308] sm:$0xff]  ;;  %v13649_v9 = vcombine.low %v6052_v31, %v6056_v48 }
 0x87b   :  { %6776 = vmatprep.subr.bf16.mxu0 %v13594_v45  ;;  %6819 = vmatprep.subr.bf16.mxu1 %v13596_v36  ;;  %v13651_v45 = vcombine.low %v6053_v51, %v6057_v49  ;;  %v13652_v55 = vcombine.high %v6053_v51, %v6057_v49  ;;  %v6065_v36 = vld [vmem:[#allocation12 + $0x368] sm:$0xff] }
 0x87e   :  { %6777 = vmatpush1.bf16.msra.mxu0 %v13593_v33  ;;  %6820 = vmatpush1.bf16.msra.mxu1 %v13595_v1  ;;  %v13658_v33 = vcombine.high %v6060_v34, %v6064_v6  ;;  %v6061_v1 = vld [vmem:[#allocation12 + $0x348] sm:$0xff] }
 0x87f   :  { %6778 = vmatprep.subr.bf16.mxu0 %v13602_v24  ;;  %6821 = vmatprep.subr.bf16.mxu1 %v13604_v23  ;;  %v13660_v35 = vcombine.high %v6061_v1, %v6065_v36  ;;  %v6069_v24 = vld [vmem:[#allocation12 + $0x388] sm:$0xff]  ;;  %v13666_v23 = vcombine.high %v6068_v56, %v6072_v25 }
 0x880   :  { %v13668_v4 = vcombine.high %v6069_v24, %v6073_v41 }
 0x882   :  { %6779 = vmatpush1.bf16.msra.mxu0 %v13601_v61  ;;  %6822 = vmatpush1.bf16.msra.mxu1 %v13603_v62  ;;  %v13657_v61 = vcombine.low %v6060_v34, %v6064_v6  ;;  %v13659_v62 = vcombine.low %v6061_v1, %v6065_v36 }
 0x883   :  { %6780 = vmatprep.subr.bf16.mxu0 %v13610_v16  ;;  %6823 = vmatprep.subr.bf16.mxu1 %v13612_v60  ;;  %v6077_v16 = vld [vmem:[#allocation12 + $0x3c8] sm:$0xff]  ;;  %v13674_v60 = vcombine.high %v6076_v40, %v6080_v5 }
 0x884   :  { %v13676_v39 = vcombine.high %v6077_v16, %v6081_v57  ;;  %v13675_v21 = vcombine.low %v6077_v16, %v6081_v57 }
 0x886   :  { %6781 = vmatpush1.bf16.msra.mxu0 %v13609_v58  ;;  %6824 = vmatpush1.bf16.msra.mxu1 %v13611_v59  ;;  %v13665_v58 = vcombine.low %v6068_v56, %v6072_v25  ;;  %v13667_v59 = vcombine.low %v6069_v24, %v6073_v41  ;;  %v5632_v25 = vld [vmem:[#allocation2 + $0x20] sm:$0x3] }
 0x887   :  { %6782 = vmatprep.subr.bf16.mxu0 %v13618_v2  ;;  %6825 = vmatprep.subr.bf16.mxu1 %v13620_v47  ;;  %v17281_v2 = vld [vmem:[#allocation12 + $0x18] sm:$0xff] }
 0x88a   :  { %6783 = vmatpush1.bf16.msra.mxu0 %v13617_v52  ;;  %6826 = vmatpush1.bf16.msra.mxu1 %v13619_v3  ;;  %v17285_v52 = vld [vmem:[#allocation12 + $0x38] sm:$0xff]  ;;  %v13673_v3 = vcombine.low %v6076_v40, %v6080_v5 }
 0x88b   :  { %6784 = vmatprep.subr.bf16.mxu0 %v13626_v19  ;;  %6827 = vmatprep.subr.bf16.mxu1 %v13628_v12  ;;  %v13559_v47 = vcombine.low %v17281_v2, %v17285_v52  ;;  %v13560_v50 = vcombine.high %v17281_v2, %v17285_v52  ;;  %v5990_v52 = vld [vmem:[#allocation12 + $0x110] sm:$0xff] }
 0x88e   :  { %6785 = vmatpush1.bf16.msra.mxu0 %v13625_v8  ;;  %6828 = vmatpush1.bf16.msra.mxu1 %v13627_v11 }
 0x88f   :  { %6786 = vmatprep.subr.bf16.mxu0 %v13634_v17  ;;  %6829 = vmatprep.subr.bf16.mxu1 %v13636_v7 }
 0x892   :  { %6787 = vmatpush1.bf16.msra.mxu0 %v13633_v43  ;;  %6830 = vmatpush1.bf16.msra.mxu1 %v13635_v37  ;;  %v5307_v43 = vld [vmem:[#allocation2 + $0x48] sm:$0xc0] }
 0x893   :  { %6788 = vmatprep.subr.bf16.mxu0 %v13642_v28  ;;  %6831 = vmatprep.subr.bf16.mxu1 %v13644_v29  ;;  %v5308_v29 = vld [vmem:[#allocation2 + $0x50] sm:$0xc0] }
 0x896   :  { %6789 = vmatpush1.bf16.msra.mxu0 %v13641_v54  ;;  %6832 = vmatpush1.bf16.msra.mxu1 %v13643_v30 }
 0x897   :  { %6790 = vmatprep.subr.bf16.mxu0 %v13650_v53  ;;  %6833 = vmatprep.subr.bf16.mxu1 %v13652_v55  ;;  %v5624_v55 = vrot.slane %v17238_v63, 6 }
 0x89a   :  { %6791 = vmatpush1.bf16.msra.mxu0 %v13649_v9  ;;  %6834 = vmatpush1.bf16.msra.mxu1 %v13651_v45 }
 0x89b   :  { %6792 = vmatprep.subr.bf16.mxu0 %v13658_v33  ;;  %6835 = vmatprep.subr.bf16.mxu1 %v13660_v35 }
 0x89e   :  { %6793 = vmatpush1.bf16.msra.mxu0 %v13657_v61  ;;  %6836 = vmatpush1.bf16.msra.mxu1 %v13659_v62  ;;  %v5633_v62 = vld [vmem:[#allocation2 + $0x28] sm:$0x3] }
 0x89f   :  { %6794 = vmatprep.subr.bf16.mxu0 %v13666_v23  ;;  %6837 = vmatprep.subr.bf16.mxu1 %v13668_v4 }
 0x8a2   :  { %6795 = vmatpush1.bf16.msra.mxu0 %v13665_v58  ;;  %6838 = vmatpush1.bf16.msra.mxu1 %v13667_v59 }
 0x8a3   :  { %6796 = vmatprep.subr.bf16.mxu0 %v13674_v60  ;;  %6839 = vmatprep.subr.bf16.mxu1 %v13676_v39  ;;  %v5635_v60 = vld [vmem:[#allocation2 + $0x38] sm:$0x3] }
 0x8a6   :  { %6797 = vmatpush1.bf16.msra.mxu0 %v13673_v3  ;;  %6840 = vmatpush1.bf16.msra.mxu1 %v13675_v21 }
 0x8a7   :  { %6852 = vmatprep.subr.bf16.mxu0 %v13558_v22  ;;  %6895 = vmatprep.subr.bf16.mxu1 %v13560_v50  ;;  %v5634_v50 = vld [vmem:[#allocation2 + $0x30] sm:$0x3] }
 0x918   :  { %v5540_v19 = vpop.f32.mrb[64].mxu0  ;;  %v5581_v32 = vpop.f32.mrb[64].mxu1 }
 0x919   :  { %v5592_v8 = vrot.slane %v5540_v19, 2  ;;  %v5542_v11 = vpop.f32.mrb[65].mxu0  ;;  %v5583_v12 = vpop.f32.mrb[65].mxu1  ;;  %v5594_v30 = vrot.slane %v5581_v32, 2 }
 0x91a   :  { %v5593_v14 = vrot.slane %v5542_v11, 2  ;;  %v5544_v15 = vpop.f32.mrb[66].mxu0  ;;  %v5585_v17 = vpop.f32.mrb[66].mxu1  ;;  %v5595_v28 = vrot.slane %v5583_v12, 2 }
 0x91b   :  { %v5600_v18 = vadd.f32 %v5592_v8, %v5306_v13  ;;  %v5545_v37 = vpop.f32.mrb[67].mxu0  ;;  %v5586_v7 = vpop.f32.mrb[67].mxu1  ;;  %v5602_v48 = vadd.f32 %v5594_v30, %v5308_v29  ;;  %v5966_v29 = vld [vmem:[#allocation12 + $0x50] sm:$0xff] }
 0x91c   :  { %v5601_v20 = vadd.f32 %v5593_v14, %v5307_v43  ;;  %v5603_v54 = vadd.f32 %v5595_v28, %v5309_v27 }
 0x91d   :  { %v13515_v26 = vmul.f32 -1.442695, %v5600_v18  ;;  %v5938_v18 = vrot.slane %v17260_v42, 2  ;;  %v5971_v42 = vld [vmem:[#allocation12 + $0x78] sm:$0xff] }
 0x91e   :  { %v13516_v10 = vmul.f32 -1.442695, %v5601_v20  ;;  %v13517_v31 = vmul.f32 -1.442695, %v5603_v54  ;;  %v5953_v54 = vld [vmem:[#allocation3 + $0x18] sm:$0xff] }
 0x91f   :  { %15415 = vpow2.f32 %v13515_v26 }
 0x920   :  { %15417 = vpow2.f32 %v13516_v10 }
 0x921   :  { %15419 = vpow2.f32 %v13517_v31  ;;  %v5970_v31 = vld [vmem:[#allocation12 + $0x70] sm:$0xff] }
 0x922   :  { %15421 = vtanh.f32 %v5602_v48 }
 0x929   :  { %v15416_v51 = vpop.eup %15415 }
 0x92a   :  { %v15418_v9 = vpop.eup %15417  ;;  %v5607_v53 = vadd.f32 1.0, %v15416_v51  ;;  %v5967_v51 = vld [vmem:[#allocation12 + $0x58] sm:$0xff] }
 0x92b   :  { %v5613_v49 = vadd.f32 1.0, %v15418_v9  ;;  %v15420_v34 = vpop.eup %15419 }
 0x92c   :  { %15423 = vrcp.f32 %v5607_v53  ;;  %v15422_v6 = vpop.eup %15421  ;;  %v5620_v36 = vadd.f32 1.0, %v15420_v34  ;;  %v5950_v53 = vld [vmem:[#allocation3] sm:$0xff] }
 0x92d   :  { %15425 = vrcp.f32 %v5613_v49  ;;  %v5974_v34 = vld [vmem:[#allocation12 + $0x90] sm:$0xff] }
 0x92e   :  { %15427 = vrcp.f32 %v5620_v36  ;;  %v13565_v36 = vcombine.low %v5966_v29, %v5970_v31 }
 0x936   :  { %v15424_v45 = vpop.eup %15423 }
 0x937   :  { %v15426_v33 = vpop.eup %15425  ;;  %v5627_v1 = vmul.f32 %v15424_v45, %v15422_v6  ;;  %v13566_v6 = vcombine.high %v5966_v29, %v5970_v31  ;;  %v13568_v45 = vcombine.high %v5967_v51, %v5971_v42 }
 0x938   :  { %v5626_v56 = vmul.f32 %v15426_v33, %v5624_v55  ;;  %v15428_v3 = vpop.eup %15427  ;;  %v5978_v55 = vld [vmem:[#allocation12 + $0xb0] sm:$0xff]  ;;  %v5975_v33 = vld [vmem:[#allocation12 + $0x98] sm:$0xff] }
 0x939   :  { %v13573_v0 = vcombine.low %v5974_v34, %v5978_v55 }
 0x93a   :  { %v5628_v35 = vadd.f32 %v5627_v1, %v5626_v56  ;;  %v5979_v1 = vld [vmem:[#allocation12 + $0xb8] sm:$0xff]  ;;  %v13567_v56 = vcombine.low %v5967_v51, %v5971_v42  ;;  %v6030_v51 = vld [vmem:[#allocation12 + $0x250] sm:$0xff] }
 0x93b   :  { %v13575_v44 = vcombine.low %v5975_v33, %v5979_v1  ;;  %v6034_v42 = vld [vmem:[#allocation12 + $0x270] sm:$0xff] }
 0x93c   :  { %15429 = vtanh.f32 %v5628_v35  ;;  %5948 = vst [vmem:[#allocation21 - $0x6] sm:$0xc0] %v5628_v35  ;;  %v5866_v24 = vpop.f32.mrb[68].mxu0  ;;  %v5907_v41 = vpop.f32.mrb[68].mxu1  ;;  %v13574_v35 = vcombine.high %v5974_v34, %v5978_v55 }
 0x93d   :  { %v5914_v61 = vadd.f32 %v5866_v24, %v5632_v25  ;;  %v5868_v23 = vpop.f32.mrb[69].mxu0  ;;  %v5909_v4 = vpop.f32.mrb[69].mxu1  ;;  %v5916_v32 = vadd.f32 %v5907_v41, %v5634_v50  ;;  %v13576_v25 = vcombine.high %v5975_v33, %v5979_v1  ;;  %v5982_v24 = vld [vmem:[#allocation12 + $0xd0] sm:$0xff] }
 0x93e   :  { %v5915_v40 = vadd.f32 %v5868_v23, %v5633_v62  ;;  %v5870_v5 = vpop.f32.mrb[70].mxu0  ;;  %v5911_v16 = vpop.f32.mrb[70].mxu1  ;;  %v5917_v39 = vadd.f32 %v5909_v4, %v5635_v60  ;;  %v5986_v41 = vld [vmem:[#allocation12 + $0xf0] sm:$0xff]  ;;  %v5987_v62 = vld [vmem:[#allocation12 + $0xf8] sm:$0xff] }
 0x93f   :  { %v13550_v57 = vmul.f32 -1.442695, %v5914_v61  ;;  %v5871_v63 = vpop.f32.mrb[71].mxu0  ;;  %v5912_v58 = vpop.f32.mrb[71].mxu1  ;;  %v5983_v61 = vld [vmem:[#allocation12 + $0xd8] sm:$0xff]  ;;  %v13582_v2 = vcombine.high %v5982_v24, %v5986_v41  ;;  %v6006_v50 = vld [vmem:[#allocation12 + $0x190] sm:$0xff] }
 0x940   :  { %v13551_v59 = vmul.f32 -1.442695, %v5915_v40  ;;  %v13552_v19 = vmul.f32 -1.442695, %v5917_v39  ;;  %v5991_v23 = vld [vmem:[#allocation12 + $0x118] sm:$0xff]  ;;  %v13581_v40 = vcombine.low %v5982_v24, %v5986_v41  ;;  %v13583_v5 = vcombine.low %v5983_v61, %v5987_v62  ;;  %v5998_v63 = vld [vmem:[#allocation12 + $0x150] sm:$0xff] }
 0x941   :  { %15431 = vpow2.f32 %v13550_v57  ;;  %v5995_v4 = vld [vmem:[#allocation12 + $0x138] sm:$0xff]  ;;  %v6002_v58 = vld [vmem:[#allocation12 + $0x170] sm:$0xff] }
 0x942   :  { %15433 = vpow2.f32 %v13551_v59  ;;  %v13592_v57 = vcombine.high %v5991_v23, %v5995_v4  ;;  %v5999_v59 = vld [vmem:[#allocation12 + $0x158] sm:$0xff]  ;;  %v6038_v33 = vld [vmem:[#allocation12 + $0x290] sm:$0xff] }
 0x943   :  { %15435 = vpow2.f32 %v13552_v19  ;;  %v6003_v60 = vld [vmem:[#allocation12 + $0x178] sm:$0xff]  ;;  %v6010_v19 = vld [vmem:[#allocation12 + $0x1b0] sm:$0xff] }
 0x944   :  { %15437 = vtanh.f32 %v5916_v32  ;;  %v6007_v32 = vld [vmem:[#allocation12 + $0x198] sm:$0xff]  ;;  %v6042_v1 = vld [vmem:[#allocation12 + $0x2b0] sm:$0xff] }
 0x945   :  { %v13638_v24 = vcombine.high %v6038_v33, %v6042_v1 }
 0x946   :  { %v15430_v21 = vpop.eup %15429 }
 0x947   :  { %v5630_v22 = vmul.f32 %v15430_v21, %v15428_v3  ;;  %v13591_v3 = vcombine.low %v5991_v23, %v5995_v4  ;;  %v13598_v21 = vcombine.high %v5998_v63, %v6002_v58  ;;  %v6054_v23 = vld [vmem:[#allocation12 + $0x310] sm:$0xff] }
 0x948   :  { %v6058_v4 = vld [vmem:[#allocation12 + $0x330] sm:$0xff] }
 0x949   :  { %5631 = vst [vmem:[#allocation3 + $0x10] sm:$0xc0] %v5630_v22  ;;  %5946 = vst [vmem:[#allocation20 - $0x6] sm:$0xc0] %v5630_v22  ;;  %v13600_v22 = vcombine.high %v5999_v59, %v6003_v60 }
 0x94b   :  { %v15432_v8 = vpop.eup %15431 }
 0x94c   :  { %v15434_v11 = vpop.eup %15433  ;;  %v5921_v12 = vadd.f32 1.0, %v15432_v8  ;;  %v6011_v8 = vld [vmem:[#allocation12 + $0x1b8] sm:$0xff] }
 0x94d   :  { %v5927_v13 = vadd.f32 1.0, %v15434_v11  ;;  %v15436_v14 = vpop.eup %15435  ;;  %v13597_v11 = vcombine.low %v5998_v63, %v6002_v58  ;;  %v13654_v63 = vcombine.high %v6054_v23, %v6058_v4 }
 0x94e   :  { %15439 = vrcp.f32 %v5921_v12  ;;  %v15438_v15 = vpop.eup %15437  ;;  %v5934_v7 = vadd.f32 1.0, %v15436_v14  ;;  %v13599_v12 = vcombine.low %v5999_v59, %v6003_v60  ;;  %v13608_v14 = vcombine.high %v6007_v32, %v6011_v8  ;;  %v6062_v59 = vld [vmem:[#allocation12 + $0x350] sm:$0xff] }
 0x94f   :  { %15441 = vrcp.f32 %v5927_v13  ;;  %v13606_v13 = vcombine.high %v6006_v50, %v6010_v19  ;;  %v6066_v60 = vld [vmem:[#allocation12 + $0x370] sm:$0xff] }
 0x950   :  { %15443 = vrcp.f32 %v5934_v7  ;;  %v5952_v30 = vld [vmem:[#allocation3 + $0x10] sm:$0xff]  ;;  %v13607_v7 = vcombine.low %v6007_v32, %v6011_v8  ;;  %v6070_v32 = vld [vmem:[#allocation12 + $0x390] sm:$0xff] }
 0x951   :  { %v17295_v49 = vpack.c.bf16 %v5952_v30, %v5950_v53  ;;  %v6035_v53 = vld [vmem:[#allocation12 + $0x278] sm:$0xff]  ;;  %v6074_v8 = vld [vmem:[#allocation12 + $0x3b0] sm:$0xff] }
 0x958   :  { %v15440_v17 = vpop.eup %15439 }
 0x959   :  { %v15442_v43 = vpop.eup %15441  ;;  %v5941_v37 = vmul.f32 %v15440_v17, %v15438_v15  ;;  %v6014_v15 = vld [vmem:[#allocation12 + $0x1d0] sm:$0xff] }
 0x95a   :  { %v5940_v20 = vmul.f32 %v15442_v43, %v5938_v18  ;;  %v15444_v10 = vpop.eup %15443  ;;  %v6018_v17 = vld [vmem:[#allocation12 + $0x1f0] sm:$0xff]  ;;  %v6015_v18 = vld [vmem:[#allocation12 + $0x1d8] sm:$0xff] }
 0x95b   :  { %v6019_v43 = vld [vmem:[#allocation12 + $0x1f8] sm:$0xff]  ;;  %v13613_v30 = vcombine.low %v6014_v15, %v6018_v17 }
 0x95c   :  { %v5942_v26 = vadd.f32 %v5941_v37, %v5940_v20  ;;  %v13605_v37 = vcombine.low %v6006_v50, %v6010_v19  ;;  %v13614_v20 = vcombine.high %v6014_v15, %v6018_v17  ;;  %v13615_v29 = vcombine.low %v6015_v18, %v6019_v43 }
 0x95d   :  { %v13662_v50 = vcombine.high %v6062_v59, %v6066_v60  ;;  %v13670_v15 = vcombine.high %v6070_v32, %v6074_v8 }
 0x95e   :  { %15445 = vtanh.f32 %v5942_v26  ;;  %5949 = vst [vmem:[#allocation21 + $0x2] sm:$0x3] %v5942_v26  ;;  %v13616_v26 = vcombine.high %v6015_v18, %v6019_v43  ;;  %v6078_v18 = vld [vmem:[#allocation12 + $0x3d0] sm:$0xff] }
 0x95f   :  { %v6082_v43 = vld [vmem:[#allocation12 + $0x3f0] sm:$0xff] }
 0x968   :  { %v15446_v28 = vpop.eup %15445 }
 0x969   :  { %v5944_v27 = vmul.f32 %v15446_v28, %v15444_v10  ;;  %v6022_v10 = vld [vmem:[#allocation12 + $0x210] sm:$0xff] }
 0x96a   :  { %v6026_v28 = vld [vmem:[#allocation12 + $0x230] sm:$0xff] }
 0x96b   :  { %5945 = vst [vmem:[#allocation3 + $0x8] sm:$0x3] %v5944_v27  ;;  %5947 = vst [vmem:[#allocation20 + $0x2] sm:$0x3] %v5944_v27  ;;  %v6023_v27 = vld [vmem:[#allocation12 + $0x218] sm:$0xff]  ;;  %v13622_v31 = vcombine.high %v6022_v10, %v6026_v28  ;;  %v13621_v34 = vcombine.low %v6022_v10, %v6026_v28  ;;  %v13678_v10 = vcombine.high %v6078_v18, %v6082_v43 }
 0x972   :  { %v5951_v48 = vld [vmem:[#allocation3 + $0x8] sm:$0xff] }
 0x973   :  { %v5955_v9 = vpack.c.bf16 %v5953_v54, %v5951_v48  ;;  %v6027_v54 = vld [vmem:[#allocation12 + $0x238] sm:$0xff] }
 0x974   :  { %v13624_v48 = vcombine.high %v6023_v27, %v6027_v54 }
 0x975   :  { %6798 = vmatprep.mubr.bf16.mxu0 %v5955_v9  ;;  %6841 = vmatprep.mubr.bf16.mxu1 %v5955_v9 }
 0x976   :  { %6799 = vmatmul.mubr.bf16.vlgmr.msra.gmra.mrb[72].mxu0 %v17295_v49  ;;  %6842 = vmatmul.mubr.bf16.vlgmr.msra.gmra.mrb[72].mxu1 %v17295_v49 }
 0x977   :  { %6853 = vmatpush1.bf16.msra.mxu0 %v13557_v46  ;;  %6896 = vmatpush1.bf16.msra.mxu1 %v13559_v47  ;;  %v13584_v46 = vcombine.high %v5983_v61, %v5987_v62  ;;  %v5994_v47 = vld [vmem:[#allocation12 + $0x130] sm:$0xff] }
 0x978   :  { %6884 = vmatprep.mubr.bf16.mxu0 %v5955_v9  ;;  %6927 = vmatprep.mubr.bf16.mxu1 %v5955_v9  ;;  %v13590_v16 = vcombine.high %v5990_v52, %v5994_v47  ;;  %v13589_v39 = vcombine.low %v5990_v52, %v5994_v47  ;;  %v6031_v9 = vld [vmem:[#allocation12 + $0x258] sm:$0xff]  ;;  %v6046_v61 = vld [vmem:[#allocation12 + $0x2d0] sm:$0xff] }
 0x979   :  { %6854 = vmatprep.subr.bf16.mxu0 %v13566_v6  ;;  %6897 = vmatprep.subr.bf16.mxu1 %v13568_v45  ;;  %v13623_v6 = vcombine.low %v6023_v27, %v6027_v54  ;;  %v13630_v45 = vcombine.high %v6030_v51, %v6034_v42  ;;  %v13632_v55 = vcombine.high %v6031_v9, %v6035_v53  ;;  %v6050_v62 = vld [vmem:[#allocation12 + $0x2f0] sm:$0xff] }
 0x97a   :  { %v13646_v52 = vcombine.high %v6046_v61, %v6050_v62  ;;  %v13677_v27 = vcombine.low %v6078_v18, %v6082_v43  ;;  %v17469_v18 = vld [vmem:[#allocation15 + $0xac] ss:$16 sps:$4 sm:$0xff]   ;;  %v17473_v43 = vld [vmem:[#allocation15 + $0xa0] ss:$16 sps:$4 sm:$0xff]  }
 0x97b   :  { %6855 = vmatpush1.bf16.msra.mxu0 %v13565_v36  ;;  %6898 = vmatpush1.bf16.msra.mxu1 %v13567_v56  ;;  %v6039_v36 = vld [vmem:[#allocation12 + $0x298] sm:$0xff]  ;;  %18696 = vst [vmem:[#allocation38_spill] sm:$0xff] %v17473_v43 }
 0x97c   :  { %6856 = vmatprep.subr.bf16.mxu0 %v13574_v35  ;;  %6899 = vmatprep.subr.bf16.mxu1 %v13576_v25  ;;  %v6043_v56 = vld [vmem:[#allocation12 + $0x2b8] sm:$0xff]  ;;  %v13629_v35 = vcombine.low %v6030_v51, %v6034_v42  ;;  %v13631_v25 = vcombine.low %v6031_v9, %v6035_v53  ;;  %v17315_v51 = vld [vmem:[#allocation14 + $0x24] ss:$16 sps:$4 sm:$0xff]   ;;  %v17323_v9 = vld [vmem:[#allocation14 + $0x20] ss:$16 sps:$4 sm:$0xff]  }
 0x97d   :  { %v13640_v41 = vcombine.high %v6039_v36, %v6043_v56  ;;  %v17317_v42 = vld [vmem:[#allocation14 + $0x2c] ss:$16 sps:$4 sm:$0xff]   ;;  %v17325_v53 = vld [vmem:[#allocation14 + $0x28] ss:$16 sps:$4 sm:$0xff]  }
 0x97f   :  { %6857 = vmatpush1.bf16.msra.mxu0 %v13573_v0  ;;  %6900 = vmatpush1.bf16.msra.mxu1 %v13575_v44  ;;  %v6047_v0 = vld [vmem:[#allocation12 + $0x2d8] sm:$0xff] }
 0x980   :  { %6858 = vmatprep.subr.bf16.mxu0 %v13582_v2  ;;  %6901 = vmatprep.subr.bf16.mxu1 %v13584_v46  ;;  %v6051_v44 = vld [vmem:[#allocation12 + $0x2f8] sm:$0xff]  ;;  %v13637_v2 = vcombine.low %v6038_v33, %v6042_v1  ;;  %v13639_v46 = vcombine.low %v6039_v36, %v6043_v56  ;;  %v17349_v1 = vld [vmem:[#allocation14 + $0x60] ss:$16 sps:$4 sm:$0xff]   ;;  %v17355_v56 = vld [vmem:[#allocation14 + $0x84] ss:$16 sps:$4 sm:$0xff]  }
 0x981   :  { %v13648_v47 = vcombine.high %v6047_v0, %v6051_v44  ;;  %v17345_v33 = vld [vmem:[#allocation14 + $0x6c] ss:$16 sps:$4 sm:$0xff]   ;;  %v17351_v36 = vld [vmem:[#allocation14 + $0x68] ss:$16 sps:$4 sm:$0xff]  }
 0x983   :  { %6859 = vmatpush1.bf16.msra.mxu0 %v13581_v40  ;;  %6902 = vmatpush1.bf16.msra.mxu1 %v13583_v5  ;;  %v6055_v40 = vld [vmem:[#allocation12 + $0x318] sm:$0xff] }
 0x984   :  { %6860 = vmatprep.subr.bf16.mxu0 %v13590_v16  ;;  %6903 = vmatprep.subr.bf16.mxu1 %v13592_v57  ;;  %v6059_v5 = vld [vmem:[#allocation12 + $0x338] sm:$0xff]  ;;  %v13645_v16 = vcombine.low %v6046_v61, %v6050_v62  ;;  %v13647_v57 = vcombine.low %v6047_v0, %v6051_v44  ;;  %v17373_v62 = vld [vmem:[#allocation14 + $0xa0] ss:$16 sps:$4 sm:$0xff]   ;;  %v17379_v44 = vld [vmem:[#allocation14 + $0xc4] ss:$16 sps:$4 sm:$0xff]  }
 0x985   :  { %v13656_v58 = vcombine.high %v6055_v40, %v6059_v5  ;;  %v17369_v61 = vld [vmem:[#allocation14 + $0xac] ss:$16 sps:$4 sm:$0xff]   ;;  %v17375_v0 = vld [vmem:[#allocation14 + $0xa8] ss:$16 sps:$4 sm:$0xff]  }
 0x987   :  { %6861 = vmatpush1.bf16.msra.mxu0 %v13589_v39  ;;  %6904 = vmatpush1.bf16.msra.mxu1 %v13591_v3  ;;  %v6063_v39 = vld [vmem:[#allocation12 + $0x358] sm:$0xff] }
 0x988   :  { %6862 = vmatprep.subr.bf16.mxu0 %v13598_v21  ;;  %6905 = vmatprep.subr.bf16.mxu1 %v13600_v22  ;;  %v6067_v3 = vld [vmem:[#allocation12 + $0x378] sm:$0xff]  ;;  %v13653_v21 = vcombine.low %v6054_v23, %v6058_v4  ;;  %v13655_v22 = vcombine.low %v6055_v40, %v6059_v5  ;;  %v17397_v4 = vld [vmem:[#allocation14 + $0xe0] ss:$16 sps:$4 sm:$0xff]   ;;  %v17403_v5 = vld [vmem:[#allocation15 + $0x4] ss:$16 sps:$4 sm:$0xff]  }
 0x989   :  { %v13664_v19 = vcombine.high %v6063_v39, %v6067_v3  ;;  %v17393_v23 = vld [vmem:[#allocation14 + $0xec] ss:$16 sps:$4 sm:$0xff]   ;;  %v17399_v40 = vld [vmem:[#allocation14 + $0xe8] ss:$16 sps:$4 sm:$0xff]  }
 0x98b   :  { %6863 = vmatpush1.bf16.msra.mxu0 %v13597_v11  ;;  %6906 = vmatpush1.bf16.msra.mxu1 %v13599_v12  ;;  %v6071_v11 = vld [vmem:[#allocation12 + $0x398] sm:$0xff] }
 0x98c   :  { %6864 = vmatprep.subr.bf16.mxu0 %v13606_v13  ;;  %6907 = vmatprep.subr.bf16.mxu1 %v13608_v14  ;;  %v6075_v12 = vld [vmem:[#allocation12 + $0x3b8] sm:$0xff]  ;;  %v13661_v13 = vcombine.low %v6062_v59, %v6066_v60  ;;  %v13663_v14 = vcombine.low %v6063_v39, %v6067_v3  ;;  %v17423_v60 = vld [vmem:[#allocation15 + $0x20] ss:$16 sps:$4 sm:$0xff]   ;;  %v17429_v3 = vld [vmem:[#allocation15 + $0x44] ss:$16 sps:$4 sm:$0xff]  }
 0x98d   :  { %v13672_v17 = vcombine.high %v6071_v11, %v6075_v12  ;;  %v17417_v59 = vld [vmem:[#allocation15 + $0x2c] ss:$16 sps:$4 sm:$0xff]   ;;  %v17425_v39 = vld [vmem:[#allocation15 + $0x28] ss:$16 sps:$4 sm:$0xff]  }
 0x98f   :  { %6865 = vmatpush1.bf16.msra.mxu0 %v13605_v37  ;;  %6908 = vmatpush1.bf16.msra.mxu1 %v13607_v7  ;;  %v6079_v37 = vld [vmem:[#allocation12 + $0x3d8] sm:$0xff] }
 0x990   :  { %6866 = vmatprep.subr.bf16.mxu0 %v13614_v20  ;;  %6909 = vmatprep.subr.bf16.mxu1 %v13616_v26  ;;  %v6083_v7 = vld [vmem:[#allocation12 + $0x3f8] sm:$0xff]  ;;  %v13669_v20 = vcombine.low %v6070_v32, %v6074_v8  ;;  %v13671_v26 = vcombine.low %v6071_v11, %v6075_v12  ;;  %v17449_v8 = vld [vmem:[#allocation15 + $0x60] ss:$16 sps:$4 sm:$0xff]   ;;  %v17455_v12 = vld [vmem:[#allocation15 + $0x84] ss:$16 sps:$4 sm:$0xff]  }
 0x991   :  { %v13680_v28 = vcombine.high %v6079_v37, %v6083_v7  ;;  %v13679_v54 = vcombine.low %v6079_v37, %v6083_v7  ;;  %v17445_v32 = vld [vmem:[#allocation15 + $0x6c] ss:$16 sps:$4 sm:$0xff]   ;;  %v17451_v11 = vld [vmem:[#allocation15 + $0x68] ss:$16 sps:$4 sm:$0xff]   ;;  %v17479_v7 = vld [vmem:[#allocation15 + $0xc4] ss:$16 sps:$4 sm:$0xff]  }
 0x992   :  { %v17475_v37 = vld [vmem:[#allocation15 + $0xa8] ss:$16 sps:$4 sm:$0xff]  }
 0x993   :  { %6867 = vmatpush1.bf16.msra.mxu0 %v13613_v30  ;;  %6910 = vmatpush1.bf16.msra.mxu1 %v13615_v29  ;;  %v17305_v30 = vld [vmem:[#allocation14 + $0x4] ss:$16 sps:$4 sm:$0xff]   ;;  %v17307_v29 = vld [vmem:[#allocation14 + $0xc] ss:$16 sps:$4 sm:$0xff]  }
 0x994   :  { %6868 = vmatprep.subr.bf16.mxu0 %v13622_v31  ;;  %6911 = vmatprep.subr.bf16.mxu1 %v13624_v48  ;;  %v17309_v31 = vld [vmem:[#allocation14] ss:$16 sps:$4 sm:$0xff]   ;;  %v17311_v48 = vld [vmem:[#allocation14 + $0x8] ss:$16 sps:$4 sm:$0xff]  }
 0x997   :  { %6869 = vmatpush1.bf16.msra.mxu0 %v13621_v34  ;;  %6912 = vmatpush1.bf16.msra.mxu1 %v13623_v6  ;;  %v17329_v34 = vld [vmem:[#allocation14 + $0x44] ss:$16 sps:$4 sm:$0xff]   ;;  %v17331_v6 = vld [vmem:[#allocation14 + $0x4c] ss:$16 sps:$4 sm:$0xff]  }
 0x998   :  { %6870 = vmatprep.subr.bf16.mxu0 %v13630_v45  ;;  %6913 = vmatprep.subr.bf16.mxu1 %v13632_v55  ;;  %v17339_v45 = vld [vmem:[#allocation14 + $0x48] ss:$16 sps:$4 sm:$0xff]   ;;  %v17343_v55 = vld [vmem:[#allocation14 + $0x64] ss:$16 sps:$4 sm:$0xff]  }
 0x99b   :  { %6871 = vmatpush1.bf16.msra.mxu0 %v13629_v35  ;;  %6914 = vmatpush1.bf16.msra.mxu1 %v13631_v25  ;;  %v17357_v35 = vld [vmem:[#allocation14 + $0x8c] ss:$16 sps:$4 sm:$0xff]   ;;  %v17361_v25 = vld [vmem:[#allocation14 + $0x80] ss:$16 sps:$4 sm:$0xff]  }
 0x99c   :  { %6872 = vmatprep.subr.bf16.mxu0 %v13638_v24  ;;  %6915 = vmatprep.subr.bf16.mxu1 %v13640_v41  ;;  %v17363_v24 = vld [vmem:[#allocation14 + $0x88] ss:$16 sps:$4 sm:$0xff]   ;;  %v17367_v41 = vld [vmem:[#allocation14 + $0xa4] ss:$16 sps:$4 sm:$0xff]  }
 0x99f   :  { %6873 = vmatpush1.bf16.msra.mxu0 %v13637_v2  ;;  %6916 = vmatpush1.bf16.msra.mxu1 %v13639_v46  ;;  %v17381_v2 = vld [vmem:[#allocation14 + $0xcc] ss:$16 sps:$4 sm:$0xff]   ;;  %v17385_v46 = vld [vmem:[#allocation14 + $0xc0] ss:$16 sps:$4 sm:$0xff]  }
 0x9a0   :  { %6874 = vmatprep.subr.bf16.mxu0 %v13646_v52  ;;  %6917 = vmatprep.subr.bf16.mxu1 %v13648_v47  ;;  %v17387_v52 = vld [vmem:[#allocation14 + $0xc8] ss:$16 sps:$4 sm:$0xff]   ;;  %v17391_v47 = vld [vmem:[#allocation14 + $0xe4] ss:$16 sps:$4 sm:$0xff]  }
 0x9a3   :  { %6875 = vmatpush1.bf16.msra.mxu0 %v13645_v16  ;;  %6918 = vmatpush1.bf16.msra.mxu1 %v13647_v57  ;;  %v17405_v16 = vld [vmem:[#allocation15 + $0xc] ss:$16 sps:$4 sm:$0xff]   ;;  %v17409_v57 = vld [vmem:[#allocation15] ss:$16 sps:$4 sm:$0xff]  }
 0x9a4   :  { %6876 = vmatprep.subr.bf16.mxu0 %v13654_v63  ;;  %6919 = vmatprep.subr.bf16.mxu1 %v13656_v58  ;;  %v17411_v63 = vld [vmem:[#allocation15 + $0x8] ss:$16 sps:$4 sm:$0xff]   ;;  %v17415_v58 = vld [vmem:[#allocation15 + $0x24] ss:$16 sps:$4 sm:$0xff]  }
 0x9a7   :  { %6877 = vmatpush1.bf16.msra.mxu0 %v13653_v21  ;;  %6920 = vmatpush1.bf16.msra.mxu1 %v13655_v22  ;;  %v17431_v21 = vld [vmem:[#allocation15 + $0x4c] ss:$16 sps:$4 sm:$0xff]   ;;  %v17437_v22 = vld [vmem:[#allocation15 + $0x40] ss:$16 sps:$4 sm:$0xff]  }
 0x9a8   :  { %6878 = vmatprep.subr.bf16.mxu0 %v13662_v50  ;;  %6921 = vmatprep.subr.bf16.mxu1 %v13664_v19  ;;  %v17439_v50 = vld [vmem:[#allocation15 + $0x48] ss:$16 sps:$4 sm:$0xff]   ;;  %v17443_v19 = vld [vmem:[#allocation15 + $0x64] ss:$16 sps:$4 sm:$0xff]  }
 0x9ab   :  { %6879 = vmatpush1.bf16.msra.mxu0 %v13661_v13  ;;  %6922 = vmatpush1.bf16.msra.mxu1 %v13663_v14  ;;  %v17457_v13 = vld [vmem:[#allocation15 + $0x8c] ss:$16 sps:$4 sm:$0xff]   ;;  %v17461_v14 = vld [vmem:[#allocation15 + $0x80] ss:$16 sps:$4 sm:$0xff]  }
 0x9ac   :  { %6880 = vmatprep.subr.bf16.mxu0 %v13670_v15  ;;  %6923 = vmatprep.subr.bf16.mxu1 %v13672_v17  ;;  %v17463_v15 = vld [vmem:[#allocation15 + $0x88] ss:$16 sps:$4 sm:$0xff]   ;;  %v17467_v17 = vld [vmem:[#allocation15 + $0xa4] ss:$16 sps:$4 sm:$0xff]  }
 0x9af   :  { %6881 = vmatpush1.bf16.msra.mxu0 %v13669_v20  ;;  %6924 = vmatpush1.bf16.msra.mxu1 %v13671_v26  ;;  %v17481_v20 = vld [vmem:[#allocation15 + $0xcc] ss:$16 sps:$4 sm:$0xff]   ;;  %v17485_v26 = vld [vmem:[#allocation15 + $0xc0] ss:$16 sps:$4 sm:$0xff]  }
 0x9b0   :  { %6882 = vmatprep.subr.bf16.mxu0 %v13678_v10  ;;  %6925 = vmatprep.subr.bf16.mxu1 %v13680_v28  ;;  %v17487_v10 = vld [vmem:[#allocation15 + $0xc8] ss:$16 sps:$4 sm:$0xff]   ;;  %v17491_v28 = vld [vmem:[#allocation15 + $0xe4] ss:$16 sps:$4 sm:$0xff]  }
 0x9b3   :  { %6883 = vmatpush1.bf16.msra.mxu0 %v13677_v27  ;;  %6926 = vmatpush1.bf16.msra.mxu1 %v13679_v54  ;;  %v17493_v27 = vld [vmem:[#allocation15 + $0xec] ss:$16 sps:$4 sm:$0xff]   ;;  %v17497_v54 = vld [vmem:[#allocation15 + $0xe0] ss:$16 sps:$4 sm:$0xff]  }
 0x9b4   :  { %7150 = vmatprep.subr.bf16.mxu0 %v17305_v30  ;;  %7191 = vmatprep.subr.bf16.mxu1 %v17307_v29 }
 0x9b6   :  { %6885 = vmatmul.mubr.bf16.vlgmr.msra.gmra.mrb[76].mxu0 %v17295_v49  ;;  %6928 = vmatmul.mubr.bf16.vlgmr.msra.gmra.mrb[76].mxu1 %v17295_v49  ;;  %v17337_v49 = vld [vmem:[#allocation14 + $0x40] ss:$16 sps:$4 sm:$0xff]  }
 0x9b7   :  { %7151 = vmatpush1.bf16.msra.mxu0 %v17309_v31  ;;  %7192 = vmatpush1.bf16.msra.mxu1 %v17311_v48 }
 0x9b8   :  { %7152 = vmatprep.subr.bf16.mxu0 %v17315_v51  ;;  %7193 = vmatprep.subr.bf16.mxu1 %v17317_v42 }
 0x9b9   :  { %7182 = vmatprep.mubr.bf16.mxu0 %v18657_v38  ;;  %7223 = vmatprep.mubr.bf16.mxu1 %v18657_v38 }
 0x9bb   :  { %7153 = vmatpush1.bf16.msra.mxu0 %v17323_v9  ;;  %7194 = vmatpush1.bf16.msra.mxu1 %v17325_v53 }
 0x9bc   :  { %7154 = vmatprep.subr.bf16.mxu0 %v17329_v34  ;;  %7195 = vmatprep.subr.bf16.mxu1 %v17331_v6 }
 0x9bf   :  { %7155 = vmatpush1.bf16.msra.mxu0 %v17337_v49  ;;  %7196 = vmatpush1.bf16.msra.mxu1 %v17339_v45 }
 0x9c0   :  { %7156 = vmatprep.subr.bf16.mxu0 %v17343_v55  ;;  %7197 = vmatprep.subr.bf16.mxu1 %v17345_v33 }
 0x9c3   :  { %7157 = vmatpush1.bf16.msra.mxu0 %v17349_v1  ;;  %7198 = vmatpush1.bf16.msra.mxu1 %v17351_v36 }
 0x9c4   :  { %7158 = vmatprep.subr.bf16.mxu0 %v17355_v56  ;;  %7199 = vmatprep.subr.bf16.mxu1 %v17357_v35 }
 0x9c7   :  { %7159 = vmatpush1.bf16.msra.mxu0 %v17361_v25  ;;  %7200 = vmatpush1.bf16.msra.mxu1 %v17363_v24 }
 0x9c8   :  { %7160 = vmatprep.subr.bf16.mxu0 %v17367_v41  ;;  %7201 = vmatprep.subr.bf16.mxu1 %v17369_v61 }
 0x9cb   :  { %7161 = vmatpush1.bf16.msra.mxu0 %v17373_v62  ;;  %7202 = vmatpush1.bf16.msra.mxu1 %v17375_v0 }
 0x9cc   :  { %7162 = vmatprep.subr.bf16.mxu0 %v17379_v44  ;;  %7203 = vmatprep.subr.bf16.mxu1 %v17381_v2 }
 0x9cf   :  { %7163 = vmatpush1.bf16.msra.mxu0 %v17385_v46  ;;  %7204 = vmatpush1.bf16.msra.mxu1 %v17387_v52 }
 0x9d0   :  { %7164 = vmatprep.subr.bf16.mxu0 %v17391_v47  ;;  %7205 = vmatprep.subr.bf16.mxu1 %v17393_v23 }
 0x9d3   :  { %7165 = vmatpush1.bf16.msra.mxu0 %v17397_v4  ;;  %7206 = vmatpush1.bf16.msra.mxu1 %v17399_v40 }
 0x9d4   :  { %7457 = vmatprep.subr.bf16.mxu0 %v17403_v5  ;;  %7498 = vmatprep.subr.bf16.mxu1 %v17405_v16 }
 0x9d6   :  { %7183 = vmatmul.mubr.bf16.vlgmr.msra.gmra.mrb[80].mxu0 %v18657_v38  ;;  %7224 = vmatmul.mubr.bf16.vlgmr.msra.gmra.mrb[80].mxu1 %v18657_v38 }
 0x9d7   :  { %7458 = vmatpush1.bf16.msra.mxu0 %v17409_v57  ;;  %7499 = vmatpush1.bf16.msra.mxu1 %v17411_v63 }
 0x9d8   :  { %7459 = vmatprep.subr.bf16.mxu0 %v17415_v58  ;;  %7500 = vmatprep.subr.bf16.mxu1 %v17417_v59 }
 0x9d9   :  { %7489 = vmatprep.mubr.bf16.mxu0 %v18657_v38  ;;  %7530 = vmatprep.mubr.bf16.mxu1 %v18657_v38 }
 0x9db   :  { %7460 = vmatpush1.bf16.msra.mxu0 %v17423_v60  ;;  %7501 = vmatpush1.bf16.msra.mxu1 %v17425_v39 }
 0x9dc   :  { %7461 = vmatprep.subr.bf16.mxu0 %v17429_v3  ;;  %7502 = vmatprep.subr.bf16.mxu1 %v17431_v21 }
 0x9df   :  { %7462 = vmatpush1.bf16.msra.mxu0 %v17437_v22  ;;  %7503 = vmatpush1.bf16.msra.mxu1 %v17439_v50 }
 0x9e0   :  { %7463 = vmatprep.subr.bf16.mxu0 %v17443_v19  ;;  %7504 = vmatprep.subr.bf16.mxu1 %v17445_v32 }
 0x9e3   :  { %7464 = vmatpush1.bf16.msra.mxu0 %v17449_v8  ;;  %7505 = vmatpush1.bf16.msra.mxu1 %v17451_v11 }
 0x9e4   :  { %7465 = vmatprep.subr.bf16.mxu0 %v17455_v12  ;;  %7506 = vmatprep.subr.bf16.mxu1 %v17457_v13 }
 0x9e7   :  { %7466 = vmatpush1.bf16.msra.mxu0 %v17461_v14  ;;  %7507 = vmatpush1.bf16.msra.mxu1 %v17463_v15 }
 0x9e8   :  { %7467 = vmatprep.subr.bf16.mxu0 %v17467_v17  ;;  %7508 = vmatprep.subr.bf16.mxu1 %v17469_v18 }
 0x9eb   :  { %7468 = vmatpush1.bf16.msra.mxu0 %v17473_v43  ;;  %7509 = vmatpush1.bf16.msra.mxu1 %v17475_v37  ;;  %v17499_v43 = vld [vmem:[#allocation15 + $0xe8] ss:$16 sps:$4 sm:$0xff]  }
 0x9ec   :  { %7469 = vmatprep.subr.bf16.mxu0 %v17479_v7  ;;  %7510 = vmatprep.subr.bf16.mxu1 %v17481_v20 }
 0x9ef   :  { %7470 = vmatpush1.bf16.msra.mxu0 %v17485_v26  ;;  %7511 = vmatpush1.bf16.msra.mxu1 %v17487_v10 }
 0x9f0   :  { %7471 = vmatprep.subr.bf16.mxu0 %v17491_v28  ;;  %7512 = vmatprep.subr.bf16.mxu1 %v17493_v27 }
 0x9f3   :  { %7472 = vmatpush1.bf16.msra.mxu0 %v17497_v54  ;;  %7513 = vmatpush1.bf16.msra.mxu1 %v17499_v43 }
 0x9f4   :  { %7777 = vmatprep.subr.bf16.mxu0 %v17305_v30  ;;  %7818 = vmatprep.subr.bf16.mxu1 %v17307_v29  ;;  %v6084_v30 = vld [vmem:[%s18554_s8] sm:$0xff] }
 0x9f5   :  { %v18697_v29 = vld [vmem:[#allocation30_spill] sm:$0xff] }
 0x9f6   :  { %7490 = vmatmul.mubr.bf16.vlgmr.msra.gmra.mrb[84].mxu0 %v18657_v38  ;;  %7531 = vmatmul.mubr.bf16.vlgmr.msra.gmra.mrb[84].mxu1 %v18657_v38 }
 0x9f7   :  { %7778 = vmatpush1.bf16.msra.mxu0 %v17309_v31  ;;  %7819 = vmatpush1.bf16.msra.mxu1 %v17311_v48  ;;  %v18698_v31 = vsub.s32 0, %v18697_v29 }
 0x9f8   :  { %7779 = vmatprep.subr.bf16.mxu0 %v17315_v51  ;;  %7820 = vmatprep.subr.bf16.mxu1 %v17317_v42  ;;  %v18699_v51 = vsub.s32 2, %v18697_v29 }
 0x9f9   :  { %7809 = vmatprep.mubr.bf16.mxu0 %v18657_v38  ;;  %7850 = vmatprep.mubr.bf16.mxu1 %v18657_v38  ;;  %v6089_v48 = vrot.slane %v6084_v30, %v18698_v31 }
 0x9fa   :  { %v6097_v42 = vrot.slane %v6084_v30, %v18699_v51 }
 0x9fb   :  { %7780 = vmatpush1.bf16.msra.mxu0 %v17323_v9  ;;  %7821 = vmatpush1.bf16.msra.mxu1 %v17325_v53  ;;  %v18700_v9 = vsub.s32 1, %v18697_v29 }
 0x9fc   :  { %7781 = vmatprep.subr.bf16.mxu0 %v17329_v34  ;;  %7822 = vmatprep.subr.bf16.mxu1 %v17331_v6  ;;  %v18701_v34 = vsub.s32 3, %v18697_v29 }
 0x9fd   :  { %v6093_v53 = vrot.slane %v6084_v30, %v18700_v9 }
 0x9fe   :  { %v6101_v6 = vrot.slane %v6084_v30, %v18701_v34 }
 0x9ff   :  { %7782 = vmatpush1.bf16.msra.mxu0 %v17337_v49  ;;  %7823 = vmatpush1.bf16.msra.mxu1 %v17339_v45 }
 0xa00   :  { %7783 = vmatprep.subr.bf16.mxu0 %v17343_v55  ;;  %7824 = vmatprep.subr.bf16.mxu1 %v17345_v33 }
 0xa03   :  { %7784 = vmatpush1.bf16.msra.mxu0 %v17349_v1  ;;  %7825 = vmatpush1.bf16.msra.mxu1 %v17351_v36 }
 0xa04   :  { %7785 = vmatprep.subr.bf16.mxu0 %v17355_v56  ;;  %7826 = vmatprep.subr.bf16.mxu1 %v17357_v35 }
 0xa07   :  { %7786 = vmatpush1.bf16.msra.mxu0 %v17361_v25  ;;  %7827 = vmatpush1.bf16.msra.mxu1 %v17363_v24 }
 0xa08   :  { %7787 = vmatprep.subr.bf16.mxu0 %v17367_v41  ;;  %7828 = vmatprep.subr.bf16.mxu1 %v17369_v61 }
 0xa0b   :  { %7788 = vmatpush1.bf16.msra.mxu0 %v17373_v62  ;;  %7829 = vmatpush1.bf16.msra.mxu1 %v17375_v0 }
 0xa0c   :  { %7789 = vmatprep.subr.bf16.mxu0 %v17379_v44  ;;  %7830 = vmatprep.subr.bf16.mxu1 %v17381_v2 }
 0xa0f   :  { %7790 = vmatpush1.bf16.msra.mxu0 %v17385_v46  ;;  %7831 = vmatpush1.bf16.msra.mxu1 %v17387_v52  ;;  %v18702_v46 = vsub.s32 4, %v18697_v29 }
 0xa10   :  { %7791 = vmatprep.subr.bf16.mxu0 %v17391_v47  ;;  %7832 = vmatprep.subr.bf16.mxu1 %v17393_v23  ;;  %v18703_v47 = vsub.s32 6, %v18697_v29 }
 0xa11   :  { %v6105_v52 = vrot.slane %v6084_v30, %v18702_v46 }
 0xa12   :  { %v6113_v23 = vrot.slane %v6084_v30, %v18703_v47 }
 0xa13   :  { %7792 = vmatpush1.bf16.msra.mxu0 %v17397_v4  ;;  %7833 = vmatpush1.bf16.msra.mxu1 %v17399_v40  ;;  %v18704_v4 = vsub.s32 5, %v18697_v29 }
 0xa14   :  { %8103 = vmatprep.subr.bf16.mxu0 %v17403_v5  ;;  %8144 = vmatprep.subr.bf16.mxu1 %v17405_v16  ;;  %v18705_v5 = vsub.s32 7, %v18697_v29 }
 0xa15   :  { %v6109_v40 = vrot.slane %v6084_v30, %v18704_v4 }
 0xa16   :  { %v6117_v16 = vrot.slane %v6084_v30, %v18705_v5 }
 0xa49   :  { %v6800_v49 = vpop.f32.mrb[72].mxu0  ;;  %v6843_v45 = vpop.f32.mrb[72].mxu1 }
 0xa4a   :  { %v6801_v55 = vadd.f32 %v6800_v49, %v6089_v48  ;;  %v6844_v33 = vadd.f32 %v6843_v45, %v6097_v42  ;;  %v6802_v1 = vpop.f32.mrb[73].mxu0  ;;  %v6845_v36 = vpop.f32.mrb[73].mxu1 }
 0xa4b   :  { %v6803_v56 = vadd.f32 %v6802_v1, %v6093_v53  ;;  %v6846_v35 = vadd.f32 %v6845_v36, %v6101_v6  ;;  %v6804_v25 = vpop.f32.mrb[74].mxu0  ;;  %v6847_v24 = vpop.f32.mrb[74].mxu1 }
 0xa4c   :  { %6938 = vst [vmem:[#allocation2] sm:$0xff] %v6801_v55  ;;  %6940 = vst [vmem:[#allocation2 + $0x10] sm:$0xff] %v6844_v33  ;;  %v6805_v41 = vadd.f32 %v6804_v25, %v6089_v48  ;;  %v6848_v61 = vadd.f32 %v6847_v24, %v6097_v42  ;;  %v6806_v62 = vpop.f32.mrb[75].mxu0  ;;  %v6849_v0 = vpop.f32.mrb[75].mxu1 }
 0xa4d   :  { %6939 = vst [vmem:[#allocation2 + $0x8] sm:$0xff] %v6803_v56  ;;  %6941 = vst [vmem:[#allocation2 + $0x18] sm:$0xff] %v6846_v35  ;;  %v6807_v44 = vadd.f32 %v6806_v62, %v6093_v53  ;;  %v6850_v2 = vadd.f32 %v6849_v0, %v6101_v6 }
 0xa4e   :  { %6946 = vst [vmem:[#allocation2 + $0x40] sm:$0xff] %v6805_v41  ;;  %6948 = vst [vmem:[#allocation2 + $0x50] sm:$0xff] %v6848_v61 }
 0xa4f   :  { %6947 = vst [vmem:[#allocation2 + $0x48] sm:$0xff] %v6807_v44  ;;  %6949 = vst [vmem:[#allocation2 + $0x58] sm:$0xff] %v6850_v2 }
 0xa53   :  { %v6954_v56 = vld [vmem:[#allocation2] sm:$0x3]  ;;  %v6956_v5 = vld [vmem:[#allocation2 + $0x10] sm:$0x3] }
 0xa54   :  { %v6955_v41 = vld [vmem:[#allocation2 + $0x8] sm:$0x3]  ;;  %v6957_v4 = vld [vmem:[#allocation2 + $0x18] sm:$0x3] }
 0xa89   :  { %v6886_v31 = vpop.f32.mrb[76].mxu0  ;;  %v6929_v48 = vpop.f32.mrb[76].mxu1 }
 0xa8a   :  { %v6887_v51 = vadd.f32 %v6886_v31, %v6105_v52  ;;  %v6930_v42 = vadd.f32 %v6929_v48, %v6113_v23  ;;  %v6888_v9 = vpop.f32.mrb[77].mxu0  ;;  %v6931_v53 = vpop.f32.mrb[77].mxu1 }
 0xa8b   :  { %v6889_v34 = vadd.f32 %v6888_v9, %v6109_v40  ;;  %v6932_v6 = vadd.f32 %v6931_v53, %v6117_v16  ;;  %v6890_v49 = vpop.f32.mrb[78].mxu0  ;;  %v6933_v45 = vpop.f32.mrb[78].mxu1 }
 0xa8c   :  { %6942 = vst [vmem:[#allocation2 + $0x20] sm:$0xff] %v6887_v51  ;;  %6944 = vst [vmem:[#allocation2 + $0x30] sm:$0xff] %v6930_v42  ;;  %v6891_v55 = vadd.f32 %v6890_v49, %v6105_v52  ;;  %v6934_v33 = vadd.f32 %v6933_v45, %v6113_v23  ;;  %v6892_v1 = vpop.f32.mrb[79].mxu0  ;;  %v6935_v36 = vpop.f32.mrb[79].mxu1 }
 0xa8d   :  { %6943 = vst [vmem:[#allocation2 + $0x28] sm:$0xff] %v6889_v34  ;;  %6945 = vst [vmem:[#allocation2 + $0x38] sm:$0xff] %v6932_v6  ;;  %v6893_v29 = vadd.f32 %v6892_v1, %v6109_v40  ;;  %v6936_v30 = vadd.f32 %v6935_v36, %v6117_v16 }
 0xa8e   :  { %6950 = vst [vmem:[#allocation2 + $0x60] sm:$0xff] %v6891_v55  ;;  %6952 = vst [vmem:[#allocation2 + $0x70] sm:$0xff] %v6934_v33 }
 0xa8f   :  { %6951 = vst [vmem:[#allocation2 + $0x68] sm:$0xff] %v6893_v29  ;;  %6953 = vst [vmem:[#allocation2 + $0x78] sm:$0xff] %v6936_v30 }
 0xaa9   :  { %v7184_v35 = vpop.f32.mrb[80].mxu0  ;;  %v7225_v25 = vpop.f32.mrb[80].mxu1 }
 0xaaa   :  { %v7232_v24 = vadd.f32 %v7184_v35, %v6954_v56  ;;  %v7186_v61 = vpop.f32.mrb[81].mxu0  ;;  %v7227_v62 = vpop.f32.mrb[81].mxu1  ;;  %v7234_v31 = vadd.f32 %v7225_v25, %v6956_v5  ;;  %v7261_v25 = vld [vmem:[#allocation2 + $0x60] sm:$0xc0] }
 0xaab   :  { %v7233_v0 = vadd.f32 %v7186_v61, %v6955_v41  ;;  %v7188_v44 = vpop.f32.mrb[82].mxu0  ;;  %v7229_v2 = vpop.f32.mrb[82].mxu1  ;;  %v7235_v40 = vadd.f32 %v7227_v62, %v6957_v4  ;;  %v7264_v4 = vld [vmem:[#allocation2 + $0x78] sm:$0xc0] }
 0xaac   :  { %v13713_v46 = vmul.f32 -1.442695, %v7232_v24  ;;  %v7189_v52 = vpop.f32.mrb[83].mxu0  ;;  %v7230_v47 = vpop.f32.mrb[83].mxu1 }
 0xaad   :  { %v13714_v23 = vmul.f32 -1.442695, %v7233_v0  ;;  %v13715_v16 = vmul.f32 -1.442695, %v7235_v40  ;;  %v7262_v0 = vld [vmem:[#allocation2 + $0x68] sm:$0xc0] }
 0xaae   :  { %15447 = vpow2.f32 %v13713_v46 }
 0xaaf   :  { %15449 = vpow2.f32 %v13714_v23 }
 0xab0   :  { %15451 = vpow2.f32 %v13715_v16 }
 0xab1   :  { %15453 = vtanh.f32 %v7234_v31 }
 0xab8   :  { %v15448_v48 = vpop.eup %15447 }
 0xab9   :  { %v15450_v51 = vpop.eup %15449  ;;  %v7239_v42 = vadd.f32 1.0, %v15448_v48 }
 0xaba   :  { %v7245_v9 = vadd.f32 1.0, %v15450_v51  ;;  %v15452_v53 = vpop.eup %15451  ;;  %v7263_v51 = vld [vmem:[#allocation2 + $0x70] sm:$0xc0] }
 0xabb   :  { %15455 = vrcp.f32 %v7239_v42  ;;  %v15454_v34 = vpop.eup %15453  ;;  %v7252_v55 = vadd.f32 1.0, %v15452_v53 }
 0xabc   :  { %15457 = vrcp.f32 %v7245_v9 }
 0xabd   :  { %15459 = vrcp.f32 %v7252_v55  ;;  %v17644_v55 = vld [vmem:[#allocation14 + $0x68] ss:$16 sps:$4 sm:$0xff]  }
 0xac5   :  { %v15456_v6 = vpop.eup %15455 }
 0xac6   :  { %v15458_v49 = vpop.eup %15457  ;;  %v7256_v45 = vmul.f32 %v15456_v6, %v15454_v34 }
 0xac7   :  { %v7255_v33 = vmul.f32 0.0, %v15458_v49  ;;  %v15460_v5 = vpop.eup %15459 }
 0xac9   :  { %v17562_v1 = vadd.f32 %v7256_v45, %v7255_v33  ;;  %v7491_v36 = vpop.f32.mrb[84].mxu0  ;;  %v7532_v29 = vpop.f32.mrb[84].mxu1  ;;  %v17650_v33 = vld [vmem:[#allocation14 + $0x84] ss:$16 sps:$4 sm:$0xff]  }
 0xaca   :  { %v7543_v30 = vrot.slane %v7491_v36, 2  ;;  %v7493_v56 = vpop.f32.mrb[85].mxu0  ;;  %v7534_v35 = vpop.f32.mrb[85].mxu1  ;;  %v7545_v16 = vrot.slane %v7532_v29, 2  ;;  %v17652_v36 = vld [vmem:[#allocation14 + $0x8c] ss:$16 sps:$4 sm:$0xff]  }
 0xacb   :  { %15461 = vtanh.f32 %v17562_v1  ;;  %v7544_v24 = vrot.slane %v7493_v56, 2  ;;  %v7495_v41 = vpop.f32.mrb[86].mxu0  ;;  %v7536_v61 = vpop.f32.mrb[86].mxu1  ;;  %v7546_v23 = vrot.slane %v7534_v35, 2  ;;  %v17654_v29 = vld [vmem:[#allocation14 + $0x80] ss:$16 sps:$4 sm:$0xff]  }
 0xacc   :  { %v7551_v62 = vadd.f32 %v7543_v30, %v7261_v25  ;;  %v7496_v44 = vpop.f32.mrb[87].mxu0  ;;  %v7537_v2 = vpop.f32.mrb[87].mxu1  ;;  %v7553_v9 = vadd.f32 %v7545_v16, %v7263_v51  ;;  %v17656_v30 = vld [vmem:[#allocation14 + $0x88] ss:$16 sps:$4 sm:$0xff]   ;;  %v17662_v56 = vld [vmem:[#allocation14 + $0xa4] ss:$16 sps:$4 sm:$0xff]  }
 0xacd   :  { %v7552_v46 = vadd.f32 %v7544_v24, %v7262_v0  ;;  %v7554_v40 = vadd.f32 %v7546_v23, %v7264_v4  ;;  %v17664_v35 = vld [vmem:[#allocation14 + $0xac] ss:$16 sps:$4 sm:$0xff]   ;;  %v17666_v25 = vld [vmem:[#allocation14 + $0xa0] ss:$16 sps:$4 sm:$0xff]   ;;  %v17668_v24 = vld [vmem:[#allocation14 + $0xa8] ss:$16 sps:$4 sm:$0xff]  }
 0xace   :  { %v13748_v52 = vmul.f32 -1.442695, %v7551_v62  ;;  %v17674_v41 = vld [vmem:[#allocation14 + $0xc4] ss:$16 sps:$4 sm:$0xff]   ;;  %v17676_v61 = vld [vmem:[#allocation14 + $0xcc] ss:$16 sps:$4 sm:$0xff]  }
 0xacf   :  { %v13749_v47 = vmul.f32 -1.442695, %v7552_v46  ;;  %v13750_v42 = vmul.f32 -1.442695, %v7554_v40  ;;  %v17678_v62 = vld [vmem:[#allocation14 + $0xc0] ss:$16 sps:$4 sm:$0xff]  }
 0xad0   :  { %15463 = vpow2.f32 %v13748_v52  ;;  %v17680_v0 = vld [vmem:[#allocation14 + $0xc8] ss:$16 sps:$4 sm:$0xff]   ;;  %v17686_v44 = vld [vmem:[#allocation14 + $0xe4] ss:$16 sps:$4 sm:$0xff]   ;;  %v17688_v2 = vld [vmem:[#allocation14 + $0xec] ss:$16 sps:$4 sm:$0xff]  }
 0xad1   :  { %15465 = vpow2.f32 %v13749_v47  ;;  %v17690_v46 = vld [vmem:[#allocation14 + $0xe0] ss:$16 sps:$4 sm:$0xff]   ;;  %v17692_v52 = vld [vmem:[#allocation14 + $0xe8] ss:$16 sps:$4 sm:$0xff]   ;;  %v17698_v47 = vld [vmem:[#allocation15 + $0x4] ss:$16 sps:$4 sm:$0xff]  }
 0xad2   :  { %15467 = vpow2.f32 %v13750_v42  ;;  %v17700_v23 = vld [vmem:[#allocation15 + $0xc] ss:$16 sps:$4 sm:$0xff]  }
 0xad3   :  { %15469 = vtanh.f32 %v7553_v9 }
 0xad5   :  { %v15462_v31 = vpop.eup %15461 }
 0xad6   :  { %v7259_v48 = vmul.f32 %v15462_v31, %v15460_v5 }
 0xad8   :  { %7260 = vst [vmem:[#allocation3] sm:$0x3] %v7259_v48  ;;  %v7584_v53 = vpack.c.bf16 %v7259_v48, %v7259_v48  ;;  %v7580_v48 = vld [vmem:[#allocation2] sm:$0xc] }
 0xada   :  { %v15464_v34 = vpop.eup %15463  ;;  %7810 = vmatmul.mubr.bf16.vlgmr.msra.gmra.mrb[88].mxu0 %v7584_v53  ;;  %7851 = vmatmul.mubr.bf16.vlgmr.msra.gmra.mrb[88].mxu1 %v7584_v53 }
 0xadb   :  { %v15466_v6 = vpop.eup %15465  ;;  %v7558_v49 = vadd.f32 1.0, %v15464_v34  ;;  %8104 = vmatpush1.bf16.msra.mxu0 %v17409_v57  ;;  %8145 = vmatpush1.bf16.msra.mxu1 %v17411_v63  ;;  %v7581_v34 = vld [vmem:[#allocation2 + $0x8] sm:$0xc] }
 0xadc   :  { %v7564_v45 = vadd.f32 1.0, %v15466_v6  ;;  %8105 = vmatprep.subr.bf16.mxu0 %v17415_v58  ;;  %8146 = vmatprep.subr.bf16.mxu1 %v17417_v59  ;;  %v15468_v57 = vpop.eup %15467 }
 0xadd   :  { %15471 = vrcp.f32 %v7558_v49  ;;  %8135 = vmatprep.mubr.bf16.mxu0 %v18657_v38  ;;  %8176 = vmatprep.mubr.bf16.mxu1 %v18657_v38  ;;  %v15470_v63 = vpop.eup %15469 }
 0xade   :  { %15473 = vrcp.f32 %v7564_v45 }
 0xadf   :  { %8106 = vmatpush1.bf16.msra.mxu0 %v17423_v60  ;;  %8147 = vmatpush1.bf16.msra.mxu1 %v17425_v39  ;;  %v7571_v39 = vadd.f32 1.0, %v15468_v57 }
 0xae0   :  { %8107 = vmatprep.subr.bf16.mxu0 %v17429_v3  ;;  %8148 = vmatprep.subr.bf16.mxu1 %v17431_v21 }
 0xae1   :  { %15475 = vrcp.f32 %v7571_v39 }
 0xae3   :  { %8108 = vmatpush1.bf16.msra.mxu0 %v17437_v22  ;;  %8149 = vmatpush1.bf16.msra.mxu1 %v17439_v50  ;;  %v18706_v22 = vld [vmem:[#allocation38_spill] sm:$0xff] }
 0xae4   :  { %8109 = vmatprep.subr.bf16.mxu0 %v17443_v19  ;;  %8150 = vmatprep.subr.bf16.mxu1 %v17445_v32 }
 0xae7   :  { %v15472_v58 = vpop.eup %15471  ;;  %8110 = vmatpush1.bf16.msra.mxu0 %v17449_v8  ;;  %8151 = vmatpush1.bf16.msra.mxu1 %v17451_v11 }
 0xae8   :  { %v15474_v59 = vpop.eup %15473  ;;  %v7575_v60 = vmul.f32 %v15472_v58, %v15470_v63  ;;  %8111 = vmatprep.subr.bf16.mxu0 %v17455_v12  ;;  %8152 = vmatprep.subr.bf16.mxu1 %v17457_v13  ;;  %v17602_v12 = vld [vmem:[#allocation14 + $0x4] ss:$16 sps:$4 sm:$0xff]   ;;  %v17604_v13 = vld [vmem:[#allocation14 + $0xc] ss:$16 sps:$4 sm:$0xff]  }
 0xae9   :  { %v7574_v3 = vmul.f32 0.0, %v15474_v59  ;;  %v7583_v59 = vld [vmem:[#allocation2 + $0x18] sm:$0xc] }
 0xaeb   :  { %v17583_v21 = vadd.f32 %v7575_v60, %v7574_v3  ;;  %8112 = vmatpush1.bf16.msra.mxu0 %v17461_v14  ;;  %8153 = vmatpush1.bf16.msra.mxu1 %v17463_v15  ;;  %v15476_v50 = vpop.eup %15475  ;;  %v17606_v14 = vld [vmem:[#allocation14] ss:$16 sps:$4 sm:$0xff]   ;;  %v17608_v15 = vld [vmem:[#allocation14 + $0x8] ss:$16 sps:$4 sm:$0xff]  }
 0xaec   :  { %8113 = vmatprep.subr.bf16.mxu0 %v17467_v17  ;;  %8154 = vmatprep.subr.bf16.mxu1 %v17469_v18  ;;  %v17614_v17 = vld [vmem:[#allocation14 + $0x24] ss:$16 sps:$4 sm:$0xff]   ;;  %v17616_v18 = vld [vmem:[#allocation14 + $0x2c] ss:$16 sps:$4 sm:$0xff]   ;;  %v7582_v3 = vld [vmem:[#allocation2 + $0x10] sm:$0xc] }
 0xaed   :  { %15477 = vtanh.f32 %v17583_v21 }
 0xaef   :  { %8114 = vmatpush1.bf16.msra.mxu0 %v18706_v22  ;;  %8155 = vmatpush1.bf16.msra.mxu1 %v17475_v37  ;;  %v17620_v37 = vld [vmem:[#allocation14 + $0x28] ss:$16 sps:$4 sm:$0xff]  }
 0xaf0   :  { %8115 = vmatprep.subr.bf16.mxu0 %v17479_v7  ;;  %8156 = vmatprep.subr.bf16.mxu1 %v17481_v20  ;;  %v17626_v7 = vld [vmem:[#allocation14 + $0x40] ss:$16 sps:$4 sm:$0xff]   ;;  %v17628_v20 = vld [vmem:[#allocation14 + $0x44] ss:$16 sps:$4 sm:$0xff]  }
 0xaf3   :  { %8116 = vmatpush1.bf16.msra.mxu0 %v17485_v26  ;;  %8157 = vmatpush1.bf16.msra.mxu1 %v17487_v10  ;;  %v17630_v26 = vld [vmem:[#allocation14 + $0x48] ss:$16 sps:$4 sm:$0xff]   ;;  %v17632_v10 = vld [vmem:[#allocation14 + $0x4c] ss:$16 sps:$4 sm:$0xff]  }
 0xaf4   :  { %8117 = vmatprep.subr.bf16.mxu0 %v17491_v28  ;;  %8158 = vmatprep.subr.bf16.mxu1 %v17493_v27  ;;  %v17634_v28 = vld [vmem:[#allocation14 + $0x64] ss:$16 sps:$4 sm:$0xff]   ;;  %v17637_v27 = vld [vmem:[#allocation14 + $0x6c] ss:$16 sps:$4 sm:$0xff]  }
 0xaf7   :  { %v15478_v19 = vpop.eup %15477  ;;  %8118 = vmatpush1.bf16.msra.mxu0 %v17497_v54  ;;  %8159 = vmatpush1.bf16.msra.mxu1 %v17499_v43  ;;  %v17618_v43 = vld [vmem:[#allocation14 + $0x20] ss:$16 sps:$4 sm:$0xff]  }
 0xaf8   :  { %v7578_v32 = vmul.f32 %v15478_v19, %v15476_v50  ;;  %8429 = vmatprep.subr.bf16.mxu0 %v17602_v12  ;;  %8470 = vmatprep.subr.bf16.mxu1 %v17604_v13  ;;  %v17642_v54 = vld [vmem:[#allocation14 + $0x60] ss:$16 sps:$4 sm:$0xff]  }
 0xafa   :  { %7579 = vst [vmem:[#allocation3 + $0x18] sm:$0xc0] %v7578_v32  ;;  %v7907_v8 = vpack.c.bf16 %v7578_v32, %v7578_v32 }
 0xafc   :  { %v7941_v11 = vrot.slane %v7907_v8, 3 }
 0xafe   :  { %8136 = vmatmul.mubr.bf16.vlgmr.msra.gmra.mrb[92].mxu0 %v7941_v11  ;;  %8177 = vmatmul.mubr.bf16.vlgmr.msra.gmra.mrb[92].mxu1 %v7941_v11 }
 0xaff   :  { %8461 = vmatprep.mubr.bf16.mxu0 %v18657_v38  ;;  %8502 = vmatprep.mubr.bf16.mxu1 %v18657_v38 }
 0xb00   :  { %8430 = vmatpush1.bf16.msra.mxu0 %v17606_v14  ;;  %8471 = vmatpush1.bf16.msra.mxu1 %v17608_v15 }
 0xb01   :  { %8431 = vmatprep.subr.bf16.mxu0 %v17614_v17  ;;  %8472 = vmatprep.subr.bf16.mxu1 %v17616_v18 }
 0xb04   :  { %8432 = vmatpush1.bf16.msra.mxu0 %v17618_v43  ;;  %8473 = vmatpush1.bf16.msra.mxu1 %v17620_v37 }
 0xb05   :  { %8433 = vmatprep.subr.bf16.mxu0 %v17628_v20  ;;  %8474 = vmatprep.subr.bf16.mxu1 %v17632_v10 }
 0xb08   :  { %8434 = vmatpush1.bf16.msra.mxu0 %v17626_v7  ;;  %8475 = vmatpush1.bf16.msra.mxu1 %v17630_v26 }
 0xb09   :  { %8435 = vmatprep.subr.bf16.mxu0 %v17634_v28  ;;  %8476 = vmatprep.subr.bf16.mxu1 %v17637_v27 }
 0xb0c   :  { %8436 = vmatpush1.bf16.msra.mxu0 %v17642_v54  ;;  %8477 = vmatpush1.bf16.msra.mxu1 %v17644_v55 }
 0xb0d   :  { %8437 = vmatprep.subr.bf16.mxu0 %v17650_v33  ;;  %8478 = vmatprep.subr.bf16.mxu1 %v17652_v36 }
 0xb10   :  { %8438 = vmatpush1.bf16.msra.mxu0 %v17654_v29  ;;  %8479 = vmatpush1.bf16.msra.mxu1 %v17656_v30 }
 0xb11   :  { %8439 = vmatprep.subr.bf16.mxu0 %v17662_v56  ;;  %8480 = vmatprep.subr.bf16.mxu1 %v17664_v35 }
 0xb14   :  { %8440 = vmatpush1.bf16.msra.mxu0 %v17666_v25  ;;  %8481 = vmatpush1.bf16.msra.mxu1 %v17668_v24 }
 0xb15   :  { %8441 = vmatprep.subr.bf16.mxu0 %v17674_v41  ;;  %8482 = vmatprep.subr.bf16.mxu1 %v17676_v61 }
 0xb18   :  { %8442 = vmatpush1.bf16.msra.mxu0 %v17678_v62  ;;  %8483 = vmatpush1.bf16.msra.mxu1 %v17680_v0 }
 0xb19   :  { %8443 = vmatprep.subr.bf16.mxu0 %v17686_v44  ;;  %8484 = vmatprep.subr.bf16.mxu1 %v17688_v2 }
 0xb1c   :  { %8444 = vmatpush1.bf16.msra.mxu0 %v17690_v46  ;;  %8485 = vmatpush1.bf16.msra.mxu1 %v17692_v52 }
 0xb1d   :  { %8755 = vmatprep.subr.bf16.mxu0 %v17698_v47  ;;  %8796 = vmatprep.subr.bf16.mxu1 %v17700_v23 }
 0xbad   :  { %v7811_v4 = vpop.f32.mrb[88].mxu0  ;;  %v7852_v40 = vpop.f32.mrb[88].mxu1 }
 0xbae   :  { %v7863_v5 = vrot.slane %v7811_v4, 6  ;;  %v7813_v16 = vpop.f32.mrb[89].mxu0  ;;  %v7854_v31 = vpop.f32.mrb[89].mxu1  ;;  %v7865_v39 = vrot.slane %v7852_v40, 6 }
 0xbaf   :  { %v7864_v51 = vrot.slane %v7813_v16, 6  ;;  %v7815_v42 = vpop.f32.mrb[90].mxu0  ;;  %v7856_v9 = vpop.f32.mrb[90].mxu1  ;;  %v7866_v58 = vrot.slane %v7854_v31, 6  ;;  %v7895_v31 = vrot.slane %v17562_v1, 6 }
 0xbb0   :  { %v7871_v53 = vadd.f32 %v7863_v5, %v7580_v48  ;;  %v7816_v6 = vpop.f32.mrb[91].mxu0  ;;  %v7857_v49 = vpop.f32.mrb[91].mxu1  ;;  %v7873_v50 = vadd.f32 %v7865_v39, %v7582_v3  ;;  %v7904_v1 = vld [vmem:[#allocation2 + $0x68] sm:$0x30] }
 0xbb1   :  { %v7872_v45 = vadd.f32 %v7864_v51, %v7581_v34  ;;  %v7874_v60 = vadd.f32 %v7866_v58, %v7583_v59 }
 0xbb2   :  { %v13783_v57 = vmul.f32 -1.442695, %v7871_v53 }
 0xbb3   :  { %v13784_v63 = vmul.f32 -1.442695, %v7872_v45  ;;  %v13785_v22 = vmul.f32 -1.442695, %v7874_v60 }
 0xbb4   :  { %15479 = vpow2.f32 %v13783_v57  ;;  %v7903_v57 = vld [vmem:[#allocation2 + $0x60] sm:$0x30] }
 0xbb5   :  { %15481 = vpow2.f32 %v13784_v63 }
 0xbb6   :  { %15483 = vpow2.f32 %v13785_v22 }
 0xbb7   :  { %15485 = vtanh.f32 %v7873_v50 }
 0xbbe   :  { %v15480_v19 = vpop.eup %15479 }
 0xbbf   :  { %v15482_v32 = vpop.eup %15481  ;;  %v7878_v8 = vadd.f32 1.0, %v15480_v19 }
 0xbc0   :  { %v7884_v11 = vadd.f32 1.0, %v15482_v32  ;;  %v15484_v4 = vpop.eup %15483 }
 0xbc1   :  { %15487 = vrcp.f32 %v7878_v8  ;;  %v15486_v5 = vpop.eup %15485  ;;  %v7891_v42 = vadd.f32 1.0, %v15484_v4 }
 0xbc2   :  { %15489 = vrcp.f32 %v7884_v11  ;;  %v7906_v11 = vld [vmem:[#allocation2 + $0x78] sm:$0x30] }
 0xbc3   :  { %15491 = vrcp.f32 %v7891_v42 }
 0xbcb   :  { %v15488_v16 = vpop.eup %15487 }
 0xbcc   :  { %v15490_v48 = vpop.eup %15489  ;;  %v7898_v51 = vmul.f32 %v15488_v16, %v15486_v5 }
 0xbcd   :  { %v7897_v40 = vmul.f32 %v15490_v48, %v7895_v31  ;;  %v15492_v8 = vpop.eup %15491  ;;  %v7905_v48 = vld [vmem:[#allocation2 + $0x70] sm:$0x30] }
 0xbcf   :  { %v17705_v9 = vadd.f32 %v7898_v51, %v7897_v40  ;;  %v17708_v40 = vld [vmem:[#allocation15] ss:$16 sps:$4 sm:$0xff]  }
 0xbd1   :  { %v8137_v53 = vpop.f32.mrb[92].mxu0  ;;  %v8178_v34 = vpop.f32.mrb[92].mxu1  ;;  %15493 = vtanh.f32 %v17705_v9 }
 0xbd2   :  { %v8189_v6 = vrot.slane %v8137_v53, 4  ;;  %v8139_v49 = vpop.f32.mrb[93].mxu0  ;;  %v8180_v45 = vpop.f32.mrb[93].mxu1  ;;  %v8191_v16 = vrot.slane %v8178_v34, 4  ;;  %v17710_v53 = vld [vmem:[#allocation15 + $0x8] ss:$16 sps:$4 sm:$0xff]  }
 0xbd3   :  { %v8190_v63 = vrot.slane %v8139_v49, 4  ;;  %v8141_v58 = vpop.f32.mrb[94].mxu0  ;;  %v8182_v59 = vpop.f32.mrb[94].mxu1  ;;  %v8192_v32 = vrot.slane %v8180_v45, 4  ;;  %v17714_v45 = vld [vmem:[#allocation15 + $0x2c] ss:$16 sps:$4 sm:$0xff]  }
 0xbd4   :  { %v8197_v60 = vadd.f32 %v8189_v6, %v7903_v57  ;;  %v8142_v39 = vpop.f32.mrb[95].mxu0  ;;  %v8183_v3 = vpop.f32.mrb[95].mxu1  ;;  %v8199_v6 = vadd.f32 %v8191_v16, %v7905_v48  ;;  %v17712_v57 = vld [vmem:[#allocation15 + $0x24] ss:$16 sps:$4 sm:$0xff]   ;;  %v17718_v59 = vld [vmem:[#allocation15 + $0x20] ss:$16 sps:$4 sm:$0xff]  }
 0xbd5   :  { %v8198_v22 = vadd.f32 %v8190_v63, %v7904_v1  ;;  %v8200_v5 = vadd.f32 %v8192_v32, %v7906_v11  ;;  %v17724_v39 = vld [vmem:[#allocation15 + $0x44] ss:$16 sps:$4 sm:$0xff]   ;;  %v17726_v3 = vld [vmem:[#allocation15 + $0x4c] ss:$16 sps:$4 sm:$0xff]   ;;  %v17746_v11 = vld [vmem:[#allocation15 + $0x68] ss:$16 sps:$4 sm:$0xff]  }
 0xbd6   :  { %v13818_v50 = vmul.f32 -1.442695, %v8197_v60  ;;  %v17720_v60 = vld [vmem:[#allocation15 + $0x28] ss:$16 sps:$4 sm:$0xff]   ;;  %v17740_v32 = vld [vmem:[#allocation15 + $0x6c] ss:$16 sps:$4 sm:$0xff]  }
 0xbd7   :  { %v13819_v19 = vmul.f32 -1.442695, %v8198_v22  ;;  %v13820_v42 = vmul.f32 -1.442695, %v8200_v5  ;;  %v17732_v22 = vld [vmem:[#allocation15 + $0x40] ss:$16 sps:$4 sm:$0xff]  }
 0xbd8   :  { %15495 = vpow2.f32 %v13818_v50  ;;  %v17734_v50 = vld [vmem:[#allocation15 + $0x48] ss:$16 sps:$4 sm:$0xff]   ;;  %18707 = vst [vmem:[#allocation31_spill] sm:$0xff] %v17740_v32  ;;  %18709 = vst [vmem:[#allocation33_spill] sm:$0xff] %v17746_v11  ;;  %v17752_v5 = vld [vmem:[#allocation15 + $0x8c] ss:$16 sps:$4 sm:$0xff]  }
 0xbd9   :  { %15497 = vpow2.f32 %v13819_v19  ;;  %v17738_v19 = vld [vmem:[#allocation15 + $0x64] ss:$16 sps:$4 sm:$0xff]  }
 0xbda   :  { %15499 = vpow2.f32 %v13820_v42  ;;  %v17757_v42 = vld [vmem:[#allocation15 + $0x80] ss:$16 sps:$4 sm:$0xff]  }
 0xbdb   :  { %v15494_v4 = vpop.eup %15493  ;;  %15501 = vtanh.f32 %v8199_v6  ;;  %v17759_v6 = vld [vmem:[#allocation15 + $0x88] ss:$16 sps:$4 sm:$0xff]  }
 0xbdc   :  { %v7901_v31 = vmul.f32 %v15494_v4, %v15492_v8  ;;  %v17744_v8 = vld [vmem:[#allocation15 + $0x60] ss:$16 sps:$4 sm:$0xff]   ;;  %v17750_v4 = vld [vmem:[#allocation15 + $0x84] ss:$16 sps:$4 sm:$0xff]  }
 0xbdd   :  { %18708 = vst [vmem:[#allocation32_spill] sm:$0xff] %v17744_v8 }
 0xbde   :  { %7902 = vst [vmem:[#allocation3] sm:$0xc] %v7901_v31  ;;  %v8233_v51 = vpack.c.bf16 %v7901_v31, %v7901_v31 }
 0xbe0   :  { %v8267_v49 = vrot.slane %v8233_v51, 1  ;;  %v8221_v51 = vrot.slane %v17583_v21, 2 }
 0xbe2   :  { %v15496_v63 = vpop.eup %15495  ;;  %8462 = vmatmul.mubr.bf16.vlgmr.msra.gmra.mrb[96].mxu0 %v8267_v49  ;;  %8503 = vmatmul.mubr.bf16.vlgmr.msra.gmra.mrb[96].mxu1 %v8267_v49 }
 0xbe3   :  { %v15498_v58 = vpop.eup %15497  ;;  %v8204_v34 = vadd.f32 1.0, %v15496_v63  ;;  %8756 = vmatpush1.bf16.msra.mxu0 %v17708_v40  ;;  %8797 = vmatpush1.bf16.msra.mxu1 %v17710_v53 }
 0xbe4   :  { %v8210_v1 = vadd.f32 1.0, %v15498_v58  ;;  %8757 = vmatprep.subr.bf16.mxu0 %v17712_v57  ;;  %8798 = vmatprep.subr.bf16.mxu1 %v17714_v45  ;;  %v15500_v16 = vpop.eup %15499 }
 0xbe5   :  { %15503 = vrcp.f32 %v8204_v34  ;;  %8787 = vmatprep.mubr.bf16.mxu0 %v18657_v38  ;;  %8828 = vmatprep.mubr.bf16.mxu1 %v18657_v38  ;;  %v15502_v31 = vpop.eup %15501  ;;  %v8217_v58 = vadd.f32 1.0, %v15500_v16  ;;  %v17763_v34 = vld [vmem:[#allocation15 + $0xa4] ss:$16 sps:$4 sm:$0xff]  }
 0xbe6   :  { %15505 = vrcp.f32 %v8210_v1  ;;  %v17765_v1 = vld [vmem:[#allocation15 + $0xac] ss:$16 sps:$4 sm:$0xff]   ;;  %v17777_v16 = vld [vmem:[#allocation15 + $0xc4] ss:$16 sps:$4 sm:$0xff]  }
 0xbe7   :  { %8758 = vmatpush1.bf16.msra.mxu0 %v17718_v59  ;;  %8799 = vmatpush1.bf16.msra.mxu1 %v17720_v60  ;;  %15507 = vrcp.f32 %v8217_v58  ;;  %18711 = vst [vmem:[#allocation35_spill] sm:$0xff] %v17777_v16  ;;  %v17796_v58 = vld [vmem:[#allocation15 + $0xe0] ss:$16 sps:$4 sm:$0xff]  }
 0xbe8   :  { %8759 = vmatprep.subr.bf16.mxu0 %v17724_v39  ;;  %8800 = vmatprep.subr.bf16.mxu1 %v17726_v3 }
 0xbeb   :  { %8760 = vmatpush1.bf16.msra.mxu0 %v17732_v22  ;;  %8801 = vmatpush1.bf16.msra.mxu1 %v17734_v50 }
 0xbec   :  { %8761 = vmatprep.subr.bf16.mxu0 %v17738_v19  ;;  %8802 = vmatprep.subr.bf16.mxu1 %v17740_v32 }
 0xbef   :  { %v15504_v48 = vpop.eup %15503  ;;  %8762 = vmatpush1.bf16.msra.mxu0 %v17744_v8  ;;  %8803 = vmatpush1.bf16.msra.mxu1 %v17746_v11  ;;  %v17771_v11 = vld [vmem:[#allocation15 + $0xa0] ss:$16 sps:$4 sm:$0xff]   ;;  %v17773_v8 = vld [vmem:[#allocation15 + $0xa8] ss:$16 sps:$4 sm:$0xff]  }
 0xbf0   :  { %v15506_v49 = vpop.eup %15505  ;;  %v8224_v63 = vmul.f32 %v15504_v48, %v15502_v31  ;;  %8763 = vmatprep.subr.bf16.mxu0 %v17750_v4  ;;  %8804 = vmatprep.subr.bf16.mxu1 %v17752_v5  ;;  %18710 = vst [vmem:[#allocation34_spill] sm:$0xff] %v17773_v8  ;;  %v17779_v31 = vld [vmem:[#allocation15 + $0xcc] ss:$16 sps:$4 sm:$0xff]   ;;  %v17784_v48 = vld [vmem:[#allocation15 + $0xc0] ss:$16 sps:$4 sm:$0xff]  }
 0xbf1   :  { %v8223_v21 = vmul.f32 %v15506_v49, %v8221_v51  ;;  %18712 = vst [vmem:[#allocation36_spill] sm:$0xff] %v17779_v31  ;;  %18713 = vst [vmem:[#allocation37_spill] sm:$0xff] %v17784_v48  ;;  %v17786_v51 = vld [vmem:[#allocation15 + $0xc8] ss:$16 sps:$4 sm:$0xff]   ;;  %v17790_v49 = vld [vmem:[#allocation15 + $0xe4] ss:$16 sps:$4 sm:$0xff]  }
 0xbf2   :  { %18714 = vst [vmem:[#allocation30_spill] sm:$0xff] %v17786_v51 }
 0xbf3   :  { %v17767_v32 = vadd.f32 %v8224_v63, %v8223_v21  ;;  %8764 = vmatpush1.bf16.msra.mxu0 %v17757_v42  ;;  %8805 = vmatpush1.bf16.msra.mxu1 %v17759_v6  ;;  %v17792_v63 = vld [vmem:[#allocation15 + $0xec] ss:$16 sps:$4 sm:$0xff]   ;;  %v17798_v21 = vld [vmem:[#allocation15 + $0xe8] ss:$16 sps:$4 sm:$0xff]  }
 0xbf4   :  { %8765 = vmatprep.subr.bf16.mxu0 %v17763_v34  ;;  %8806 = vmatprep.subr.bf16.mxu1 %v17765_v1 }
 0xbf5   :  { %15509 = vtanh.f32 %v17767_v32 }
 0xbf7   :  { %8766 = vmatpush1.bf16.msra.mxu0 %v17771_v11  ;;  %8807 = vmatpush1.bf16.msra.mxu1 %v17773_v8  ;;  %v15508_v8 = vpop.eup %15507 }
 0xbf8   :  { %8767 = vmatprep.subr.bf16.mxu0 %v17777_v16  ;;  %8808 = vmatprep.subr.bf16.mxu1 %v17779_v31 }
 0xbfb   :  { %8768 = vmatpush1.bf16.msra.mxu0 %v17784_v48  ;;  %8809 = vmatpush1.bf16.msra.mxu1 %v17786_v51 }
 0xbfc   :  { %8769 = vmatprep.subr.bf16.mxu0 %v17790_v49  ;;  %8810 = vmatprep.subr.bf16.mxu1 %v17792_v63 }
 0xbff   :  { %v15510_v16 = vpop.eup %15509  ;;  %8770 = vmatpush1.bf16.msra.mxu0 %v17796_v58  ;;  %8811 = vmatpush1.bf16.msra.mxu1 %v17798_v21 }
 0xc00   :  { %v8227_v31 = vmul.f32 %v15510_v16, %v15508_v8  ;;  %9081 = vmatprep.subr.bf16.mxu0 %v17602_v12  ;;  %9122 = vmatprep.subr.bf16.mxu1 %v17604_v13 }
 0xc02   :  { %8228 = vst [vmem:[#allocation3 + $0x18] sm:$0x30] %v8227_v31  ;;  %v8559_v51 = vpack.c.bf16 %v8227_v31, %v8227_v31 }
 0xc04   :  { %v8593_v48 = vrot.slane %v8559_v51, 2 }
 0xc06   :  { %8788 = vmatmul.mubr.bf16.vlgmr.msra.gmra.mrb[100].mxu0 %v8593_v48  ;;  %8829 = vmatmul.mubr.bf16.vlgmr.msra.gmra.mrb[100].mxu1 %v8593_v48 }
 0xc07   :  { %9082 = vmatpush1.bf16.msra.mxu0 %v17606_v14  ;;  %9123 = vmatpush1.bf16.msra.mxu1 %v17608_v15 }
 0xc08   :  { %9083 = vmatprep.subr.bf16.mxu0 %v17614_v17  ;;  %9124 = vmatprep.subr.bf16.mxu1 %v17616_v18  ;;  %v8229_v18 = vld [vmem:[#allocation2] sm:$0x30] }
 0xc09   :  { %9113 = vmatprep.mubr.bf16.mxu0 %v18657_v38  ;;  %9154 = vmatprep.mubr.bf16.mxu1 %v18657_v38 }
 0xc0b   :  { %9084 = vmatpush1.bf16.msra.mxu0 %v17618_v43  ;;  %9125 = vmatpush1.bf16.msra.mxu1 %v17620_v37 }
 0xc0c   :  { %9085 = vmatprep.subr.bf16.mxu0 %v17628_v20  ;;  %9126 = vmatprep.subr.bf16.mxu1 %v17632_v10 }
 0xc0f   :  { %9086 = vmatpush1.bf16.msra.mxu0 %v17626_v7  ;;  %9127 = vmatpush1.bf16.msra.mxu1 %v17630_v26  ;;  %v8230_v26 = vld [vmem:[#allocation2 + $0x8] sm:$0x30] }
 0xc10   :  { %9087 = vmatprep.subr.bf16.mxu0 %v17634_v28  ;;  %9128 = vmatprep.subr.bf16.mxu1 %v17637_v27 }
 0xc13   :  { %9088 = vmatpush1.bf16.msra.mxu0 %v17642_v54  ;;  %9129 = vmatpush1.bf16.msra.mxu1 %v17644_v55 }
 0xc14   :  { %9089 = vmatprep.subr.bf16.mxu0 %v17650_v33  ;;  %9130 = vmatprep.subr.bf16.mxu1 %v17652_v36  ;;  %v8232_v36 = vld [vmem:[#allocation2 + $0x18] sm:$0x30] }
 0xc17   :  { %9090 = vmatpush1.bf16.msra.mxu0 %v17654_v29  ;;  %9131 = vmatpush1.bf16.msra.mxu1 %v17656_v30 }
 0xc18   :  { %9091 = vmatprep.subr.bf16.mxu0 %v17662_v56  ;;  %9132 = vmatprep.subr.bf16.mxu1 %v17664_v35  ;;  %v8231_v56 = vld [vmem:[#allocation2 + $0x10] sm:$0x30] }
 0xc1b   :  { %9092 = vmatpush1.bf16.msra.mxu0 %v17666_v25  ;;  %9133 = vmatpush1.bf16.msra.mxu1 %v17668_v24 }
 0xc1c   :  { %9093 = vmatprep.subr.bf16.mxu0 %v17674_v41  ;;  %9134 = vmatprep.subr.bf16.mxu1 %v17676_v61 }
 0xc1f   :  { %9094 = vmatpush1.bf16.msra.mxu0 %v17678_v62  ;;  %9135 = vmatpush1.bf16.msra.mxu1 %v17680_v0 }
 0xc20   :  { %9095 = vmatprep.subr.bf16.mxu0 %v17686_v44  ;;  %9136 = vmatprep.subr.bf16.mxu1 %v17688_v2 }
 0xc23   :  { %9096 = vmatpush1.bf16.msra.mxu0 %v17690_v46  ;;  %9137 = vmatpush1.bf16.msra.mxu1 %v17692_v52  ;;  %v8547_v46 = vrot.slane %v17705_v9, 6  ;;  %v8556_v9 = vld [vmem:[#allocation2 + $0x68] sm:$0xc] }
 0xc24   :  { %9407 = vmatprep.subr.bf16.mxu0 %v17698_v47  ;;  %9448 = vmatprep.subr.bf16.mxu1 %v17700_v23 }
 0xcb5   :  { %v8463_v12 = vpop.f32.mrb[96].mxu0  ;;  %v8504_v13 = vpop.f32.mrb[96].mxu1 }
 0xcb6   :  { %v8515_v14 = vrot.slane %v8463_v12, 4  ;;  %v8465_v15 = vpop.f32.mrb[97].mxu0  ;;  %v8506_v17 = vpop.f32.mrb[97].mxu1  ;;  %v8517_v30 = vrot.slane %v8504_v13, 4 }
 0xcb7   :  { %v8516_v43 = vrot.slane %v8465_v15, 4  ;;  %v8467_v37 = vpop.f32.mrb[98].mxu0  ;;  %v8508_v7 = vpop.f32.mrb[98].mxu1  ;;  %v8518_v33 = vrot.slane %v8506_v17, 4 }
 0xcb8   :  { %v8523_v20 = vadd.f32 %v8515_v14, %v8229_v18  ;;  %v8468_v10 = vpop.f32.mrb[99].mxu0  ;;  %v8509_v28 = vpop.f32.mrb[99].mxu1  ;;  %v8525_v25 = vadd.f32 %v8517_v30, %v8231_v56  ;;  %v8555_v14 = vld [vmem:[#allocation2 + $0x60] sm:$0xc]  ;;  %v8557_v56 = vld [vmem:[#allocation2 + $0x70] sm:$0xc] }
 0xcb9   :  { %v8524_v27 = vadd.f32 %v8516_v43, %v8230_v26  ;;  %v8526_v29 = vadd.f32 %v8518_v33, %v8232_v36 }
 0xcba   :  { %v13853_v54 = vmul.f32 -1.442695, %v8523_v20 }
 0xcbb   :  { %v13854_v55 = vmul.f32 -1.442695, %v8524_v27  ;;  %v13855_v35 = vmul.f32 -1.442695, %v8526_v29 }
 0xcbc   :  { %15511 = vpow2.f32 %v13853_v54  ;;  %v8558_v54 = vld [vmem:[#allocation2 + $0x78] sm:$0xc] }
 0xcbd   :  { %15513 = vpow2.f32 %v13854_v55 }
 0xcbe   :  { %15515 = vpow2.f32 %v13855_v35 }
 0xcbf   :  { %15517 = vtanh.f32 %v8525_v25 }
 0xcc6   :  { %v15512_v24 = vpop.eup %15511 }
 0xcc7   :  { %v15514_v41 = vpop.eup %15513  ;;  %v8530_v61 = vadd.f32 1.0, %v15512_v24 }
 0xcc8   :  { %v8536_v62 = vadd.f32 1.0, %v15514_v41  ;;  %v15516_v0 = vpop.eup %15515 }
 0xcc9   :  { %15519 = vrcp.f32 %v8530_v61  ;;  %v15518_v44 = vpop.eup %15517  ;;  %v8543_v23 = vadd.f32 1.0, %v15516_v0 }
 0xcca   :  { %15521 = vrcp.f32 %v8536_v62 }
 0xccb   :  { %15523 = vrcp.f32 %v8543_v23  ;;  %v17898_v23 = vld [vmem:[#allocation14 + $0x20] ss:$16 sps:$4 sm:$0xff]  }
 0xcd3   :  { %v15520_v2 = vpop.eup %15519 }
 0xcd4   :  { %v15522_v52 = vpop.eup %15521  ;;  %v8550_v47 = vmul.f32 %v15520_v2, %v15518_v44  ;;  %v8873_v44 = vrot.slane %v17767_v32, 2  ;;  %v18719_v32 = vld [vmem:[#allocation35_spill] sm:$0xff] }
 0xcd5   :  { %v8549_v8 = vmul.f32 %v15522_v52, %v8547_v46  ;;  %v15524_v27 = vpop.eup %15523  ;;  %v17882_v52 = vld [vmem:[#allocation14 + $0x4] ss:$16 sps:$4 sm:$0xff]  }
 0xcd7   :  { %v17841_v16 = vadd.f32 %v8550_v47, %v8549_v8  ;;  %v17888_v47 = vld [vmem:[#allocation14 + $0x8] ss:$16 sps:$4 sm:$0xff]  }
 0xcd8   :  { %v17900_v8 = vld [vmem:[#allocation14 + $0x28] ss:$16 sps:$4 sm:$0xff]  }
 0xcd9   :  { %v8789_v31 = vpop.f32.mrb[100].mxu0  ;;  %v8830_v48 = vpop.f32.mrb[100].mxu1  ;;  %15525 = vtanh.f32 %v17841_v16 }
 0xcda   :  { %v8841_v51 = vrot.slane %v8789_v31, 6  ;;  %v8791_v12 = vpop.f32.mrb[101].mxu0  ;;  %v8832_v13 = vpop.f32.mrb[101].mxu1  ;;  %v8843_v36 = vrot.slane %v8830_v48, 6  ;;  %v17906_v31 = vld [vmem:[#allocation14 + $0x40] ss:$16 sps:$4 sm:$0xff]  }
 0xcdb   :  { %v8842_v15 = vrot.slane %v8791_v12, 6  ;;  %v8793_v17 = vpop.f32.mrb[102].mxu0  ;;  %v8834_v18 = vpop.f32.mrb[102].mxu1  ;;  %v8844_v28 = vrot.slane %v8832_v13, 6  ;;  %v17908_v48 = vld [vmem:[#allocation14 + $0x44] ss:$16 sps:$4 sm:$0xff]  }
 0xcdc   :  { %v8849_v43 = vadd.f32 %v8841_v51, %v8555_v14  ;;  %v8794_v37 = vpop.f32.mrb[103].mxu0  ;;  %v8835_v7 = vpop.f32.mrb[103].mxu1  ;;  %v8851_v25 = vadd.f32 %v8843_v36, %v8557_v56  ;;  %v17910_v51 = vld [vmem:[#allocation14 + $0x48] ss:$16 sps:$4 sm:$0xff]   ;;  %v17912_v12 = vld [vmem:[#allocation14 + $0x4c] ss:$16 sps:$4 sm:$0xff]  }
 0xcdd   :  { %v8850_v20 = vadd.f32 %v8842_v15, %v8556_v9  ;;  %v8852_v33 = vadd.f32 %v8844_v28, %v8558_v54  ;;  %v17914_v13 = vld [vmem:[#allocation14 + $0x64] ss:$16 sps:$4 sm:$0xff]   ;;  %v17917_v14 = vld [vmem:[#allocation14 + $0x6c] ss:$16 sps:$4 sm:$0xff]   ;;  %v17922_v15 = vld [vmem:[#allocation14 + $0x60] ss:$16 sps:$4 sm:$0xff]  }
 0xcde   :  { %v13888_v26 = vmul.f32 -1.442695, %v8849_v43  ;;  %v17924_v17 = vld [vmem:[#allocation14 + $0x68] ss:$16 sps:$4 sm:$0xff]   ;;  %v17930_v18 = vld [vmem:[#allocation14 + $0x84] ss:$16 sps:$4 sm:$0xff]  }
 0xcdf   :  { %v13889_v10 = vmul.f32 -1.442695, %v8850_v20  ;;  %v13890_v35 = vmul.f32 -1.442695, %v8852_v33  ;;  %v17932_v43 = vld [vmem:[#allocation14 + $0x8c] ss:$16 sps:$4 sm:$0xff]  }
 0xce0   :  { %15527 = vpow2.f32 %v13888_v26  ;;  %v17934_v9 = vld [vmem:[#allocation14 + $0x80] ss:$16 sps:$4 sm:$0xff]   ;;  %v17936_v37 = vld [vmem:[#allocation14 + $0x88] ss:$16 sps:$4 sm:$0xff]   ;;  %v17942_v7 = vld [vmem:[#allocation14 + $0xa4] ss:$16 sps:$4 sm:$0xff]  }
 0xce1   :  { %15529 = vpow2.f32 %v13889_v10  ;;  %v17944_v20 = vld [vmem:[#allocation14 + $0xac] ss:$16 sps:$4 sm:$0xff]   ;;  %v17946_v26 = vld [vmem:[#allocation14 + $0xa0] ss:$16 sps:$4 sm:$0xff]   ;;  %v17948_v10 = vld [vmem:[#allocation14 + $0xa8] ss:$16 sps:$4 sm:$0xff]  }
 0xce2   :  { %15531 = vpow2.f32 %v13890_v35  ;;  %v17954_v28 = vld [vmem:[#allocation14 + $0xc4] ss:$16 sps:$4 sm:$0xff]   ;;  %v17958_v54 = vld [vmem:[#allocation14 + $0xc0] ss:$16 sps:$4 sm:$0xff]   ;;  %v17968_v36 = vld [vmem:[#allocation14 + $0xec] ss:$16 sps:$4 sm:$0xff]  }
 0xce3   :  { %v15526_v55 = vpop.eup %15525  ;;  %15533 = vtanh.f32 %v8851_v25  ;;  %v17966_v33 = vld [vmem:[#allocation14 + $0xe4] ss:$16 sps:$4 sm:$0xff]   ;;  %v17980_v35 = vld [vmem:[#allocation15 + $0xc] ss:$16 sps:$4 sm:$0xff]  }
 0xce4   :  { %v8553_v29 = vmul.f32 %v15526_v55, %v15524_v27  ;;  %v17956_v27 = vld [vmem:[#allocation14 + $0xcc] ss:$16 sps:$4 sm:$0xff]   ;;  %v17960_v55 = vld [vmem:[#allocation14 + $0xc8] ss:$16 sps:$4 sm:$0xff]   ;;  %v17978_v56 = vld [vmem:[#allocation15 + $0x4] ss:$16 sps:$4 sm:$0xff]  }
 0xce6   :  { %8554 = vst [vmem:[#allocation3] sm:$0x30] %v8553_v29  ;;  %v8885_v30 = vpack.c.bf16 %v8553_v29, %v8553_v29  ;;  %v17970_v29 = vld [vmem:[#allocation14 + $0xe0] ss:$16 sps:$4 sm:$0xff]  }
 0xce8   :  { %v8919_v24 = vrot.slane %v8885_v30, 2  ;;  %v17972_v30 = vld [vmem:[#allocation14 + $0xe8] ss:$16 sps:$4 sm:$0xff]  }
 0xcea   :  { %v15528_v41 = vpop.eup %15527  ;;  %9114 = vmatmul.mubr.bf16.vlgmr.msra.gmra.mrb[104].mxu0 %v8919_v24  ;;  %9155 = vmatmul.mubr.bf16.vlgmr.msra.gmra.mrb[104].mxu1 %v8919_v24 }
 0xceb   :  { %v15530_v61 = vpop.eup %15529  ;;  %v8856_v62 = vadd.f32 1.0, %v15528_v41  ;;  %9408 = vmatpush1.bf16.msra.mxu0 %v17708_v40  ;;  %9449 = vmatpush1.bf16.msra.mxu1 %v17710_v53  ;;  %v18715_v40 = vld [vmem:[#allocation31_spill] sm:$0xff] }
 0xcec   :  { %v8862_v0 = vadd.f32 1.0, %v15530_v61  ;;  %9409 = vmatprep.subr.bf16.mxu0 %v17712_v57  ;;  %9450 = vmatprep.subr.bf16.mxu1 %v17714_v45  ;;  %v15532_v53 = vpop.eup %15531 }
 0xced   :  { %15535 = vrcp.f32 %v8856_v62  ;;  %9439 = vmatprep.mubr.bf16.mxu0 %v18657_v38  ;;  %9480 = vmatprep.mubr.bf16.mxu1 %v18657_v38  ;;  %v15534_v57 = vpop.eup %15533 }
 0xcee   :  { %15537 = vrcp.f32 %v8862_v0  ;;  %v8881_v0 = vld [vmem:[#allocation2] sm:$0xc0] }
 0xcef   :  { %9410 = vmatpush1.bf16.msra.mxu0 %v17718_v59  ;;  %9451 = vmatpush1.bf16.msra.mxu1 %v17720_v60  ;;  %v18716_v59 = vld [vmem:[#allocation32_spill] sm:$0xff]  ;;  %v18717_v60 = vld [vmem:[#allocation33_spill] sm:$0xff] }
 0xcf0   :  { %9411 = vmatprep.subr.bf16.mxu0 %v17724_v39  ;;  %9452 = vmatprep.subr.bf16.mxu1 %v17726_v3  ;;  %v8869_v3 = vadd.f32 1.0, %v15532_v53 }
 0xcf2   :  { %15539 = vrcp.f32 %v8869_v3 }
 0xcf3   :  { %9412 = vmatpush1.bf16.msra.mxu0 %v17732_v22  ;;  %9453 = vmatpush1.bf16.msra.mxu1 %v17734_v50 }
 0xcf4   :  { %9413 = vmatprep.subr.bf16.mxu0 %v17738_v19  ;;  %9454 = vmatprep.subr.bf16.mxu1 %v18715_v40  ;;  %v18718_v19 = vld [vmem:[#allocation34_spill] sm:$0xff] }
 0xcf7   :  { %v15536_v45 = vpop.eup %15535  ;;  %9414 = vmatpush1.bf16.msra.mxu0 %v18716_v59  ;;  %9455 = vmatpush1.bf16.msra.mxu1 %v18717_v60 }
 0xcf8   :  { %v15538_v39 = vpop.eup %15537  ;;  %v8876_v2 = vmul.f32 %v15536_v45, %v15534_v57  ;;  %9415 = vmatprep.subr.bf16.mxu0 %v17750_v4  ;;  %9456 = vmatprep.subr.bf16.mxu1 %v17752_v5  ;;  %v18720_v4 = vld [vmem:[#allocation36_spill] sm:$0xff]  ;;  %v18721_v5 = vld [vmem:[#allocation37_spill] sm:$0xff] }
 0xcf9   :  { %v8875_v22 = vmul.f32 %v15538_v39, %v8873_v44  ;;  %v8882_v44 = vld [vmem:[#allocation2 + $0x8] sm:$0xc0] }
 0xcfb   :  { %v17863_v50 = vadd.f32 %v8876_v2, %v8875_v22  ;;  %9416 = vmatpush1.bf16.msra.mxu0 %v17757_v42  ;;  %9457 = vmatpush1.bf16.msra.mxu1 %v17759_v6  ;;  %v18722_v42 = vld [vmem:[#allocation30_spill] sm:$0xff] }
 0xcfc   :  { %9417 = vmatprep.subr.bf16.mxu0 %v17763_v34  ;;  %9458 = vmatprep.subr.bf16.mxu1 %v17765_v1  ;;  %v15540_v6 = vpop.eup %15539 }
 0xcfd   :  { %15541 = vtanh.f32 %v17863_v50 }
 0xcff   :  { %9418 = vmatpush1.bf16.msra.mxu0 %v17771_v11  ;;  %9459 = vmatpush1.bf16.msra.mxu1 %v18718_v19  ;;  %v8884_v19 = vld [vmem:[#allocation2 + $0x18] sm:$0xc0] }
 0xd00   :  { %9419 = vmatprep.subr.bf16.mxu0 %v18719_v32  ;;  %9460 = vmatprep.subr.bf16.mxu1 %v18720_v4 }
 0xd03   :  { %9420 = vmatpush1.bf16.msra.mxu0 %v18721_v5  ;;  %9461 = vmatpush1.bf16.msra.mxu1 %v18722_v42  ;;  %v8883_v5 = vld [vmem:[#allocation2 + $0x10] sm:$0xc0] }
 0xd04   :  { %9421 = vmatprep.subr.bf16.mxu0 %v17790_v49  ;;  %9462 = vmatprep.subr.bf16.mxu1 %v17792_v63  ;;  %v17884_v49 = vld [vmem:[#allocation14 + $0xc] ss:$16 sps:$4 sm:$0xff]   ;;  %v17886_v63 = vld [vmem:[#allocation14] ss:$16 sps:$4 sm:$0xff]  }
 0xd07   :  { %v15542_v34 = vpop.eup %15541  ;;  %9422 = vmatpush1.bf16.msra.mxu0 %v17796_v58  ;;  %9463 = vmatpush1.bf16.msra.mxu1 %v17798_v21  ;;  %v17894_v58 = vld [vmem:[#allocation14 + $0x24] ss:$16 sps:$4 sm:$0xff]   ;;  %v17896_v21 = vld [vmem:[#allocation14 + $0x2c] ss:$16 sps:$4 sm:$0xff]  }
 0xd08   :  { %v8879_v11 = vmul.f32 %v15542_v34, %v15540_v6  ;;  %9721 = vmatprep.subr.bf16.mxu0 %v17882_v52  ;;  %9762 = vmatprep.subr.bf16.mxu1 %v17884_v49 }
 0xd0a   :  { %8880 = vst [vmem:[#allocation3 + $0x18] sm:$0xc] %v8879_v11  ;;  %v9211_v1 = vpack.c.bf16 %v8879_v11, %v8879_v11 }
 0xd0c   :  { %v9245_v46 = vrot.slane %v9211_v1, 1 }
 0xd0e   :  { %9440 = vmatmul.mubr.bf16.vlgmr.msra.gmra.mrb[108].mxu0 %v9245_v46  ;;  %9481 = vmatmul.mubr.bf16.vlgmr.msra.gmra.mrb[108].mxu1 %v9245_v46 }
 0xd0f   :  { %9753 = vmatprep.mubr.bf16.mxu0 %v18657_v38  ;;  %9794 = vmatprep.mubr.bf16.mxu1 %v18657_v38 }
 0xd10   :  { %9722 = vmatpush1.bf16.msra.mxu0 %v17886_v63  ;;  %9763 = vmatpush1.bf16.msra.mxu1 %v17888_v47 }
 0xd11   :  { %9723 = vmatprep.subr.bf16.mxu0 %v17894_v58  ;;  %9764 = vmatprep.subr.bf16.mxu1 %v17896_v21 }
 0xd14   :  { %9724 = vmatpush1.bf16.msra.mxu0 %v17898_v23  ;;  %9765 = vmatpush1.bf16.msra.mxu1 %v17900_v8 }
 0xd15   :  { %9725 = vmatprep.subr.bf16.mxu0 %v17908_v48  ;;  %9766 = vmatprep.subr.bf16.mxu1 %v17912_v12 }
 0xd18   :  { %9726 = vmatpush1.bf16.msra.mxu0 %v17906_v31  ;;  %9767 = vmatpush1.bf16.msra.mxu1 %v17910_v51 }
 0xd19   :  { %9727 = vmatprep.subr.bf16.mxu0 %v17914_v13  ;;  %9768 = vmatprep.subr.bf16.mxu1 %v17917_v14 }
 0xd1c   :  { %9728 = vmatpush1.bf16.msra.mxu0 %v17922_v15  ;;  %9769 = vmatpush1.bf16.msra.mxu1 %v17924_v17 }
 0xd1d   :  { %9729 = vmatprep.subr.bf16.mxu0 %v17930_v18  ;;  %9770 = vmatprep.subr.bf16.mxu1 %v17932_v43 }
 0xd20   :  { %9730 = vmatpush1.bf16.msra.mxu0 %v17934_v9  ;;  %9771 = vmatpush1.bf16.msra.mxu1 %v17936_v37 }
 0xd21   :  { %9731 = vmatprep.subr.bf16.mxu0 %v17942_v7  ;;  %9772 = vmatprep.subr.bf16.mxu1 %v17944_v20 }
 0xd24   :  { %9732 = vmatpush1.bf16.msra.mxu0 %v17946_v26  ;;  %9773 = vmatpush1.bf16.msra.mxu1 %v17948_v10 }
 0xd25   :  { %9733 = vmatprep.subr.bf16.mxu0 %v17954_v28  ;;  %9774 = vmatprep.subr.bf16.mxu1 %v17956_v27 }
 0xd28   :  { %9734 = vmatpush1.bf16.msra.mxu0 %v17958_v54  ;;  %9775 = vmatpush1.bf16.msra.mxu1 %v17960_v55 }
 0xd29   :  { %9735 = vmatprep.subr.bf16.mxu0 %v17966_v33  ;;  %9776 = vmatprep.subr.bf16.mxu1 %v17968_v36 }
 0xd2c   :  { %9736 = vmatpush1.bf16.msra.mxu0 %v17970_v29  ;;  %9777 = vmatpush1.bf16.msra.mxu1 %v17972_v30 }
 0xd2d   :  { %10032 = vmatprep.subr.bf16.mxu0 %v17978_v56  ;;  %10073 = vmatprep.subr.bf16.mxu1 %v17980_v35 }
 0xdbd   :  { %v9115_v25 = vpop.f32.mrb[104].mxu0  ;;  %v9156_v24 = vpop.f32.mrb[104].mxu1 }
 0xdbe   :  { %v9167_v41 = vrot.slane %v9115_v25, 2  ;;  %v9117_v61 = vpop.f32.mrb[105].mxu0  ;;  %v9158_v62 = vpop.f32.mrb[105].mxu1  ;;  %v9169_v4 = vrot.slane %v9156_v24, 2 }
 0xdbf   :  { %v9168_v40 = vrot.slane %v9117_v61, 2  ;;  %v9119_v53 = vpop.f32.mrb[106].mxu0  ;;  %v9160_v57 = vpop.f32.mrb[106].mxu1  ;;  %v9170_v22 = vrot.slane %v9158_v62, 2  ;;  %v9199_v62 = vrot.slane %v17841_v16, 6 }
 0xdc0   :  { %v9175_v45 = vadd.f32 %v9167_v41, %v8881_v0  ;;  %v9120_v59 = vpop.f32.mrb[107].mxu0  ;;  %v9161_v60 = vpop.f32.mrb[107].mxu1  ;;  %v9177_v6 = vadd.f32 %v9169_v4, %v8883_v5 }
 0xdc1   :  { %v9176_v39 = vadd.f32 %v9168_v40, %v8882_v44  ;;  %v9178_v32 = vadd.f32 %v9170_v22, %v8884_v19 }
 0xdc2   :  { %v13923_v2 = vmul.f32 -1.442695, %v9175_v45  ;;  %v9207_v45 = vld [vmem:[#allocation2 + $0x60] sm:$0x3] }
 0xdc3   :  { %v13924_v3 = vmul.f32 -1.442695, %v9176_v39  ;;  %v13925_v42 = vmul.f32 -1.442695, %v9178_v32  ;;  %v9208_v39 = vld [vmem:[#allocation2 + $0x68] sm:$0x3] }
 0xdc4   :  { %15543 = vpow2.f32 %v13923_v2 }
 0xdc5   :  { %15545 = vpow2.f32 %v13924_v3 }
 0xdc6   :  { %15547 = vpow2.f32 %v13925_v42 }
 0xdc7   :  { %15549 = vtanh.f32 %v9177_v6  ;;  %v9210_v6 = vld [vmem:[#allocation2 + $0x78] sm:$0x3] }
 0xdce   :  { %v15544_v34 = vpop.eup %15543 }
 0xdcf   :  { %v15546_v11 = vpop.eup %15545  ;;  %v9182_v1 = vadd.f32 1.0, %v15544_v34 }
 0xdd0   :  { %v9188_v46 = vadd.f32 1.0, %v15546_v11  ;;  %v15548_v25 = vpop.eup %15547 }
 0xdd1   :  { %15551 = vrcp.f32 %v9182_v1  ;;  %v15550_v41 = vpop.eup %15549  ;;  %v9195_v53 = vadd.f32 1.0, %v15548_v25  ;;  %v9209_v25 = vld [vmem:[#allocation2 + $0x70] sm:$0x3] }
 0xdd2   :  { %15553 = vrcp.f32 %v9188_v46 }
 0xdd3   :  { %15555 = vrcp.f32 %v9195_v53 }
 0xddb   :  { %v15552_v61 = vpop.eup %15551 }
 0xddc   :  { %v15554_v0 = vpop.eup %15553  ;;  %v9202_v40 = vmul.f32 %v15552_v61, %v15550_v41 }
 0xddd   :  { %v9201_v24 = vmul.f32 %v15554_v0, %v9199_v62  ;;  %v15556_v11 = vpop.eup %15555  ;;  %v17988_v0 = vld [vmem:[#allocation15] ss:$16 sps:$4 sm:$0xff]  }
 0xddf   :  { %v17985_v57 = vadd.f32 %v9202_v40, %v9201_v24  ;;  %v17990_v40 = vld [vmem:[#allocation15 + $0x8] ss:$16 sps:$4 sm:$0xff]  }
 0xde1   :  { %v9441_v44 = vpop.f32.mrb[108].mxu0  ;;  %v9482_v59 = vpop.f32.mrb[108].mxu1  ;;  %15557 = vtanh.f32 %v17985_v57 }
 0xde2   :  { %v9489_v60 = vadd.f32 %v9441_v44, %v9207_v45  ;;  %v9443_v2 = vpop.f32.mrb[109].mxu0  ;;  %v9484_v3 = vpop.f32.mrb[109].mxu1  ;;  %v9491_v61 = vadd.f32 %v9482_v59, %v9209_v25  ;;  %v17992_v45 = vld [vmem:[#allocation15 + $0x24] ss:$16 sps:$4 sm:$0xff]   ;;  %v17994_v44 = vld [vmem:[#allocation15 + $0x2c] ss:$16 sps:$4 sm:$0xff]  }
 0xde3   :  { %v9490_v22 = vadd.f32 %v9443_v2, %v9208_v39  ;;  %v9445_v19 = vpop.f32.mrb[110].mxu0  ;;  %v9486_v32 = vpop.f32.mrb[110].mxu1  ;;  %v9492_v34 = vadd.f32 %v9484_v3, %v9210_v6  ;;  %v17998_v59 = vld [vmem:[#allocation15 + $0x20] ss:$16 sps:$4 sm:$0xff]   ;;  %v18000_v3 = vld [vmem:[#allocation15 + $0x28] ss:$16 sps:$4 sm:$0xff]  }
 0xde4   :  { %v13958_v16 = vmul.f32 -1.442695, %v9489_v60  ;;  %v9446_v4 = vpop.f32.mrb[111].mxu0  ;;  %v9487_v5 = vpop.f32.mrb[111].mxu1  ;;  %v18006_v19 = vld [vmem:[#allocation15 + $0x4c] ss:$16 sps:$4 sm:$0xff]  }
 0xde5   :  { %v13959_v42 = vmul.f32 -1.442695, %v9490_v22  ;;  %v13960_v41 = vmul.f32 -1.442695, %v9492_v34  ;;  %v18004_v22 = vld [vmem:[#allocation15 + $0x44] ss:$16 sps:$4 sm:$0xff]  }
 0xde6   :  { %15559 = vpow2.f32 %v13958_v16  ;;  %v18012_v32 = vld [vmem:[#allocation15 + $0x40] ss:$16 sps:$4 sm:$0xff]   ;;  %v18014_v16 = vld [vmem:[#allocation15 + $0x48] ss:$16 sps:$4 sm:$0xff]   ;;  %v18018_v4 = vld [vmem:[#allocation15 + $0x64] ss:$16 sps:$4 sm:$0xff]  }
 0xde7   :  { %15561 = vpow2.f32 %v13959_v42  ;;  %v18020_v5 = vld [vmem:[#allocation15 + $0x6c] ss:$16 sps:$4 sm:$0xff]   ;;  %v18024_v6 = vld [vmem:[#allocation15 + $0x60] ss:$16 sps:$4 sm:$0xff]   ;;  %v18026_v34 = vld [vmem:[#allocation15 + $0x68] ss:$16 sps:$4 sm:$0xff]  }
 0xde8   :  { %15563 = vpow2.f32 %v13960_v41  ;;  %18723 = vst [vmem:[#allocation38_spill] sm:$0xff] %v18020_v5  ;;  %v9513_v41 = vrot.slane %v17863_v50, 2 }
 0xde9   :  { %15565 = vtanh.f32 %v9491_v61 }
 0xdeb   :  { %v15558_v1 = vpop.eup %15557 }
 0xdec   :  { %v9205_v46 = vmul.f32 %v15558_v1, %v15556_v11  ;;  %v18030_v1 = vld [vmem:[#allocation15 + $0x84] ss:$16 sps:$4 sm:$0xff]  }
 0xdee   :  { %9206 = vst [vmem:[#allocation3] sm:$0xc0] %v9205_v46  ;;  %v9525_v62 = vpack.c.bf16 %v9205_v46, %v9205_v46  ;;  %v18032_v46 = vld [vmem:[#allocation15 + $0x8c] ss:$16 sps:$4 sm:$0xff]  }
 0xdf0   :  { %v15560_v53 = vpop.eup %15559  ;;  %v9559_v24 = vrot.slane %v9525_v62, 3 }
 0xdf1   :  { %v15562_v60 = vpop.eup %15561  ;;  %v9496_v39 = vadd.f32 1.0, %v15560_v53 }
 0xdf2   :  { %v9502_v2 = vadd.f32 1.0, %v15562_v60  ;;  %9754 = vmatmul.mubr.bf16.vlgmr.msra.gmra.mrb[112].mxu0 %v9559_v24  ;;  %9795 = vmatmul.mubr.bf16.vlgmr.msra.gmra.mrb[112].mxu1 %v9559_v24  ;;  %v15564_v42 = vpop.eup %15563  ;;  %v18037_v60 = vld [vmem:[#allocation15 + $0x80] ss:$16 sps:$4 sm:$0xff]  }
 0xdf3   :  { %15567 = vrcp.f32 %v9496_v39  ;;  %10033 = vmatpush1.bf16.msra.mxu0 %v17988_v0  ;;  %10074 = vmatpush1.bf16.msra.mxu1 %v17990_v40  ;;  %v15566_v11 = vpop.eup %15565  ;;  %v9509_v53 = vadd.f32 1.0, %v15564_v42  ;;  %v18039_v39 = vld [vmem:[#allocation15 + $0x88] ss:$16 sps:$4 sm:$0xff]   ;;  %v18052_v42 = vld [vmem:[#allocation15 + $0xa0] ss:$16 sps:$4 sm:$0xff]  }
 0xdf4   :  { %15569 = vrcp.f32 %v9502_v2  ;;  %10034 = vmatprep.subr.bf16.mxu0 %v17992_v45  ;;  %10075 = vmatprep.subr.bf16.mxu1 %v17994_v44  ;;  %v18043_v2 = vld [vmem:[#allocation15 + $0xa4] ss:$16 sps:$4 sm:$0xff]   ;;  %18726 = vst [vmem:[#allocation33_spill] sm:$0xff] %v18052_v42 }
 0xdf5   :  { %10064 = vmatprep.mubr.bf16.mxu0 %v18657_v38  ;;  %10105 = vmatprep.mubr.bf16.mxu1 %v18657_v38  ;;  %18724 = vst [vmem:[#allocation31_spill] sm:$0xff] %v18043_v2  ;;  %15571 = vrcp.f32 %v9509_v53  ;;  %v18070_v53 = vld [vmem:[#allocation15 + $0xe4] ss:$16 sps:$4 sm:$0xff]  }
 0xdf7   :  { %10035 = vmatpush1.bf16.msra.mxu0 %v17998_v59  ;;  %10076 = vmatpush1.bf16.msra.mxu1 %v18000_v3 }
 0xdf8   :  { %10036 = vmatprep.subr.bf16.mxu0 %v18004_v22  ;;  %10077 = vmatprep.subr.bf16.mxu1 %v18006_v19 }
 0xdfb   :  { %10037 = vmatpush1.bf16.msra.mxu0 %v18012_v32  ;;  %10078 = vmatpush1.bf16.msra.mxu1 %v18014_v16 }
 0xdfc   :  { %10038 = vmatprep.subr.bf16.mxu0 %v18018_v4  ;;  %10079 = vmatprep.subr.bf16.mxu1 %v18020_v5  ;;  %v18045_v5 = vld [vmem:[#allocation15 + $0xac] ss:$16 sps:$4 sm:$0xff]  }
 0xdfd   :  { %v15568_v25 = vpop.eup %15567  ;;  %18725 = vst [vmem:[#allocation32_spill] sm:$0xff] %v18045_v5 }
 0xdfe   :  { %v15570_v61 = vpop.eup %15569  ;;  %v9516_v62 = vmul.f32 %v15568_v25, %v15566_v11  ;;  %v18054_v11 = vld [vmem:[#allocation15 + $0xa8] ss:$16 sps:$4 sm:$0xff]   ;;  %v18058_v25 = vld [vmem:[#allocation15 + $0xc4] ss:$16 sps:$4 sm:$0xff]  }
 0xdff   :  { %v9515_v24 = vmul.f32 %v15570_v61, %v9513_v41  ;;  %10039 = vmatpush1.bf16.msra.mxu0 %v18024_v6  ;;  %10080 = vmatpush1.bf16.msra.mxu1 %v18026_v34  ;;  %18727 = vst [vmem:[#allocation34_spill] sm:$0xff] %v18054_v11  ;;  %18728 = vst [vmem:[#allocation35_spill] sm:$0xff] %v18058_v25  ;;  %v18060_v41 = vld [vmem:[#allocation15 + $0xcc] ss:$16 sps:$4 sm:$0xff]   ;;  %v18064_v61 = vld [vmem:[#allocation15 + $0xc0] ss:$16 sps:$4 sm:$0xff]  }
 0xe00   :  { %10040 = vmatprep.subr.bf16.mxu0 %v18030_v1  ;;  %10081 = vmatprep.subr.bf16.mxu1 %v18032_v46  ;;  %18729 = vst [vmem:[#allocation36_spill] sm:$0xff] %v18060_v41 }
 0xe01   :  { %v18047_v50 = vadd.f32 %v9516_v62, %v9515_v24  ;;  %v18066_v62 = vld [vmem:[#allocation15 + $0xc8] ss:$16 sps:$4 sm:$0xff]   ;;  %v18072_v24 = vld [vmem:[#allocation15 + $0xec] ss:$16 sps:$4 sm:$0xff]  }
 0xe03   :  { %15573 = vtanh.f32 %v18047_v50  ;;  %10041 = vmatpush1.bf16.msra.mxu0 %v18037_v60  ;;  %10082 = vmatpush1.bf16.msra.mxu1 %v18039_v39 }
 0xe04   :  { %10042 = vmatprep.subr.bf16.mxu0 %v18043_v2  ;;  %10083 = vmatprep.subr.bf16.mxu1 %v18045_v5  ;;  %v18076_v5 = vld [vmem:[#allocation15 + $0xe0] ss:$16 sps:$4 sm:$0xff]  }
 0xe07   :  { %10043 = vmatpush1.bf16.msra.mxu0 %v18052_v42  ;;  %10084 = vmatpush1.bf16.msra.mxu1 %v18054_v11  ;;  %v18078_v42 = vld [vmem:[#allocation15 + $0xe8] ss:$16 sps:$4 sm:$0xff]   ;;  %v15572_v11 = vpop.eup %15571 }
 0xe08   :  { %10044 = vmatprep.subr.bf16.mxu0 %v18058_v25  ;;  %10085 = vmatprep.subr.bf16.mxu1 %v18060_v41 }
 0xe0b   :  { %10045 = vmatpush1.bf16.msra.mxu0 %v18064_v61  ;;  %10086 = vmatpush1.bf16.msra.mxu1 %v18066_v62 }
 0xe0c   :  { %10046 = vmatprep.subr.bf16.mxu0 %v18070_v53  ;;  %10087 = vmatprep.subr.bf16.mxu1 %v18072_v24 }
 0xe0d   :  { %v15574_v25 = vpop.eup %15573 }
 0xe0e   :  { %v9519_v2 = vmul.f32 %v15574_v25, %v15572_v11 }
 0xe0f   :  { %10047 = vmatpush1.bf16.msra.mxu0 %v18076_v5  ;;  %10088 = vmatpush1.bf16.msra.mxu1 %v18078_v42 }
 0xe10   :  { %9520 = vst [vmem:[#allocation3 + $0x18] sm:$0x3] %v9519_v2  ;;  %v9839_v41 = vpack.c.bf16 %v9519_v2, %v9519_v2  ;;  %10355 = vmatprep.subr.bf16.mxu0 %v17882_v52  ;;  %10396 = vmatprep.subr.bf16.mxu1 %v17884_v49  ;;  %v9521_v52 = vld [vmem:[#allocation2 + $0x40] sm:$0x3] }
 0xe12   :  { %10065 = vmatmul.mubr.bf16.vlgmr.msra.gmra.mrb[116].mxu0 %v9839_v41  ;;  %10106 = vmatmul.mubr.bf16.vlgmr.msra.gmra.mrb[116].mxu1 %v9839_v41  ;;  %v9835_v41 = vld [vmem:[#allocation2 + $0x20] sm:$0xc0] }
 0xe13   :  { %10356 = vmatpush1.bf16.msra.mxu0 %v17886_v63  ;;  %10397 = vmatpush1.bf16.msra.mxu1 %v17888_v47 }
 0xe14   :  { %10357 = vmatprep.subr.bf16.mxu0 %v17894_v58  ;;  %10398 = vmatprep.subr.bf16.mxu1 %v17896_v21  ;;  %v9522_v58 = vld [vmem:[#allocation2 + $0x48] sm:$0x3] }
 0xe15   :  { %10387 = vmatprep.mubr.bf16.mxu0 %v18657_v38  ;;  %10428 = vmatprep.mubr.bf16.mxu1 %v18657_v38 }
 0xe17   :  { %10358 = vmatpush1.bf16.msra.mxu0 %v17898_v23  ;;  %10399 = vmatpush1.bf16.msra.mxu1 %v17900_v8 }
 0xe18   :  { %10359 = vmatprep.subr.bf16.mxu0 %v17908_v48  ;;  %10400 = vmatprep.subr.bf16.mxu1 %v17912_v12 }
 0xe1b   :  { %10360 = vmatpush1.bf16.msra.mxu0 %v17906_v31  ;;  %10401 = vmatpush1.bf16.msra.mxu1 %v17910_v51 }
 0xe1c   :  { %10361 = vmatprep.subr.bf16.mxu0 %v17914_v13  ;;  %10402 = vmatprep.subr.bf16.mxu1 %v17917_v14 }
 0xe1f   :  { %10362 = vmatpush1.bf16.msra.mxu0 %v17922_v15  ;;  %10403 = vmatpush1.bf16.msra.mxu1 %v17924_v17  ;;  %v9524_v15 = vld [vmem:[#allocation2 + $0x58] sm:$0x3] }
 0xe20   :  { %10363 = vmatprep.subr.bf16.mxu0 %v17930_v18  ;;  %10404 = vmatprep.subr.bf16.mxu1 %v17932_v43  ;;  %v9523_v18 = vld [vmem:[#allocation2 + $0x50] sm:$0x3] }
 0xe23   :  { %10364 = vmatpush1.bf16.msra.mxu0 %v17934_v9  ;;  %10405 = vmatpush1.bf16.msra.mxu1 %v17936_v37 }
 0xe24   :  { %10365 = vmatprep.subr.bf16.mxu0 %v17942_v7  ;;  %10406 = vmatprep.subr.bf16.mxu1 %v17944_v20 }
 0xe27   :  { %10366 = vmatpush1.bf16.msra.mxu0 %v17946_v26  ;;  %10407 = vmatpush1.bf16.msra.mxu1 %v17948_v10 }
 0xe28   :  { %10367 = vmatprep.subr.bf16.mxu0 %v17954_v28  ;;  %10408 = vmatprep.subr.bf16.mxu1 %v17956_v27 }
 0xe2b   :  { %10368 = vmatpush1.bf16.msra.mxu0 %v17958_v54  ;;  %10409 = vmatpush1.bf16.msra.mxu1 %v17960_v55  ;;  %v9827_v54 = vrot.slane %v17985_v57, 6  ;;  %v9836_v57 = vld [vmem:[#allocation2 + $0x28] sm:$0xc0] }
 0xe2c   :  { %10369 = vmatprep.subr.bf16.mxu0 %v17966_v33  ;;  %10410 = vmatprep.subr.bf16.mxu1 %v17968_v36 }
 0xe2f   :  { %10370 = vmatpush1.bf16.msra.mxu0 %v17970_v29  ;;  %10411 = vmatpush1.bf16.msra.mxu1 %v17972_v30 }
 0xe30   :  { %10681 = vmatprep.subr.bf16.mxu0 %v17978_v56  ;;  %10722 = vmatprep.subr.bf16.mxu1 %v17980_v35 }
 0xec5   :  { %v9755_v49 = vpop.f32.mrb[112].mxu0  ;;  %v9796_v63 = vpop.f32.mrb[112].mxu1 }
 0xec6   :  { %v9803_v47 = vadd.f32 %v9755_v49, %v9521_v52  ;;  %v9757_v21 = vpop.f32.mrb[113].mxu0  ;;  %v9798_v23 = vpop.f32.mrb[113].mxu1  ;;  %v9805_v9 = vadd.f32 %v9796_v63, %v9523_v18  ;;  %v9837_v18 = vld [vmem:[#allocation2 + $0x30] sm:$0xc0] }
 0xec7   :  { %v9804_v8 = vadd.f32 %v9757_v21, %v9522_v58  ;;  %v9759_v31 = vpop.f32.mrb[114].mxu0  ;;  %v9800_v48 = vpop.f32.mrb[114].mxu1  ;;  %v9806_v17 = vadd.f32 %v9798_v23, %v9524_v15 }
 0xec8   :  { %v13993_v51 = vmul.f32 -1.442695, %v9803_v47  ;;  %v9760_v12 = vpop.f32.mrb[115].mxu0  ;;  %v9801_v13 = vpop.f32.mrb[115].mxu1 }
 0xec9   :  { %v13994_v14 = vmul.f32 -1.442695, %v9804_v8  ;;  %v13995_v43 = vmul.f32 -1.442695, %v9806_v17 }
 0xeca   :  { %15575 = vpow2.f32 %v13993_v51  ;;  %v9838_v51 = vld [vmem:[#allocation2 + $0x38] sm:$0xc0] }
 0xecb   :  { %15577 = vpow2.f32 %v13994_v14 }
 0xecc   :  { %15579 = vpow2.f32 %v13995_v43 }
 0xecd   :  { %15581 = vtanh.f32 %v9805_v9 }
 0xed4   :  { %v15576_v37 = vpop.eup %15575 }
 0xed5   :  { %v15578_v7 = vpop.eup %15577  ;;  %v9810_v20 = vadd.f32 1.0, %v15576_v37 }
 0xed6   :  { %v9816_v26 = vadd.f32 1.0, %v15578_v7  ;;  %v15580_v10 = vpop.eup %15579 }
 0xed7   :  { %15583 = vrcp.f32 %v9810_v20  ;;  %v15582_v28 = vpop.eup %15581  ;;  %v9823_v36 = vadd.f32 1.0, %v15580_v10 }
 0xed8   :  { %15585 = vrcp.f32 %v9816_v26 }
 0xed9   :  { %15587 = vrcp.f32 %v9823_v36  ;;  %v18186_v36 = vld [vmem:[#allocation14 + $0x40] ss:$16 sps:$4 sm:$0xff]  }
 0xee1   :  { %v15584_v27 = vpop.eup %15583 }
 0xee2   :  { %v15586_v55 = vpop.eup %15585  ;;  %v9830_v33 = vmul.f32 %v15584_v27, %v15582_v28  ;;  %v10150_v28 = vrot.slane %v18047_v50, 2 }
 0xee3   :  { %v9829_v29 = vmul.f32 %v15586_v55, %v9827_v54  ;;  %v15588_v13 = vpop.eup %15587  ;;  %v18178_v55 = vld [vmem:[#allocation14 + $0x20] ss:$16 sps:$4 sm:$0xff]  }
 0xee5   :  { %v18121_v30 = vadd.f32 %v9830_v33, %v9829_v29  ;;  %v10066_v56 = vpop.f32.mrb[116].mxu0  ;;  %v10107_v35 = vpop.f32.mrb[116].mxu1  ;;  %v18180_v33 = vld [vmem:[#allocation14 + $0x28] ss:$16 sps:$4 sm:$0xff]   ;;  %v18188_v29 = vld [vmem:[#allocation14 + $0x44] ss:$16 sps:$4 sm:$0xff]  }
 0xee6   :  { %v10118_v2 = vrot.slane %v10066_v56, 2  ;;  %v10068_v11 = vpop.f32.mrb[117].mxu0  ;;  %v10109_v25 = vpop.f32.mrb[117].mxu1  ;;  %v10120_v14 = vrot.slane %v10107_v35, 2  ;;  %v18190_v56 = vld [vmem:[#allocation14 + $0x48] ss:$16 sps:$4 sm:$0xff]  }
 0xee7   :  { %15589 = vtanh.f32 %v18121_v30  ;;  %v10119_v52 = vrot.slane %v10068_v11, 2  ;;  %v10070_v49 = vpop.f32.mrb[118].mxu0  ;;  %v10111_v63 = vpop.f32.mrb[118].mxu1  ;;  %v10121_v48 = vrot.slane %v10109_v25, 2  ;;  %v18192_v35 = vld [vmem:[#allocation14 + $0x4c] ss:$16 sps:$4 sm:$0xff]  }
 0xee8   :  { %v10126_v47 = vadd.f32 %v10118_v2, %v9835_v41  ;;  %v10071_v58 = vpop.f32.mrb[119].mxu0  ;;  %v10112_v21 = vpop.f32.mrb[119].mxu1  ;;  %v10128_v9 = vadd.f32 %v10120_v14, %v9837_v18  ;;  %v18194_v2 = vld [vmem:[#allocation14 + $0x64] ss:$16 sps:$4 sm:$0xff]   ;;  %v18197_v11 = vld [vmem:[#allocation14 + $0x6c] ss:$16 sps:$4 sm:$0xff]  }
 0xee9   :  { %v10127_v23 = vadd.f32 %v10119_v52, %v9836_v57  ;;  %v10129_v12 = vadd.f32 %v10121_v48, %v9838_v51  ;;  %v18202_v25 = vld [vmem:[#allocation14 + $0x60] ss:$16 sps:$4 sm:$0xff]   ;;  %v18204_v41 = vld [vmem:[#allocation14 + $0x68] ss:$16 sps:$4 sm:$0xff]   ;;  %v18210_v52 = vld [vmem:[#allocation14 + $0x84] ss:$16 sps:$4 sm:$0xff]  }
 0xeea   :  { %v14028_v8 = vmul.f32 -1.442695, %v10126_v47  ;;  %v18212_v49 = vld [vmem:[#allocation14 + $0x8c] ss:$16 sps:$4 sm:$0xff]   ;;  %v18214_v63 = vld [vmem:[#allocation14 + $0x80] ss:$16 sps:$4 sm:$0xff]  }
 0xeeb   :  { %v14029_v31 = vmul.f32 -1.442695, %v10127_v23  ;;  %v14030_v43 = vmul.f32 -1.442695, %v10129_v12  ;;  %v18216_v47 = vld [vmem:[#allocation14 + $0x88] ss:$16 sps:$4 sm:$0xff]  }
 0xeec   :  { %15591 = vpow2.f32 %v14028_v8  ;;  %v18222_v57 = vld [vmem:[#allocation14 + $0xa4] ss:$16 sps:$4 sm:$0xff]   ;;  %v18224_v58 = vld [vmem:[#allocation14 + $0xac] ss:$16 sps:$4 sm:$0xff]   ;;  %v18226_v21 = vld [vmem:[#allocation14 + $0xa0] ss:$16 sps:$4 sm:$0xff]  }
 0xeed   :  { %15593 = vpow2.f32 %v14029_v31  ;;  %v18228_v23 = vld [vmem:[#allocation14 + $0xa8] ss:$16 sps:$4 sm:$0xff]   ;;  %v18234_v8 = vld [vmem:[#allocation14 + $0xc4] ss:$16 sps:$4 sm:$0xff]   ;;  %v18236_v31 = vld [vmem:[#allocation14 + $0xcc] ss:$16 sps:$4 sm:$0xff]  }
 0xeee   :  { %15595 = vpow2.f32 %v14030_v43  ;;  %v18238_v48 = vld [vmem:[#allocation14 + $0xc0] ss:$16 sps:$4 sm:$0xff]   ;;  %v18240_v51 = vld [vmem:[#allocation14 + $0xc8] ss:$16 sps:$4 sm:$0xff]   ;;  %v18246_v12 = vld [vmem:[#allocation14 + $0xe4] ss:$16 sps:$4 sm:$0xff]  }
 0xeef   :  { %15597 = vtanh.f32 %v10128_v9  ;;  %v18250_v14 = vld [vmem:[#allocation14 + $0xe0] ss:$16 sps:$4 sm:$0xff]   ;;  %v18260_v18 = vld [vmem:[#allocation15 + $0xc] ss:$16 sps:$4 sm:$0xff]  }
 0xef1   :  { %v15590_v15 = vpop.eup %15589 }
 0xef2   :  { %v9833_v17 = vmul.f32 %v15590_v15, %v15588_v13  ;;  %v18248_v13 = vld [vmem:[#allocation14 + $0xec] ss:$16 sps:$4 sm:$0xff]   ;;  %v18252_v15 = vld [vmem:[#allocation14 + $0xe8] ss:$16 sps:$4 sm:$0xff]  }
 0xef4   :  { %9834 = vst [vmem:[#allocation3 + $0x10] sm:$0x3] %v9833_v17  ;;  %v10162_v37 = vpack.c.bf16 %v9833_v17, %v9833_v17  ;;  %v18258_v17 = vld [vmem:[#allocation15 + $0x4] ss:$16 sps:$4 sm:$0xff]  }
 0xef6   :  { %v15592_v7 = vpop.eup %15591  ;;  %10388 = vmatmul.mubr.bf16.vlgmr.msra.gmra.mrb[120].mxu0 %v10162_v37  ;;  %10429 = vmatmul.mubr.bf16.vlgmr.msra.gmra.mrb[120].mxu1 %v10162_v37 }
 0xef7   :  { %v15594_v20 = vpop.eup %15593  ;;  %v10133_v26 = vadd.f32 1.0, %v15592_v7  ;;  %10682 = vmatpush1.bf16.msra.mxu0 %v17988_v0  ;;  %10723 = vmatpush1.bf16.msra.mxu1 %v17990_v40  ;;  %v18730_v0 = vld [vmem:[#allocation38_spill] sm:$0xff] }
 0xef8   :  { %v10139_v10 = vadd.f32 1.0, %v15594_v20  ;;  %10683 = vmatprep.subr.bf16.mxu0 %v17992_v45  ;;  %10724 = vmatprep.subr.bf16.mxu1 %v17994_v44  ;;  %v15596_v40 = vpop.eup %15595 }
 0xef9   :  { %15599 = vrcp.f32 %v10133_v26  ;;  %10713 = vmatprep.mubr.bf16.mxu0 %v18657_v38  ;;  %10754 = vmatprep.mubr.bf16.mxu1 %v18657_v38  ;;  %v15598_v45 = vpop.eup %15597  ;;  %v10158_v26 = vld [vmem:[#allocation2 + $0x40] sm:$0xc] }
 0xefa   :  { %15601 = vrcp.f32 %v10139_v10 }
 0xefb   :  { %10684 = vmatpush1.bf16.msra.mxu0 %v17998_v59  ;;  %10725 = vmatpush1.bf16.msra.mxu1 %v18000_v3 }
 0xefc   :  { %10685 = vmatprep.subr.bf16.mxu0 %v18004_v22  ;;  %10726 = vmatprep.subr.bf16.mxu1 %v18006_v19  ;;  %v10146_v22 = vadd.f32 1.0, %v15596_v40 }
 0xefe   :  { %15603 = vrcp.f32 %v10146_v22 }
 0xeff   :  { %10686 = vmatpush1.bf16.msra.mxu0 %v18012_v32  ;;  %10727 = vmatpush1.bf16.msra.mxu1 %v18014_v16  ;;  %v18731_v16 = vld [vmem:[#allocation31_spill] sm:$0xff] }
 0xf00   :  { %10687 = vmatprep.subr.bf16.mxu0 %v18018_v4  ;;  %10728 = vmatprep.subr.bf16.mxu1 %v18730_v0  ;;  %v18732_v4 = vld [vmem:[#allocation32_spill] sm:$0xff] }
 0xf03   :  { %v15600_v44 = vpop.eup %15599  ;;  %10688 = vmatpush1.bf16.msra.mxu0 %v18024_v6  ;;  %10729 = vmatpush1.bf16.msra.mxu1 %v18026_v34  ;;  %v18733_v6 = vld [vmem:[#allocation33_spill] sm:$0xff]  ;;  %v18734_v34 = vld [vmem:[#allocation34_spill] sm:$0xff] }
 0xf04   :  { %v15602_v59 = vpop.eup %15601  ;;  %v10153_v3 = vmul.f32 %v15600_v44, %v15598_v45  ;;  %10689 = vmatprep.subr.bf16.mxu0 %v18030_v1  ;;  %10730 = vmatprep.subr.bf16.mxu1 %v18032_v46  ;;  %v18735_v1 = vld [vmem:[#allocation35_spill] sm:$0xff]  ;;  %v18736_v46 = vld [vmem:[#allocation36_spill] sm:$0xff] }
 0xf05   :  { %v10152_v19 = vmul.f32 %v15602_v59, %v10150_v28  ;;  %v10159_v44 = vld [vmem:[#allocation2 + $0x48] sm:$0xc] }
 0xf07   :  { %v18143_v32 = vadd.f32 %v10153_v3, %v10152_v19  ;;  %10690 = vmatpush1.bf16.msra.mxu0 %v18037_v60  ;;  %10731 = vmatpush1.bf16.msra.mxu1 %v18039_v39 }
 0xf08   :  { %10691 = vmatprep.subr.bf16.mxu0 %v18731_v16  ;;  %10732 = vmatprep.subr.bf16.mxu1 %v18732_v4  ;;  %v15604_v60 = vpop.eup %15603  ;;  %v10161_v4 = vld [vmem:[#allocation2 + $0x58] sm:$0xc] }
 0xf09   :  { %15605 = vtanh.f32 %v18143_v32 }
 0xf0b   :  { %10692 = vmatpush1.bf16.msra.mxu0 %v18733_v6  ;;  %10733 = vmatpush1.bf16.msra.mxu1 %v18734_v34 }
 0xf0c   :  { %10693 = vmatprep.subr.bf16.mxu0 %v18735_v1  ;;  %10734 = vmatprep.subr.bf16.mxu1 %v18736_v46  ;;  %v10160_v1 = vld [vmem:[#allocation2 + $0x50] sm:$0xc] }
 0xf0f   :  { %10694 = vmatpush1.bf16.msra.mxu0 %v18064_v61  ;;  %10735 = vmatpush1.bf16.msra.mxu1 %v18066_v62  ;;  %v18162_v61 = vld [vmem:[#allocation14 + $0x4] ss:$16 sps:$4 sm:$0xff]   ;;  %v18164_v62 = vld [vmem:[#allocation14 + $0xc] ss:$16 sps:$4 sm:$0xff]  }
 0xf10   :  { %10695 = vmatprep.subr.bf16.mxu0 %v18070_v53  ;;  %10736 = vmatprep.subr.bf16.mxu1 %v18072_v24  ;;  %v18166_v53 = vld [vmem:[#allocation14] ss:$16 sps:$4 sm:$0xff]   ;;  %v18168_v24 = vld [vmem:[#allocation14 + $0x8] ss:$16 sps:$4 sm:$0xff]  }
 0xf13   :  { %v15606_v39 = vpop.eup %15605  ;;  %10696 = vmatpush1.bf16.msra.mxu0 %v18076_v5  ;;  %10737 = vmatpush1.bf16.msra.mxu1 %v18078_v42  ;;  %v18174_v5 = vld [vmem:[#allocation14 + $0x24] ss:$16 sps:$4 sm:$0xff]   ;;  %v18176_v42 = vld [vmem:[#allocation14 + $0x2c] ss:$16 sps:$4 sm:$0xff]  }
 0xf14   :  { %v10156_v50 = vmul.f32 %v15606_v39, %v15604_v60  ;;  %11007 = vmatprep.subr.bf16.mxu0 %v18162_v61  ;;  %11048 = vmatprep.subr.bf16.mxu1 %v18164_v62 }
 0xf16   :  { %10157 = vst [vmem:[#allocation3 + $0x8] sm:$0xc0] %v10156_v50  ;;  %v10485_v27 = vpack.c.bf16 %v10156_v50, %v10156_v50 }
 0xf18   :  { %v10519_v54 = vrot.slane %v10485_v27, 3 }
 0xf1a   :  { %10714 = vmatmul.mubr.bf16.vlgmr.msra.gmra.mrb[124].mxu0 %v10519_v54  ;;  %10755 = vmatmul.mubr.bf16.vlgmr.msra.gmra.mrb[124].mxu1 %v10519_v54 }
 0xf1b   :  { %11039 = vmatprep.mubr.bf16.mxu0 %v18657_v38  ;;  %11080 = vmatprep.mubr.bf16.mxu1 %v18657_v38 }
 0xf1c   :  { %11008 = vmatpush1.bf16.msra.mxu0 %v18166_v53  ;;  %11049 = vmatpush1.bf16.msra.mxu1 %v18168_v24 }
 0xf1d   :  { %11009 = vmatprep.subr.bf16.mxu0 %v18174_v5  ;;  %11050 = vmatprep.subr.bf16.mxu1 %v18176_v42 }
 0xf20   :  { %11010 = vmatpush1.bf16.msra.mxu0 %v18178_v55  ;;  %11051 = vmatpush1.bf16.msra.mxu1 %v18180_v33 }
 0xf21   :  { %11011 = vmatprep.subr.bf16.mxu0 %v18188_v29  ;;  %11052 = vmatprep.subr.bf16.mxu1 %v18192_v35 }
 0xf24   :  { %11012 = vmatpush1.bf16.msra.mxu0 %v18186_v36  ;;  %11053 = vmatpush1.bf16.msra.mxu1 %v18190_v56 }
 0xf25   :  { %11013 = vmatprep.subr.bf16.mxu0 %v18194_v2  ;;  %11054 = vmatprep.subr.bf16.mxu1 %v18197_v11 }
 0xf28   :  { %11014 = vmatpush1.bf16.msra.mxu0 %v18202_v25  ;;  %11055 = vmatpush1.bf16.msra.mxu1 %v18204_v41 }
 0xf29   :  { %11015 = vmatprep.subr.bf16.mxu0 %v18210_v52  ;;  %11056 = vmatprep.subr.bf16.mxu1 %v18212_v49 }
 0xf2c   :  { %11016 = vmatpush1.bf16.msra.mxu0 %v18214_v63  ;;  %11057 = vmatpush1.bf16.msra.mxu1 %v18216_v47 }
 0xf2d   :  { %11017 = vmatprep.subr.bf16.mxu0 %v18222_v57  ;;  %11058 = vmatprep.subr.bf16.mxu1 %v18224_v58 }
 0xf30   :  { %11018 = vmatpush1.bf16.msra.mxu0 %v18226_v21  ;;  %11059 = vmatpush1.bf16.msra.mxu1 %v18228_v23 }
 0xf31   :  { %11019 = vmatprep.subr.bf16.mxu0 %v18234_v8  ;;  %11060 = vmatprep.subr.bf16.mxu1 %v18236_v31 }
 0xf34   :  { %11020 = vmatpush1.bf16.msra.mxu0 %v18238_v48  ;;  %11061 = vmatpush1.bf16.msra.mxu1 %v18240_v51 }
 0xf35   :  { %11021 = vmatprep.subr.bf16.mxu0 %v18246_v12  ;;  %11062 = vmatprep.subr.bf16.mxu1 %v18248_v13 }
 0xf38   :  { %11022 = vmatpush1.bf16.msra.mxu0 %v18250_v14  ;;  %11063 = vmatpush1.bf16.msra.mxu1 %v18252_v15 }
 0xf39   :  { %11333 = vmatprep.subr.bf16.mxu0 %v18258_v17  ;;  %11374 = vmatprep.subr.bf16.mxu1 %v18260_v18 }
 0xfc9   :  { %v10389_v43 = vpop.f32.mrb[120].mxu0  ;;  %v10430_v9 = vpop.f32.mrb[120].mxu1 }
 0xfca   :  { %v10441_v37 = vrot.slane %v10389_v43, 6  ;;  %v10391_v7 = vpop.f32.mrb[121].mxu0  ;;  %v10432_v20 = vpop.f32.mrb[121].mxu1  ;;  %v10443_v34 = vrot.slane %v10430_v9, 6 }
 0xfcb   :  { %v10442_v10 = vrot.slane %v10391_v7, 6  ;;  %v10393_v0 = vpop.f32.mrb[122].mxu0  ;;  %v10434_v40 = vpop.f32.mrb[122].mxu1  ;;  %v10444_v16 = vrot.slane %v10432_v20, 6  ;;  %v10473_v20 = vrot.slane %v18121_v30, 6 }
 0xfcc   :  { %v10449_v45 = vadd.f32 %v10441_v37, %v10158_v26  ;;  %v10394_v28 = vpop.f32.mrb[123].mxu0  ;;  %v10435_v59 = vpop.f32.mrb[123].mxu1  ;;  %v10451_v60 = vadd.f32 %v10443_v34, %v10160_v1  ;;  %v10482_v30 = vld [vmem:[#allocation2 + $0x28] sm:$0x30] }
 0xfcd   :  { %v10450_v3 = vadd.f32 %v10442_v10, %v10159_v44  ;;  %v10452_v6 = vadd.f32 %v10444_v16, %v10161_v4 }
 0xfce   :  { %v14063_v22 = vmul.f32 -1.442695, %v10449_v45 }
 0xfcf   :  { %v14064_v19 = vmul.f32 -1.442695, %v10450_v3  ;;  %v14065_v46 = vmul.f32 -1.442695, %v10452_v6 }
 0xfd0   :  { %15607 = vpow2.f32 %v14063_v22  ;;  %v10481_v22 = vld [vmem:[#allocation2 + $0x20] sm:$0x30] }
 0xfd1   :  { %15609 = vpow2.f32 %v14064_v19 }
 0xfd2   :  { %15611 = vpow2.f32 %v14065_v46 }
 0xfd3   :  { %15613 = vtanh.f32 %v10451_v60 }
 0xfda   :  { %v15608_v39 = vpop.eup %15607 }
 0xfdb   :  { %v15610_v50 = vpop.eup %15609  ;;  %v10456_v27 = vadd.f32 1.0, %v15608_v39 }
 0xfdc   :  { %v10462_v54 = vadd.f32 1.0, %v15610_v50  ;;  %v15612_v43 = vpop.eup %15611 }
 0xfdd   :  { %15615 = vrcp.f32 %v10456_v27  ;;  %v15614_v37 = vpop.eup %15613  ;;  %v10469_v0 = vadd.f32 1.0, %v15612_v43 }
 0xfde   :  { %15617 = vrcp.f32 %v10462_v54  ;;  %v10484_v54 = vld [vmem:[#allocation2 + $0x38] sm:$0x30] }
 0xfdf   :  { %15619 = vrcp.f32 %v10469_v0 }
 0xfe7   :  { %v15616_v7 = vpop.eup %15615 }
 0xfe8   :  { %v15618_v26 = vpop.eup %15617  ;;  %v10476_v10 = vmul.f32 %v15616_v7, %v15614_v37 }
 0xfe9   :  { %v10475_v9 = vmul.f32 %v15618_v26, %v10473_v20  ;;  %v15620_v27 = vpop.eup %15619  ;;  %v10483_v26 = vld [vmem:[#allocation2 + $0x30] sm:$0x30] }
 0xfeb   :  { %v18265_v40 = vadd.f32 %v10476_v10, %v10475_v9  ;;  %v18268_v9 = vld [vmem:[#allocation15] ss:$16 sps:$4 sm:$0xff]  }
 0xfed   :  { %v10715_v45 = vpop.f32.mrb[124].mxu0  ;;  %v10756_v44 = vpop.f32.mrb[124].mxu1  ;;  %15621 = vtanh.f32 %v18265_v40 }
 0xfee   :  { %v10767_v28 = vrot.slane %v10715_v45, 4  ;;  %v10717_v59 = vpop.f32.mrb[125].mxu0  ;;  %v10758_v3 = vpop.f32.mrb[125].mxu1  ;;  %v10769_v7 = vrot.slane %v10756_v44, 4  ;;  %v18270_v45 = vld [vmem:[#allocation15 + $0x8] ss:$16 sps:$4 sm:$0xff]  }
 0xfef   :  { %v10768_v19 = vrot.slane %v10717_v59, 4  ;;  %v10719_v16 = vpop.f32.mrb[126].mxu0  ;;  %v10760_v4 = vpop.f32.mrb[126].mxu1  ;;  %v10770_v50 = vrot.slane %v10758_v3, 4  ;;  %v18274_v3 = vld [vmem:[#allocation15 + $0x2c] ss:$16 sps:$4 sm:$0xff]  }
 0xff0   :  { %v10775_v6 = vadd.f32 %v10767_v28, %v10481_v22  ;;  %v10720_v34 = vpop.f32.mrb[127].mxu0  ;;  %v10761_v1 = vpop.f32.mrb[127].mxu1  ;;  %v10777_v28 = vadd.f32 %v10769_v7, %v10483_v26  ;;  %v18272_v22 = vld [vmem:[#allocation15 + $0x24] ss:$16 sps:$4 sm:$0xff]   ;;  %v18278_v4 = vld [vmem:[#allocation15 + $0x20] ss:$16 sps:$4 sm:$0xff]  }
 0xff1   :  { %v10776_v46 = vadd.f32 %v10768_v19, %v10482_v30  ;;  %v10778_v37 = vadd.f32 %v10770_v50, %v10484_v54  ;;  %v18284_v34 = vld [vmem:[#allocation15 + $0x44] ss:$16 sps:$4 sm:$0xff]   ;;  %v18286_v1 = vld [vmem:[#allocation15 + $0x4c] ss:$16 sps:$4 sm:$0xff]   ;;  %v18306_v54 = vld [vmem:[#allocation15 + $0x68] ss:$16 sps:$4 sm:$0xff]  }
 0xff2   :  { %v14098_v60 = vmul.f32 -1.442695, %v10775_v6  ;;  %v18280_v6 = vld [vmem:[#allocation15 + $0x28] ss:$16 sps:$4 sm:$0xff]   ;;  %v18300_v50 = vld [vmem:[#allocation15 + $0x6c] ss:$16 sps:$4 sm:$0xff]  }
 0xff3   :  { %v14099_v39 = vmul.f32 -1.442695, %v10776_v46  ;;  %v14100_v0 = vmul.f32 -1.442695, %v10778_v37  ;;  %v18292_v46 = vld [vmem:[#allocation15 + $0x40] ss:$16 sps:$4 sm:$0xff]  }
 0xff4   :  { %15623 = vpow2.f32 %v14098_v60  ;;  %v18294_v60 = vld [vmem:[#allocation15 + $0x48] ss:$16 sps:$4 sm:$0xff]   ;;  %18737 = vst [vmem:[#allocation37_spill] sm:$0xff] %v18300_v50  ;;  %18739 = vst [vmem:[#allocation38_spill] sm:$0xff] %v18306_v54  ;;  %v18312_v37 = vld [vmem:[#allocation15 + $0x8c] ss:$16 sps:$4 sm:$0xff]  }
 0xff5   :  { %15625 = vpow2.f32 %v14099_v39  ;;  %v18298_v39 = vld [vmem:[#allocation15 + $0x64] ss:$16 sps:$4 sm:$0xff]  }
 0xff6   :  { %15627 = vpow2.f32 %v14100_v0  ;;  %v18317_v0 = vld [vmem:[#allocation15 + $0x80] ss:$16 sps:$4 sm:$0xff]  }
 0xff7   :  { %v15622_v43 = vpop.eup %15621  ;;  %15629 = vtanh.f32 %v10777_v28  ;;  %v18319_v28 = vld [vmem:[#allocation15 + $0x88] ss:$16 sps:$4 sm:$0xff]  }
 0xff8   :  { %v10479_v20 = vmul.f32 %v15622_v43, %v15620_v27  ;;  %v18304_v27 = vld [vmem:[#allocation15 + $0x60] ss:$16 sps:$4 sm:$0xff]   ;;  %v18310_v43 = vld [vmem:[#allocation15 + $0x84] ss:$16 sps:$4 sm:$0xff]  }
 0xff9   :  { %18738 = vst [vmem:[#allocation30_spill] sm:$0xff] %v18304_v27 }
 0xffa   :  { %10480 = vst [vmem:[#allocation3 + $0x10] sm:$0xc] %v10479_v20  ;;  %v10811_v10 = vpack.c.bf16 %v10479_v20, %v10479_v20 }
 0xffc   :  { %v10845_v59 = vrot.slane %v10811_v10, 1  ;;  %v10799_v10 = vrot.slane %v18143_v32, 2 }
 0xffe   :  { %v15624_v19 = vpop.eup %15623  ;;  %11040 = vmatmul.mubr.bf16.vlgmr.msra.gmra.mrb[128].mxu0 %v10845_v59  ;;  %11081 = vmatmul.mubr.bf16.vlgmr.msra.gmra.mrb[128].mxu1 %v10845_v59 }
 0xfff   :  { %v15626_v16 = vpop.eup %15625  ;;  %v10782_v44 = vadd.f32 1.0, %v15624_v19  ;;  %11334 = vmatpush1.bf16.msra.mxu0 %v18268_v9  ;;  %11375 = vmatpush1.bf16.msra.mxu1 %v18270_v45 }
0x1000   :  { %v10788_v30 = vadd.f32 1.0, %v15626_v16  ;;  %11335 = vmatprep.subr.bf16.mxu0 %v18272_v22  ;;  %11376 = vmatprep.subr.bf16.mxu1 %v18274_v3  ;;  %v15628_v7 = vpop.eup %15627 }
0x1001   :  { %15631 = vrcp.f32 %v10782_v44  ;;  %11365 = vmatprep.mubr.bf16.mxu0 %v18657_v38  ;;  %11406 = vmatprep.mubr.bf16.mxu1 %v18657_v38  ;;  %v15630_v20 = vpop.eup %15629  ;;  %v10795_v16 = vadd.f32 1.0, %v15628_v7  ;;  %v18323_v44 = vld [vmem:[#allocation15 + $0xa4] ss:$16 sps:$4 sm:$0xff]  }
0x1002   :  { %15633 = vrcp.f32 %v10788_v30  ;;  %v18325_v30 = vld [vmem:[#allocation15 + $0xac] ss:$16 sps:$4 sm:$0xff]   ;;  %v18337_v7 = vld [vmem:[#allocation15 + $0xc4] ss:$16 sps:$4 sm:$0xff]  }
0x1003   :  { %11336 = vmatpush1.bf16.msra.mxu0 %v18278_v4  ;;  %11377 = vmatpush1.bf16.msra.mxu1 %v18280_v6  ;;  %15635 = vrcp.f32 %v10795_v16  ;;  %18741 = vst [vmem:[#allocation32_spill] sm:$0xff] %v18337_v7  ;;  %v18356_v16 = vld [vmem:[#allocation15 + $0xe0] ss:$16 sps:$4 sm:$0xff]  }
0x1004   :  { %11337 = vmatprep.subr.bf16.mxu0 %v18284_v34  ;;  %11378 = vmatprep.subr.bf16.mxu1 %v18286_v1 }
0x1007   :  { %11338 = vmatpush1.bf16.msra.mxu0 %v18292_v46  ;;  %11379 = vmatpush1.bf16.msra.mxu1 %v18294_v60 }
0x1008   :  { %11339 = vmatprep.subr.bf16.mxu0 %v18298_v39  ;;  %11380 = vmatprep.subr.bf16.mxu1 %v18300_v50 }
0x100b   :  { %v15632_v26 = vpop.eup %15631  ;;  %11340 = vmatpush1.bf16.msra.mxu0 %v18304_v27  ;;  %11381 = vmatpush1.bf16.msra.mxu1 %v18306_v54  ;;  %v18331_v54 = vld [vmem:[#allocation15 + $0xa0] ss:$16 sps:$4 sm:$0xff]   ;;  %v18333_v27 = vld [vmem:[#allocation15 + $0xa8] ss:$16 sps:$4 sm:$0xff]  }
0x100c   :  { %v15634_v59 = vpop.eup %15633  ;;  %v10802_v19 = vmul.f32 %v15632_v26, %v15630_v20  ;;  %11341 = vmatprep.subr.bf16.mxu0 %v18310_v43  ;;  %11382 = vmatprep.subr.bf16.mxu1 %v18312_v37  ;;  %18740 = vst [vmem:[#allocation31_spill] sm:$0xff] %v18333_v27  ;;  %v18339_v20 = vld [vmem:[#allocation15 + $0xcc] ss:$16 sps:$4 sm:$0xff]   ;;  %v18344_v26 = vld [vmem:[#allocation15 + $0xc0] ss:$16 sps:$4 sm:$0xff]  }
0x100d   :  { %v10801_v32 = vmul.f32 %v15634_v59, %v10799_v10  ;;  %18742 = vst [vmem:[#allocation33_spill] sm:$0xff] %v18339_v20  ;;  %18743 = vst [vmem:[#allocation34_spill] sm:$0xff] %v18344_v26  ;;  %v18346_v10 = vld [vmem:[#allocation15 + $0xc8] ss:$16 sps:$4 sm:$0xff]   ;;  %v18350_v59 = vld [vmem:[#allocation15 + $0xe4] ss:$16 sps:$4 sm:$0xff]  }
0x100e   :  { %18744 = vst [vmem:[#allocation35_spill] sm:$0xff] %v18346_v10 }
0x100f   :  { %v18327_v50 = vadd.f32 %v10802_v19, %v10801_v32  ;;  %11342 = vmatpush1.bf16.msra.mxu0 %v18317_v0  ;;  %11383 = vmatpush1.bf16.msra.mxu1 %v18319_v28  ;;  %v18352_v19 = vld [vmem:[#allocation15 + $0xec] ss:$16 sps:$4 sm:$0xff]   ;;  %v18358_v32 = vld [vmem:[#allocation15 + $0xe8] ss:$16 sps:$4 sm:$0xff]  }
0x1010   :  { %11343 = vmatprep.subr.bf16.mxu0 %v18323_v44  ;;  %11384 = vmatprep.subr.bf16.mxu1 %v18325_v30 }
0x1011   :  { %15637 = vtanh.f32 %v18327_v50 }
0x1013   :  { %11344 = vmatpush1.bf16.msra.mxu0 %v18331_v54  ;;  %11385 = vmatpush1.bf16.msra.mxu1 %v18333_v27  ;;  %v15636_v27 = vpop.eup %15635 }
0x1014   :  { %11345 = vmatprep.subr.bf16.mxu0 %v18337_v7  ;;  %11386 = vmatprep.subr.bf16.mxu1 %v18339_v20 }
0x1017   :  { %11346 = vmatpush1.bf16.msra.mxu0 %v18344_v26  ;;  %11387 = vmatpush1.bf16.msra.mxu1 %v18346_v10 }
0x1018   :  { %11347 = vmatprep.subr.bf16.mxu0 %v18350_v59  ;;  %11388 = vmatprep.subr.bf16.mxu1 %v18352_v19 }
0x101b   :  { %v15638_v7 = vpop.eup %15637  ;;  %11348 = vmatpush1.bf16.msra.mxu0 %v18356_v16  ;;  %11389 = vmatpush1.bf16.msra.mxu1 %v18358_v32 }
0x101c   :  { %v10805_v20 = vmul.f32 %v15638_v7, %v15636_v27  ;;  %11659 = vmatprep.subr.bf16.mxu0 %v18162_v61  ;;  %11700 = vmatprep.subr.bf16.mxu1 %v18164_v62 }
0x101e   :  { %10806 = vst [vmem:[#allocation3 + $0x8] sm:$0x30] %v10805_v20  ;;  %v11137_v10 = vpack.c.bf16 %v10805_v20, %v10805_v20 }
0x1020   :  { %v11171_v26 = vrot.slane %v11137_v10, 2 }
0x1022   :  { %11366 = vmatmul.mubr.bf16.vlgmr.msra.gmra.mrb[132].mxu0 %v11171_v26  ;;  %11407 = vmatmul.mubr.bf16.vlgmr.msra.gmra.mrb[132].mxu1 %v11171_v26 }
0x1023   :  { %11660 = vmatpush1.bf16.msra.mxu0 %v18166_v53  ;;  %11701 = vmatpush1.bf16.msra.mxu1 %v18168_v24 }
0x1024   :  { %11661 = vmatprep.subr.bf16.mxu0 %v18174_v5  ;;  %11702 = vmatprep.subr.bf16.mxu1 %v18176_v42  ;;  %v10807_v42 = vld [vmem:[#allocation2 + $0x40] sm:$0x30] }
0x1025   :  { %11691 = vmatprep.mubr.bf16.mxu0 %v18657_v38  ;;  %11732 = vmatprep.mubr.bf16.mxu1 %v18657_v38 }
0x1027   :  { %11662 = vmatpush1.bf16.msra.mxu0 %v18178_v55  ;;  %11703 = vmatpush1.bf16.msra.mxu1 %v18180_v33 }
0x1028   :  { %11663 = vmatprep.subr.bf16.mxu0 %v18188_v29  ;;  %11704 = vmatprep.subr.bf16.mxu1 %v18192_v35 }
0x102b   :  { %11664 = vmatpush1.bf16.msra.mxu0 %v18186_v36  ;;  %11705 = vmatpush1.bf16.msra.mxu1 %v18190_v56  ;;  %v10808_v56 = vld [vmem:[#allocation2 + $0x48] sm:$0x30] }
0x102c   :  { %11665 = vmatprep.subr.bf16.mxu0 %v18194_v2  ;;  %11706 = vmatprep.subr.bf16.mxu1 %v18197_v11 }
0x102f   :  { %11666 = vmatpush1.bf16.msra.mxu0 %v18202_v25  ;;  %11707 = vmatpush1.bf16.msra.mxu1 %v18204_v41 }
0x1030   :  { %11667 = vmatprep.subr.bf16.mxu0 %v18210_v52  ;;  %11708 = vmatprep.subr.bf16.mxu1 %v18212_v49  ;;  %v10810_v49 = vld [vmem:[#allocation2 + $0x58] sm:$0x30] }
0x1033   :  { %11668 = vmatpush1.bf16.msra.mxu0 %v18214_v63  ;;  %11709 = vmatpush1.bf16.msra.mxu1 %v18216_v47 }
0x1034   :  { %11669 = vmatprep.subr.bf16.mxu0 %v18222_v57  ;;  %11710 = vmatprep.subr.bf16.mxu1 %v18224_v58  ;;  %v10809_v57 = vld [vmem:[#allocation2 + $0x50] sm:$0x30] }
0x1037   :  { %11670 = vmatpush1.bf16.msra.mxu0 %v18226_v21  ;;  %11711 = vmatpush1.bf16.msra.mxu1 %v18228_v23 }
0x1038   :  { %11671 = vmatprep.subr.bf16.mxu0 %v18234_v8  ;;  %11712 = vmatprep.subr.bf16.mxu1 %v18236_v31 }
0x103b   :  { %11672 = vmatpush1.bf16.msra.mxu0 %v18238_v48  ;;  %11713 = vmatpush1.bf16.msra.mxu1 %v18240_v51 }
0x103c   :  { %11673 = vmatprep.subr.bf16.mxu0 %v18246_v12  ;;  %11714 = vmatprep.subr.bf16.mxu1 %v18248_v13 }
0x103f   :  { %11674 = vmatpush1.bf16.msra.mxu0 %v18250_v14  ;;  %11715 = vmatpush1.bf16.msra.mxu1 %v18252_v15  ;;  %v11125_v14 = vrot.slane %v18265_v40, 6  ;;  %v11134_v40 = vld [vmem:[#allocation2 + $0x28] sm:$0xc] }
0x1040   :  { %11985 = vmatprep.subr.bf16.mxu0 %v18258_v17  ;;  %12026 = vmatprep.subr.bf16.mxu1 %v18260_v18 }
0x10d1   :  { %v11041_v61 = vpop.f32.mrb[128].mxu0  ;;  %v11082_v62 = vpop.f32.mrb[128].mxu1 }
0x10d2   :  { %v11093_v53 = vrot.slane %v11041_v61, 4  ;;  %v11043_v24 = vpop.f32.mrb[129].mxu0  ;;  %v11084_v5 = vpop.f32.mrb[129].mxu1  ;;  %v11095_v47 = vrot.slane %v11082_v62, 4 }
0x10d3   :  { %v11094_v55 = vrot.slane %v11043_v24, 4  ;;  %v11045_v33 = vpop.f32.mrb[130].mxu0  ;;  %v11086_v36 = vpop.f32.mrb[130].mxu1  ;;  %v11096_v52 = vrot.slane %v11084_v5, 4 }
0x10d4   :  { %v11101_v29 = vadd.f32 %v11093_v53, %v10807_v42  ;;  %v11046_v35 = vpop.f32.mrb[131].mxu0  ;;  %v11087_v2 = vpop.f32.mrb[131].mxu1  ;;  %v11103_v21 = vadd.f32 %v11095_v47, %v10809_v57  ;;  %v11133_v53 = vld [vmem:[#allocation2 + $0x20] sm:$0xc]  ;;  %v11135_v57 = vld [vmem:[#allocation2 + $0x30] sm:$0xc] }
0x10d5   :  { %v11102_v11 = vadd.f32 %v11094_v55, %v10808_v56  ;;  %v11104_v63 = vadd.f32 %v11096_v52, %v10810_v49 }
0x10d6   :  { %v14133_v25 = vmul.f32 -1.442695, %v11101_v29 }
0x10d7   :  { %v14134_v41 = vmul.f32 -1.442695, %v11102_v11  ;;  %v14135_v58 = vmul.f32 -1.442695, %v11104_v63 }
0x10d8   :  { %15639 = vpow2.f32 %v14133_v25  ;;  %v11136_v25 = vld [vmem:[#allocation2 + $0x38] sm:$0xc] }
0x10d9   :  { %15641 = vpow2.f32 %v14134_v41 }
0x10da   :  { %15643 = vpow2.f32 %v14135_v58 }
0x10db   :  { %15645 = vtanh.f32 %v11103_v21 }
0x10e2   :  { %v15640_v23 = vpop.eup %15639 }
0x10e3   :  { %v15642_v8 = vpop.eup %15641  ;;  %v11108_v31 = vadd.f32 1.0, %v15640_v23 }
0x10e4   :  { %v11114_v48 = vadd.f32 1.0, %v15642_v8  ;;  %v15644_v51 = vpop.eup %15643 }
0x10e5   :  { %15647 = vrcp.f32 %v11108_v31  ;;  %v15646_v12 = vpop.eup %15645  ;;  %v11121_v18 = vadd.f32 1.0, %v15644_v51 }
0x10e6   :  { %15649 = vrcp.f32 %v11114_v48 }
0x10e7   :  { %15651 = vrcp.f32 %v11121_v18  ;;  %v15158_v18 = vld [vmem:[%s18555_s9 + $0x18] sm:$0xff]  }
0x10ef   :  { %v15648_v13 = vpop.eup %15647 }
0x10f0   :  { %v15650_v15 = vpop.eup %15649  ;;  %v11128_v17 = vmul.f32 %v15648_v13, %v15646_v12 }
0x10f1   :  { %v11127_v27 = vmul.f32 %v15650_v15, %v11125_v14  ;;  %v15652_v11 = vpop.eup %15651  ;;  %v15151_v14 = vld [vmem:[%s18555_s9 + $0x40] sm:$0xff]   ;;  %v15156_v15 = vld [vmem:[%s18555_s9 + $0x10] sm:$0xff]  }
0x10f3   :  { %v18401_v7 = vadd.f32 %v11128_v17, %v11127_v27  ;;  %v15157_v17 = vld [vmem:[%s18555_s9 + $0x58] sm:$0xff]   ;;  %v15159_v27 = vld [vmem:[%s18555_s9 + $0x60] sm:$0xff]  }
0x10f5   :  { %v11367_v20 = vpop.f32.mrb[132].mxu0  ;;  %v11408_v26 = vpop.f32.mrb[132].mxu1  ;;  %15653 = vtanh.f32 %v18401_v7 }
0x10f6   :  { %v11419_v10 = vrot.slane %v11367_v20, 6  ;;  %v11369_v61 = vpop.f32.mrb[133].mxu0  ;;  %v11410_v62 = vpop.f32.mrb[133].mxu1  ;;  %v11421_v49 = vrot.slane %v11408_v26, 6  ;;  %v15160_v20 = vld [vmem:[%s18555_s9 + $0x20] sm:$0xff]   ;;  %v15161_v26 = vld [vmem:[%s18555_s9 + $0x68] sm:$0xff]  }
0x10f7   :  { %v11420_v24 = vrot.slane %v11369_v61, 6  ;;  %v11371_v5 = vpop.f32.mrb[134].mxu0  ;;  %v11412_v42 = vpop.f32.mrb[134].mxu1  ;;  %v11422_v2 = vrot.slane %v11410_v62, 6  ;;  %v15163_v61 = vld [vmem:[%s18555_s9 + $0x70] sm:$0xff]  }
0x10f8   :  { %v11427_v55 = vadd.f32 %v11419_v10, %v11133_v53  ;;  %v11372_v33 = vpop.f32.mrb[135].mxu0  ;;  %v11413_v36 = vpop.f32.mrb[135].mxu1  ;;  %v11429_v21 = vadd.f32 %v11421_v49, %v11135_v57  ;;  %v15162_v10 = vld [vmem:[%s18555_s9 + $0x28] sm:$0xff]   ;;  %v15164_v62 = vld [vmem:[%s18555_s9 + $0x30] sm:$0xff]   ;;  %v15165_v53 = vld [vmem:[%s18555_s9 + $0x78] sm:$0xff]  }
0x10f9   :  { %v11428_v29 = vadd.f32 %v11420_v24, %v11134_v40  ;;  %v11430_v52 = vadd.f32 %v11422_v2, %v11136_v25  ;;  %v15166_v24 = vld [vmem:[%s18555_s9 + $0x38] sm:$0xff]   ;;  %v11459_v36 = vld [vmem:[#allocation2 + $0x40] sm:$0xc0] }
0x10fa   :  { %v14168_v56 = vmul.f32 -1.442695, %v11427_v55  ;;  %v11462_v57 = vld [vmem:[#allocation2 + $0x58] sm:$0xc0] }
0x10fb   :  { %v14169_v35 = vmul.f32 -1.442695, %v11428_v29  ;;  %v14170_v58 = vmul.f32 -1.442695, %v11430_v52 }
0x10fc   :  { %15655 = vpow2.f32 %v14168_v56 }
0x10fd   :  { %15657 = vpow2.f32 %v14169_v35 }
0x10fe   :  { %15659 = vpow2.f32 %v14170_v58 }
0x10ff   :  { %v15654_v41 = vpop.eup %15653  ;;  %15661 = vtanh.f32 %v11429_v21 }
0x1100   :  { %v11131_v63 = vmul.f32 %v15654_v41, %v15652_v11  ;;  %v11460_v11 = vld [vmem:[#allocation2 + $0x48] sm:$0xc0] }
0x1102   :  { %11132 = vst [vmem:[#allocation3 + $0x10] sm:$0x30] %v11131_v63  ;;  %v11463_v47 = vpack.c.bf16 %v11131_v63, %v11131_v63 }
0x1104   :  { %v11497_v23 = vrot.slane %v11463_v47, 2 }
0x1106   :  { %v15656_v8 = vpop.eup %15655  ;;  %11692 = vmatmul.mubr.bf16.vlgmr.msra.gmra.mrb[136].mxu0 %v11497_v23  ;;  %11733 = vmatmul.mubr.bf16.vlgmr.msra.gmra.mrb[136].mxu1 %v11497_v23  ;;  %v11461_v23 = vld [vmem:[#allocation2 + $0x50] sm:$0xc0] }
0x1107   :  { %v15658_v31 = vpop.eup %15657  ;;  %v11434_v48 = vadd.f32 1.0, %v15656_v8  ;;  %11986 = vmatpush1.bf16.msra.mxu0 %v18268_v9  ;;  %12027 = vmatpush1.bf16.msra.mxu1 %v18270_v45  ;;  %v18745_v9 = vld [vmem:[#allocation37_spill] sm:$0xff] }
0x1108   :  { %v11440_v51 = vadd.f32 1.0, %v15658_v31  ;;  %11987 = vmatprep.subr.bf16.mxu0 %v18272_v22  ;;  %12028 = vmatprep.subr.bf16.mxu1 %v18274_v3  ;;  %v15660_v45 = vpop.eup %15659  ;;  %v11451_v3 = vrot.slane %v18327_v50, 2  ;;  %v18749_v50 = vld [vmem:[#allocation32_spill] sm:$0xff] }
0x1109   :  { %15663 = vrcp.f32 %v11434_v48  ;;  %12017 = vmatprep.mubr.bf16.mxu0 %v18657_v38  ;;  %12058 = vmatprep.mubr.bf16.mxu1 %v18657_v38  ;;  %v15662_v22 = vpop.eup %15661 }
0x110a   :  { %15665 = vrcp.f32 %v11440_v51 }
0x110b   :  { %11988 = vmatpush1.bf16.msra.mxu0 %v18278_v4  ;;  %12029 = vmatpush1.bf16.msra.mxu1 %v18280_v6  ;;  %v18746_v4 = vld [vmem:[#allocation30_spill] sm:$0xff] }
0x110c   :  { %11989 = vmatprep.subr.bf16.mxu0 %v18284_v34  ;;  %12030 = vmatprep.subr.bf16.mxu1 %v18286_v1  ;;  %v18747_v6 = vld [vmem:[#allocation38_spill] sm:$0xff]  ;;  %v11447_v1 = vadd.f32 1.0, %v15660_v45 }
0x110e   :  { %15667 = vrcp.f32 %v11447_v1 }
0x110f   :  { %11990 = vmatpush1.bf16.msra.mxu0 %v18292_v46  ;;  %12031 = vmatpush1.bf16.msra.mxu1 %v18294_v60 }
0x1110   :  { %11991 = vmatprep.subr.bf16.mxu0 %v18298_v39  ;;  %12032 = vmatprep.subr.bf16.mxu1 %v18745_v9  ;;  %v18748_v39 = vld [vmem:[#allocation31_spill] sm:$0xff] }
0x1113   :  { %v15664_v38 = vpop.eup %15663  ;;  %11992 = vmatpush1.bf16.msra.mxu0 %v18746_v4  ;;  %12033 = vmatpush1.bf16.msra.mxu1 %v18747_v6  ;;  %v11777_v4 = vrot.slane %v18401_v7, 6 }
0x1114   :  { %v15666_v34 = vpop.eup %15665  ;;  %v11454_v12 = vmul.f32 %v15664_v38, %v15662_v22  ;;  %11993 = vmatprep.subr.bf16.mxu0 %v18310_v43  ;;  %12034 = vmatprep.subr.bf16.mxu1 %v18312_v37  ;;  %v18750_v43 = vld [vmem:[#allocation33_spill] sm:$0xff]  ;;  %v18751_v37 = vld [vmem:[#allocation34_spill] sm:$0xff] }
0x1115   :  { %v11453_v46 = vmul.f32 %v15666_v34, %v11451_v3 }
0x1117   :  { %v18423_v60 = vadd.f32 %v11454_v12, %v11453_v46  ;;  %11994 = vmatpush1.bf16.msra.mxu0 %v18317_v0  ;;  %12035 = vmatpush1.bf16.msra.mxu1 %v18319_v28  ;;  %v18752_v0 = vld [vmem:[#allocation35_spill] sm:$0xff] }
0x1118   :  { %11995 = vmatprep.subr.bf16.mxu0 %v18323_v44  ;;  %12036 = vmatprep.subr.bf16.mxu1 %v18325_v30  ;;  %v15668_v28 = vpop.eup %15667 }
0x1119   :  { %15669 = vtanh.f32 %v18423_v60 }
0x111b   :  { %11996 = vmatpush1.bf16.msra.mxu0 %v18331_v54  ;;  %12037 = vmatpush1.bf16.msra.mxu1 %v18748_v39  ;;  %v11785_v39 = vld [vmem:[#allocation2 + $0x20] sm:$0x3] }
0x111c   :  { %11997 = vmatprep.subr.bf16.mxu0 %v18749_v50  ;;  %12038 = vmatprep.subr.bf16.mxu1 %v18750_v43 }
0x111f   :  { %11998 = vmatpush1.bf16.msra.mxu0 %v18751_v37  ;;  %12039 = vmatpush1.bf16.msra.mxu1 %v18752_v0  ;;  %v11786_v0 = vld [vmem:[#allocation2 + $0x28] sm:$0x3] }
0x1120   :  { %11999 = vmatprep.subr.bf16.mxu0 %v18350_v59  ;;  %12040 = vmatprep.subr.bf16.mxu1 %v18352_v19  ;;  %v15152_v59 = vld [vmem:[%s18555_s9] sm:$0xff]   ;;  %v15153_v19 = vld [vmem:[%s18555_s9 + $0x48] sm:$0xff]  }
0x1123   :  { %v15670_v44 = vpop.eup %15669  ;;  %12000 = vmatpush1.bf16.msra.mxu0 %v18356_v16  ;;  %12041 = vmatpush1.bf16.msra.mxu1 %v18358_v32  ;;  %v15154_v16 = vld [vmem:[%s18555_s9 + $0x8] sm:$0xff]   ;;  %v15155_v32 = vld [vmem:[%s18555_s9 + $0x50] sm:$0xff]  }
0x1124   :  { %v11457_v54 = vmul.f32 %v15670_v44, %v15668_v28  ;;  %14288 = vmatprep.subr.bf16.mxu0 %v15151_v14 }
0x1126   :  { %11458 = vst [vmem:[#allocation3 + $0x8] sm:$0xc] %v11457_v54  ;;  %v11789_v30 = vpack.c.bf16 %v11457_v54, %v11457_v54 }
0x1128   :  { %v11823_v13 = vrot.slane %v11789_v30, 1 }
0x112a   :  { %12018 = vmatmul.mubr.bf16.vlgmr.msra.gmra.mrb[140].mxu0 %v11823_v13  ;;  %12059 = vmatmul.mubr.bf16.vlgmr.msra.gmra.mrb[140].mxu1 %v11823_v13 }
0x112b   :  { %14289 = vmatpush3.bf16.msra.mxu0 %v15152_v59 }
0x112c   :  { %14290 = vmatprep.subr.bf16.mxu0 %v15153_v19 }
0x112f   :  { %14291 = vmatpush3.bf16.msra.mxu0 %v15154_v16  ;;  %v11788_v16 = vld [vmem:[#allocation2 + $0x38] sm:$0x3] }
0x1130   :  { %14292 = vmatprep.subr.bf16.mxu0 %v15155_v32 }
0x1133   :  { %14293 = vmatpush3.bf16.msra.mxu0 %v15156_v15 }
0x1134   :  { %14294 = vmatprep.subr.bf16.mxu0 %v15157_v17 }
0x1137   :  { %14295 = vmatpush3.bf16.msra.mxu0 %v15158_v18 }
0x1138   :  { %14296 = vmatprep.subr.bf16.mxu0 %v15159_v27  ;;  %v11787_v27 = vld [vmem:[#allocation2 + $0x30] sm:$0x3] }
0x113b   :  { %14297 = vmatpush3.bf16.msra.mxu0 %v15160_v20 }
0x113c   :  { %14298 = vmatprep.subr.bf16.mxu0 %v15161_v26 }
0x113f   :  { %14299 = vmatpush3.bf16.msra.mxu0 %v15162_v10 }
0x1140   :  { %14300 = vmatprep.subr.bf16.mxu0 %v15163_v61 }
0x1143   :  { %14301 = vmatpush3.bf16.msra.mxu0 %v15164_v62 }
0x1144   :  { %14302 = vmatprep.subr.bf16.mxu0 %v15165_v53 }
0x1147   :  { %14303 = vmatpush3.bf16.msra.mxu0 %v15166_v24 }
0x11d9   :  { %v11693_v5 = vpop.f32.mrb[136].mxu0  ;;  %v11734_v42 = vpop.f32.mrb[136].mxu1 }
0x11da   :  { %v11745_v55 = vrot.slane %v11693_v5, 2  ;;  %v11695_v40 = vpop.f32.mrb[137].mxu0  ;;  %v11736_v33 = vpop.f32.mrb[137].mxu1  ;;  %v11747_v21 = vrot.slane %v11734_v42, 2 }
0x11db   :  { %v11746_v29 = vrot.slane %v11695_v40, 2  ;;  %v11697_v56 = vpop.f32.mrb[138].mxu0  ;;  %v11738_v35 = vpop.f32.mrb[138].mxu1  ;;  %v11748_v47 = vrot.slane %v11736_v33, 2 }
0x11dc   :  { %v11753_v2 = vadd.f32 %v11745_v55, %v11459_v36  ;;  %v11698_v25 = vpop.f32.mrb[139].mxu0  ;;  %v11739_v41 = vpop.f32.mrb[139].mxu1  ;;  %v11755_v31 = vadd.f32 %v11747_v21, %v11461_v23  ;;  %v12091_v55 = vrot.slane %v18423_v60, 2 }
0x11dd   :  { %v11754_v52 = vadd.f32 %v11746_v29, %v11460_v11  ;;  %v11756_v58 = vadd.f32 %v11748_v47, %v11462_v57  ;;  %v14241_v57 = vld [vmem:[%s18556_s10] ss:$0 sm:$0xff] }
0x11de   :  { %v14203_v49 = vmul.f32 -1.442695, %v11753_v2 }
0x11df   :  { %v14204_v63 = vmul.f32 -1.442695, %v11754_v52  ;;  %v14205_v8 = vmul.f32 -1.442695, %v11756_v58  ;;  %v12106_v52 = vld [vmem:[#allocation3 + $0x18] sm:$0xff] }
0x11e0   :  { %15671 = vpow2.f32 %v14203_v49 }
0x11e1   :  { %15673 = vpow2.f32 %v14204_v63  ;;  %v12103_v63 = vld [vmem:[#allocation3] sm:$0xff] }
0x11e2   :  { %15675 = vpow2.f32 %v14205_v8 }
0x11e3   :  { %15677 = vtanh.f32 %v11755_v31 }
0x11ea   :  { %v15672_v48 = vpop.eup %15671 }
0x11eb   :  { %v15674_v51 = vpop.eup %15673  ;;  %v11760_v9 = vadd.f32 1.0, %v15672_v48 }
0x11ec   :  { %v11766_v45 = vadd.f32 1.0, %v15674_v51  ;;  %v15676_v22 = vpop.eup %15675 }
0x11ed   :  { %15679 = vrcp.f32 %v11760_v9  ;;  %v15678_v38 = vpop.eup %15677  ;;  %v11773_v12 = vadd.f32 1.0, %v15676_v22  ;;  %v14258_v9 = vld [vmem:[%s18557_s11] ss:$0 sm:$0xff] }
0x11ee   :  { %15681 = vrcp.f32 %v11766_v45 }
0x11ef   :  { %15683 = vrcp.f32 %v11773_v12 }
0x11f7   :  { %v15680_v3 = vpop.eup %15679 }
0x11f8   :  { %v15682_v6 = vpop.eup %15681  ;;  %v11780_v34 = vmul.f32 %v15680_v3, %v15678_v38 }
0x11f9   :  { %v11779_v1 = vmul.f32 %v15682_v6, %v11777_v4  ;;  %v15684_v15 = vpop.eup %15683  ;;  %v14259_v4 = vld [vmem:[#allocation5] ss:$0 sm:$0xff] }
0x11fb   :  { %v11781_v46 = vadd.f32 %v11780_v34, %v11779_v1 }
0x11fd   :  { %15685 = vtanh.f32 %v11781_v46  ;;  %12101 = vst [vmem:[#allocation21 - $0x2] sm:$0xc0] %v11781_v46  ;;  %v12019_v50 = vpop.f32.mrb[140].mxu0  ;;  %v12060_v43 = vpop.f32.mrb[140].mxu1 }
0x11fe   :  { %v12067_v37 = vadd.f32 %v12019_v50, %v11785_v39  ;;  %v12021_v28 = vpop.f32.mrb[141].mxu0  ;;  %v12062_v44 = vpop.f32.mrb[141].mxu1  ;;  %v12069_v26 = vadd.f32 %v12060_v43, %v11787_v27 }
0x11ff   :  { %v12068_v54 = vadd.f32 %v12021_v28, %v11786_v0  ;;  %v12023_v30 = vpop.f32.mrb[142].mxu0  ;;  %v12064_v13 = vpop.f32.mrb[142].mxu1  ;;  %v12070_v32 = vadd.f32 %v12062_v44, %v11788_v16 }
0x1200   :  { %v14238_v14 = vmul.f32 -1.442695, %v12067_v37  ;;  %v12024_v7 = vpop.f32.mrb[143].mxu0  ;;  %v12065_v59 = vpop.f32.mrb[143].mxu1 }
0x1201   :  { %v14239_v19 = vmul.f32 -1.442695, %v12068_v54  ;;  %v14240_v20 = vmul.f32 -1.442695, %v12070_v32 }
0x1202   :  { %15687 = vpow2.f32 %v14238_v14 }
0x1203   :  { %15689 = vpow2.f32 %v14239_v19 }
0x1204   :  { %15691 = vpow2.f32 %v14240_v20 }
0x1205   :  { %15693 = vtanh.f32 %v12069_v26 }
0x1207   :  { %v15686_v17 = vpop.eup %15685 }
0x1208   :  { %v11783_v18 = vmul.f32 %v15686_v17, %v15684_v15 }
0x120a   :  { %11784 = vst [vmem:[#allocation3 + $0x10] sm:$0xc0] %v11783_v18  ;;  %12099 = vst [vmem:[#allocation20 - $0x2] sm:$0xc0] %v11783_v18 }
0x120c   :  { %v15688_v10 = vpop.eup %15687 }
0x120d   :  { %v15690_v61 = vpop.eup %15689  ;;  %v12074_v62 = vadd.f32 1.0, %v15688_v10 }
0x120e   :  { %v12080_v53 = vadd.f32 1.0, %v15690_v61  ;;  %v15692_v24 = vpop.eup %15691 }
0x120f   :  { %15695 = vrcp.f32 %v12074_v62  ;;  %v15694_v5 = vpop.eup %15693  ;;  %v12087_v36 = vadd.f32 1.0, %v15692_v24 }
0x1210   :  { %15697 = vrcp.f32 %v12080_v53 }
0x1211   :  { %15699 = vrcp.f32 %v12087_v36  ;;  %v12105_v25 = vld [vmem:[#allocation3 + $0x10] sm:$0xff] }
0x1212   :  { %v12107_v47 = vpack.c.bf16 %v12105_v25, %v12103_v63 }
0x1219   :  { %v15696_v42 = vpop.eup %15695 }
0x121a   :  { %v15698_v40 = vpop.eup %15697  ;;  %v12094_v33 = vmul.f32 %v15696_v42, %v15694_v5 }
0x121b   :  { %v12093_v29 = vmul.f32 %v15698_v40, %v12091_v55  ;;  %v15700_v35 = vpop.eup %15699 }
0x121d   :  { %v12095_v56 = vadd.f32 %v12094_v33, %v12093_v29 }
0x121f   :  { %15701 = vtanh.f32 %v12095_v56  ;;  %12102 = vst [vmem:[#allocation21 + $0x6] sm:$0x3] %v12095_v56 }
0x1229   :  { %v15702_v2 = vpop.eup %15701 }
0x122a   :  { %v12097_v11 = vmul.f32 %v15702_v2, %v15700_v35 }
0x122c   :  { %12098 = vst [vmem:[#allocation3 + $0x8] sm:$0x3] %v12097_v11  ;;  %12100 = vst [vmem:[#allocation20 + $0x6] sm:$0x3] %v12097_v11 }
0x1233   :  { %v12104_v41 = vld [vmem:[#allocation3 + $0x8] sm:$0xff] }
0x1234   :  { %v12108_v49 = vpack.c.bf16 %v12106_v52, %v12104_v41 }
0x1236   :  { %12276 = vmatprep.mubr.bf16.mxu0 %v12108_v49 }
0x1237   :  { %12277 = vmatmul.mubr.bf16.vlgmr.msra.gmra.mrb[144].mxu0 %v12107_v47 }
0x130a   :  { %v14304_v60 = vpop.f32.mrb[144].mxu0 }
0x130b   :  { %v14305_v58 = vpop.f32.mrb[145].mxu0 }
0x130c   :  { %v14306_v21 = vadd.f32 %v14305_v58, %v14304_v60  ;;  %v14307_v23 = vpop.f32.mrb[146].mxu0  ;;  %v15168_v58 = vld [vmem:[#allocation17] sm:$0xff]  }
0x130d   :  { %v14308_v8 = vpop.f32.mrb[147].mxu0 }
0x130e   :  { %v12279_v31 = vadd.f32 %v14306_v21, %v14241_v57  ;;  %v14309_v48 = vadd.f32 %v14308_v8, %v14307_v23  ;;  %v15169_v21 = vld [vmem:[#allocation17 + $0x48] sm:$0xff]   ;;  %v15171_v8 = vld [vmem:[#allocation17 + $0x50] sm:$0xff]  }
0x130f   :  { %v15170_v23 = vld [vmem:[#allocation17 + $0x8] sm:$0xff]  }
0x1310   :  { %15703 = vtanh.f32 %v12279_v31  ;;  %v12282_v51 = vadd.f32 %v14309_v48, %v14241_v57  ;;  %v15167_v57 = vld [vmem:[#allocation17 + $0x40] sm:$0xff]   ;;  %v15172_v31 = vld [vmem:[#allocation17 + $0x10] sm:$0xff]   ;;  %v15173_v48 = vld [vmem:[#allocation17 + $0x58] sm:$0xff]  }
0x1311   :  { %14310 = vmatprep.subr.bf16.mxu1 %v15167_v57 }
0x1312   :  { %15705 = vtanh.f32 %v12282_v51  ;;  %14311 = vmatpush3.bf16.msra.mxu1 %v15168_v58  ;;  %v15174_v51 = vld [vmem:[#allocation17 + $0x18] sm:$0xff]  }
0x1313   :  { %14312 = vmatprep.subr.bf16.mxu1 %v15169_v21  ;;  %v12466_v21 = vld [vmem:[#allocation3 + $0x10] sm:$0xc0] }
0x1316   :  { %14313 = vmatpush3.bf16.msra.mxu1 %v15170_v23  ;;  %v12467_v23 = vld [vmem:[#allocation3 + $0x18] sm:$0xc0] }
0x1317   :  { %14314 = vmatprep.subr.bf16.mxu1 %v15171_v8 }
0x131a   :  { %v15704_v45 = vpop.eup %15703  ;;  %14315 = vmatpush3.bf16.msra.mxu1 %v15172_v31 }
0x131b   :  { %v12294_v22 = vmul.f32 %v15704_v45, %v14258_v9  ;;  %14316 = vmatprep.subr.bf16.mxu1 %v15173_v48  ;;  %v15175_v45 = vld [vmem:[#allocation17 + $0x60] sm:$0xff]  }
0x131c   :  { %v15706_v38 = vpop.eup %15705 }
0x131d   :  { %12296 = vadd.xlane.f32.xlu0 %v12294_v22  ;;  %v12295_v3 = vmul.f32 %v15706_v38, %v14258_v9  ;;  %v15176_v22 = vld [vmem:[#allocation17 + $0x20] sm:$0xff]   ;;  %v15177_v38 = vld [vmem:[#allocation17 + $0x68] sm:$0xff]  }
0x131e   :  { %14317 = vmatpush3.bf16.msra.mxu1 %v15174_v51 }
0x131f   :  { %14318 = vmatprep.subr.bf16.mxu1 %v15175_v45 }
0x1321   :  { %12298 = vadd.xlane.f32.xlu0 %v12295_v3  ;;  %v15178_v3 = vld [vmem:[#allocation17 + $0x28] sm:$0xff]  }
0x1322   :  { %14319 = vmatpush3.bf16.msra.mxu1 %v15176_v22  ;;  %v12475_v22 = vrot.slane %v12466_v21, 6  ;;  %v14260_v21 = vld [vmem:[%s18560_s14] ss:$0 sm:$0xff] }
0x1323   :  { %14320 = vmatprep.subr.bf16.mxu1 %v15177_v38  ;;  %v12476_v38 = vrot.slane %v12467_v23, 6 }
0x1326   :  { %14321 = vmatpush3.bf16.msra.mxu1 %v15178_v3 }
0x13aa   :  { %v12297_v6 = vpop.xlane.xlu0 %12296 }
0x13ab   :  { %v12307_v34 = vadd.f32 %v14259_v4, %v12297_v6  ;;  %v15180_v6 = vld [vmem:[#allocation17 + $0x30] sm:$0xff]  }
0x13ad   :  { %12310 = vst.msk [vmem:[#allocation4] sm:$0xff] %vm12309_vm0, %v12307_v34  ;;  %v15181_v34 = vld [vmem:[#allocation17 + $0x78] sm:$0xff]  }
0x13ae   :  { %v12299_v12 = vpop.xlane.xlu0 %12298 }
0x13af   :  { %v12308_v1 = vadd.f32 %v14259_v4, %v12299_v12  ;;  %v15179_v4 = vld [vmem:[#allocation17 + $0x70] sm:$0xff]   ;;  %v15182_v12 = vld [vmem:[#allocation17 + $0x38] sm:$0xff]  }
0x13b0   :  { %14322 = vmatprep.subr.bf16.mxu1 %v15179_v4 }
0x13b1   :  { %12311 = vst.msk [vmem:[#allocation4 + $0x8] sm:$0xff] %vm12309_vm0, %v12308_v1  ;;  %14323 = vmatpush3.bf16.msra.mxu1 %v15180_v6 }
0x13b2   :  { %14324 = vmatprep.subr.bf16.mxu1 %v15181_v34 }
0x13b4   :  { %v12312_v46 = vld [vmem:[#allocation4] sm:$0x3]  ;;  %v12313_v39 = vld [vmem:[#allocation4 + $0x2] sm:$0x3]  ;;  %v12315_v43 = vld [vmem:[#allocation4 + $0x4] sm:$0x3] }
0x13b5   :  { %v12314_v50 = vmax.f32 %v12312_v46, %v12313_v39  ;;  %v12317_v0 = vld [vmem:[#allocation4 + $0x6] sm:$0x3]  ;;  %14325 = vmatpush3.bf16.msra.mxu1 %v15182_v12 }
0x13b7   :  { %v12316_v37 = vmax.f32 %v12314_v50, %v12315_v43 }
0x13b8   :  { %v12319_v44 = vld [vmem:[#allocation4 + $0x8] sm:$0x3]  ;;  %v12321_v30 = vld [vmem:[#allocation4 + $0xa] sm:$0x3]  ;;  %v12323_v14 = vld [vmem:[#allocation4 + $0xc] sm:$0x3] }
0x13b9   :  { %v12318_v28 = vmax.f32 %v12316_v37, %v12317_v0  ;;  %v12325_v59 = vld [vmem:[#allocation4 + $0xe] sm:$0x3] }
0x13bb   :  { %v12320_v54 = vmax.f32 %v12318_v28, %v12319_v44 }
0x13bd   :  { %v12322_v13 = vmax.f32 %v12320_v54, %v12321_v30  ;;  %v12367_v54 = vld [vmem:[#allocation3] sm:$0x30] }
0x13bf   :  { %v12324_v7 = vmax.f32 %v12322_v13, %v12323_v14  ;;  %v18498_v13 = vld [vmem:[#allocation3 + $0x8] sm:$0x3] }
0x13c1   :  { %v12326_v19 = vmax.f32 %v12324_v7, %v12325_v59 }
0x13c3   :  { %v12363_v16 = vsub.f32 %v12315_v43, %v12326_v19  ;;  %v12327_v32 = vsub.f32 %v12312_v46, %v12326_v19  ;;  %v12342_v15 = vsub.f32 %v12313_v39, %v12326_v19  ;;  %v12384_v20 = vsub.f32 %v12317_v0, %v12326_v19  ;;  %v12346_v46 = vld [vmem:[#allocation3] sm:$0xc]  ;;  %v12347_v39 = vld [vmem:[#allocation3 + $0x8] sm:$0xc]  ;;  %v18496_v0 = vld [vmem:[#allocation3] sm:$0x3] }
0x13c4   :  { %v12405_v26 = vsub.f32 %v12319_v44, %v12326_v19  ;;  %v12420_v61 = vsub.f32 %v12321_v30, %v12326_v19  ;;  %v12441_v53 = vsub.f32 %v12323_v14, %v12326_v19  ;;  %v12462_v5 = vsub.f32 %v12325_v59, %v12326_v19  ;;  %v12368_v30 = vld [vmem:[#allocation3 + $0x8] sm:$0x30] }
0x13c5   :  { %v12364_v17 = vmul.f32 1.442695, %v12363_v16  ;;  %v12328_v18 = vmul.f32 1.442695, %v12327_v32  ;;  %v12343_v27 = vmul.f32 1.442695, %v12342_v15 }
0x13c6   :  { %v12385_v10 = vmul.f32 1.442695, %v12384_v20  ;;  %v12406_v62 = vmul.f32 1.442695, %v12405_v26  ;;  %v12421_v24 = vmul.f32 1.442695, %v12420_v61 }
0x13c7   :  { %15707 = vpow2.f32 %v12364_v17  ;;  %v12442_v42 = vmul.f32 1.442695, %v12441_v53  ;;  %v12463_v40 = vmul.f32 1.442695, %v12462_v5  ;;  %v12355_v43 = vrot.slane %v12346_v46, 2 }
0x13c8   :  { %15709 = vpow2.f32 %v12328_v18  ;;  %v12356_v37 = vrot.slane %v12347_v39, 2  ;;  %v12388_v16 = vld [vmem:[#allocation3] sm:$0xc0]  ;;  %v12389_v32 = vld [vmem:[#allocation3 + $0x8] sm:$0xc0]  ;;  %v12376_v15 = vrot.slane %v12367_v54, 4 }
0x13c9   :  { %15711 = vpow2.f32 %v12343_v27  ;;  %v12377_v17 = vrot.slane %v12368_v30, 4  ;;  %v12397_v61 = vrot.slane %v12388_v16, 6  ;;  %v12424_v53 = vld [vmem:[#allocation3 + $0x10] sm:$0xc]  ;;  %v12528_v54 = vld [vmem:[#allocation3 + $0x18] sm:$0x3] }
0x13ca   :  { %15713 = vpow2.f32 %v12385_v10  ;;  %v12540_v16 = vld [vmem:[#allocation3 + $0x18] sm:$0x30] }
0x13cb   :  { %15715 = vpow2.f32 %v12406_v62  ;;  %v12398_v62 = vrot.slane %v12389_v32, 6 }
0x13cc   :  { %15717 = vpow2.f32 %v12421_v24  ;;  %v12425_v24 = vld [vmem:[#allocation3 + $0x18] sm:$0xc] }
0x13cd   :  { %15719 = vpow2.f32 %v12442_v42 }
0x13ce   :  { %15721 = vpow2.f32 %v12463_v40 }
0x13d1   :  { %v15708_v55 = vpop.eup %15707 }
0x13d2   :  { %v15710_v33 = vpop.eup %15709  ;;  %12371 = vperm.xlu0 %14381, %v15708_v55  }
0x13d3   :  { %v15712_v36 = vpop.eup %15711  ;;  %12335 = vperm.xlu1 %14380, %v15710_v33  }
0x13d4   :  { %v12345_v29 = vadd.f32 %v15712_v36, %v15710_v33  ;;  %v15714_v35 = vpop.eup %15713  ;;  %v12445_v33 = vld [vmem:[#allocation3 + $0x10] sm:$0x30] }
0x13d5   :  { %v15716_v11 = vpop.eup %15715 }
0x13d6   :  { %v12366_v56 = vadd.f32 %v15708_v55, %v12345_v29  ;;  %v15718_v41 = vpop.eup %15717  ;;  %v12409_v29 = vld [vmem:[#allocation3 + $0x10] sm:$0x3] }
0x13d7   :  { %12350 = vperm.xlu1 %14380, %v15712_v36   ;;  %v15720_v49 = vpop.eup %15719  ;;  %v12446_v36 = vld [vmem:[#allocation3 + $0x18] sm:$0x30] }
0x13d8   :  { %v12387_v2 = vadd.f32 %v15714_v35, %v12366_v56  ;;  %v15722_v47 = vpop.eup %15721  ;;  %v12410_v56 = vld [vmem:[#allocation3 + $0x18] sm:$0x3] }
0x13da   :  { %v12408_v25 = vadd.f32 %v15716_v11, %v12387_v2 }
0x13db   :  { %12392 = vperm.xlu1 %14380, %v15714_v35  }
0x13dc   :  { %v12423_v52 = vadd.f32 %v15718_v41, %v12408_v25  ;;  %v12433_v25 = vrot.slane %v12424_v53, 2 }
0x13de   :  { %v12444_v63 = vadd.f32 %v15720_v49, %v12423_v52  ;;  %v12454_v52 = vrot.slane %v12445_v33, 4  ;;  %v12545_v33 = vld [vmem:[#allocation3 + $0x10] sm:$0xc0] }
0x13df   :  { %12413 = vperm.xlu1 %14380, %v15716_v11  }
0x13e0   :  { %v12465_v60 = vadd.f32 %v15722_v47, %v12444_v63 }
0x13e2   :  { %15723 = vrcp.f32 %v12465_v60 }
0x13e3   :  { %12428 = vperm.xlu1 %14380, %v15718_v41   ;;  %v12434_v41 = vrot.slane %v12425_v24, 2  ;;  %v12534_v24 = vld [vmem:[#allocation3 + $0x18] sm:$0xc] }
0x13e7   :  { %12449 = vperm.xlu1 %14380, %v15720_v49   ;;  %v12455_v49 = vrot.slane %v12446_v36, 4  ;;  %v12546_v36 = vld [vmem:[#allocation3 + $0x18] sm:$0xc0] }
0x13eb   :  { %12470 = vperm.xlu1 %14380, %v15722_v47  }
0x13ec   :  { %v15724_v9 = vpop.eup %15723 }
0x13ef   :  { %12486 = vperm.xlu1 %14380, %v15724_v9  }
0x1451   :  { %v12372_v19 = vpop.permute.xlu0 %12371 }
0x1452   :  { %v12336_v1 = vpop.permute.xlu1 %12335  ;;  %v12380_v26 = vmul.f32 %v12376_v15, %v12372_v19  ;;  %v12381_v10 = vmul.f32 %v12377_v17, %v12372_v19  ;;  %v12496_v19 = vld [vmem:[#allocation3 + $0x8] sm:$0xc] }
0x1453   :  { %v12338_v7 = vmul.f32 %v12336_v1, %v18496_v0  ;;  %v12339_v59 = vmul.f32 %v12336_v1, %v18498_v13 }
0x1456   :  { %v12351_v50 = vpop.permute.xlu1 %12350 }
0x1457   :  { %v12359_v28 = vmul.f32 %v12355_v43, %v12351_v50  ;;  %v12360_v44 = vmul.f32 %v12356_v37, %v12351_v50  ;;  %v12495_v37 = vld [vmem:[#allocation3] sm:$0xc] }
0x1459   :  { %v12361_v18 = vadd.f32 %v12359_v28, %v12338_v7  ;;  %v12362_v27 = vadd.f32 %v12360_v44, %v12339_v59  ;;  %v12507_v28 = vld [vmem:[#allocation3] sm:$0x30]  ;;  %v12527_v44 = vld [vmem:[#allocation3 + $0x10] sm:$0x3] }
0x145a   :  { %v12393_v14 = vpop.permute.xlu1 %12392 }
0x145b   :  { %v12382_v5 = vadd.f32 %v12380_v26, %v12361_v18  ;;  %v12383_v42 = vadd.f32 %v12381_v10, %v12362_v27  ;;  %v12401_v55 = vmul.f32 %v12397_v61, %v12393_v14  ;;  %v12402_v40 = vmul.f32 %v12398_v62, %v12393_v14  ;;  %v12508_v27 = vld [vmem:[#allocation3 + $0x8] sm:$0x30]  ;;  %v12518_v26 = vld [vmem:[#allocation3 + $0x8] sm:$0xc0] }
0x145d   :  { %v12403_v63 = vadd.f32 %v12401_v55, %v12382_v5  ;;  %v12404_v47 = vadd.f32 %v12402_v40, %v12383_v42 }
0x145e   :  { %v12414_v20 = vpop.permute.xlu1 %12413 }
0x145f   :  { %v12416_v2 = vmul.f32 %v12414_v20, %v12409_v29  ;;  %v12417_v11 = vmul.f32 %v12414_v20, %v12410_v56  ;;  %v12517_v20 = vld [vmem:[#allocation3] sm:$0xc0] }
0x1461   :  { %v12418_v8 = vadd.f32 %v12416_v2, %v12403_v63  ;;  %v12419_v31 = vadd.f32 %v12417_v11, %v12404_v47 }
0x1462   :  { %v12429_v35 = vpop.permute.xlu1 %12428 }
0x1463   :  { %v12437_v60 = vmul.f32 %v12433_v25, %v12429_v35  ;;  %v12438_v57 = vmul.f32 %v12434_v41, %v12429_v35 }
0x1465   :  { %v12439_v9 = vadd.f32 %v12437_v60, %v12418_v8  ;;  %v12440_v45 = vadd.f32 %v12438_v57, %v12419_v31 }
0x1466   :  { %v12450_v58 = vpop.permute.xlu1 %12449 }
0x1467   :  { %v12458_v48 = vmul.f32 %v12454_v52, %v12450_v58  ;;  %v12459_v51 = vmul.f32 %v12455_v49, %v12450_v58 }
0x1469   :  { %v12460_v4 = vadd.f32 %v12458_v48, %v12439_v9  ;;  %v12461_v6 = vadd.f32 %v12459_v51, %v12440_v45  ;;  %v15183_v45 = vld [vmem:[#allocation18] sm:$0xff]  }
0x146a   :  { %v12471_v3 = vpop.permute.xlu1 %12470 }
0x146b   :  { %v12479_v34 = vmul.f32 %v12475_v22, %v12471_v3  ;;  %v12480_v12 = vmul.f32 %v12476_v38, %v12471_v3  ;;  %v16008_v22 = vmov 0.0  }
0x146c   :  { %14341 = vmatprep.subr.bf16.mxu0 %v16008_v22  ;;  %14357 = vmatprep.mubr.msk.bf16.mxu0 %vm16009_vm1, %v16008_v22 }
0x146d   :  { %v12481_v1 = vadd.f32 %v12479_v34, %v12460_v4  ;;  %v12482_v46 = vadd.f32 %v12480_v12, %v12461_v6  ;;  %14342 = vmatpush3.bf16.msra.mxu0 %v15183_v45 }
0x146e   :  { %v12487_v39 = vpop.permute.xlu1 %12486  ;;  %14343 = vmatprep.subr.bf16.mxu0 %v16008_v22 }
0x146f   :  { %v12489_v50 = vmul.f32 %v12487_v39, %v12481_v1  ;;  %v12490_v43 = vmul.f32 %v12487_v39, %v12482_v46  ;;  %v15184_v39 = vld [vmem:[#allocation18 + $0x8] sm:$0xff]  }
0x1471   :  { %v12491_v30 = vadd.f32 %v12489_v50, %v18496_v0  ;;  %v12492_v14 = vadd.f32 %v12490_v43, %v18498_v13  ;;  %v12499_v7 = vrot.slane %v12489_v50, 6  ;;  %v12500_v59 = vrot.slane %v12490_v43, 6  ;;  %v12533_v0 = vld [vmem:[#allocation3 + $0x10] sm:$0xc]  ;;  %v12539_v13 = vld [vmem:[#allocation3 + $0x10] sm:$0x30]  ;;  %14344 = vmatpush3.bf16.msra.mxu0 %v15184_v39 }
0x1472   :  { %v12509_v32 = vrot.slane %v12489_v50, 4  ;;  %v12510_v15 = vrot.slane %v12490_v43, 4  ;;  %v12519_v17 = vrot.slane %v12489_v50, 2  ;;  %v12520_v18 = vrot.slane %v12490_v43, 2  ;;  %14345 = vmatprep.subr.bf16.mxu0 %v16008_v22 }
0x1473   :  { %12493 = vst [vmem:[#allocation3] sm:$0x3] %v12491_v30  ;;  %12494 = vst [vmem:[#allocation3 + $0x8] sm:$0x3] %v12492_v14  ;;  %v12503_v10 = vadd.f32 %v12499_v7, %v12495_v37  ;;  %v12504_v61 = vadd.f32 %v12500_v59, %v12496_v19  ;;  %v12529_v62 = vadd.f32 %v12527_v44, %v12489_v50  ;;  %v15185_v50 = vld [vmem:[#allocation18 + $0x10] sm:$0xff]   ;;  %v15187_v37 = vld [vmem:[#allocation18 + $0x20] sm:$0xff]  }
0x1474   :  { %v12530_v53 = vadd.f32 %v12528_v54, %v12490_v43  ;;  %v12513_v5 = vadd.f32 %v12509_v32, %v12507_v28  ;;  %v12514_v42 = vadd.f32 %v12510_v15, %v12508_v27  ;;  %v12523_v55 = vadd.f32 %v12519_v17, %v12517_v20  ;;  %v15186_v43 = vld [vmem:[#allocation18 + $0x18] sm:$0xff]   ;;  %v15188_v28 = vld [vmem:[#allocation18 + $0x28] sm:$0xff]   ;;  %v15189_v44 = vld [vmem:[#allocation18 + $0x30] sm:$0xff]  }
0x1475   :  { %v12524_v40 = vadd.f32 %v12520_v18, %v12518_v26  ;;  %12505 = vst [vmem:[#allocation3] sm:$0xc] %v12503_v10  ;;  %12506 = vst [vmem:[#allocation3 + $0x8] sm:$0xc] %v12504_v61  ;;  %v12535_v29 = vadd.f32 %v12533_v0, %v12499_v7  ;;  %v12536_v56 = vadd.f32 %v12534_v24, %v12500_v59  ;;  %14346 = vmatpush3.bf16.msra.mxu0 %v15185_v50  ;;  %v15190_v54 = vld [vmem:[#allocation18 + $0x38] sm:$0xff]  }
0x1476   :  { %12531 = vst [vmem:[#allocation3 + $0x10] sm:$0x3] %v12529_v62  ;;  %12532 = vst [vmem:[#allocation3 + $0x18] sm:$0x3] %v12530_v53  ;;  %v12541_v35 = vadd.f32 %v12539_v13, %v12509_v32  ;;  %v12542_v2 = vadd.f32 %v12540_v16, %v12510_v15  ;;  %v12547_v11 = vadd.f32 %v12545_v33, %v12519_v17  ;;  %14347 = vmatprep.subr.bf16.mxu0 %v16008_v22  ;;  %v14277_v15 = vld [vmem:[%s18561_s15] ss:$0 sm:$0xff] }
0x1477   :  { %12515 = vst [vmem:[#allocation3] sm:$0x30] %v12513_v5  ;;  %12516 = vst [vmem:[#allocation3 + $0x8] sm:$0x30] %v12514_v42  ;;  %v12548_v25 = vadd.f32 %v12546_v36, %v12520_v18  ;;  %v14278_v20 = vld [vmem:[%s18562_s16] ss:$0 sm:$0xff] }
0x1478   :  { %12525 = vst [vmem:[#allocation3] sm:$0xc0] %v12523_v55  ;;  %12526 = vst [vmem:[#allocation3 + $0x8] sm:$0xc0] %v12524_v40  ;;  %s15935_s15 = scalar_lea.vmem %s12900_s0, 128 }
0x1479   :  { %12537 = vst [vmem:[#allocation3 + $0x10] sm:$0xc] %v12535_v29  ;;  %12538 = vst [vmem:[#allocation3 + $0x18] sm:$0xc] %v12536_v56  ;;  %14348 = vmatpush3.bf16.msra.mxu0 %v15186_v43  ;;  %p15936_p8 = scmp.ne.s32.totalorder %s12900_s0, %s15935_s15  ;;  %p15941_p10 = scmp.lt.s32.totalorder %s15935_s15, %s15935_s15 }
0x147a   :  { %12543 = vst [vmem:[#allocation3 + $0x10] sm:$0x30] %v12541_v35  ;;  %12544 = vst [vmem:[#allocation3 + $0x18] sm:$0x30] %v12542_v2  ;;  %14349 = vmatprep.subr.bf16.mxu0 %v16008_v22 }
0x147b   :  { %12549 = vst [vmem:[#allocation3 + $0x10] sm:$0xc0] %v12547_v11  ;;  %12550 = vst [vmem:[#allocation3 + $0x18] sm:$0xc0] %v12548_v25  ;;  %p15942_p11 = por %p15941_p10, %p15940_p9 }
0x147d   :  { %14350 = vmatpush3.bf16.msra.mxu0 %v15187_v37  ;;  %p15943_p12 = pnand %p15942_p11, %p15936_p8 }
0x147e   :  { %14351 = vmatprep.subr.bf16.mxu0 %v16008_v22 }
0x147f   :  { %v12552_v41 = vld [vmem:[#allocation3 + $0x8] sm:$0xff]  ;;  %v12551_v52 = vld [vmem:[#allocation3] sm:$0xff] }
0x1481   :  { %14352 = vmatpush3.bf16.msra.mxu0 %v15188_v28 }
0x1482   :  { %v12554_v49 = vld [vmem:[#allocation3 + $0x18] sm:$0xff]  ;;  %v12553_v63 = vld [vmem:[#allocation3 + $0x10] sm:$0xff]  ;;  %14353 = vmatprep.subr.bf16.mxu0 %v16008_v22 }
0x1483   :  { %v12556_v47 = vpack.c.bf16 %v12554_v49, %v12552_v41  ;;  %v12555_v60 = vpack.c.bf16 %v12553_v63, %v12551_v52 }
0x1485   :  { %12724 = vmatprep.mubr.bf16.mxu1 %v12556_v47  ;;  %14354 = vmatpush3.bf16.msra.mxu0 %v15189_v44 }
0x1486   :  { %12725 = vmatmul.mubr.bf16.vlgmr.msra.gmra.mrb[144].mxu1 %v12555_v60  ;;  %14355 = vmatprep.subr.bf16.mxu0 %v16008_v22 }
0x1489   :  { %14356 = vmatpush3.bf16.msra.mxu0 %v15190_v54 }
0x1559   :  { %v14326_v57 = vpop.f32.mrb[144].mxu1 }
0x155a   :  { %v14327_v58 = vpop.f32.mrb[145].mxu1 }
0x155b   :  { %v14328_v23 = vadd.f32 %v14327_v58, %v14326_v57  ;;  %v14329_v8 = vpop.f32.mrb[146].mxu1 }
0x155c   :  { %v14330_v31 = vpop.f32.mrb[147].mxu1 }
0x155d   :  { %v14331_v48 = vadd.f32 %v14330_v31, %v14329_v8  ;;  %v12727_v51 = vadd.f32 %v14328_v23, %v14260_v21 }
0x155f   :  { %12733 = vadd.xlane.f32.xlu1 %v12727_v51  ;;  %v12730_v9 = vadd.f32 %v14331_v48, %v14260_v21 }
0x1561   :  { %12735 = vadd.xlane.f32.xlu0 %v12730_v9 }
0x15ec   :  { %v12734_v38 = vpop.xlane.xlu1 %12733 }
0x15ed   :  { %v12738_v3 = vmul.f32 0.0078125, %v12734_v38 }
0x15ee   :  { %v12736_v4 = vpop.xlane.xlu0 %12735 }
0x15ef   :  { %v12740_v6 = vsub.f32 %v12727_v51, %v12738_v3  ;;  %v12739_v34 = vmul.f32 0.0078125, %v12736_v4 }
0x15f1   :  { %v12741_v12 = vsub.f32 %v12730_v9, %v12739_v34  ;;  %v12742_v1 = vmul.f32 %v12740_v6, %v12740_v6 }
0x15f3   :  { %12744 = vadd.xlane.f32.xlu1 %v12742_v1  ;;  %v12743_v46 = vmul.f32 %v12741_v12, %v12741_v12 }
0x15f7   :  { %12746 = vadd.xlane.f32.xlu1 %v12743_v46 }
0x1680   :  { %v12745_v30 = vpop.xlane.xlu1 %12744 }
0x1681   :  { %v12748_v14 = vmul.f32 0.0078125, %v12745_v30 }
0x1683   :  { %v12750_v7 = vadd.f32 1e-05, %v12748_v14 }
0x1684   :  { %v12747_v59 = vpop.xlane.xlu1 %12746 }
0x1685   :  { %15725 = vrsqrt.f32 %v12750_v7  ;;  %v12749_v19 = vmul.f32 0.0078125, %v12747_v59 }
0x1687   :  { %v12751_v16 = vadd.f32 1e-05, %v12749_v19 }
0x1689   :  { %15727 = vrsqrt.f32 %v12751_v16 }
0x168f   :  { %v15726_v32 = vpop.eup %15725 }
0x1690   :  { %v12754_v17 = vmul.f32 %v15726_v32, %v12740_v6 }
0x1692   :  { %v12763_v18 = vmul.f32 %v14277_v15, %v12754_v17 }
0x1693   :  { %v15728_v27 = vpop.eup %15727 }
0x1694   :  { %v12755_v26 = vmul.f32 %v15728_v27, %v12741_v12  ;;  %v12772_v61 = vadd.f32 %v14278_v20, %v12763_v18 }
0x1696   :  { %v12764_v10 = vmul.f32 %v14277_v15, %v12755_v26  ;;  %v12774_v53 = vmax.f32 %v12772_v61, 0.0 }
0x1698   :  { %v12773_v62 = vadd.f32 %v14278_v20, %v12764_v10 }
0x169a   :  { %v12775_v0 = vmax.f32 %v12773_v62, 0.0 }
0x169c   :  { %v12776_v24 = vpack.c.bf16 %v12775_v0, %v12774_v53 }
0x169e   :  { %14358 = vmatmul.mubr.bf16.vlgmr.msra.gmra.mrb[148].mxu0 %v12776_v24 }
0x169f   :  { %15946 = shalt.err (!%p15943_p12)
}
0x16a0   :  { %s15947_s29 = scalar_lea.hbm %s18566_s20, 128 }
0x16a1   :  { %p15948_p13 = scmp.ne.s32.totalorder %s18566_s20, %s15947_s29  ;;  %p15951_p0 = scmp.lt.u32.totalorder %s15947_s29, %s18566_s20 }
0x16a3   :  { %p15953_p1 = pnand %p15951_p0, %p15948_p13 }
0x16a5   :  { %15956 = shalt.err (!%p15953_p1)
}
0x16a6   :  { %12902 = dma.vmem_to_hbm [thread:$0]  %s12900_s0, 128, %s18566_s20, [#allocation8]  }
0x16a7   :  { %s15957_s3 = scalar_lea.vmem %s12910_s30, 128  ;;  %p15962_p3 = scmp.lt.s32.totalorder %s12910_s30, %s12910_s30 }
0x16a8   :  { %p15958_p2 = scmp.ne.s32.totalorder %s12910_s30, %s15957_s3  ;;  %p15963_p4 = scmp.lt.s32.totalorder %s15957_s3, %s15957_s3 }
0x16aa   :  { %p15964_p5 = por %p15963_p4, %p15962_p3 }
0x16ac   :  { %p15965_p6 = pnand %p15964_p5, %p15958_p2 }
0x16ae   :  { %15968 = shalt.err (!%p15965_p6)
}
0x16af   :  { %s15969_s18 = scalar_lea.hbm %s18567_s21, 128 }
0x16b0   :  { %p15970_p7 = scmp.ne.s32.totalorder %s18567_s21, %s15969_s18  ;;  %p15973_p8 = scmp.lt.u32.totalorder %s15969_s18, %s18567_s21 }
0x16b2   :  { %p15975_p9 = pnand %p15973_p8, %p15970_p7 }
0x16b4   :  { %15978 = shalt.err (!%p15975_p9)
}
0x16b5   :  { %12912 = dma.vmem_to_hbm [thread:$0]  %s12910_s30, 128, %s18567_s21, [#allocation22]  }
0x16b6   :  { %s18753_s14 = sld [smem:[#allocation45_spill]]  ;;  %s18754_s26 = sld [smem:[#allocation46_spill]] }
0x16bc   :  { %v14279_v13 = vld [vmem:[%s18753_s14] ss:$0 sm:$0xff] }
0x1771   :  { %v12882_v5 = vpop.f32.mrb[148].mxu0 }
0x1772   :  { %v12883_v42 = vadd.f32 %v14279_v13, %v12882_v5  ;;  %v14359_v55 = vpop.f32.mrb[149].mxu0 }
0x1773   :  { %v12885_v40 = vpop.f32.mrb[150].mxu0 }
0x1774   :  { %12889 = vst [vmem:[%s18754_s26] sm:$0xff] %v12883_v42  ;;  %v12886_v33 = vadd.f32 %v14279_v13, %v12885_v40  ;;  %v14360_v36 = vpop.f32.mrb[151].mxu0 }
0x1776   :  { %12890 = vst [vmem:[%s18754_s26 + $0x8] sm:$0xff] %v12886_v33 }
0x1777   :  { %15989 = dma.done.wait [#allocation8], 128  }
0x1778   :  { %15990 = vsyncadd [#allocation8], 4294967168 }
0x1779   :  { %15991 = dma.done.wait [#allocation22], 128  }
0x177a   :  { %15992 = vsyncadd [#allocation22], 4294967168 }
0x177b   :  { %12921 = vsyncpa [#allocation7], 1 }
0x177c   :  { %12922 = vsyncpa [#allocation10], 1 }
0x177d   :  { %12923 = vsyncpa [#allocation13], 1 }
0x177e   :  { %12924 = vsyncpa [#allocation16], 1 }
0x177f   :  { %12925 = vsyncpa [#allocation19], 1 }
0x1780   :  { %12926 = vsyncpa [#allocation8], 1 }
0x1781   :  { %12927 = vsyncpa [#allocation22], 1 }

</bundles_post_ra>
